<compile_context>
chip_gen: v7x
topology: tpu7x:2x2x1
jax: 0.10.0
libtpu: 0.0.40
codegen_flags: <defaults>
</compile_context>

<pallas_src>
import functools
import math

import jax
import jax.numpy as jnp
from jax.experimental import pallas as pl
from jax.experimental.pallas import tpu as pltpu

K_HOPS = 3          # PyG TAGConv default (streaming kernels written for K=3)
LANE = 128          # TPU lane width


def _round_up(x, m):
    return ((x + m - 1) // m) * m


def _detect_vmem_capacity():
    try:
        return int(pltpu.get_tpu_info().vmem_capacity_bytes)
    except Exception:
        return 64 << 20      # conservative default (v7x per-TC VMEM)


# -----------------------------------------------------------------------------
# Shared in-kernel math (all in f32; bf16 only when feeding the MXU / storing)
# -----------------------------------------------------------------------------
def _leaky_relu(x):
    return jnp.where(x >= 0.0, x, 0.02 * x)


def _masked_log_softmax(acc, valid_cols):
    col = jax.lax.broadcasted_iota(jnp.int32, acc.shape, 1)
    logits = jnp.where(col < valid_cols, acc, -jnp.inf)
    m = jnp.max(logits, axis=-1, keepdims=True)
    z = logits - m
    return z - jnp.log(jnp.sum(jnp.exp(z), axis=-1, keepdims=True))


def _tag_layer_math(s, h0, w_ref, b_ref):
    """TAGConv mix as a sum of dots (no concat): sum_k (S^k h0) @ W_k + b."""
    acc = jnp.dot(h0, w_ref[0], preferred_element_type=jnp.float32)
    h = h0
    for k in range(1, K_HOPS + 1):
        h = jnp.dot(s, h, preferred_element_type=jnp.float32).astype(jnp.bfloat16)
        acc = acc + jnp.dot(h, w_ref[k], preferred_element_type=jnp.float32)
    return acc + b_ref[...]


# -----------------------------------------------------------------------------
# Path A: whole encoder in one kernel, S resident in VMEM (single S DMA total)
# -----------------------------------------------------------------------------
def _encoder_resident_kernel(s_ref, x_ref, w1_ref, b1_ref, w2_ref, b2_ref,
                             o_ref, *, latent_valid):
    s = s_ref[...]                                    # bf16, resident
    acc1 = _tag_layer_math(s, x_ref[...], w1_ref, b1_ref)
    h1 = _leaky_relu(acc1)                            # f32
    # TODO(synk): F.dropout(p=0.4, training=True) not implemented; eval => identity.
    acc2 = _tag_layer_math(s, h1.astype(jnp.bfloat16), w2_ref, b2_ref)
    o_ref[...] = _masked_log_softmax(acc2, latent_valid)


def _encoder_resident(s_pad, x_pad, w1, b1, w2, b2, *, latent_valid, vmem_limit):
    n_pad = s_pad.shape[0]
    lat_p = w2.shape[-1]
    kernel = functools.partial(_encoder_resident_kernel,
                               latent_valid=latent_valid)
    return pl.pallas_call(
        kernel,
        out_shape=jax.ShapeDtypeStruct((n_pad, lat_p), jnp.float32),
        compiler_params=pltpu.CompilerParams(vmem_limit_bytes=vmem_limit),
    )(s_pad, x_pad, w1, b1, w2, b2)


# -----------------------------------------------------------------------------
# Path B (large N): streaming hop kernel.  S tiled (tm,tk); H fully resident.
# A scalar-prefetched block-nonzero mask skips the dot on all-zero S blocks.
# -----------------------------------------------------------------------------
def _hop_kernel(blk_ref, s_ref, h_ref, o_ref, acc_ref, *, tk):
    i = pl.program_id(0)
    k = pl.program_id(1)

    @pl.when(k == 0)
    def _():
        acc_ref[...] = jnp.zeros_like(acc_ref)

    @pl.when(blk_ref[i, k] != 0)          # skip MXU on all-zero adjacency blocks
    def _():
        off = pl.multiple_of(k * tk, tk)
        acc_ref[...] += jnp.dot(s_ref[...], h_ref[pl.ds(off, tk), :],
                                preferred_element_type=jnp.float32)

    @pl.when(k == pl.num_programs(1) - 1)
    def _():
        o_ref[...] = acc_ref[...].astype(o_ref.dtype)


def _hop(s_pad, h, blk, *, tm, tk, vmem_limit):
    n_pad = s_pad.shape[0]
    cp = h.shape[1]
    return pl.pallas_call(
        functools.partial(_hop_kernel, tk=tk),
        out_shape=jax.ShapeDtypeStruct((n_pad, cp), jnp.bfloat16),
        grid_spec=pltpu.PrefetchScalarGridSpec(
            num_scalar_prefetch=1,
            grid=(n_pad // tm, n_pad // tk),
            in_specs=[
                pl.BlockSpec((tm, tk), lambda i, k, m: (i, k)),      # S tile
                pl.BlockSpec((n_pad, cp), lambda i, k, m: (0, 0)),   # H resident
            ],
            out_specs=pl.BlockSpec((tm, cp), lambda i, k, m: (i, 0)),
            scratch_shapes=[pltpu.VMEM((tm, cp), jnp.float32)]),
        compiler_params=pltpu.CompilerParams(
            # On v7x use pltpu.CORE_PARALLEL on axis 0 to shard across both TCs.
            dimension_semantics=("parallel", "arbitrary"),
            vmem_limit_bytes=vmem_limit),
    )(blk, s_pad, h)


# Final hop fused with the (K+1)-hop mix + bias + activation epilogue.
def _hop_mix_kernel(blk_ref, s_ref, hprev_ref, hop0_ref, hop1_ref, w_ref,
                    b_ref, o_ref, acc_ref, *, tm, tk, activation, valid_cols):
    i = pl.program_id(0)
    k = pl.program_id(1)

    @pl.when(k == 0)
    def _():
        acc_ref[...] = jnp.zeros_like(acc_ref)

    @pl.when(blk_ref[i, k] != 0)
    def _():
        off = pl.multiple_of(k * tk, tk)
        acc_ref[...] += jnp.dot(s_ref[...], hprev_ref[pl.ds(off, tk), :],
                                preferred_element_type=jnp.float32)

    @pl.when(k == pl.num_programs(1) - 1)
    def _():
        row = pl.multiple_of(i * tm, tm)
        hop3 = acc_ref[...].astype(jnp.bfloat16)        # S^3 h0 (this row tile)
        hop2 = hprev_ref[pl.ds(row, tm), :]             # S^2 h0 (resident input)
        mix = jnp.dot(hop0_ref[...], w_ref[0], preferred_element_type=jnp.float32)
        mix += jnp.dot(hop1_ref[...], w_ref[1], preferred_element_type=jnp.float32)
        mix += jnp.dot(hop2, w_ref[2], preferred_element_type=jnp.float32)
        mix += jnp.dot(hop3, w_ref[3], preferred_element_type=jnp.float32)
        mix += b_ref[...]
        if activation == "leaky_relu":
            out = _leaky_relu(mix)
        else:
            out = _masked_log_softmax(mix, valid_cols)
        o_ref[...] = out.astype(o_ref.dtype)


def _hop_mix(s_pad, hprev, hop0, hop1, w, b, blk, *, activation, valid_cols,
             out_dtype, tm, tk, vmem_limit):
    n_pad = s_pad.shape[0]
    cp = hprev.shape[1]
    cout_p = w.shape[-1]
    kernel = functools.partial(_hop_mix_kernel, tm=tm, tk=tk,
                               activation=activation, valid_cols=valid_cols)
    return pl.pallas_call(
        kernel,
        out_shape=jax.ShapeDtypeStruct((n_pad, cout_p), out_dtype),
        grid_spec=pltpu.PrefetchScalarGridSpec(
            num_scalar_prefetch=1,
            grid=(n_pad // tm, n_pad // tk),
            in_specs=[
                pl.BlockSpec((tm, tk), lambda i, k, m: (i, k)),       # S tile
                pl.BlockSpec((n_pad, cp), lambda i, k, m: (0, 0)),    # hop2 resident
                pl.BlockSpec((tm, cp), lambda i, k, m: (i, 0)),       # hop0 row tile
                pl.BlockSpec((tm, cp), lambda i, k, m: (i, 0)),       # hop1 row tile
                pl.BlockSpec((K_HOPS + 1, cp, cout_p), lambda i, k, m: (0, 0, 0)),
                pl.BlockSpec((1, cout_p), lambda i, k, m: (0, 0)),
            ],
            out_specs=pl.BlockSpec((tm, cout_p), lambda i, k, m: (i, 0)),
            scratch_shapes=[pltpu.VMEM((tm, cp), jnp.float32)]),
        compiler_params=pltpu.CompilerParams(
            dimension_semantics=("parallel", "arbitrary"),
            vmem_limit_bytes=vmem_limit),
    )(blk, s_pad, hprev, hop0, hop1, w, b)


def _tag_layer_stream(s_pad, blk, h0, w, b, *, activation, valid_cols,
                      out_dtype, tm, tk, vmem_limit):
    # K_HOPS == 3: two plain hop launches + one fused (hop + mix + epilogue).
    hop1 = _hop(s_pad, h0, blk, tm=tm, tk=tk, vmem_limit=vmem_limit)
    hop2 = _hop(s_pad, hop1, blk, tm=tm, tk=tk, vmem_limit=vmem_limit)
    return _hop_mix(s_pad, hop2, h0, hop1, w, b, blk, activation=activation,
                    valid_cols=valid_cols, out_dtype=out_dtype,
                    tm=tm, tk=tk, vmem_limit=vmem_limit)


def _block_mask(s_pad, tm, tk):
    n_pad = s_pad.shape[0]
    nrt, nct = n_pad // tm, n_pad // tk
    blocks = s_pad.reshape(nrt, tm, nct, tk)
    return jnp.any(blocks != 0, axis=(1, 3)).astype(jnp.int32)


# -----------------------------------------------------------------------------
# Fused producer: padded bf16 normalized adjacency, built in-place (one scatter)
# -----------------------------------------------------------------------------
def _build_s_padded(edge_index, num_nodes, n_pad):
    src, dst = edge_index[0], edge_index[1]
    deg = jnp.zeros((num_nodes,), jnp.float32).at[dst].add(1.0)
    dinv = jnp.where(deg > 0, jax.lax.rsqrt(deg), 0.0)
    vals = dinv[dst] * dinv[src]                       # pre-normalized edge values
    s = jnp.zeros((n_pad, n_pad), jnp.float32).at[dst, src].add(vals)
    return s.astype(jnp.bfloat16)


def _pad_weight_stack(w, c_in, c_out, cin_p, cout_p):
    wp = jnp.zeros((K_HOPS + 1, cin_p, cout_p), jnp.float32)
    wp = wp.at[:, :c_in, :c_out].set(w)
    return wp.astype(jnp.bfloat16)


def _pad_bias(b, c_out, cout_p):
    return jnp.zeros((1, cout_p), jnp.float32).at[:, :c_out].set(b)


# -----------------------------------------------------------------------------
# Parameter init (mirrors reset_parameters: xavier_uniform / zeros)
# -----------------------------------------------------------------------------
def xavier_uniform(key, c_in, c_out, k_hops):
    bound = math.sqrt(6.0 / (c_in + c_out))
    return jax.random.uniform(
        key, (k_hops + 1, c_in, c_out), jnp.float32, -bound, bound)


def init_tag_encoder(key, num_genes, hidden_dim, latent_dim):
    k1, k2 = jax.random.split(key)
    return {
        "w1": xavier_uniform(k1, num_genes, hidden_dim, K_HOPS),
        "b1": jnp.zeros((1, hidden_dim), jnp.float32),
        "w2": xavier_uniform(k2, hidden_dim, latent_dim, K_HOPS),
        "b2": jnp.zeros((1, latent_dim), jnp.float32),
    }


# -----------------------------------------------------------------------------
# Forward pass (eval mode: dropout is identity)
# -----------------------------------------------------------------------------
@functools.partial(jax.jit,
                   static_argnames=("tm", "tk", "force_streaming",
                                    "vmem_cap_bytes"))
def tag_encoder_forward(params, x, edge_index, *, tm=512, tk=512,
                        force_streaming=False, vmem_cap_bytes=None):
    n, c_in = x.shape
    hidden = params["w1"].shape[-1]
    latent = params["w2"].shape[-1]
    cin_p = _round_up(c_in, LANE)
    hid_p = _round_up(hidden, LANE)
    lat_p = _round_up(latent, LANE)

    cap = vmem_cap_bytes if vmem_cap_bytes is not None else _detect_vmem_capacity()
    vmem_limit = int(cap * 0.85)

    # Generation-gated residency decision (S counted twice as headroom against
    # a possible compiler-side full-buffer materialization + temporaries).
    n_pad0 = _round_up(n, LANE)
    resident_bytes = (2 * n_pad0 * n_pad0 * 2
                      + n_pad0 * (cin_p + hid_p) * 2
                      + n_pad0 * lat_p * 4
                      + (K_HOPS + 1) * (cin_p * hid_p + hid_p * lat_p) * 2
                      + 8 * n_pad0 * LANE * 4)
    use_resident = (not force_streaming) and resident_bytes <= int(cap * 0.8)

    if use_resident:
        n_pad = n_pad0
    else:
        tm = min(_round_up(tm, LANE), n_pad0)
        tk = min(_round_up(tk, LANE), n_pad0)
        n_pad = _round_up(n, math.lcm(tm, tk))

    s_pad = _build_s_padded(edge_index, n, n_pad)
    x_pad = jnp.zeros((n_pad, cin_p), jnp.bfloat16).at[:n, :c_in].set(
        x.astype(jnp.bfloat16))
    w1 = _pad_weight_stack(params["w1"], c_in, hidden, cin_p, hid_p)
    b1 = _pad_bias(params["b1"], hidden, hid_p)
    w2 = _pad_weight_stack(params["w2"], hidden, latent, hid_p, lat_p)
    b2 = _pad_bias(params["b2"], latent, lat_p)

    if use_resident:
        out = _encoder_resident(s_pad, x_pad, w1, b1, w2, b2,
                                latent_valid=latent, vmem_limit=vmem_limit)
    else:
        blk = _block_mask(s_pad, tm, tk)
        h1 = _tag_layer_stream(s_pad, blk, x_pad, w1, b1,
                               activation="leaky_relu", valid_cols=hidden,
                               out_dtype=jnp.bfloat16, tm=tm, tk=tk,
                               vmem_limit=vmem_limit)
        # TODO(synk): F.dropout(p=0.4, training=True) not implemented; eval => identity.
        out = _tag_layer_stream(s_pad, blk, h1, w2, b2,
                                activation="log_softmax", valid_cols=latent,
                                out_dtype=jnp.float32, tm=tm, tk=tk,
                                vmem_limit=vmem_limit)
    return out[:n, :latent]


# -----------------------------------------------------------------------------
# Pure-JAX f32 reference (same S construction; validates bf16 kernel numerics)
# -----------------------------------------------------------------------------
@jax.jit
def tag_encoder_reference(params, x, edge_index):
    n = x.shape[0]
    src, dst = edge_index[0], edge_index[1]
    deg = jnp.zeros((n,), jnp.float32).at[dst].add(1.0)
    dinv = jnp.where(deg > 0, 1.0 / jnp.sqrt(deg), 0.0)
    a = jnp.zeros((n, n), jnp.float32).at[dst, src].add(1.0)
    s = dinv[:, None] * a * dinv[None, :]
    hi = jax.lax.Precision.HIGHEST

    def layer(h, w, b):
        acc = jnp.dot(h, w[0], precision=hi) + b
        hk = h
        for k in range(1, K_HOPS + 1):
            hk = jnp.dot(s, hk, precision=hi)
            acc = acc + jnp.dot(hk, w[k], precision=hi)
        return acc

    h1 = layer(x, params["w1"], params["b1"])
    h1 = jnp.where(h1 >= 0.0, h1, 0.02 * h1)
    h2 = layer(h1, params["w2"], params["b2"])
    return jax.nn.log_softmax(h2, axis=1)


if __name__ == "__main__":
    num_nodes = 300
    num_genes = 32
    hidden_dim = 32
    latent_dim = 16

    root = jax.random.PRNGKey(0)
    k_param, k_x = jax.random.split(root)

    params = init_tag_encoder(k_param, num_genes, hidden_dim, latent_dim)
    x = jax.random.normal(k_x, (num_nodes, num_genes), jnp.float32)

    # deterministic bidirectional ring graph: i <-> (i+1) % N
    src = jnp.arange(num_nodes, dtype=jnp.int32)
    dst = (src + 1) % num_nodes
    edge_index = jnp.stack(
        [jnp.concatenate([src, dst]), jnp.concatenate([dst, src])], axis=0)

    # Fast path: S is VMEM-resident, whole encoder in one kernel.
    out_res = jax.block_until_ready(tag_encoder_forward(params, x, edge_index))
    # Exercise the tiled streaming fallback too (small tiles force a real grid).
    out_str = jax.block_until_ready(
        tag_encoder_forward(params, x, edge_index, tm=128, tk=128,
                            force_streaming=True))
    ref = jax.block_until_ready(tag_encoder_reference(params, x, edge_index))

    assert out_res.shape == (num_nodes, latent_dim)
    assert bool(jnp.all(jnp.isfinite(out_res)))
    assert bool(jnp.all(jnp.isfinite(out_str)))
    # rows of log_softmax must sum (in prob space) to 1
    assert bool(jnp.allclose(jnp.sum(jnp.exp(out_res), axis=-1), 1.0, atol=1e-3))
    assert bool(jnp.allclose(jnp.sum(jnp.exp(out_str), axis=-1), 1.0, atol=1e-3))
    # resident and streaming paths must agree (same bf16 math, different tiling)
    assert float(jnp.max(jnp.abs(out_res - out_str))) < 0.05
    # bf16 kernel vs f32 reference (review correctness concern)
    assert float(jnp.max(jnp.abs(out_res - ref))) < 0.15
    print("KERNEL_OK")
</pallas_src>

<mosaic_0001>
module attributes {stable_mosaic.version = 11 : i64} {
  func.func @_encoder_resident_kernel(%arg0: memref<384x384xbf16, #tpu.memory_space<vmem>>, %arg1: memref<384x128xbf16, #tpu.memory_space<vmem>>, %arg2: memref<4x128x128xbf16, #tpu.memory_space<vmem>>, %arg3: memref<1x128xf32, #tpu.memory_space<vmem>>, %arg4: memref<4x128x128xbf16, #tpu.memory_space<vmem>>, %arg5: memref<1x128xf32, #tpu.memory_space<vmem>>, %arg6: memref<384x128xf32, #tpu.memory_space<vmem>>) attributes {dimension_semantics = [], scalar_prefetch = 0 : i64, scratch_operands = 0 : i64, tpu.core_type = #tpu.core_type<tc>} {
    %c0 = arith.constant 0 : index
    %c0_0 = arith.constant 0 : index
    %0 = vector.load %arg0[%c0, %c0_0] : memref<384x384xbf16, #tpu.memory_space<vmem>>, vector<384x384xbf16>
    %c0_1 = arith.constant 0 : index
    %c0_2 = arith.constant 0 : index
    %1 = vector.load %arg1[%c0_1, %c0_2] : memref<384x128xbf16, #tpu.memory_space<vmem>>, vector<384x128xbf16>
    %c0_3 = arith.constant 0 : index
    %c0_4 = arith.constant 0 : index
    %c0_5 = arith.constant 0 : index
    %2 = vector.load %arg2[%c0_3, %c0_4, %c0_5] : memref<4x128x128xbf16, #tpu.memory_space<vmem>>, vector<1x128x128xbf16>
    %3 = vector.shape_cast %2 : vector<1x128x128xbf16> to vector<128x128xbf16>
    %cst = arith.constant dense<0.000000e+00> : vector<384x128xf32>
    %4 = tpu.matmul %1, %3, %cst {dimension_numbers = #tpu.dot_dimension_numbers<[1], [0], [0], [1], [0, 0, 1, 1], [], []>} : vector<384x128xbf16>, vector<128x128xbf16>, vector<384x128xf32> -> vector<384x128xf32>
    %cst_6 = arith.constant dense<0.000000e+00> : vector<384x128xf32>
    %5 = tpu.matmul %0, %1, %cst_6 {dimension_numbers = #tpu.dot_dimension_numbers<[1], [0], [0], [1], [0, 0, 1, 1], [], []>} : vector<384x384xbf16>, vector<384x128xbf16>, vector<384x128xf32> -> vector<384x128xf32>
    %6 = arith.truncf %5 : vector<384x128xf32> to vector<384x128xbf16>
    %c1 = arith.constant 1 : index
    %c0_7 = arith.constant 0 : index
    %c0_8 = arith.constant 0 : index
    %7 = vector.load %arg2[%c1, %c0_7, %c0_8] : memref<4x128x128xbf16, #tpu.memory_space<vmem>>, vector<1x128x128xbf16>
    %8 = vector.shape_cast %7 : vector<1x128x128xbf16> to vector<128x128xbf16>
    %cst_9 = arith.constant dense<0.000000e+00> : vector<384x128xf32>
    %9 = tpu.matmul %6, %8, %cst_9 {dimension_numbers = #tpu.dot_dimension_numbers<[1], [0], [0], [1], [0, 0, 1, 1], [], []>} : vector<384x128xbf16>, vector<128x128xbf16>, vector<384x128xf32> -> vector<384x128xf32>
    %10 = arith.addf %4, %9 : vector<384x128xf32>
    %cst_10 = arith.constant dense<0.000000e+00> : vector<384x128xf32>
    %11 = tpu.matmul %0, %6, %cst_10 {dimension_numbers = #tpu.dot_dimension_numbers<[1], [0], [0], [1], [0, 0, 1, 1], [], []>} : vector<384x384xbf16>, vector<384x128xbf16>, vector<384x128xf32> -> vector<384x128xf32>
    %12 = arith.truncf %11 : vector<384x128xf32> to vector<384x128xbf16>
    %c2 = arith.constant 2 : index
    %c0_11 = arith.constant 0 : index
    %c0_12 = arith.constant 0 : index
    %13 = vector.load %arg2[%c2, %c0_11, %c0_12] : memref<4x128x128xbf16, #tpu.memory_space<vmem>>, vector<1x128x128xbf16>
    %14 = vector.shape_cast %13 : vector<1x128x128xbf16> to vector<128x128xbf16>
    %cst_13 = arith.constant dense<0.000000e+00> : vector<384x128xf32>
    %15 = tpu.matmul %12, %14, %cst_13 {dimension_numbers = #tpu.dot_dimension_numbers<[1], [0], [0], [1], [0, 0, 1, 1], [], []>} : vector<384x128xbf16>, vector<128x128xbf16>, vector<384x128xf32> -> vector<384x128xf32>
    %16 = arith.addf %10, %15 : vector<384x128xf32>
    %cst_14 = arith.constant dense<0.000000e+00> : vector<384x128xf32>
    %17 = tpu.matmul %0, %12, %cst_14 {dimension_numbers = #tpu.dot_dimension_numbers<[1], [0], [0], [1], [0, 0, 1, 1], [], []>} : vector<384x384xbf16>, vector<384x128xbf16>, vector<384x128xf32> -> vector<384x128xf32>
    %18 = arith.truncf %17 : vector<384x128xf32> to vector<384x128xbf16>
    %c3 = arith.constant 3 : index
    %c0_15 = arith.constant 0 : index
    %c0_16 = arith.constant 0 : index
    %19 = vector.load %arg2[%c3, %c0_15, %c0_16] : memref<4x128x128xbf16, #tpu.memory_space<vmem>>, vector<1x128x128xbf16>
    %20 = vector.shape_cast %19 : vector<1x128x128xbf16> to vector<128x128xbf16>
    %cst_17 = arith.constant dense<0.000000e+00> : vector<384x128xf32>
    %21 = tpu.matmul %18, %20, %cst_17 {dimension_numbers = #tpu.dot_dimension_numbers<[1], [0], [0], [1], [0, 0, 1, 1], [], []>} : vector<384x128xbf16>, vector<128x128xbf16>, vector<384x128xf32> -> vector<384x128xf32>
    %22 = arith.addf %16, %21 : vector<384x128xf32>
    %c0_18 = arith.constant 0 : index
    %c0_19 = arith.constant 0 : index
    %23 = vector.load %arg3[%c0_18, %c0_19] : memref<1x128xf32, #tpu.memory_space<vmem>>, vector<1x128xf32>
    %24 = vector.broadcast %23 : vector<1x128xf32> to vector<384x128xf32>
    %25 = arith.addf %22, %24 : vector<384x128xf32>
    %cst_20 = arith.constant 0.000000e+00 : f32
    %26 = vector.broadcast %cst_20 : f32 to vector<384x128xf32>
    %27 = arith.cmpf oge, %25, %26 : vector<384x128xf32>
    %cst_21 = arith.constant 2.000000e-02 : f32
    %28 = vector.broadcast %cst_21 : f32 to vector<384x128xf32>
    %29 = arith.mulf %28, %25 : vector<384x128xf32>
    %30 = arith.select %27, %25, %29 : vector<384x128xi1>, vector<384x128xf32>
    %31 = arith.truncf %30 : vector<384x128xf32> to vector<384x128xbf16>
    %c0_22 = arith.constant 0 : index
    %c0_23 = arith.constant 0 : index
    %c0_24 = arith.constant 0 : index
    %32 = vector.load %arg4[%c0_22, %c0_23, %c0_24] : memref<4x128x128xbf16, #tpu.memory_space<vmem>>, vector<1x128x128xbf16>
    %33 = vector.shape_cast %32 : vector<1x128x128xbf16> to vector<128x128xbf16>
    %cst_25 = arith.constant dense<0.000000e+00> : vector<384x128xf32>
    %34 = tpu.matmul %31, %33, %cst_25 {dimension_numbers = #tpu.dot_dimension_numbers<[1], [0], [0], [1], [0, 0, 1, 1], [], []>} : vector<384x128xbf16>, vector<128x128xbf16>, vector<384x128xf32> -> vector<384x128xf32>
    %cst_26 = arith.constant dense<0.000000e+00> : vector<384x128xf32>
    %35 = tpu.matmul %0, %31, %cst_26 {dimension_numbers = #tpu.dot_dimension_numbers<[1], [0], [0], [1], [0, 0, 1, 1], [], []>} : vector<384x384xbf16>, vector<384x128xbf16>, vector<384x128xf32> -> vector<384x128xf32>
    %36 = arith.truncf %35 : vector<384x128xf32> to vector<384x128xbf16>
    %c1_27 = arith.constant 1 : index
    %c0_28 = arith.constant 0 : index
    %c0_29 = arith.constant 0 : index
    %37 = vector.load %arg4[%c1_27, %c0_28, %c0_29] : memref<4x128x128xbf16, #tpu.memory_space<vmem>>, vector<1x128x128xbf16>
    %38 = vector.shape_cast %37 : vector<1x128x128xbf16> to vector<128x128xbf16>
    %cst_30 = arith.constant dense<0.000000e+00> : vector<384x128xf32>
    %39 = tpu.matmul %36, %38, %cst_30 {dimension_numbers = #tpu.dot_dimension_numbers<[1], [0], [0], [1], [0, 0, 1, 1], [], []>} : vector<384x128xbf16>, vector<128x128xbf16>, vector<384x128xf32> -> vector<384x128xf32>
    %40 = arith.addf %34, %39 : vector<384x128xf32>
    %cst_31 = arith.constant dense<0.000000e+00> : vector<384x128xf32>
    %41 = tpu.matmul %0, %36, %cst_31 {dimension_numbers = #tpu.dot_dimension_numbers<[1], [0], [0], [1], [0, 0, 1, 1], [], []>} : vector<384x384xbf16>, vector<384x128xbf16>, vector<384x128xf32> -> vector<384x128xf32>
    %42 = arith.truncf %41 : vector<384x128xf32> to vector<384x128xbf16>
    %c2_32 = arith.constant 2 : index
    %c0_33 = arith.constant 0 : index
    %c0_34 = arith.constant 0 : index
    %43 = vector.load %arg4[%c2_32, %c0_33, %c0_34] : memref<4x128x128xbf16, #tpu.memory_space<vmem>>, vector<1x128x128xbf16>
    %44 = vector.shape_cast %43 : vector<1x128x128xbf16> to vector<128x128xbf16>
    %cst_35 = arith.constant dense<0.000000e+00> : vector<384x128xf32>
    %45 = tpu.matmul %42, %44, %cst_35 {dimension_numbers = #tpu.dot_dimension_numbers<[1], [0], [0], [1], [0, 0, 1, 1], [], []>} : vector<384x128xbf16>, vector<128x128xbf16>, vector<384x128xf32> -> vector<384x128xf32>
    %46 = arith.addf %40, %45 : vector<384x128xf32>
    %cst_36 = arith.constant dense<0.000000e+00> : vector<384x128xf32>
    %47 = tpu.matmul %0, %42, %cst_36 {dimension_numbers = #tpu.dot_dimension_numbers<[1], [0], [0], [1], [0, 0, 1, 1], [], []>} : vector<384x384xbf16>, vector<384x128xbf16>, vector<384x128xf32> -> vector<384x128xf32>
    %48 = arith.truncf %47 : vector<384x128xf32> to vector<384x128xbf16>
    %c3_37 = arith.constant 3 : index
    %c0_38 = arith.constant 0 : index
    %c0_39 = arith.constant 0 : index
    %49 = vector.load %arg4[%c3_37, %c0_38, %c0_39] : memref<4x128x128xbf16, #tpu.memory_space<vmem>>, vector<1x128x128xbf16>
    %50 = vector.shape_cast %49 : vector<1x128x128xbf16> to vector<128x128xbf16>
    %cst_40 = arith.constant dense<0.000000e+00> : vector<384x128xf32>
    %51 = tpu.matmul %48, %50, %cst_40 {dimension_numbers = #tpu.dot_dimension_numbers<[1], [0], [0], [1], [0, 0, 1, 1], [], []>} : vector<384x128xbf16>, vector<128x128xbf16>, vector<384x128xf32> -> vector<384x128xf32>
    %52 = arith.addf %46, %51 : vector<384x128xf32>
    %c0_41 = arith.constant 0 : index
    %c0_42 = arith.constant 0 : index
    %53 = vector.load %arg5[%c0_41, %c0_42] : memref<1x128xf32, #tpu.memory_space<vmem>>, vector<1x128xf32>
    %54 = vector.broadcast %53 : vector<1x128xf32> to vector<384x128xf32>
    %55 = arith.addf %52, %54 : vector<384x128xf32>
    %56 = tpu.iota {dimensions = array<i32: 1>} : vector<384x128xi32>
    %c16_i32 = arith.constant 16 : i32
    %57 = vector.broadcast %c16_i32 : i32 to vector<384x128xi32>
    %58 = arith.cmpi slt, %56, %57 : vector<384x128xi32>
    %cst_43 = arith.constant 0xFF800000 : f32
    %59 = vector.broadcast %cst_43 : f32 to vector<384x128xf32>
    %60 = arith.select %58, %55, %59 : vector<384x128xi1>, vector<384x128xf32>
    %cst_44 = arith.constant dense<0xFF800000> : vector<384xf32>
    %61 = vector.multi_reduction <maximumf>, %60, %cst_44 [1] : vector<384x128xf32> to vector<384xf32>
    %62 = vector.shape_cast %61 : vector<384xf32> to vector<384x1xf32>
    %63 = vector.broadcast %62 : vector<384x1xf32> to vector<384x128xf32>
    %64 = arith.subf %60, %63 : vector<384x128xf32>
    %65 = math.exp %64 : vector<384x128xf32>
    %cst_45 = arith.constant dense<0.000000e+00> : vector<384xf32>
    %66 = vector.multi_reduction <add>, %65, %cst_45 [1] : vector<384x128xf32> to vector<384xf32>
    %67 = vector.shape_cast %66 : vector<384xf32> to vector<384x1xf32>
    %68 = math.log %67 : vector<384x1xf32>
    %69 = vector.broadcast %68 : vector<384x1xf32> to vector<384x128xf32>
    %70 = arith.subf %64, %69 : vector<384x128xf32>
    %c0_46 = arith.constant 0 : index
    %c0_47 = arith.constant 0 : index
    %71 = vector.load %arg6[%c0_46, %c0_47] : memref<384x128xf32, #tpu.memory_space<vmem>>, vector<384x128xf32>
    tpu.vector_store %arg6[%c0_46, %c0_47], %70 {strides = array<i32>} : memref<384x128xf32, #tpu.memory_space<vmem>>, vector<384x128xf32>,
    return
  }
}

</mosaic_0001>

<bundles_post_ra>
// kernel: mul.1
= control target key start
LH: loop header
LB: loop body
LE: loop exit
PB: predicated region body
PF: predicated region fallthrough
CT: control target
= control target key end

     0   :  { %s34_s0 = inlined_call_operand.vmem [shape: f32[600], index: 0, kind: input, shape index: {}]   ;;  %s35_s1 = inlined_call_operand.vmem [shape: f32[600], index: 1, kind: input, shape index: {}]   ;;  %s36_s2 = inlined_call_operand.vmem [shape: f32[600], index: 2, kind: output, shape index: {}]  }
   0x1   :  { %v3_v0 = vld [vmem:[%s34_s0] sm:$0x1f] }
   0x2   :  { %v4_v1 = vld [vmem:[%s35_s1] sm:$0x1f] }
   0x3   :  { %v7_v2 = vmul.f32 %v4_v1, %v3_v0 }
   0x5   :  { %9 = vst [vmem:[%s36_s2] sm:$0xff] %v7_v2 }

// kernel: tag_encoder_forward.1
= control target key start
LH: loop header
LB: loop body
LE: loop exit
PB: predicated region body
PF: predicated region fallthrough
CT: control target
= control target key end

     0   :  { %v12803_v0 = vmov 0   ;;  %s12796_s1 = inlined_call_operand.vmem [shape: bf16[384,128], index: 1, kind: input, shape index: {}]   ;;  %s12797_s0 = inlined_call_operand.vmem [shape: bf16[384,384], index: 0, kind: input, shape index: {}]   ;;  %s12798_s2 = inlined_call_operand.vmem [shape: bf16[4,128,128], index: 2, kind: input, shape index: {}]   ;;  %s12799_s3 = inlined_call_operand.vmem [shape: f32[1,128], index: 3, kind: input, shape index: {}]   ;;  %s12800_s4 = inlined_call_operand.vmem [shape: bf16[4,128,128], index: 4, kind: input, shape index: {}]   ;;  %s12801_s5 = inlined_call_operand.vmem [shape: f32[1,128], index: 5, kind: input, shape index: {}]   ;;  %s12802_s6 = inlined_call_operand.vmem [shape: f32[384,128], index: 6, kind: output, shape index: {}]  }
   0x1   :  { %712 = vmatprep.subr.bf16.mxu0 %v12803_v0  ;;  %v8818_v1 = vld [vmem:[%s12796_s1] sm:$0xff]   ;;  %v8819_v2 = vld [vmem:[%s12796_s1 + $0x8] sm:$0xff]   ;;  %v8820_v3 = vld [vmem:[%s12796_s1 + $0x10] sm:$0xff]  }
   0x2   :  { %713 = vmatpush1.bf16.msra.mxu0 %v8818_v1  ;;  %v8826_v4 = vld [vmem:[%s12796_s1 + $0x80] sm:$0xff]   ;;  %v8821_v5 = vld [vmem:[%s12796_s1 + $0x18] sm:$0xff]   ;;  %v8828_v6 = vld [vmem:[%s12796_s1 + $0x88] sm:$0xff]  }
   0x3   :  { %714 = vmatprep.subr.bf16.mxu0 %v12803_v0  ;;  %7617 = vmatprep.subr.bf16.mxu1 %v8826_v4  ;;  %v8830_v7 = vld [vmem:[%s12796_s1 + $0x90] sm:$0xff]   ;;  %v8822_v8 = vld [vmem:[%s12796_s1 + $0x20] sm:$0xff]   ;;  %v8832_v9 = vld [vmem:[%s12796_s1 + $0x98] sm:$0xff]  }
   0x4   :  { %7618 = vmatpush3.bf16.msra.mxu1 %v8826_v4  ;;  %v8823_v10 = vld [vmem:[%s12796_s1 + $0x28] sm:$0xff]   ;;  %v8834_v11 = vld [vmem:[%s12796_s1 + $0xa0] sm:$0xff]   ;;  %v8824_v12 = vld [vmem:[%s12796_s1 + $0x30] sm:$0xff]  }
   0x5   :  { %7619 = vmatprep.subr.bf16.mxu1 %v8828_v6  ;;  %v8836_v13 = vld [vmem:[%s12796_s1 + $0xa8] sm:$0xff]   ;;  %v9521_v15 = vld [vmem:[%s12797_s0 + $0x4] ss:$12 sps:$4 sm:$0xff]   ;;  %v8825_v16 = vld [vmem:[%s12796_s1 + $0x38] sm:$0xff]  }
   0x6   :  { %715 = vmatpush1.bf16.msra.mxu0 %v8819_v2  ;;  %v8842_v14 = vld [vmem:[%s12797_s0 + $0x8] ss:$12 sps:$4 sm:$0xff]   ;;  %744 = vmatprep.mubr.bf16.mxu0 %v9521_v15  ;;  %v8827_v18 = vld [vmem:[%s12796_s1 + $0x40] sm:$0xff]   ;;  %v8840_v19 = vld [vmem:[%s12796_s1 + $0xb8] sm:$0xff]  }
   0x7   :  { %716 = vmatprep.subr.bf16.mxu0 %v12803_v0  ;;  %7633 = vmatprep.mubr.bf16.mxu1 %v8842_v14  ;;  %v8838_v17 = vld [vmem:[%s12796_s1 + $0xb0] sm:$0xff]   ;;  %v8829_v20 = vld [vmem:[%s12796_s1 + $0x48] sm:$0xff]   ;;  %v8850_v23 = vld [vmem:[%s12797_s0 + $0x38] ss:$12 sps:$4 sm:$0xff]  }
   0x8   :  { %7620 = vmatpush3.bf16.msra.mxu1 %v8828_v6  ;;  %v8831_v21 = vld [vmem:[%s12796_s1 + $0x50] sm:$0xff]   ;;  %v8845_v22 = vld [vmem:[%s12797_s0 + $0x20] ss:$12 sps:$4 sm:$0xff]   ;;  %v8833_v24 = vld [vmem:[%s12796_s1 + $0x58] sm:$0xff]  }
   0x9   :  { %7621 = vmatprep.subr.bf16.mxu1 %v8830_v7  ;;  %v8835_v25 = vld [vmem:[%s12796_s1 + $0x60] sm:$0xff]   ;;  %v8853_v26 = vld [vmem:[%s12797_s0 + $0x50] ss:$12 sps:$4 sm:$0xff]   ;;  %v8858_v27 = vld [vmem:[%s12797_s0 + $0x68] ss:$12 sps:$4 sm:$0xff]  }
   0xa   :  { %717 = vmatpush1.bf16.msra.mxu0 %v8820_v3  ;;  %v8837_v28 = vld [vmem:[%s12796_s1 + $0x68] sm:$0xff]   ;;  %v8839_v29 = vld [vmem:[%s12796_s1 + $0x70] sm:$0xff]   ;;  %v8866_v31 = vld [vmem:[%s12797_s0 + $0x98] ss:$12 sps:$4 sm:$0xff]  }
   0xb   :  { %718 = vmatprep.subr.bf16.mxu0 %v12803_v0  ;;  %v8861_v30 = vld [vmem:[%s12797_s0 + $0x80] ss:$12 sps:$4 sm:$0xff]   ;;  %v8841_v32 = vld [vmem:[%s12796_s1 + $0x78] sm:$0xff]   ;;  %v8874_v36 = vld [vmem:[%s12797_s0 + $0xc8] ss:$12 sps:$4 sm:$0xff]  }
   0xc   :  { %7622 = vmatpush3.bf16.msra.mxu1 %v8830_v7  ;;  %v9587_v33 = vld [vmem:[%s12797_s0] ss:$12 sps:$4 sm:$0xff]   ;;  %v9592_v34 = vld [vmem:[%s12797_s0 + $0x1c] ss:$12 sps:$4 sm:$0xff]   ;;  %v9606_v37 = vld [vmem:[%s12797_s0 + $0x18] ss:$12 sps:$4 sm:$0xff]  }
   0xd   :  { %7623 = vmatprep.subr.bf16.mxu1 %v8832_v9  ;;  %v8869_v35 = vld [vmem:[%s12797_s0 + $0xb0] ss:$12 sps:$4 sm:$0xff]   ;;  %v9611_v38 = vld [vmem:[%s12797_s0 + $0x34] ss:$12 sps:$4 sm:$0xff]   ;;  %v8882_v40 = vld [vmem:[%s12797_s0 + $0xf8] ss:$12 sps:$4 sm:$0xff]  }
   0xe   :  { %719 = vmatpush1.bf16.msra.mxu0 %v8821_v5  ;;  %v8877_v39 = vld [vmem:[%s12797_s0 + $0xe0] ss:$12 sps:$4 sm:$0xff]   ;;  %v9624_v41 = vld [vmem:[%s12797_s0 + $0x30] ss:$12 sps:$4 sm:$0xff]   ;;  %v8890_v44 = vld [vmem:[%s12797_s0 + $0x128] ss:$12 sps:$4 sm:$0xff]  }
   0xf   :  { %720 = vmatprep.subr.bf16.mxu0 %v12803_v0  ;;  %v9629_v42 = vld [vmem:[%s12797_s0 + $0x4c] ss:$12 sps:$4 sm:$0xff]   ;;  %v8885_v43 = vld [vmem:[%s12797_s0 + $0x110] ss:$12 sps:$4 sm:$0xff]   ;;  %v9642_v45 = vld [vmem:[%s12797_s0 + $0x48] ss:$12 sps:$4 sm:$0xff]  }
  0x10   :  { %7624 = vmatpush3.bf16.msra.mxu1 %v8832_v9  ;;  %v9647_v46 = vld [vmem:[%s12797_s0 + $0x64] ss:$12 sps:$4 sm:$0xff]   ;;  %v8893_v47 = vld [vmem:[%s12797_s0 + $0x140] ss:$12 sps:$4 sm:$0xff]   ;;  %v9665_v50 = vld [vmem:[%s12797_s0 + $0x7c] ss:$12 sps:$4 sm:$0xff]  }
  0x11   :  { %7625 = vmatprep.subr.bf16.mxu1 %v8834_v11  ;;  %v8898_v48 = vld [vmem:[%s12797_s0 + $0x158] ss:$12 sps:$4 sm:$0xff]   ;;  %v9660_v49 = vld [vmem:[%s12797_s0 + $0x60] ss:$12 sps:$4 sm:$0xff]   ;;  %v8901_v51 = vld [vmem:[%s12797_s0 + $0x170] ss:$12 sps:$4 sm:$0xff]  }
  0x12   :  { %721 = vmatpush1.bf16.msra.mxu0 %v8822_v8  ;;  %v8906_v52 = vld [vmem:[%s12797_s0 + $0x188] ss:$12 sps:$4 sm:$0xff]   ;;  %v9678_v53 = vld [vmem:[%s12797_s0 + $0x78] ss:$12 sps:$4 sm:$0xff]   ;;  %v8909_v55 = vld [vmem:[%s12797_s0 + $0x1a0] ss:$12 sps:$4 sm:$0xff]  }
  0x13   :  { %722 = vmatprep.subr.bf16.mxu0 %v12803_v0  ;;  %v9683_v54 = vld [vmem:[%s12797_s0 + $0x94] ss:$12 sps:$4 sm:$0xff]   ;;  %v8914_v56 = vld [vmem:[%s12797_s0 + $0x1b8] ss:$12 sps:$4 sm:$0xff]   ;;  %v9696_v57 = vld [vmem:[%s12797_s0 + $0x90] ss:$12 sps:$4 sm:$0xff]  }
  0x14   :  { %7626 = vmatpush3.bf16.msra.mxu1 %v8834_v11  ;;  %v9701_v58 = vld [vmem:[%s12797_s0 + $0xac] ss:$12 sps:$4 sm:$0xff]   ;;  %v8917_v59 = vld [vmem:[%s12797_s0 + $0x1d0] ss:$12 sps:$4 sm:$0xff]   ;;  %v8922_v60 = vld [vmem:[%s12797_s0 + $0x1e8] ss:$12 sps:$4 sm:$0xff]  }
  0x15   :  { %7627 = vmatprep.subr.bf16.mxu1 %v8836_v13  ;;  %v9714_v61 = vld [vmem:[%s12797_s0 + $0xa8] ss:$12 sps:$4 sm:$0xff]   ;;  %v9719_v62 = vld [vmem:[%s12797_s0 + $0xc4] ss:$12 sps:$4 sm:$0xff]   ;;  %v8925_v63 = vld [vmem:[%s12797_s0 + $0x200] ss:$12 sps:$4 sm:$0xff]  }
  0x16   :  { %723 = vmatpush1.bf16.msra.mxu0 %v8823_v10  ;;  %v8930_v1 = vld [vmem:[%s12797_s0 + $0x218] ss:$12 sps:$4 sm:$0xff]   ;;  %v9735_v3 = vld [vmem:[%s12797_s0 + $0xc0] ss:$12 sps:$4 sm:$0xff]   ;;  %v9743_v5 = vld [vmem:[%s12797_s0 + $0xdc] ss:$12 sps:$4 sm:$0xff]  }
  0x17   :  { %724 = vmatprep.subr.bf16.mxu0 %v12803_v0  ;;  %v8938_v2 = vld [vmem:[%s12798_s2 + $0x40] sm:$0xff]   ;;  %v8939_v4 = vld [vmem:[%s12798_s2 + $0x48] sm:$0xff]   ;;  %v8933_v6 = vld [vmem:[%s12797_s0 + $0x230] ss:$12 sps:$4 sm:$0xff]  }
  0x18   :  { %7628 = vmatpush3.bf16.msra.mxu1 %v8836_v13  ;;  %v8940_v7 = vld [vmem:[%s12798_s2 + $0x50] sm:$0xff]   ;;  %v8941_v8 = vld [vmem:[%s12798_s2 + $0x58] sm:$0xff]   ;;  %v8942_v11 = vld [vmem:[%s12798_s2 + $0x60] sm:$0xff]  }
  0x19   :  { %7629 = vmatprep.subr.bf16.mxu1 %v8838_v17  ;;  %v9759_v9 = vld [vmem:[%s12797_s0 + $0xd8] ss:$12 sps:$4 sm:$0xff]   ;;  %v9764_v10 = vld [vmem:[%s12797_s0 + $0xf4] ss:$12 sps:$4 sm:$0xff]  }
  0x1a   :  { %725 = vmatpush1.bf16.msra.mxu0 %v8824_v12  ;;  %12911 = vst [vmem:[#allocation2_spill] sm:$0xff] %v9764_v10  ;;  %v9774_v12 = vld [vmem:[%s12797_s0 + $0xf0] ss:$12 sps:$4 sm:$0xff]   ;;  %v9779_v13 = vld [vmem:[%s12797_s0 + $0x10c] ss:$12 sps:$4 sm:$0xff]  }
  0x1b   :  { %726 = vmatprep.subr.bf16.mxu0 %v12803_v0  ;;  %12912 = vst [vmem:[#allocation3_spill] sm:$0xff] %v9774_v12  ;;  %12913 = vst [vmem:[#allocation4_spill] sm:$0xff] %v9779_v13  ;;  %v9786_v14 = vld [vmem:[%s12797_s0 + $0x108] ss:$12 sps:$4 sm:$0xff]  }
  0x1c   :  { %7630 = vmatpush3.bf16.msra.mxu1 %v8838_v17  ;;  %12914 = vst [vmem:[#allocation5_spill] sm:$0xff] %v9786_v14  ;;  %v9794_v17 = vld [vmem:[%s12797_s0 + $0x124] ss:$12 sps:$4 sm:$0xff]  }
  0x1d   :  { %7631 = vmatprep.subr.bf16.mxu1 %v8840_v19  ;;  %12915 = vst [vmem:[#allocation6_spill] sm:$0xff] %v9794_v17 }
  0x1e   :  { %727 = vmatpush1.bf16.msra.mxu0 %v8825_v16  ;;  %v8943_v16 = vld [vmem:[%s12798_s2 + $0x68] sm:$0xff]  }
  0x1f   :  { %728 = vmatprep.subr.bf16.mxu0 %v12803_v0 }
  0x20   :  { %7632 = vmatpush3.bf16.msra.mxu1 %v8840_v19  ;;  %v9804_v19 = vld [vmem:[%s12797_s0 + $0x120] ss:$12 sps:$4 sm:$0xff]  }
  0x21   :  { %7681 = vmatprep.subr.bf16.mxu1 %v8938_v2  ;;  %12916 = vst [vmem:[#allocation7_spill] sm:$0xff] %v9804_v19 }
  0x22   :  { %729 = vmatpush1.bf16.msra.mxu0 %v8827_v18  ;;  %v8944_v18 = vld [vmem:[%s12798_s2 + $0x70] sm:$0xff]  }
  0x23   :  { %730 = vmatprep.subr.bf16.mxu0 %v12803_v0  ;;  %7634 = vmatmul.mubr.bf16.vlgmr.msra.gmra.mrb[0].mxu1 %v8845_v22  ;;  %v9819_v22 = vld [vmem:[%s12797_s0 + $0x138] ss:$12 sps:$4 sm:$0xff]  }
  0x24   :  { %7637 = vmatprep.mubr.bf16.mxu1 %v8850_v23  ;;  %7682 = vmatpush3.bf16.msra.mxu1 %v8938_v2  ;;  %12918 = vst [vmem:[#allocation9_spill] sm:$0xff] %v9819_v22  ;;  %v9824_v23 = vld [vmem:[%s12797_s0 + $0x154] ss:$12 sps:$4 sm:$0xff]  }
  0x25   :  { %7683 = vmatprep.subr.bf16.mxu1 %v8939_v4  ;;  %12919 = vst [vmem:[#allocation10_spill] sm:$0xff] %v9824_v23 }
  0x26   :  { %731 = vmatpush1.bf16.msra.mxu0 %v8829_v20  ;;  %v8945_v20 = vld [vmem:[%s12798_s2 + $0x78] sm:$0xff]  }
  0x27   :  { %732 = vmatprep.subr.bf16.mxu0 %v12803_v0 }
  0x28   :  { %7684 = vmatpush3.bf16.msra.mxu1 %v8939_v4 }
  0x29   :  { %7685 = vmatprep.subr.bf16.mxu1 %v8940_v7 }
  0x2a   :  { %733 = vmatpush1.bf16.msra.mxu0 %v8831_v21  ;;  %v9812_v21 = vld [vmem:[%s12797_s0 + $0x13c] ss:$12 sps:$4 sm:$0xff]  }
  0x2b   :  { %734 = vmatprep.subr.bf16.mxu0 %v12803_v0  ;;  %7638 = vmatmul.mubr.bf16.gmra.mrb[4].mxu1 %v8853_v26  ;;  %12917 = vst [vmem:[#allocation8_spill] sm:$0xff] %v9812_v21  ;;  %v9843_v26 = vld [vmem:[%s12797_s0 + $0x168] ss:$12 sps:$4 sm:$0xff]  }
  0x2c   :  { %7641 = vmatprep.mubr.bf16.mxu1 %v8858_v27  ;;  %7686 = vmatpush3.bf16.msra.mxu1 %v8940_v7  ;;  %12922 = vst [vmem:[#allocation13_spill] sm:$0xff] %v9843_v26  ;;  %v9848_v27 = vld [vmem:[%s12797_s0 + $0x184] ss:$12 sps:$4 sm:$0xff]  }
  0x2d   :  { %7687 = vmatprep.subr.bf16.mxu1 %v8941_v8  ;;  %12923 = vst [vmem:[#allocation14_spill] sm:$0xff] %v9848_v27 }
  0x2e   :  { %735 = vmatpush1.bf16.msra.mxu0 %v8833_v24  ;;  %v9831_v24 = vld [vmem:[%s12797_s0 + $0x150] ss:$12 sps:$4 sm:$0xff]  }
  0x2f   :  { %736 = vmatprep.subr.bf16.mxu0 %v12803_v0  ;;  %12920 = vst [vmem:[#allocation11_spill] sm:$0xff] %v9831_v24 }
  0x30   :  { %7688 = vmatpush3.bf16.msra.mxu1 %v8941_v8 }
  0x31   :  { %7689 = vmatprep.subr.bf16.mxu1 %v8942_v11 }
  0x32   :  { %737 = vmatpush1.bf16.msra.mxu0 %v8835_v25  ;;  %v9836_v25 = vld [vmem:[%s12797_s0 + $0x16c] ss:$12 sps:$4 sm:$0xff]  }
  0x33   :  { %738 = vmatprep.subr.bf16.mxu0 %v12803_v0  ;;  %7642 = vmatmul.mubr.bf16.gmra.mrb[8].mxu1 %v8861_v30  ;;  %12921 = vst [vmem:[#allocation12_spill] sm:$0xff] %v9836_v25  ;;  %v9867_v30 = vld [vmem:[%s12797_s0 + $0x198] ss:$12 sps:$4 sm:$0xff]  }
  0x34   :  { %7645 = vmatprep.mubr.bf16.mxu1 %v8866_v31  ;;  %7690 = vmatpush3.bf16.msra.mxu1 %v8942_v11  ;;  %12926 = vst [vmem:[#allocation17_spill] sm:$0xff] %v9867_v30  ;;  %v9872_v31 = vld [vmem:[%s12797_s0 + $0x1b4] ss:$12 sps:$4 sm:$0xff]  }
  0x35   :  { %7691 = vmatprep.subr.bf16.mxu1 %v8943_v16  ;;  %12927 = vst [vmem:[#allocation18_spill] sm:$0xff] %v9872_v31 }
  0x36   :  { %739 = vmatpush1.bf16.msra.mxu0 %v8837_v28  ;;  %v9855_v28 = vld [vmem:[%s12797_s0 + $0x180] ss:$12 sps:$4 sm:$0xff]  }
  0x37   :  { %740 = vmatprep.subr.bf16.mxu0 %v12803_v0  ;;  %12924 = vst [vmem:[#allocation15_spill] sm:$0xff] %v9855_v28 }
  0x38   :  { %7692 = vmatpush3.bf16.msra.mxu1 %v8943_v16 }
  0x39   :  { %7693 = vmatprep.subr.bf16.mxu1 %v8944_v18 }
  0x3a   :  { %741 = vmatpush1.bf16.msra.mxu0 %v8839_v29  ;;  %v9860_v29 = vld [vmem:[%s12797_s0 + $0x19c] ss:$12 sps:$4 sm:$0xff]  }
  0x3b   :  { %742 = vmatprep.subr.bf16.mxu0 %v12803_v0  ;;  %7646 = vmatmul.mubr.bf16.gmra.mrb[12].mxu1 %v8869_v35  ;;  %12925 = vst [vmem:[#allocation16_spill] sm:$0xff] %v9860_v29  ;;  %v9884_v35 = vld [vmem:[%s12797_s0 + $0x1cc] ss:$12 sps:$4 sm:$0xff]  }
  0x3c   :  { %7649 = vmatprep.mubr.bf16.mxu1 %v8874_v36  ;;  %7694 = vmatpush3.bf16.msra.mxu1 %v8944_v18  ;;  %12929 = vst [vmem:[#allocation20_spill] sm:$0xff] %v9884_v35  ;;  %v9891_v36 = vld [vmem:[%s12797_s0 + $0x1c8] ss:$12 sps:$4 sm:$0xff]  }
  0x3d   :  { %7695 = vmatprep.subr.bf16.mxu1 %v8945_v20  ;;  %12930 = vst [vmem:[#allocation21_spill] sm:$0xff] %v9891_v36 }
  0x3e   :  { %743 = vmatpush1.bf16.msra.mxu0 %v8841_v32  ;;  %v9879_v32 = vld [vmem:[%s12797_s0 + $0x1b0] ss:$12 sps:$4 sm:$0xff]  }
  0x3f   :  { %1749 = vmatprep.subr.bf16.mxu0 %v12803_v0  ;;  %12928 = vst [vmem:[#allocation19_spill] sm:$0xff] %v9879_v32 }
  0x40   :  { %7696 = vmatpush3.bf16.msra.mxu1 %v8945_v20 }
  0x41   :  { %745 = vmatmul.mubr.bf16.vlgmr.msra.gmra.mrb[0].mxu0 %v9587_v33 }
  0x42   :  { %752 = vmatprep.mubr.bf16.mxu0 %v9592_v34 }
  0x43   :  { %7650 = vmatmul.mubr.bf16.gmra.mrb[16].mxu1 %v8877_v39  ;;  %v9896_v39 = vld [vmem:[%s12797_s0 + $0x1e4] ss:$12 sps:$4 sm:$0xff]  }
  0x44   :  { %7653 = vmatprep.mubr.bf16.mxu1 %v8882_v40  ;;  %12931 = vst [vmem:[#allocation22_spill] sm:$0xff] %v9896_v39  ;;  %v9903_v40 = vld [vmem:[%s12797_s0 + $0x1e0] ss:$12 sps:$4 sm:$0xff]  }
  0x45   :  { %12932 = vst [vmem:[#allocation23_spill] sm:$0xff] %v9903_v40 }
  0x49   :  { %753 = vmatmul.mubr.bf16.gmra.mrb[4].mxu0 %v9606_v37 }
  0x4a   :  { %760 = vmatprep.mubr.bf16.mxu0 %v9611_v38 }
  0x4b   :  { %7654 = vmatmul.mubr.bf16.gmra.mrb[20].mxu1 %v8885_v43  ;;  %v9908_v43 = vld [vmem:[%s12797_s0 + $0x1fc] ss:$12 sps:$4 sm:$0xff]  }
  0x4c   :  { %7657 = vmatprep.mubr.bf16.mxu1 %v8890_v44  ;;  %12933 = vst [vmem:[#allocation24_spill] sm:$0xff] %v9908_v43  ;;  %v9915_v44 = vld [vmem:[%s12797_s0 + $0x1f8] ss:$12 sps:$4 sm:$0xff]  }
  0x4d   :  { %12934 = vst [vmem:[#allocation25_spill] sm:$0xff] %v9915_v44 }
  0x51   :  { %761 = vmatmul.mubr.bf16.gmra.mrb[8].mxu0 %v9624_v41 }
  0x52   :  { %768 = vmatprep.mubr.bf16.mxu0 %v9629_v42 }
  0x53   :  { %7658 = vmatmul.mubr.bf16.gmra.mrb[24].mxu1 %v8893_v47  ;;  %v9920_v47 = vld [vmem:[%s12797_s0 + $0x214] ss:$12 sps:$4 sm:$0xff]  }
  0x54   :  { %7661 = vmatprep.mubr.bf16.mxu1 %v8898_v48  ;;  %12935 = vst [vmem:[#allocation26_spill] sm:$0xff] %v9920_v47  ;;  %v9927_v48 = vld [vmem:[%s12797_s0 + $0x210] ss:$12 sps:$4 sm:$0xff]  }
  0x55   :  { %12936 = vst [vmem:[#allocation27_spill] sm:$0xff] %v9927_v48 }
  0x59   :  { %769 = vmatmul.mubr.bf16.gmra.mrb[12].mxu0 %v9642_v45 }
  0x5a   :  { %776 = vmatprep.mubr.bf16.mxu0 %v9647_v46 }
  0x5b   :  { %7662 = vmatmul.mubr.bf16.gmra.mrb[28].mxu1 %v8901_v51  ;;  %v9932_v51 = vld [vmem:[%s12797_s0 + $0x22c] ss:$12 sps:$4 sm:$0xff]  }
  0x5c   :  { %7665 = vmatprep.mubr.bf16.mxu1 %v8906_v52  ;;  %12937 = vst [vmem:[#allocation28_spill] sm:$0xff] %v9932_v51  ;;  %v9939_v52 = vld [vmem:[%s12797_s0 + $0x228] ss:$12 sps:$4 sm:$0xff]  }
  0x5d   :  { %12938 = vst [vmem:[#allocation29_spill] sm:$0xff] %v9939_v52 }
  0x61   :  { %777 = vmatmul.mubr.bf16.gmra.mrb[16].mxu0 %v9660_v49 }
  0x62   :  { %784 = vmatprep.mubr.bf16.mxu0 %v9665_v50 }
  0x63   :  { %7666 = vmatmul.mubr.bf16.gmra.mrb[32].mxu1 %v8909_v55  ;;  %v8946_v55 = vld [vmem:[%s12798_s2] sm:$0xff]  }
  0x64   :  { %7669 = vmatprep.mubr.bf16.mxu1 %v8914_v56  ;;  %7745 = vmatprep.subr.bf16.mxu1 %v8946_v55 }
  0x69   :  { %785 = vmatmul.mubr.bf16.gmra.mrb[20].mxu0 %v9678_v53 }
  0x6a   :  { %792 = vmatprep.mubr.bf16.mxu0 %v9683_v54 }
  0x6b   :  { %7670 = vmatmul.mubr.bf16.gmra.mrb[36].mxu1 %v8917_v59 }
  0x6c   :  { %7673 = vmatprep.mubr.bf16.mxu1 %v8922_v60 }
  0x71   :  { %793 = vmatmul.mubr.bf16.gmra.mrb[24].mxu0 %v9696_v57 }
  0x72   :  { %800 = vmatprep.mubr.bf16.mxu0 %v9701_v58 }
  0x73   :  { %7674 = vmatmul.mubr.bf16.gmra.mrb[40].mxu1 %v8925_v63 }
  0x74   :  { %7677 = vmatprep.mubr.bf16.mxu1 %v8930_v1 }
  0x79   :  { %801 = vmatmul.mubr.bf16.gmra.mrb[28].mxu0 %v9714_v61 }
  0x7a   :  { %808 = vmatprep.mubr.bf16.mxu0 %v9719_v62 }
  0x7b   :  { %7678 = vmatmul.mubr.bf16.gmra.mrb[44].mxu1 %v8933_v6 }
  0x81   :  { %809 = vmatmul.mubr.bf16.gmra.mrb[32].mxu0 %v9735_v3 }
  0x82   :  { %816 = vmatprep.mubr.bf16.mxu0 %v9743_v5 }
  0x89   :  { %817 = vmatmul.mubr.bf16.gmra.mrb[36].mxu0 %v9759_v9 }
  0x8a   :  { %824 = vmatprep.mubr.bf16.mxu0 %v9764_v10 }
  0x91   :  { %825 = vmatmul.mubr.bf16.gmra.mrb[40].mxu0 %v9774_v12 }
  0x92   :  { %832 = vmatprep.mubr.bf16.mxu0 %v9779_v13 }
  0x99   :  { %833 = vmatmul.mubr.bf16.gmra.mrb[44].mxu0 %v9786_v14 }
  0x9a   :  { %840 = vmatprep.mubr.bf16.mxu0 %v9794_v17 }
  0xa1   :  { %841 = vmatmul.mubr.bf16.gmra.mrb[48].mxu0 %v9804_v19 }
  0xa2   :  { %848 = vmatprep.mubr.bf16.mxu0 %v9812_v21 }
  0xa9   :  { %849 = vmatmul.mubr.bf16.gmra.mrb[52].mxu0 %v9819_v22 }
  0xaa   :  { %856 = vmatprep.mubr.bf16.mxu0 %v9824_v23 }
  0xb1   :  { %857 = vmatmul.mubr.bf16.gmra.mrb[56].mxu0 %v9831_v24 }
  0xb2   :  { %864 = vmatprep.mubr.bf16.mxu0 %v9836_v25 }
  0xb9   :  { %865 = vmatmul.mubr.bf16.gmra.mrb[60].mxu0 %v9843_v26 }
  0xba   :  { %872 = vmatprep.mubr.bf16.mxu0 %v9848_v27 }
  0xc1   :  { %873 = vmatmul.mubr.bf16.gmra.mrb[64].mxu0 %v9855_v28 }
  0xc2   :  { %880 = vmatprep.mubr.bf16.mxu0 %v9860_v29 }
  0xc9   :  { %881 = vmatmul.mubr.bf16.gmra.mrb[68].mxu0 %v9867_v30 }
  0xca   :  { %888 = vmatprep.mubr.bf16.mxu0 %v9872_v31 }
  0xd1   :  { %889 = vmatmul.mubr.bf16.gmra.mrb[72].mxu0 %v9879_v32 }
  0xd2   :  { %896 = vmatprep.mubr.bf16.mxu0 %v9884_v35 }
  0xd9   :  { %897 = vmatmul.mubr.bf16.gmra.mrb[76].mxu0 %v9891_v36  ;;  %v12939_v36 = vmov 0  }
  0xda   :  { %904 = vmatprep.mubr.bf16.mxu0 %v9896_v39 }
  0xe1   :  { %905 = vmatmul.mubr.bf16.gmra.mrb[80].mxu0 %v9903_v40 }
  0xe2   :  { %912 = vmatprep.mubr.bf16.mxu0 %v9908_v43 }
  0xe9   :  { %913 = vmatmul.mubr.bf16.gmra.mrb[84].mxu0 %v9915_v44 }
  0xea   :  { %920 = vmatprep.mubr.bf16.mxu0 %v9920_v47 }
  0xf1   :  { %921 = vmatmul.mubr.bf16.gmra.mrb[88].mxu0 %v9927_v48 }
  0xf2   :  { %928 = vmatprep.mubr.bf16.mxu0 %v9932_v51 }
  0xf6   :  { %v7635_v56 = vpop.f32.mrb[0].mxu1 }
  0xf7   :  { %v971_v59 = vpop.f32.mrb[1].mxu1 }
  0xf8   :  { %v7636_v60 = vpop.f32.mrb[2].mxu1 }
  0xf9   :  { %929 = vmatmul.mubr.bf16.gmra.mrb[92].mxu0 %v9939_v52  ;;  %v974_v63 = vpop.f32.mrb[3].mxu1 }
  0xfa   :  { %1781 = vmatprep.mubr.bf16.mxu0 %v9521_v15 }
  0xfe   :  { %v7639_v1 = vpop.f32.mrb[4].mxu1 }
  0xff   :  { %v987_v2 = vpop.f32.mrb[5].mxu1 }
 0x100   :  { %v9946_v4 = vpop.f32.mrb[6].mxu1 }
 0x101   :  { %v990_v6 = vpop.f32.mrb[7].mxu1 }
 0x106   :  { %v9948_v7 = vpop.f32.mrb[8].mxu1 }
 0x107   :  { %v9950_v8 = vpop.f32.mrb[9].mxu1 }
 0x108   :  { %v9952_v11 = vpop.f32.mrb[10].mxu1 }
 0x109   :  { %v9954_v15 = vpop.f32.mrb[11].mxu1 }
 0x10e   :  { %v9956_v0 = vpop.f32.mrb[12].mxu1 }
 0x10f   :  { %v9958_v51 = vpop.f32.mrb[13].mxu1 }
 0x110   :  { %v9960_v44 = vpop.f32.mrb[14].mxu1 }
 0x111   :  { %v9962_v43 = vpop.f32.mrb[15].mxu1 }
 0x114   :  { %v746_v16 = vpop.f32.mrb[0].mxu0 }
 0x115   :  { %v748_v18 = vpop.f32.mrb[1].mxu0  ;;  %v972_v20 = vadd.f32 %v971_v59, %v746_v16 }
 0x116   :  { %v749_v52 = vpop.f32.mrb[2].mxu0  ;;  %v9965_v59 = vpop.f32.mrb[16].mxu1 }
 0x117   :  { %v751_v48 = vpop.f32.mrb[3].mxu0  ;;  %v975_v47 = vadd.f32 %v974_v63, %v749_v52  ;;  %v9967_v32 = vpop.f32.mrb[17].mxu1 }
 0x118   :  { %v9969_v52 = vpop.f32.mrb[18].mxu1 }
 0x119   :  { %v1162_v40 = vpack.c.bf16 %v975_v47, %v972_v20  ;;  %v9971_v63 = vpop.f32.mrb[19].mxu1 }
 0x11b   :  { %7697 = vmatprep.mubr.bf16.mxu1 %v1162_v40  ;;  %1750 = vmatpush1.bf16.msra.mxu0 %v1162_v40  ;;  %v8947_v40 = vld [vmem:[%s12798_s2 + $0x8] sm:$0xff]  }
 0x11c   :  { %v754_v39 = vpop.f32.mrb[4].mxu0  ;;  %1751 = vmatprep.subr.bf16.mxu0 %v12939_v36 }
 0x11d   :  { %v980_v35 = vadd.f32 %v7635_v56, %v754_v39  ;;  %v756_v18 = vpop.f32.mrb[5].mxu0 }
 0x11e   :  { %v757_v16 = vpop.f32.mrb[6].mxu0  ;;  %v9977_v20 = vpop.f32.mrb[20].mxu1 }
 0x11f   :  { %v983_v31 = vadd.f32 %v7636_v60, %v757_v16  ;;  %v759_v48 = vpop.f32.mrb[7].mxu0  ;;  %v8948_v60 = vld [vmem:[%s12798_s2 + $0x10] sm:$0xff]  }
 0x121   :  { %v1163_v30 = vpack.c.bf16 %v983_v31, %v980_v35  ;;  %v9982_v35 = vpop.f32.mrb[21].mxu1 }
 0x122   :  { %v9984_v48 = vpop.f32.mrb[22].mxu1 }
 0x123   :  { %7698 = vmatmul.mubr.bf16.vlgmr.msra.gmra.mrb[48].mxu1 %v1163_v30  ;;  %1752 = vmatpush1.bf16.msra.mxu0 %v1163_v30  ;;  %v9986_v30 = vpop.f32.mrb[23].mxu1 }
 0x124   :  { %v762_v39 = vpop.f32.mrb[8].mxu0  ;;  %1753 = vmatprep.subr.bf16.mxu0 %v12939_v36  ;;  %7746 = vmatpush3.bf16.msra.mxu1 %v8946_v55 }
 0x125   :  { %v764_v47 = vpop.f32.mrb[9].mxu0  ;;  %v988_v56 = vadd.f32 %v987_v2, %v762_v39  ;;  %7747 = vmatprep.subr.bf16.mxu1 %v8947_v40  ;;  %v8949_v2 = vld [vmem:[%s12798_s2 + $0x18] sm:$0xff]  }
 0x126   :  { %v765_v31 = vpop.f32.mrb[10].mxu0 }
 0x127   :  { %v767_v18 = vpop.f32.mrb[11].mxu0  ;;  %v991_v16 = vadd.f32 %v990_v6, %v765_v31  ;;  %v9992_v6 = vpop.f32.mrb[24].mxu1 }
 0x128   :  { %7748 = vmatpush3.bf16.msra.mxu1 %v8947_v40  ;;  %v8950_v40 = vld [vmem:[%s12798_s2 + $0x20] sm:$0xff]   ;;  %v9997_v31 = vpop.f32.mrb[25].mxu1 }
 0x129   :  { %v1164_v55 = vpack.c.bf16 %v991_v16, %v988_v56  ;;  %7749 = vmatprep.subr.bf16.mxu1 %v8948_v60 }
 0x12b   :  { %7701 = vmatprep.mubr.bf16.mxu1 %v1164_v55  ;;  %1754 = vmatpush1.bf16.msra.mxu0 %v1164_v55  ;;  %v10000_v55 = vpop.f32.mrb[26].mxu1 }
 0x12c   :  { %v770_v39 = vpop.f32.mrb[12].mxu0  ;;  %1755 = vmatprep.subr.bf16.mxu0 %v12939_v36  ;;  %7750 = vmatpush3.bf16.msra.mxu1 %v8948_v60  ;;  %v10002_v28 = vpop.f32.mrb[27].mxu1  ;;  %v8951_v60 = vld [vmem:[%s12798_s2 + $0x28] sm:$0xff]  }
 0x12d   :  { %v996_v47 = vadd.f32 %v7639_v1, %v770_v39  ;;  %v772_v18 = vpop.f32.mrb[13].mxu0  ;;  %7751 = vmatprep.subr.bf16.mxu1 %v8949_v2 }
 0x12e   :  { %v773_v56 = vpop.f32.mrb[14].mxu0 }
 0x12f   :  { %v999_v16 = vadd.f32 %v9946_v4, %v773_v56  ;;  %v775_v29 = vpop.f32.mrb[15].mxu0  ;;  %v10009_v4 = vpop.f32.mrb[28].mxu1 }
 0x130   :  { %7752 = vmatpush3.bf16.msra.mxu1 %v8949_v2  ;;  %v8952_v2 = vld [vmem:[%s12798_s2 + $0x30] sm:$0xff]   ;;  %v10014_v56 = vpop.f32.mrb[29].mxu1 }
 0x131   :  { %v1165_v1 = vpack.c.bf16 %v999_v16, %v996_v47  ;;  %7753 = vmatprep.subr.bf16.mxu1 %v8950_v40  ;;  %v10017_v27 = vpop.f32.mrb[30].mxu1 }
 0x132   :  { %v10019_v26 = vpop.f32.mrb[31].mxu1 }
 0x133   :  { %7702 = vmatmul.mubr.bf16.gmra.mrb[52].mxu1 %v1165_v1  ;;  %1756 = vmatpush1.bf16.msra.mxu0 %v1165_v1 }
 0x134   :  { %v778_v39 = vpop.f32.mrb[16].mxu0  ;;  %1757 = vmatprep.subr.bf16.mxu0 %v12939_v36  ;;  %7754 = vmatpush3.bf16.msra.mxu1 %v8950_v40 }
 0x135   :  { %v780_v18 = vpop.f32.mrb[17].mxu0  ;;  %v1004_v29 = vadd.f32 %v9950_v8, %v778_v39  ;;  %7755 = vmatprep.subr.bf16.mxu1 %v8951_v60  ;;  %v8953_v8 = vld [vmem:[%s12798_s2 + $0x38] sm:$0xff]  }
 0x136   :  { %v781_v47 = vpop.f32.mrb[18].mxu0 }
 0x137   :  { %v783_v16 = vpop.f32.mrb[19].mxu0  ;;  %v1007_v1 = vadd.f32 %v9954_v15, %v781_v47  ;;  %v10026_v47 = vpop.f32.mrb[32].mxu1 }
 0x138   :  { %7756 = vmatpush3.bf16.msra.mxu1 %v8951_v60  ;;  %v10028_v60 = vpop.f32.mrb[33].mxu1 }
 0x139   :  { %v1166_v40 = vpack.c.bf16 %v1007_v1, %v1004_v29  ;;  %7757 = vmatprep.subr.bf16.mxu1 %v8952_v2  ;;  %v10031_v25 = vpop.f32.mrb[34].mxu1 }
 0x13a   :  { %v10033_v24 = vpop.f32.mrb[35].mxu1 }
 0x13b   :  { %7705 = vmatprep.mubr.bf16.mxu1 %v1166_v40  ;;  %1758 = vmatpush1.bf16.msra.mxu0 %v1166_v40 }
 0x13c   :  { %v786_v39 = vpop.f32.mrb[20].mxu0  ;;  %1759 = vmatprep.subr.bf16.mxu0 %v12939_v36  ;;  %7758 = vmatpush3.bf16.msra.mxu1 %v8952_v2 }
 0x13d   :  { %v1012_v18 = vadd.f32 %v9948_v7, %v786_v39  ;;  %v788_v15 = vpop.f32.mrb[21].mxu0  ;;  %7759 = vmatprep.subr.bf16.mxu1 %v8953_v8 }
 0x13e   :  { %v789_v16 = vpop.f32.mrb[22].mxu0  ;;  %v10037_v15 = vpop.f32.mrb[36].mxu1 }
 0x13f   :  { %v1015_v29 = vadd.f32 %v9952_v11, %v789_v16  ;;  %v791_v1 = vpop.f32.mrb[23].mxu0  ;;  %v10039_v22 = vpop.f32.mrb[37].mxu1 }
 0x140   :  { %7760 = vmatpush3.bf16.msra.mxu1 %v8953_v8  ;;  %v10042_v1 = vpop.f32.mrb[38].mxu1 }
 0x141   :  { %v1167_v40 = vpack.c.bf16 %v1015_v29, %v1012_v18  ;;  %v10044_v8 = vpop.f32.mrb[39].mxu1 }
 0x143   :  { %7706 = vmatmul.mubr.bf16.gmra.mrb[56].mxu1 %v1167_v40  ;;  %1760 = vmatpush1.bf16.msra.mxu0 %v1167_v40 }
 0x144   :  { %v794_v2 = vpop.f32.mrb[24].mxu0  ;;  %1761 = vmatprep.subr.bf16.mxu0 %v12939_v36 }
 0x145   :  { %v796_v7 = vpop.f32.mrb[25].mxu0  ;;  %v1020_v39 = vadd.f32 %v9958_v51, %v794_v2 }
 0x146   :  { %v797_v23 = vpop.f32.mrb[26].mxu0  ;;  %v10048_v2 = vpop.f32.mrb[40].mxu1 }
 0x147   :  { %v799_v11 = vpop.f32.mrb[27].mxu0  ;;  %v1023_v16 = vadd.f32 %v9962_v43, %v797_v23  ;;  %v10050_v21 = vpop.f32.mrb[41].mxu1 }
 0x148   :  { %v10053_v11 = vpop.f32.mrb[42].mxu1 }
 0x149   :  { %v1168_v18 = vpack.c.bf16 %v1023_v16, %v1020_v39  ;;  %v10055_v19 = vpop.f32.mrb[43].mxu1 }
 0x14b   :  { %7709 = vmatprep.mubr.bf16.mxu1 %v1168_v18  ;;  %1762 = vmatpush1.bf16.msra.mxu0 %v1168_v18 }
 0x14c   :  { %v802_v29 = vpop.f32.mrb[28].mxu0  ;;  %1763 = vmatprep.subr.bf16.mxu0 %v12939_v36 }
 0x14d   :  { %v1028_v51 = vadd.f32 %v9956_v0, %v802_v29  ;;  %v804_v40 = vpop.f32.mrb[29].mxu0 }
 0x14e   :  { %v805_v7 = vpop.f32.mrb[30].mxu0  ;;  %v10059_v29 = vpop.f32.mrb[44].mxu1 }
 0x14f   :  { %v1031_v23 = vadd.f32 %v9960_v44, %v805_v7  ;;  %v807_v43 = vpop.f32.mrb[31].mxu0  ;;  %v10061_v17 = vpop.f32.mrb[45].mxu1 }
 0x150   :  { %v10064_v43 = vpop.f32.mrb[46].mxu1 }
 0x151   :  { %v1169_v39 = vpack.c.bf16 %v1031_v23, %v1028_v51  ;;  %v10066_v14 = vpop.f32.mrb[47].mxu1 }
 0x153   :  { %7710 = vmatmul.mubr.bf16.gmra.mrb[60].mxu1 %v1169_v39  ;;  %1764 = vmatpush1.bf16.msra.mxu0 %v1169_v39 }
 0x154   :  { %v810_v16 = vpop.f32.mrb[32].mxu0  ;;  %1765 = vmatprep.subr.bf16.mxu0 %v12939_v36 }
 0x155   :  { %v812_v0 = vpop.f32.mrb[33].mxu0  ;;  %v1036_v18 = vadd.f32 %v9967_v32, %v810_v16 }
 0x156   :  { %v813_v40 = vpop.f32.mrb[34].mxu0 }
 0x157   :  { %v815_v44 = vpop.f32.mrb[35].mxu0  ;;  %v1039_v7 = vadd.f32 %v9971_v63, %v813_v40 }
 0x159   :  { %v1170_v51 = vpack.c.bf16 %v1039_v7, %v1036_v18 }
 0x15b   :  { %7713 = vmatprep.mubr.bf16.mxu1 %v1170_v51  ;;  %1766 = vmatpush1.bf16.msra.mxu0 %v1170_v51 }
 0x15c   :  { %v818_v23 = vpop.f32.mrb[36].mxu0  ;;  %1767 = vmatprep.subr.bf16.mxu0 %v12939_v36 }
 0x15d   :  { %v1044_v32 = vadd.f32 %v9965_v59, %v818_v23  ;;  %v820_v39 = vpop.f32.mrb[37].mxu0 }
 0x15e   :  { %v821_v16 = vpop.f32.mrb[38].mxu0 }
 0x15f   :  { %v1047_v0 = vadd.f32 %v9969_v52, %v821_v16  ;;  %v823_v13 = vpop.f32.mrb[39].mxu0 }
 0x161   :  { %v1171_v44 = vpack.c.bf16 %v1047_v0, %v1044_v32 }
 0x163   :  { %7714 = vmatmul.mubr.bf16.gmra.mrb[64].mxu1 %v1171_v44  ;;  %1768 = vmatpush1.bf16.msra.mxu0 %v1171_v44 }
 0x164   :  { %v826_v63 = vpop.f32.mrb[40].mxu0  ;;  %1769 = vmatprep.subr.bf16.mxu0 %v12939_v36 }
 0x165   :  { %v828_v40 = vpop.f32.mrb[41].mxu0  ;;  %v1052_v18 = vadd.f32 %v9982_v35, %v826_v63 }
 0x166   :  { %v829_v7 = vpop.f32.mrb[42].mxu0 }
 0x167   :  { %v831_v51 = vpop.f32.mrb[43].mxu0  ;;  %v1055_v12 = vadd.f32 %v9986_v30, %v829_v7 }
 0x169   :  { %v1172_v10 = vpack.c.bf16 %v1055_v12, %v1052_v18 }
 0x16b   :  { %7717 = vmatprep.mubr.bf16.mxu1 %v1172_v10  ;;  %1770 = vmatpush1.bf16.msra.mxu0 %v1172_v10 }
 0x16c   :  { %v834_v59 = vpop.f32.mrb[44].mxu0  ;;  %1771 = vmatprep.subr.bf16.mxu0 %v12939_v36 }
 0x16d   :  { %v1060_v13 = vadd.f32 %v9977_v20, %v834_v59  ;;  %v836_v52 = vpop.f32.mrb[45].mxu0 }
 0x16e   :  { %v837_v23 = vpop.f32.mrb[46].mxu0 }
 0x16f   :  { %v1063_v32 = vadd.f32 %v9984_v48, %v837_v23  ;;  %v839_v39 = vpop.f32.mrb[47].mxu0 }
 0x171   :  { %v1173_v16 = vpack.c.bf16 %v1063_v32, %v1060_v13 }
 0x173   :  { %7718 = vmatmul.mubr.bf16.gmra.mrb[68].mxu1 %v1173_v16  ;;  %1772 = vmatpush1.bf16.msra.mxu0 %v1173_v16 }
 0x174   :  { %v842_v35 = vpop.f32.mrb[48].mxu0  ;;  %1773 = vmatprep.subr.bf16.mxu0 %v12939_v36 }
 0x175   :  { %v844_v30 = vpop.f32.mrb[49].mxu0  ;;  %v1068_v12 = vadd.f32 %v9997_v31, %v842_v35 }
 0x176   :  { %v845_v10 = vpop.f32.mrb[50].mxu0 }
 0x177   :  { %v847_v0 = vpop.f32.mrb[51].mxu0  ;;  %v1071_v44 = vadd.f32 %v10002_v28, %v845_v10 }
 0x179   :  { %v1174_v63 = vpack.c.bf16 %v1071_v44, %v1068_v12 }
 0x17b   :  { %7721 = vmatprep.mubr.bf16.mxu1 %v1174_v63  ;;  %1774 = vmatpush1.bf16.msra.mxu0 %v1174_v63 }
 0x17c   :  { %v850_v20 = vpop.f32.mrb[52].mxu0  ;;  %1775 = vmatprep.subr.bf16.mxu0 %v12939_v36 }
 0x17d   :  { %v1076_v48 = vadd.f32 %v9992_v6, %v850_v20  ;;  %v852_v40 = vpop.f32.mrb[53].mxu0 }
 0x17e   :  { %v853_v18 = vpop.f32.mrb[54].mxu0 }
 0x17f   :  { %v1079_v7 = vadd.f32 %v10000_v55, %v853_v18  ;;  %v855_v51 = vpop.f32.mrb[55].mxu0 }
 0x181   :  { %v1175_v59 = vpack.c.bf16 %v1079_v7, %v1076_v48 }
 0x183   :  { %7722 = vmatmul.mubr.bf16.gmra.mrb[72].mxu1 %v1175_v59  ;;  %1776 = vmatpush1.bf16.msra.mxu0 %v1175_v59 }
 0x184   :  { %v858_v31 = vpop.f32.mrb[56].mxu0  ;;  %1777 = vmatprep.subr.bf16.mxu0 %v12939_v36 }
 0x185   :  { %v860_v28 = vpop.f32.mrb[57].mxu0  ;;  %v1084_v13 = vadd.f32 %v10014_v56, %v858_v31 }
 0x186   :  { %v861_v52 = vpop.f32.mrb[58].mxu0 }
 0x187   :  { %v863_v23 = vpop.f32.mrb[59].mxu0  ;;  %v1087_v32 = vadd.f32 %v10019_v26, %v861_v52 }
 0x189   :  { %v1176_v39 = vpack.c.bf16 %v1087_v32, %v1084_v13 }
 0x18b   :  { %7725 = vmatprep.mubr.bf16.mxu1 %v1176_v39  ;;  %1778 = vmatpush1.bf16.msra.mxu0 %v1176_v39 }
 0x18c   :  { %v866_v6 = vpop.f32.mrb[60].mxu0  ;;  %1779 = vmatprep.subr.bf16.mxu0 %v12939_v36 }
 0x18d   :  { %v1092_v55 = vadd.f32 %v10009_v4, %v866_v6  ;;  %v868_v16 = vpop.f32.mrb[61].mxu0 }
 0x18e   :  { %v869_v35 = vpop.f32.mrb[62].mxu0 }
 0x18f   :  { %v1095_v30 = vadd.f32 %v10017_v27, %v869_v35  ;;  %v871_v12 = vpop.f32.mrb[63].mxu0 }
 0x191   :  { %v1177_v10 = vpack.c.bf16 %v1095_v30, %v1092_v55 }
 0x193   :  { %7726 = vmatmul.mubr.bf16.gmra.mrb[76].mxu1 %v1177_v10  ;;  %1780 = vmatpush1.bf16.msra.mxu0 %v1177_v10 }
 0x194   :  { %v874_v56 = vpop.f32.mrb[64].mxu0  ;;  %2561 = vmatprep.subr.bf16.mxu0 %v12939_v36 }
 0x195   :  { %v1100_v26 = vadd.f32 %v10028_v60, %v874_v56  ;;  %v876_v0 = vpop.f32.mrb[65].mxu0 }
 0x196   :  { %v877_v44 = vpop.f32.mrb[66].mxu0  ;;  %1782 = vmatmul.mubr.bf16.vlgmr.msra.gmra.mrb[96].mxu0 %v9587_v33  ;;  %v9200_v0 = vld [vmem:[%s12796_s1 + $0x30] sm:$0xff]  }
 0x197   :  { %v1103_v63 = vadd.f32 %v10033_v24, %v877_v44  ;;  %v879_v4 = vpop.f32.mrb[67].mxu0  ;;  %1789 = vmatprep.mubr.bf16.mxu0 %v9592_v34  ;;  %v12943_v44 = vld [vmem:[#allocation5_spill] sm:$0xff] }
 0x198   :  { %v9201_v4 = vld [vmem:[%s12796_s1 + $0x38] sm:$0xff]  }
 0x199   :  { %v10094_v20 = vpack.c.bf16 %v1103_v63, %v1100_v26  ;;  %v12944_v63 = vld [vmem:[#allocation6_spill] sm:$0xff] }
 0x19b   :  { %7729 = vmatprep.mubr.bf16.mxu1 %v10094_v20  ;;  %7809 = vmatprep.subr.bf16.mxu1 %v10094_v20 }
 0x19c   :  { %v882_v27 = vpop.f32.mrb[68].mxu0 }
 0x19d   :  { %v1108_v48 = vadd.f32 %v10026_v47, %v882_v27  ;;  %v884_v40 = vpop.f32.mrb[69].mxu0  ;;  %v12945_v27 = vld [vmem:[#allocation7_spill] sm:$0xff] }
 0x19e   :  { %v885_v60 = vpop.f32.mrb[70].mxu0  ;;  %1790 = vmatmul.mubr.bf16.gmra.mrb[100].mxu0 %v9606_v37  ;;  %v9203_v40 = vld [vmem:[%s12796_s1 + $0x48] sm:$0xff]  }
 0x19f   :  { %v1111_v33 = vadd.f32 %v10031_v25, %v885_v60  ;;  %v887_v18 = vpop.f32.mrb[71].mxu0  ;;  %1797 = vmatprep.mubr.bf16.mxu0 %v9611_v38  ;;  %v9204_v60 = vld [vmem:[%s12796_s1 + $0x50] sm:$0xff]  }
 0x1a0   :  { %v12948_v18 = vld [vmem:[#allocation10_spill] sm:$0xff] }
 0x1a1   :  { %v10102_v24 = vpack.c.bf16 %v1111_v33, %v1108_v48  ;;  %v12946_v48 = vld [vmem:[#allocation8_spill] sm:$0xff]  ;;  %v12947_v33 = vld [vmem:[#allocation9_spill] sm:$0xff] }
 0x1a3   :  { %7730 = vmatmul.mubr.bf16.gmra.mrb[80].mxu1 %v10102_v24 }
 0x1a4   :  { %v890_v34 = vpop.f32.mrb[72].mxu0 }
 0x1a5   :  { %v1116_v7 = vadd.f32 %v10039_v22, %v890_v34  ;;  %v892_v51 = vpop.f32.mrb[73].mxu0  ;;  %v9206_v34 = vld [vmem:[%s12796_s1 + $0x60] sm:$0xff]  }
 0x1a6   :  { %v893_v59 = vpop.f32.mrb[74].mxu0  ;;  %1798 = vmatmul.mubr.bf16.gmra.mrb[104].mxu0 %v9624_v41  ;;  %v12950_v51 = vld [vmem:[#allocation12_spill] sm:$0xff] }
 0x1a7   :  { %v1119_v47 = vadd.f32 %v10044_v8, %v893_v59  ;;  %v895_v31 = vpop.f32.mrb[75].mxu0  ;;  %1805 = vmatprep.mubr.bf16.mxu0 %v9629_v42  ;;  %v9207_v59 = vld [vmem:[%s12796_s1 + $0x68] sm:$0xff]  }
 0x1a8   :  { %v12951_v31 = vld [vmem:[#allocation13_spill] sm:$0xff] }
 0x1a9   :  { %v10109_v37 = vpack.c.bf16 %v1119_v47, %v1116_v7  ;;  %v12949_v7 = vld [vmem:[#allocation11_spill] sm:$0xff]  ;;  %v9208_v47 = vld [vmem:[%s12796_s1 + $0x70] sm:$0xff]  }
 0x1ab   :  { %7733 = vmatprep.mubr.bf16.mxu1 %v10109_v37 }
 0x1ac   :  { %v898_v38 = vpop.f32.mrb[76].mxu0 }
 0x1ad   :  { %v1124_v25 = vadd.f32 %v10037_v15, %v898_v38  ;;  %v900_v28 = vpop.f32.mrb[77].mxu0  ;;  %v9209_v38 = vld [vmem:[%s12796_s1 + $0x78] sm:$0xff]  }
 0x1ae   :  { %v901_v13 = vpop.f32.mrb[78].mxu0  ;;  %1806 = vmatmul.mubr.bf16.gmra.mrb[108].mxu0 %v9642_v45  ;;  %v8954_v28 = vld [vmem:[%s12798_s2 + $0x80] sm:$0xff]  }
 0x1af   :  { %v1127_v22 = vadd.f32 %v10042_v1, %v901_v13  ;;  %v903_v52 = vpop.f32.mrb[79].mxu0  ;;  %1813 = vmatprep.mubr.bf16.mxu0 %v9647_v46  ;;  %v12953_v13 = vld [vmem:[#allocation15_spill] sm:$0xff] }
 0x1b0   :  { %v9211_v52 = vld [vmem:[%s12796_s1 + $0x88] sm:$0xff]  }
 0x1b1   :  { %v10116_v41 = vpack.c.bf16 %v1127_v22, %v1124_v25  ;;  %v9210_v25 = vld [vmem:[%s12796_s1 + $0x80] sm:$0xff]   ;;  %v12954_v22 = vld [vmem:[#allocation16_spill] sm:$0xff] }
 0x1b3   :  { %7734 = vmatmul.mubr.bf16.gmra.mrb[84].mxu1 %v10116_v41 }
 0x1b4   :  { %v906_v42 = vpop.f32.mrb[80].mxu0 }
 0x1b5   :  { %v1132_v8 = vadd.f32 %v10050_v21, %v906_v42  ;;  %v908_v23 = vpop.f32.mrb[81].mxu0  ;;  %v12955_v42 = vld [vmem:[#allocation17_spill] sm:$0xff] }
 0x1b6   :  { %v909_v32 = vpop.f32.mrb[82].mxu0  ;;  %1814 = vmatmul.mubr.bf16.gmra.mrb[112].mxu0 %v9660_v49  ;;  %v9213_v23 = vld [vmem:[%s12796_s1 + $0x98] sm:$0xff]  }
 0x1b7   :  { %v1135_v15 = vadd.f32 %v10055_v19, %v909_v32  ;;  %v911_v39 = vpop.f32.mrb[83].mxu0  ;;  %1821 = vmatprep.mubr.bf16.mxu0 %v9665_v50  ;;  %v9214_v32 = vld [vmem:[%s12796_s1 + $0xa0] sm:$0xff]  }
 0x1b8   :  { %v12958_v39 = vld [vmem:[#allocation20_spill] sm:$0xff] }
 0x1b9   :  { %v1182_v45 = vpack.c.bf16 %v1135_v15, %v1132_v8  ;;  %v12956_v8 = vld [vmem:[#allocation18_spill] sm:$0xff]  ;;  %v12957_v15 = vld [vmem:[#allocation19_spill] sm:$0xff] }
 0x1bb   :  { %7737 = vmatprep.mubr.bf16.mxu1 %v1182_v45 }
 0x1bc   :  { %v914_v1 = vpop.f32.mrb[84].mxu0 }
 0x1bd   :  { %v1140_v46 = vadd.f32 %v10048_v2, %v914_v1  ;;  %v916_v6 = vpop.f32.mrb[85].mxu0  ;;  %v9216_v1 = vld [vmem:[%s12796_s1 + $0xb0] sm:$0xff]  }
 0x1be   :  { %v917_v55 = vpop.f32.mrb[86].mxu0  ;;  %1822 = vmatmul.mubr.bf16.gmra.mrb[116].mxu0 %v9678_v53  ;;  %v12960_v6 = vld [vmem:[#allocation22_spill] sm:$0xff] }
 0x1bf   :  { %v1143_v21 = vadd.f32 %v10053_v11, %v917_v55  ;;  %v919_v16 = vpop.f32.mrb[87].mxu0  ;;  %1829 = vmatprep.mubr.bf16.mxu0 %v9683_v54  ;;  %v9217_v55 = vld [vmem:[%s12796_s1 + $0xb8] sm:$0xff]  }
 0x1c0   :  { %v12961_v16 = vld [vmem:[#allocation23_spill] sm:$0xff] }
 0x1c1   :  { %v1183_v49 = vpack.c.bf16 %v1143_v21, %v1140_v46  ;;  %v12959_v46 = vld [vmem:[#allocation21_spill] sm:$0xff]  ;;  %v10244_v21 = vld [vmem:[%s12797_s0 + $0x8] ss:$12 sps:$4 sm:$0xff]  }
 0x1c3   :  { %7738 = vmatmul.mubr.bf16.gmra.mrb[88].mxu1 %v1183_v49 }
 0x1c4   :  { %v922_v19 = vpop.f32.mrb[88].mxu0 }
 0x1c5   :  { %v1148_v35 = vadd.f32 %v10061_v17, %v922_v19  ;;  %v924_v50 = vpop.f32.mrb[89].mxu0  ;;  %v8955_v19 = vld [vmem:[%s12798_s2 + $0x88] sm:$0xff]  }
 0x1c6   :  { %v925_v30 = vpop.f32.mrb[90].mxu0  ;;  %1830 = vmatmul.mubr.bf16.gmra.mrb[120].mxu0 %v9696_v57  ;;  %v10261_v50 = vld [vmem:[%s12797_s0 + $0x38] ss:$12 sps:$4 sm:$0xff]  }
 0x1c7   :  { %v1151_v2 = vadd.f32 %v10066_v14, %v925_v30  ;;  %v927_v12 = vpop.f32.mrb[91].mxu0  ;;  %1837 = vmatprep.mubr.bf16.mxu0 %v9701_v58  ;;  %v9194_v58 = vld [vmem:[%s12796_s1] sm:$0xff]   ;;  %v8956_v30 = vld [vmem:[%s12798_s2 + $0x90] sm:$0xff]  }
 0x1c8   :  { %v12940_v14 = vld [vmem:[#allocation2_spill] sm:$0xff] }
 0x1c9   :  { %v1184_v53 = vpack.c.bf16 %v1151_v2, %v1148_v35  ;;  %v10255_v35 = vld [vmem:[%s12797_s0 + $0x20] ss:$12 sps:$4 sm:$0xff]   ;;  %v12963_v2 = vld [vmem:[#allocation25_spill] sm:$0xff] }
 0x1ca   :  { %v12964_v12 = vld [vmem:[#allocation26_spill] sm:$0xff] }
 0x1cb   :  { %7741 = vmatprep.mubr.bf16.mxu1 %v1184_v53 }
 0x1cc   :  { %v930_v11 = vpop.f32.mrb[92].mxu0 }
 0x1cd   :  { %v1156_v10 = vadd.f32 %v10059_v29, %v930_v11  ;;  %v932_v54 = vpop.f32.mrb[93].mxu0  ;;  %v12942_v29 = vld [vmem:[#allocation4_spill] sm:$0xff] }
 0x1ce   :  { %v933_v56 = vpop.f32.mrb[94].mxu0  ;;  %1838 = vmatmul.mubr.bf16.gmra.mrb[124].mxu0 %v9714_v61  ;;  %v9195_v61 = vld [vmem:[%s12796_s1 + $0x8] sm:$0xff]   ;;  %v10275_v11 = vld [vmem:[%s12797_s0 + $0x50] ss:$12 sps:$4 sm:$0xff]   ;;  %v8958_v54 = vld [vmem:[%s12798_s2 + $0xa0] sm:$0xff]  }
 0x1cf   :  { %v1159_v17 = vadd.f32 %v10064_v43, %v933_v56  ;;  %v935_v26 = vpop.f32.mrb[95].mxu0  ;;  %1845 = vmatprep.mubr.bf16.mxu0 %v9719_v62  ;;  %v9196_v62 = vld [vmem:[%s12796_s1 + $0x10] sm:$0xff]   ;;  %v9199_v43 = vld [vmem:[%s12796_s1 + $0x28] sm:$0xff]  }
 0x1d0   :  { %v12965_v56 = vld [vmem:[#allocation27_spill] sm:$0xff] }
 0x1d1   :  { %v1185_v57 = vpack.c.bf16 %v1159_v17, %v1156_v10  ;;  %v10281_v10 = vld [vmem:[%s12797_s0 + $0x68] ss:$12 sps:$4 sm:$0xff]  }
 0x1d2   :  { %v12966_v17 = vld [vmem:[#allocation28_spill] sm:$0xff]  ;;  %v8959_v26 = vld [vmem:[%s12798_s2 + $0xa8] sm:$0xff]  }
 0x1d3   :  { %7742 = vmatmul.mubr.bf16.gmra.mrb[92].mxu1 %v1185_v57 }
 0x1d4   :  { %7761 = vmatprep.mubr.bf16.mxu1 %v9194_v58  ;;  %v10301_v58 = vld [vmem:[%s12797_s0 + $0x98] ss:$12 sps:$4 sm:$0xff]  }
 0x1d5   :  { %12967 = vst [vmem:[#allocation2_spill] sm:$0xff] %v10301_v58 }
 0x1d6   :  { %1846 = vmatmul.mubr.bf16.gmra.mrb[128].mxu0 %v9735_v3  ;;  %v9197_v3 = vld [vmem:[%s12796_s1 + $0x18] sm:$0xff]  }
 0x1d7   :  { %1853 = vmatprep.mubr.bf16.mxu0 %v9743_v5  ;;  %v9198_v5 = vld [vmem:[%s12796_s1 + $0x20] sm:$0xff]  }
 0x1db   :  { %7762 = vmatmul.mubr.bf16.vlgmr.msra.gmra.mrb[48].mxu1 %v9195_v61  ;;  %v12968_v61 = vld [vmem:[#allocation29_spill] sm:$0xff] }
 0x1dc   :  { %7810 = vmatpush3.bf16.msra.mxu1 %v10094_v20  ;;  %7765 = vmatprep.mubr.bf16.mxu1 %v9196_v62  ;;  %v9202_v20 = vld [vmem:[%s12796_s1 + $0x40] sm:$0xff]  }
 0x1dd   :  { %7811 = vmatprep.subr.bf16.mxu1 %v10102_v24  ;;  %v10308_v62 = vld [vmem:[%s12797_s0 + $0x4] ss:$12 sps:$4 sm:$0xff]  }
 0x1de   :  { %1854 = vmatmul.mubr.bf16.gmra.mrb[132].mxu0 %v9759_v9  ;;  %v12941_v9 = vld [vmem:[#allocation3_spill] sm:$0xff] }
 0x1df   :  { %1861 = vmatprep.mubr.bf16.mxu0 %v12940_v14  ;;  %12969 = vst [vmem:[#allocation3_spill] sm:$0xff] %v10308_v62  ;;  %v10314_v14 = vld [vmem:[%s12797_s0 + $0xb0] ss:$12 sps:$4 sm:$0xff]  }
 0x1e0   :  { %7812 = vmatpush3.bf16.msra.mxu1 %v10102_v24  ;;  %v9205_v24 = vld [vmem:[%s12796_s1 + $0x58] sm:$0xff]   ;;  %12970 = vst [vmem:[#allocation4_spill] sm:$0xff] %v10314_v14 }
 0x1e1   :  { %7813 = vmatprep.subr.bf16.mxu1 %v10109_v37 }
 0x1e3   :  { %7766 = vmatmul.mubr.bf16.gmra.mrb[52].mxu1 %v9197_v3  ;;  %v10320_v3 = vld [vmem:[%s12797_s0 + $0xc8] ss:$12 sps:$4 sm:$0xff]  }
 0x1e4   :  { %7814 = vmatpush3.bf16.msra.mxu1 %v10109_v37  ;;  %7769 = vmatprep.mubr.bf16.mxu1 %v9198_v5  ;;  %v12952_v37 = vld [vmem:[#allocation14_spill] sm:$0xff]  ;;  %12971 = vst [vmem:[#allocation5_spill] sm:$0xff] %v10320_v3 }
 0x1e5   :  { %7815 = vmatprep.subr.bf16.mxu1 %v10116_v41  ;;  %v10326_v5 = vld [vmem:[%s12797_s0 + $0xe0] ss:$12 sps:$4 sm:$0xff]  }
 0x1e6   :  { %1862 = vmatmul.mubr.bf16.gmra.mrb[136].mxu0 %v12941_v9  ;;  %12972 = vst [vmem:[#allocation6_spill] sm:$0xff] %v10326_v5  ;;  %v10332_v9 = vld [vmem:[%s12797_s0 + $0xf8] ss:$12 sps:$4 sm:$0xff]  }
 0x1e7   :  { %1869 = vmatprep.mubr.bf16.mxu0 %v12942_v29  ;;  %12973 = vst [vmem:[#allocation7_spill] sm:$0xff] %v10332_v9  ;;  %v10338_v29 = vld [vmem:[%s12797_s0 + $0x110] ss:$12 sps:$4 sm:$0xff]  }
 0x1e8   :  { %7816 = vmatpush3.bf16.msra.mxu1 %v10116_v41  ;;  %v9212_v41 = vld [vmem:[%s12796_s1 + $0x90] sm:$0xff]   ;;  %12974 = vst [vmem:[#allocation8_spill] sm:$0xff] %v10338_v29 }
 0x1e9   :  { %7817 = vmatprep.subr.bf16.mxu1 %v1182_v45 }
 0x1eb   :  { %7770 = vmatmul.mubr.bf16.gmra.mrb[56].mxu1 %v9199_v43  ;;  %v10344_v43 = vld [vmem:[%s12797_s0 + $0x128] ss:$12 sps:$4 sm:$0xff]  }
 0x1ec   :  { %7818 = vmatpush3.bf16.msra.mxu1 %v1182_v45  ;;  %7773 = vmatprep.mubr.bf16.mxu1 %v9200_v0  ;;  %v9215_v45 = vld [vmem:[%s12796_s1 + $0xa8] sm:$0xff]   ;;  %12975 = vst [vmem:[#allocation9_spill] sm:$0xff] %v10344_v43 }
 0x1ed   :  { %7819 = vmatprep.subr.bf16.mxu1 %v1183_v49 }
 0x1ee   :  { %1870 = vmatmul.mubr.bf16.gmra.mrb[140].mxu0 %v12943_v44 }
 0x1ef   :  { %1877 = vmatprep.mubr.bf16.mxu0 %v12944_v63  ;;  %v10352_v63 = vld [vmem:[%s12797_s0 + $0x140] ss:$12 sps:$4 sm:$0xff]  }
 0x1f0   :  { %7820 = vmatpush3.bf16.msra.mxu1 %v1183_v49  ;;  %v12962_v49 = vld [vmem:[#allocation24_spill] sm:$0xff]  ;;  %12976 = vst [vmem:[#allocation10_spill] sm:$0xff] %v10352_v63 }
 0x1f1   :  { %7821 = vmatprep.subr.bf16.mxu1 %v1184_v53 }
 0x1f3   :  { %7774 = vmatmul.mubr.bf16.gmra.mrb[60].mxu1 %v9201_v4 }
 0x1f4   :  { %7822 = vmatpush3.bf16.msra.mxu1 %v1184_v53  ;;  %7777 = vmatprep.mubr.bf16.mxu1 %v9202_v20  ;;  %v8957_v53 = vld [vmem:[%s12798_s2 + $0x98] sm:$0xff]  }
 0x1f5   :  { %7823 = vmatprep.subr.bf16.mxu1 %v1185_v57  ;;  %v10360_v20 = vld [vmem:[%s12797_s0 + $0x158] ss:$12 sps:$4 sm:$0xff]  }
 0x1f6   :  { %1878 = vmatmul.mubr.bf16.gmra.mrb[144].mxu0 %v12945_v27  ;;  %12977 = vst [vmem:[#allocation11_spill] sm:$0xff] %v10360_v20 }
 0x1f7   :  { %1885 = vmatprep.mubr.bf16.mxu0 %v12946_v48 }
 0x1f8   :  { %7824 = vmatpush3.bf16.msra.mxu1 %v1185_v57  ;;  %v10295_v57 = vld [vmem:[%s12797_s0 + $0x80] ss:$12 sps:$4 sm:$0xff]  }
 0x1f9   :  { %7873 = vmatprep.subr.bf16.mxu1 %v8954_v28 }
 0x1fb   :  { %7778 = vmatmul.mubr.bf16.gmra.mrb[64].mxu1 %v9203_v40 }
 0x1fc   :  { %7781 = vmatprep.mubr.bf16.mxu1 %v9204_v60  ;;  %v10368_v60 = vld [vmem:[%s12797_s0 + $0x170] ss:$12 sps:$4 sm:$0xff]  }
 0x1fd   :  { %12978 = vst [vmem:[#allocation12_spill] sm:$0xff] %v10368_v60 }
 0x1fe   :  { %1886 = vmatmul.mubr.bf16.gmra.mrb[148].mxu0 %v12947_v33 }
 0x1ff   :  { %1893 = vmatprep.mubr.bf16.mxu0 %v12948_v18  ;;  %v10376_v18 = vld [vmem:[%s12797_s0 + $0x188] ss:$12 sps:$4 sm:$0xff]  }
 0x200   :  { %12979 = vst [vmem:[#allocation13_spill] sm:$0xff] %v10376_v18 }
 0x203   :  { %7782 = vmatmul.mubr.bf16.gmra.mrb[68].mxu1 %v9205_v24 }
 0x204   :  { %7785 = vmatprep.mubr.bf16.mxu1 %v9206_v34 }
 0x206   :  { %1894 = vmatmul.mubr.bf16.gmra.mrb[152].mxu0 %v12949_v7 }
 0x207   :  { %1901 = vmatprep.mubr.bf16.mxu0 %v12950_v51  ;;  %v10384_v51 = vld [vmem:[%s12797_s0 + $0x1a0] ss:$12 sps:$4 sm:$0xff]  }
 0x208   :  { %12980 = vst [vmem:[#allocation14_spill] sm:$0xff] %v10384_v51 }
 0x20b   :  { %7786 = vmatmul.mubr.bf16.gmra.mrb[72].mxu1 %v9207_v59 }
 0x20c   :  { %7789 = vmatprep.mubr.bf16.mxu1 %v9208_v47  ;;  %v10392_v47 = vld [vmem:[%s12797_s0 + $0x1b8] ss:$12 sps:$4 sm:$0xff]  }
 0x20d   :  { %12981 = vst [vmem:[#allocation15_spill] sm:$0xff] %v10392_v47 }
 0x20e   :  { %1902 = vmatmul.mubr.bf16.gmra.mrb[156].mxu0 %v12951_v31 }
 0x20f   :  { %1909 = vmatprep.mubr.bf16.mxu0 %v12952_v37 }
 0x213   :  { %7790 = vmatmul.mubr.bf16.gmra.mrb[76].mxu1 %v9209_v38 }
 0x214   :  { %7793 = vmatprep.mubr.bf16.mxu1 %v9210_v25  ;;  %v10400_v25 = vld [vmem:[%s12797_s0 + $0x1d0] ss:$12 sps:$4 sm:$0xff]  }
 0x215   :  { %12982 = vst [vmem:[#allocation16_spill] sm:$0xff] %v10400_v25 }
 0x216   :  { %1910 = vmatmul.mubr.bf16.gmra.mrb[160].mxu0 %v12953_v13  ;;  %v10408_v13 = vld [vmem:[%s12797_s0 + $0x1e8] ss:$12 sps:$4 sm:$0xff]  }
 0x217   :  { %1917 = vmatprep.mubr.bf16.mxu0 %v12954_v22  ;;  %12983 = vst [vmem:[#allocation17_spill] sm:$0xff] %v10408_v13 }
 0x21b   :  { %7794 = vmatmul.mubr.bf16.gmra.mrb[80].mxu1 %v9211_v52 }
 0x21c   :  { %7797 = vmatprep.mubr.bf16.mxu1 %v9212_v41 }
 0x21e   :  { %1918 = vmatmul.mubr.bf16.gmra.mrb[164].mxu0 %v12955_v42  ;;  %v10416_v42 = vld [vmem:[%s12797_s0 + $0x200] ss:$12 sps:$4 sm:$0xff]  }
 0x21f   :  { %1925 = vmatprep.mubr.bf16.mxu0 %v12956_v8  ;;  %12984 = vst [vmem:[#allocation18_spill] sm:$0xff] %v10416_v42 }
 0x223   :  { %7798 = vmatmul.mubr.bf16.gmra.mrb[84].mxu1 %v9213_v23  ;;  %v10424_v23 = vld [vmem:[%s12797_s0 + $0x218] ss:$12 sps:$4 sm:$0xff]  }
 0x224   :  { %7801 = vmatprep.mubr.bf16.mxu1 %v9214_v32  ;;  %12985 = vst [vmem:[#allocation19_spill] sm:$0xff] %v10424_v23 }
 0x226   :  { %1926 = vmatmul.mubr.bf16.gmra.mrb[168].mxu0 %v12957_v15  ;;  %v8960_v15 = vld [vmem:[%s12798_s2 + $0xb0] sm:$0xff]  }
 0x227   :  { %1933 = vmatprep.mubr.bf16.mxu0 %v12958_v39 }
 0x22b   :  { %7802 = vmatmul.mubr.bf16.gmra.mrb[88].mxu1 %v9215_v45 }
 0x22c   :  { %7805 = vmatprep.mubr.bf16.mxu1 %v9216_v1  ;;  %v8961_v1 = vld [vmem:[%s12798_s2 + $0xb8] sm:$0xff]  }
 0x22e   :  { %1934 = vmatmul.mubr.bf16.gmra.mrb[172].mxu0 %v12959_v46  ;;  %v10438_v46 = vld [vmem:[%s12797_s0 + $0x230] ss:$12 sps:$4 sm:$0xff]  }
 0x22f   :  { %1941 = vmatprep.mubr.bf16.mxu0 %v12960_v6  ;;  %12986 = vst [vmem:[#allocation20_spill] sm:$0xff] %v10438_v46 }
 0x233   :  { %7806 = vmatmul.mubr.bf16.gmra.mrb[92].mxu1 %v9217_v55 }
 0x234   :  { %7825 = vmatprep.mubr.bf16.mxu1 %v10244_v21 }
 0x236   :  { %1942 = vmatmul.mubr.bf16.gmra.mrb[176].mxu0 %v12961_v16 }
 0x237   :  { %1949 = vmatprep.mubr.bf16.mxu0 %v12962_v49 }
 0x23b   :  { %7826 = vmatmul.mubr.bf16.vlgmr.msra.gmra.mrb[96].mxu1 %v10255_v35 }
 0x23c   :  { %7829 = vmatprep.mubr.bf16.mxu1 %v10261_v50  ;;  %7874 = vmatpush3.bf16.msra.mxu1 %v8954_v28 }
 0x23d   :  { %7875 = vmatprep.subr.bf16.mxu1 %v8955_v19 }
 0x23e   :  { %1950 = vmatmul.mubr.bf16.gmra.mrb[180].mxu0 %v12963_v2 }
 0x23f   :  { %1957 = vmatprep.mubr.bf16.mxu0 %v12964_v12 }
 0x240   :  { %7876 = vmatpush3.bf16.msra.mxu1 %v8955_v19 }
 0x241   :  { %7877 = vmatprep.subr.bf16.mxu1 %v8956_v30 }
 0x243   :  { %7830 = vmatmul.mubr.bf16.gmra.mrb[100].mxu1 %v10275_v11 }
 0x244   :  { %7833 = vmatprep.mubr.bf16.mxu1 %v10281_v10  ;;  %7878 = vmatpush3.bf16.msra.mxu1 %v8956_v30 }
 0x245   :  { %7879 = vmatprep.subr.bf16.mxu1 %v8957_v53 }
 0x246   :  { %1958 = vmatmul.mubr.bf16.gmra.mrb[184].mxu0 %v12965_v56 }
 0x247   :  { %1965 = vmatprep.mubr.bf16.mxu0 %v12966_v17 }
 0x248   :  { %7880 = vmatpush3.bf16.msra.mxu1 %v8957_v53 }
 0x249   :  { %7881 = vmatprep.subr.bf16.mxu1 %v8958_v54 }
 0x24b   :  { %7834 = vmatmul.mubr.bf16.gmra.mrb[104].mxu1 %v10295_v57 }
 0x24c   :  { %7837 = vmatprep.mubr.bf16.mxu1 %v10301_v58  ;;  %7882 = vmatpush3.bf16.msra.mxu1 %v8958_v54 }
 0x24d   :  { %7883 = vmatprep.subr.bf16.mxu1 %v8959_v26 }
 0x24e   :  { %1966 = vmatmul.mubr.bf16.gmra.mrb[188].mxu0 %v12968_v61 }
 0x24f   :  { %2593 = vmatprep.mubr.bf16.mxu0 %v10308_v62 }
 0x250   :  { %7884 = vmatpush3.bf16.msra.mxu1 %v8959_v26 }
 0x251   :  { %7885 = vmatprep.subr.bf16.mxu1 %v8960_v15 }
 0x253   :  { %7838 = vmatmul.mubr.bf16.gmra.mrb[108].mxu1 %v10314_v14 }
 0x254   :  { %7841 = vmatprep.mubr.bf16.mxu1 %v10320_v3  ;;  %7886 = vmatpush3.bf16.msra.mxu1 %v8960_v15 }
 0x255   :  { %7887 = vmatprep.subr.bf16.mxu1 %v8961_v1 }
 0x258   :  { %7888 = vmatpush3.bf16.msra.mxu1 %v8961_v1 }
 0x25b   :  { %7842 = vmatmul.mubr.bf16.gmra.mrb[112].mxu1 %v10326_v5 }
 0x25c   :  { %7845 = vmatprep.mubr.bf16.mxu1 %v10332_v9 }
 0x263   :  { %7846 = vmatmul.mubr.bf16.gmra.mrb[116].mxu1 %v10338_v29 }
 0x264   :  { %7849 = vmatprep.mubr.bf16.mxu1 %v10344_v43 }
 0x269   :  { %v10347_v0 = vpop.f32.mrb[96].mxu0 }
 0x26a   :  { %v1785_v44 = vpop.f32.mrb[97].mxu0 }
 0x26b   :  { %7850 = vmatmul.mubr.bf16.gmra.mrb[120].mxu1 %v10352_v63  ;;  %v10355_v4 = vpop.f32.mrb[98].mxu0 }
 0x26c   :  { %7853 = vmatprep.mubr.bf16.mxu1 %v10360_v20  ;;  %v1788_v27 = vpop.f32.mrb[99].mxu0 }
 0x271   :  { %v10363_v48 = vpop.f32.mrb[100].mxu0 }
 0x272   :  { %v1793_v40 = vpop.f32.mrb[101].mxu0 }
 0x273   :  { %7854 = vmatmul.mubr.bf16.gmra.mrb[124].mxu1 %v10368_v60  ;;  %v10371_v33 = vpop.f32.mrb[102].mxu0 }
 0x274   :  { %7857 = vmatprep.mubr.bf16.mxu1 %v10376_v18  ;;  %v1796_v24 = vpop.f32.mrb[103].mxu0 }
 0x279   :  { %v10379_v34 = vpop.f32.mrb[104].mxu0 }
 0x27a   :  { %v1801_v7 = vpop.f32.mrb[105].mxu0 }
 0x27b   :  { %7858 = vmatmul.mubr.bf16.gmra.mrb[128].mxu1 %v10384_v51  ;;  %v10387_v59 = vpop.f32.mrb[106].mxu0 }
 0x27c   :  { %7861 = vmatprep.mubr.bf16.mxu1 %v10392_v47  ;;  %v1804_v31 = vpop.f32.mrb[107].mxu0 }
 0x281   :  { %v10395_v37 = vpop.f32.mrb[108].mxu0 }
 0x282   :  { %v1809_v38 = vpop.f32.mrb[109].mxu0 }
 0x283   :  { %7862 = vmatmul.mubr.bf16.gmra.mrb[132].mxu1 %v10400_v25  ;;  %v10403_v28 = vpop.f32.mrb[110].mxu0 }
 0x284   :  { %7865 = vmatprep.mubr.bf16.mxu1 %v10408_v13  ;;  %v1812_v22 = vpop.f32.mrb[111].mxu0 }
 0x289   :  { %v10411_v52 = vpop.f32.mrb[112].mxu0 }
 0x28a   :  { %v1817_v41 = vpop.f32.mrb[113].mxu0 }
 0x28b   :  { %7866 = vmatmul.mubr.bf16.gmra.mrb[136].mxu1 %v10416_v42  ;;  %v10419_v8 = vpop.f32.mrb[114].mxu0 }
 0x28c   :  { %7869 = vmatprep.mubr.bf16.mxu1 %v10424_v23  ;;  %v1820_v32 = vpop.f32.mrb[115].mxu0 }
 0x291   :  { %v10430_v39 = vpop.f32.mrb[116].mxu0 }
 0x292   :  { %v1825_v45 = vpop.f32.mrb[117].mxu0 }
 0x293   :  { %7870 = vmatmul.mubr.bf16.gmra.mrb[140].mxu1 %v10438_v46  ;;  %v10441_v6 = vpop.f32.mrb[118].mxu0 }
 0x294   :  { %v1828_v55 = vpop.f32.mrb[119].mxu0 }
 0x299   :  { %v10443_v16 = vpop.f32.mrb[120].mxu0 }
 0x29a   :  { %v1833_v49 = vpop.f32.mrb[121].mxu0 }
 0x29b   :  { %v10445_v19 = vpop.f32.mrb[122].mxu0 }
 0x29c   :  { %v1836_v30 = vpop.f32.mrb[123].mxu0 }
 0x2a1   :  { %v10447_v2 = vpop.f32.mrb[124].mxu0 }
 0x2a2   :  { %v1841_v12 = vpop.f32.mrb[125].mxu0 }
 0x2a3   :  { %v10449_v53 = vpop.f32.mrb[126].mxu0 }
 0x2a4   :  { %v1844_v54 = vpop.f32.mrb[127].mxu0 }
 0x2a9   :  { %v10451_v56 = vpop.f32.mrb[128].mxu0 }
 0x2aa   :  { %v1849_v17 = vpop.f32.mrb[129].mxu0 }
 0x2ab   :  { %v10453_v26 = vpop.f32.mrb[130].mxu0 }
 0x2ac   :  { %v1852_v61 = vpop.f32.mrb[131].mxu0 }
 0x2b1   :  { %v10455_v44 = vpop.f32.mrb[132].mxu0 }
 0x2b2   :  { %v1857_v27 = vpop.f32.mrb[133].mxu0 }
 0x2b3   :  { %v10457_v40 = vpop.f32.mrb[134].mxu0 }
 0x2b4   :  { %v1860_v24 = vpop.f32.mrb[135].mxu0 }
 0x2b9   :  { %v10459_v7 = vpop.f32.mrb[136].mxu0 }
 0x2ba   :  { %v1865_v31 = vpop.f32.mrb[137].mxu0 }
 0x2bb   :  { %v10461_v38 = vpop.f32.mrb[138].mxu0 }
 0x2bc   :  { %v1868_v22 = vpop.f32.mrb[139].mxu0 }
 0x2c1   :  { %v10463_v41 = vpop.f32.mrb[140].mxu0 }
 0x2c2   :  { %v1873_v32 = vpop.f32.mrb[141].mxu0 }
 0x2c3   :  { %v10465_v15 = vpop.f32.mrb[142].mxu0 }
 0x2c4   :  { %v1876_v45 = vpop.f32.mrb[143].mxu0 }
 0x2c9   :  { %v10467_v1 = vpop.f32.mrb[144].mxu0 }
 0x2ca   :  { %v1881_v55 = vpop.f32.mrb[145].mxu0 }
 0x2cb   :  { %v10469_v49 = vpop.f32.mrb[146].mxu0 }
 0x2cc   :  { %v1884_v30 = vpop.f32.mrb[147].mxu0 }
 0x2d1   :  { %v10471_v12 = vpop.f32.mrb[148].mxu0 }
 0x2d2   :  { %v1889_v54 = vpop.f32.mrb[149].mxu0 }
 0x2d3   :  { %v10473_v17 = vpop.f32.mrb[150].mxu0 }
 0x2d4   :  { %v1892_v61 = vpop.f32.mrb[151].mxu0 }
 0x2d9   :  { %v10475_v27 = vpop.f32.mrb[152].mxu0 }
 0x2da   :  { %v1897_v24 = vpop.f32.mrb[153].mxu0 }
 0x2db   :  { %v10477_v31 = vpop.f32.mrb[154].mxu0 }
 0x2dc   :  { %v1900_v22 = vpop.f32.mrb[155].mxu0 }
 0x2e1   :  { %v10479_v32 = vpop.f32.mrb[156].mxu0 }
 0x2e2   :  { %v1905_v45 = vpop.f32.mrb[157].mxu0 }
 0x2e3   :  { %v10481_v62 = vpop.f32.mrb[158].mxu0 }
 0x2e4   :  { %v1908_v55 = vpop.f32.mrb[159].mxu0 }
 0x2e9   :  { %v10483_v46 = vpop.f32.mrb[160].mxu0 }
 0x2ea   :  { %v1913_v30 = vpop.f32.mrb[161].mxu0 }
 0x2eb   :  { %v10485_v23 = vpop.f32.mrb[162].mxu0 }
 0x2ec   :  { %v1916_v54 = vpop.f32.mrb[163].mxu0 }
 0x2f1   :  { %v10487_v42 = vpop.f32.mrb[164].mxu0 }
 0x2f2   :  { %v1921_v61 = vpop.f32.mrb[165].mxu0 }
 0x2f3   :  { %v10489_v13 = vpop.f32.mrb[166].mxu0 }
 0x2f4   :  { %v1924_v24 = vpop.f32.mrb[167].mxu0 }
 0x2f9   :  { %v10491_v25 = vpop.f32.mrb[168].mxu0 }
 0x2fa   :  { %v1929_v22 = vpop.f32.mrb[169].mxu0 }
 0x2fb   :  { %v10493_v47 = vpop.f32.mrb[170].mxu0 }
 0x2fc   :  { %v1932_v45 = vpop.f32.mrb[171].mxu0 }
 0x301   :  { %v10495_v51 = vpop.f32.mrb[172].mxu0 }
 0x302   :  { %v1937_v55 = vpop.f32.mrb[173].mxu0 }
 0x303   :  { %v10497_v18 = vpop.f32.mrb[174].mxu0 }
 0x304   :  { %v1940_v30 = vpop.f32.mrb[175].mxu0 }
 0x309   :  { %v10499_v60 = vpop.f32.mrb[176].mxu0 }
 0x30a   :  { %v1945_v54 = vpop.f32.mrb[177].mxu0 }
 0x30b   :  { %v10501_v20 = vpop.f32.mrb[178].mxu0 }
 0x30c   :  { %v1948_v61 = vpop.f32.mrb[179].mxu0 }
 0x30e   :  { %v7827_v63 = vpop.f32.mrb[96].mxu1 }
 0x30f   :  { %v2017_v24 = vadd.f32 %v7827_v63, %v10363_v48  ;;  %v2008_v43 = vpop.f32.mrb[97].mxu1 }
 0x310   :  { %v2009_v22 = vadd.f32 %v2008_v43, %v10347_v0  ;;  %v7828_v29 = vpop.f32.mrb[98].mxu1 }
 0x311   :  { %v2020_v45 = vadd.f32 %v7828_v29, %v10371_v33  ;;  %v2011_v9 = vpop.f32.mrb[99].mxu1  ;;  %v10506_v55 = vpop.f32.mrb[180].mxu0 }
 0x312   :  { %v2012_v30 = vadd.f32 %v2011_v9, %v10355_v4  ;;  %v1953_v5 = vpop.f32.mrb[181].mxu0 }
 0x313   :  { %v2200_v3 = vpack.c.bf16 %v2020_v45, %v2017_v24  ;;  %v10509_v54 = vpop.f32.mrb[182].mxu0 }
 0x314   :  { %v2199_v14 = vpack.c.bf16 %v2012_v30, %v2009_v22  ;;  %v1956_v61 = vpop.f32.mrb[183].mxu0 }
 0x316   :  { %v7831_v58 = vpop.f32.mrb[100].mxu1  ;;  %7889 = vmatprep.mubr.bf16.mxu1 %v2199_v14  ;;  %2562 = vmatpush1.bf16.msra.mxu0 %v2199_v14 }
 0x317   :  { %v2033_v63 = vadd.f32 %v7831_v58, %v10395_v37  ;;  %v2024_v43 = vpop.f32.mrb[101].mxu1  ;;  %7890 = vmatmul.mubr.bf16.vlgmr.msra.gmra.mrb[48].mxu1 %v2200_v3  ;;  %2563 = vmatprep.subr.bf16.mxu0 %v12939_v36 }
 0x318   :  { %v2025_v29 = vadd.f32 %v2024_v43, %v10379_v34  ;;  %v7832_v0 = vpop.f32.mrb[102].mxu1 }
 0x319   :  { %v2036_v9 = vadd.f32 %v7832_v0, %v10403_v28  ;;  %v2027_v5 = vpop.f32.mrb[103].mxu1  ;;  %v10515_v4 = vpop.f32.mrb[184].mxu0 }
 0x31a   :  { %v2028_v48 = vadd.f32 %v2027_v5, %v10387_v59  ;;  %2564 = vmatpush1.bf16.msra.mxu0 %v2200_v3  ;;  %v1961_v33 = vpop.f32.mrb[185].mxu0 }
 0x31b   :  { %2565 = vmatprep.subr.bf16.mxu0 %v12939_v36  ;;  %v2202_v14 = vpack.c.bf16 %v2036_v9, %v2033_v63  ;;  %v10519_v58 = vpop.f32.mrb[186].mxu0 }
 0x31c   :  { %v2201_v37 = vpack.c.bf16 %v2028_v48, %v2025_v29  ;;  %v1964_v24 = vpop.f32.mrb[187].mxu0 }
 0x31e   :  { %v7835_v22 = vpop.f32.mrb[104].mxu1  ;;  %7893 = vmatprep.mubr.bf16.mxu1 %v2201_v37  ;;  %2566 = vmatpush1.bf16.msra.mxu0 %v2201_v37 }
 0x31f   :  { %v2049_v34 = vadd.f32 %v7835_v22, %v10430_v39  ;;  %v2040_v28 = vpop.f32.mrb[105].mxu1  ;;  %7894 = vmatmul.mubr.bf16.gmra.mrb[52].mxu1 %v2202_v14  ;;  %2567 = vmatprep.subr.bf16.mxu0 %v12939_v36 }
 0x320   :  { %v2041_v59 = vadd.f32 %v2040_v28, %v10411_v52  ;;  %v7836_v3 = vpop.f32.mrb[106].mxu1 }
 0x321   :  { %v2052_v45 = vadd.f32 %v7836_v3, %v10441_v6  ;;  %v2043_v30 = vpop.f32.mrb[107].mxu1  ;;  %v10525_v61 = vpop.f32.mrb[188].mxu0 }
 0x322   :  { %v2044_v63 = vadd.f32 %v2043_v30, %v10419_v8  ;;  %2568 = vmatpush1.bf16.msra.mxu0 %v2202_v14  ;;  %v1969_v43 = vpop.f32.mrb[189].mxu0 }
 0x323   :  { %2569 = vmatprep.subr.bf16.mxu0 %v12939_v36  ;;  %v2204_v29 = vpack.c.bf16 %v2052_v45, %v2049_v34  ;;  %v10529_v39 = vpop.f32.mrb[190].mxu0 }
 0x324   :  { %v2203_v0 = vpack.c.bf16 %v2044_v63, %v2041_v59  ;;  %v1972_v9 = vpop.f32.mrb[191].mxu0 }
 0x326   :  { %v7839_v5 = vpop.f32.mrb[108].mxu1  ;;  %7897 = vmatprep.mubr.bf16.mxu1 %v2203_v0  ;;  %2570 = vmatpush1.bf16.msra.mxu0 %v2203_v0 }
 0x327   :  { %v2065_v52 = vadd.f32 %v7839_v5, %v10447_v2  ;;  %v2056_v6 = vpop.f32.mrb[109].mxu1  ;;  %7898 = vmatmul.mubr.bf16.gmra.mrb[56].mxu1 %v2204_v29  ;;  %2571 = vmatprep.subr.bf16.mxu0 %v12939_v36 }
 0x328   :  { %v2057_v8 = vadd.f32 %v2056_v6, %v10443_v16  ;;  %v7840_v48 = vpop.f32.mrb[110].mxu1 }
 0x329   :  { %v2068_v33 = vadd.f32 %v7840_v48, %v10449_v53  ;;  %v2059_v14 = vpop.f32.mrb[111].mxu1 }
 0x32a   :  { %v2060_v37 = vadd.f32 %v2059_v14, %v10445_v19  ;;  %2572 = vmatpush1.bf16.msra.mxu0 %v2204_v29 }
 0x32b   :  { %2573 = vmatprep.subr.bf16.mxu0 %v12939_v36  ;;  %v2206_v24 = vpack.c.bf16 %v2068_v33, %v2065_v52 }
 0x32c   :  { %v2205_v22 = vpack.c.bf16 %v2060_v37, %v2057_v8 }
 0x32e   :  { %v7843_v34 = vpop.f32.mrb[112].mxu1  ;;  %7901 = vmatprep.mubr.bf16.mxu1 %v2205_v22  ;;  %2574 = vmatpush1.bf16.msra.mxu0 %v2205_v22 }
 0x32f   :  { %v2081_v2 = vadd.f32 %v7843_v34, %v10455_v44  ;;  %v2072_v28 = vpop.f32.mrb[113].mxu1  ;;  %7902 = vmatmul.mubr.bf16.gmra.mrb[60].mxu1 %v2206_v24  ;;  %2575 = vmatprep.subr.bf16.mxu0 %v12939_v36 }
 0x330   :  { %v2073_v16 = vadd.f32 %v2072_v28, %v10451_v56  ;;  %v7844_v53 = vpop.f32.mrb[114].mxu1 }
 0x331   :  { %v2084_v59 = vadd.f32 %v7844_v53, %v10457_v40  ;;  %v2075_v19 = vpop.f32.mrb[115].mxu1 }
 0x332   :  { %v2076_v3 = vadd.f32 %v2075_v19, %v10453_v26  ;;  %2576 = vmatpush1.bf16.msra.mxu0 %v2206_v24 }
 0x333   :  { %2577 = vmatprep.subr.bf16.mxu0 %v12939_v36  ;;  %v2208_v45 = vpack.c.bf16 %v2084_v59, %v2081_v2 }
 0x334   :  { %v2207_v30 = vpack.c.bf16 %v2076_v3, %v2073_v16 }
 0x336   :  { %v7847_v63 = vpop.f32.mrb[116].mxu1  ;;  %7905 = vmatprep.mubr.bf16.mxu1 %v2207_v30  ;;  %2578 = vmatpush1.bf16.msra.mxu0 %v2207_v30  ;;  %v9243_v30 = vld [vmem:[%s12797_s0] ss:$12 sps:$4 sm:$0xff]  }
 0x337   :  { %v2097_v44 = vadd.f32 %v7847_v63, %v10463_v41  ;;  %v2088_v43 = vpop.f32.mrb[117].mxu1  ;;  %7906 = vmatmul.mubr.bf16.gmra.mrb[64].mxu1 %v2208_v45  ;;  %2579 = vmatprep.subr.bf16.mxu0 %v12939_v36 }
 0x338   :  { %v2089_v56 = vadd.f32 %v2088_v43, %v10459_v7  ;;  %v7848_v40 = vpop.f32.mrb[118].mxu1 }
 0x339   :  { %v2100_v29 = vadd.f32 %v7848_v40, %v10465_v15  ;;  %v2091_v26 = vpop.f32.mrb[119].mxu1 }
 0x33a   :  { %v2092_v0 = vadd.f32 %v2091_v26, %v10461_v38  ;;  %2580 = vmatpush1.bf16.msra.mxu0 %v2208_v45 }
 0x33b   :  { %2581 = vmatprep.subr.bf16.mxu0 %v12939_v36  ;;  %v2210_v9 = vpack.c.bf16 %v2100_v29, %v2097_v44 }
 0x33c   :  { %v2209_v5 = vpack.c.bf16 %v2092_v0, %v2089_v56 }
 0x33e   :  { %v7851_v52 = vpop.f32.mrb[120].mxu1  ;;  %7909 = vmatprep.mubr.bf16.mxu1 %v2209_v5  ;;  %2582 = vmatpush1.bf16.msra.mxu0 %v2209_v5 }
 0x33f   :  { %v2113_v41 = vadd.f32 %v7851_v52, %v10471_v12  ;;  %v2104_v6 = vpop.f32.mrb[121].mxu1  ;;  %7910 = vmatmul.mubr.bf16.gmra.mrb[68].mxu1 %v2210_v9  ;;  %2583 = vmatprep.subr.bf16.mxu0 %v12939_v36 }
 0x340   :  { %v2105_v7 = vadd.f32 %v2104_v6, %v10467_v1  ;;  %v7852_v15 = vpop.f32.mrb[122].mxu1 }
 0x341   :  { %v2116_v8 = vadd.f32 %v7852_v15, %v10473_v17  ;;  %v2107_v38 = vpop.f32.mrb[123].mxu1 }
 0x342   :  { %v2108_v48 = vadd.f32 %v2107_v38, %v10469_v49  ;;  %2584 = vmatpush1.bf16.msra.mxu0 %v2210_v9 }
 0x343   :  { %2585 = vmatprep.subr.bf16.mxu0 %v12939_v36  ;;  %v2212_v33 = vpack.c.bf16 %v2116_v8, %v2113_v41 }
 0x344   :  { %v2211_v14 = vpack.c.bf16 %v2108_v48, %v2105_v7 }
 0x346   :  { %v7855_v37 = vpop.f32.mrb[124].mxu1  ;;  %7913 = vmatprep.mubr.bf16.mxu1 %v2211_v14  ;;  %2586 = vmatpush1.bf16.msra.mxu0 %v2211_v14 }
 0x347   :  { %v2129_v12 = vadd.f32 %v7855_v37, %v10479_v32  ;;  %v2120_v24 = vpop.f32.mrb[125].mxu1  ;;  %7914 = vmatmul.mubr.bf16.gmra.mrb[72].mxu1 %v2212_v33  ;;  %2587 = vmatprep.subr.bf16.mxu0 %v12939_v36 }
 0x348   :  { %v2121_v1 = vadd.f32 %v2120_v24, %v10475_v27  ;;  %v7856_v17 = vpop.f32.mrb[126].mxu1 }
 0x349   :  { %v2132_v22 = vadd.f32 %v7856_v17, %v10481_v62  ;;  %v2123_v49 = vpop.f32.mrb[127].mxu1  ;;  %v12987_v17 = vld [vmem:[#allocation2_spill] sm:$0xff] }
 0x34a   :  { %v2124_v34 = vadd.f32 %v2123_v49, %v10477_v31  ;;  %2588 = vmatpush1.bf16.msra.mxu0 %v2212_v33  ;;  %v12989_v49 = vld [vmem:[#allocation5_spill] sm:$0xff] }
 0x34b   :  { %2589 = vmatprep.subr.bf16.mxu0 %v12939_v36  ;;  %v2214_v2 = vpack.c.bf16 %v2132_v22, %v2129_v12  ;;  %v12988_v22 = vld [vmem:[#allocation4_spill] sm:$0xff] }
 0x34c   :  { %v2213_v28 = vpack.c.bf16 %v2124_v34, %v2121_v1  ;;  %v9254_v1 = vld [vmem:[%s12797_s0 + $0x94] ss:$12 sps:$4 sm:$0xff]   ;;  %v9260_v34 = vld [vmem:[%s12797_s0 + $0xdc] ss:$12 sps:$4 sm:$0xff]  }
 0x34e   :  { %v7859_v16 = vpop.f32.mrb[128].mxu1  ;;  %7917 = vmatprep.mubr.bf16.mxu1 %v2213_v28  ;;  %2590 = vmatpush1.bf16.msra.mxu0 %v2213_v28  ;;  %v12991_v28 = vld [vmem:[#allocation7_spill] sm:$0xff] }
 0x34f   :  { %v2136_v32 = vpop.f32.mrb[129].mxu1  ;;  %7918 = vmatmul.mubr.bf16.gmra.mrb[76].mxu1 %v2214_v2  ;;  %v2145_v53 = vadd.f32 %v7859_v16, %v10487_v42  ;;  %2591 = vmatprep.subr.bf16.mxu0 %v12939_v36  ;;  %v9261_v16 = vld [vmem:[%s12797_s0 + $0xd8] ss:$12 sps:$4 sm:$0xff]  }
 0x350   :  { %v2137_v27 = vadd.f32 %v2136_v32, %v10483_v46  ;;  %v7860_v62 = vpop.f32.mrb[130].mxu1  ;;  %v9262_v32 = vld [vmem:[%s12797_s0 + $0xf4] ss:$12 sps:$4 sm:$0xff]  }
 0x351   :  { %v2139_v59 = vpop.f32.mrb[131].mxu1  ;;  %v2148_v31 = vadd.f32 %v7860_v62, %v10489_v13  ;;  %v9244_v13 = vld [vmem:[%s12797_s0 + $0x1c] ss:$12 sps:$4 sm:$0xff]  }
 0x352   :  { %v2140_v19 = vadd.f32 %v2139_v59, %v10485_v23  ;;  %2592 = vmatpush1.bf16.msra.mxu0 %v2214_v2  ;;  %v12990_v2 = vld [vmem:[#allocation6_spill] sm:$0xff]  ;;  %v9263_v62 = vld [vmem:[%s12797_s0 + $0xf0] ss:$12 sps:$4 sm:$0xff]   ;;  %v9264_v59 = vld [vmem:[%s12797_s0 + $0x10c] ss:$12 sps:$4 sm:$0xff]  }
 0x353   :  { %v2216_v3 = vpack.c.bf16 %v2148_v31, %v2145_v53  ;;  %3612 = vmatprep.subr.bf16.mxu0 %v12939_v36  ;;  %v12992_v53 = vld [vmem:[#allocation8_spill] sm:$0xff]  ;;  %v12994_v31 = vld [vmem:[#allocation10_spill] sm:$0xff] }
 0x354   :  { %v2215_v45 = vpack.c.bf16 %v2140_v19, %v2137_v27  ;;  %v12993_v27 = vld [vmem:[#allocation9_spill] sm:$0xff]  ;;  %v12995_v19 = vld [vmem:[#allocation11_spill] sm:$0xff] }
 0x355   :  { %2594 = vmatmul.mubr.bf16.vlgmr.msra.gmra.mrb[192].mxu0 %v9243_v30  ;;  %v12996_v30 = vld [vmem:[#allocation12_spill] sm:$0xff] }
 0x356   :  { %v7863_v42 = vpop.f32.mrb[132].mxu1  ;;  %7921 = vmatprep.mubr.bf16.mxu1 %v2215_v45  ;;  %7937 = vmatprep.subr.bf16.mxu1 %v2215_v45 }
 0x357   :  { %v2152_v46 = vpop.f32.mrb[133].mxu1  ;;  %7922 = vmatmul.mubr.bf16.gmra.mrb[80].mxu1 %v2216_v3  ;;  %v2161_v63 = vadd.f32 %v7863_v42, %v10495_v51  ;;  %2601 = vmatprep.mubr.bf16.mxu0 %v9244_v13  ;;  %v9245_v51 = vld [vmem:[%s12797_s0 + $0x18] ss:$12 sps:$4 sm:$0xff]   ;;  %v9267_v13 = vld [vmem:[%s12797_s0 + $0x120] ss:$12 sps:$4 sm:$0xff]  }
 0x358   :  { %v2153_v23 = vadd.f32 %v2152_v46, %v10491_v25  ;;  %7938 = vmatpush3.bf16.msra.mxu1 %v2215_v45  ;;  %v7864_v44 = vpop.f32.mrb[134].mxu1  ;;  %v9266_v45 = vld [vmem:[%s12797_s0 + $0x124] ss:$12 sps:$4 sm:$0xff]   ;;  %v12997_v42 = vld [vmem:[#allocation13_spill] sm:$0xff] }
 0x359   :  { %v2155_v43 = vpop.f32.mrb[135].mxu1  ;;  %7939 = vmatprep.subr.bf16.mxu1 %v2216_v3  ;;  %v2164_v56 = vadd.f32 %v7864_v44, %v10497_v18  ;;  %v9246_v18 = vld [vmem:[%s12797_s0 + $0x34] ss:$12 sps:$4 sm:$0xff]  }
 0x35a   :  { %v2156_v40 = vadd.f32 %v2155_v43, %v10493_v47  ;;  %v8962_v46 = vld [vmem:[%s12798_s2 + $0xc0] sm:$0xff]   ;;  %v12999_v43 = vld [vmem:[#allocation15_spill] sm:$0xff] }
 0x35b   :  { %v2218_v29 = vpack.c.bf16 %v2164_v56, %v2161_v63  ;;  %v8963_v63 = vld [vmem:[%s12798_s2 + $0xc8] sm:$0xff]   ;;  %v12998_v44 = vld [vmem:[#allocation14_spill] sm:$0xff]  ;;  %v8964_v56 = vld [vmem:[%s12798_s2 + $0xd0] sm:$0xff]  }
 0x35c   :  { %7940 = vmatpush3.bf16.msra.mxu1 %v2216_v3  ;;  %v2217_v26 = vpack.c.bf16 %v2156_v40, %v2153_v23  ;;  %v9265_v3 = vld [vmem:[%s12797_s0 + $0x108] ss:$12 sps:$4 sm:$0xff]   ;;  %v8965_v40 = vld [vmem:[%s12798_s2 + $0xd8] sm:$0xff]  }
 0x35d   :  { %2602 = vmatmul.mubr.bf16.gmra.mrb[196].mxu0 %v9245_v51  ;;  %v9268_v23 = vld [vmem:[%s12797_s0 + $0x13c] ss:$12 sps:$4 sm:$0xff]   ;;  %v13000_v51 = vld [vmem:[#allocation16_spill] sm:$0xff] }
 0x35e   :  { %v7867_v0 = vpop.f32.mrb[136].mxu1  ;;  %7925 = vmatprep.mubr.bf16.mxu1 %v2217_v26  ;;  %7941 = vmatprep.subr.bf16.mxu1 %v2217_v26 }
 0x35f   :  { %v2168_v25 = vpop.f32.mrb[137].mxu1  ;;  %7926 = vmatmul.mubr.bf16.gmra.mrb[84].mxu1 %v2218_v29  ;;  %v2177_v9 = vadd.f32 %v7867_v0, %v10506_v55  ;;  %2609 = vmatprep.mubr.bf16.mxu0 %v9246_v18  ;;  %v9247_v55 = vld [vmem:[%s12797_s0 + $0x30] ss:$12 sps:$4 sm:$0xff]  }
 0x360   :  { %v2169_v47 = vadd.f32 %v2168_v25, %v10499_v60  ;;  %v7868_v5 = vpop.f32.mrb[138].mxu1  ;;  %7942 = vmatpush3.bf16.msra.mxu1 %v2217_v26  ;;  %v9270_v26 = vld [vmem:[%s12797_s0 + $0x154] ss:$12 sps:$4 sm:$0xff]   ;;  %v13001_v0 = vld [vmem:[#allocation17_spill] sm:$0xff] }
 0x361   :  { %v2171_v52 = vpop.f32.mrb[139].mxu1  ;;  %v2180_v41 = vadd.f32 %v7868_v5, %v10509_v54  ;;  %7943 = vmatprep.subr.bf16.mxu1 %v2218_v29  ;;  %v9248_v54 = vld [vmem:[%s12797_s0 + $0x4c] ss:$12 sps:$4 sm:$0xff]   ;;  %v8966_v25 = vld [vmem:[%s12798_s2 + $0xe0] sm:$0xff]   ;;  %v9271_v18 = vld [vmem:[%s12797_s0 + $0x150] ss:$12 sps:$4 sm:$0xff]  }
 0x362   :  { %v2172_v6 = vadd.f32 %v2171_v52, %v10501_v20  ;;  %v13002_v5 = vld [vmem:[#allocation18_spill] sm:$0xff]  ;;  %v13003_v52 = vld [vmem:[#allocation19_spill] sm:$0xff] }
 0x363   :  { %v2220_v7 = vpack.c.bf16 %v2180_v41, %v2177_v9  ;;  %v8967_v9 = vld [vmem:[%s12798_s2 + $0xe8] sm:$0xff]   ;;  %v8968_v41 = vld [vmem:[%s12798_s2 + $0xf0] sm:$0xff]  }
 0x364   :  { %7944 = vmatpush3.bf16.msra.mxu1 %v2218_v29  ;;  %v2219_v15 = vpack.c.bf16 %v2172_v6, %v2169_v47  ;;  %v9269_v29 = vld [vmem:[%s12797_s0 + $0x138] ss:$12 sps:$4 sm:$0xff]   ;;  %v9273_v6 = vld [vmem:[%s12797_s0 + $0x168] ss:$12 sps:$4 sm:$0xff]  }
 0x365   :  { %2610 = vmatmul.mubr.bf16.gmra.mrb[200].mxu0 %v9247_v55  ;;  %v9272_v47 = vld [vmem:[%s12797_s0 + $0x16c] ss:$12 sps:$4 sm:$0xff]   ;;  %v13004_v55 = vld [vmem:[#allocation20_spill] sm:$0xff] }
 0x366   :  { %v7871_v8 = vpop.f32.mrb[140].mxu1  ;;  %7929 = vmatprep.mubr.bf16.mxu1 %v2219_v15  ;;  %7945 = vmatprep.subr.bf16.mxu1 %v2219_v15 }
 0x367   :  { %v2184_v60 = vpop.f32.mrb[141].mxu1  ;;  %7930 = vmatmul.mubr.bf16.gmra.mrb[88].mxu1 %v2220_v7  ;;  %v2193_v38 = vadd.f32 %v7871_v8, %v10525_v61  ;;  %2617 = vmatprep.mubr.bf16.mxu0 %v9248_v54  ;;  %v9249_v61 = vld [vmem:[%s12797_s0 + $0x48] ss:$12 sps:$4 sm:$0xff]   ;;  %v9275_v8 = vld [vmem:[%s12797_s0 + $0x180] ss:$12 sps:$4 sm:$0xff]  }
 0x368   :  { %v2185_v20 = vadd.f32 %v2184_v60, %v10515_v4  ;;  %v7872_v48 = vpop.f32.mrb[142].mxu1  ;;  %7946 = vmatpush3.bf16.msra.mxu1 %v2219_v15  ;;  %v9250_v4 = vld [vmem:[%s12797_s0 + $0x64] ss:$12 sps:$4 sm:$0xff]   ;;  %v8969_v15 = vld [vmem:[%s12798_s2 + $0xf8] sm:$0xff]   ;;  %v9278_v54 = vld [vmem:[%s12797_s0 + $0x1b4] ss:$12 sps:$4 sm:$0xff]  }
 0x369   :  { %v2187_v33 = vpop.f32.mrb[143].mxu1  ;;  %v2196_v14 = vadd.f32 %v7872_v48, %v10529_v39  ;;  %7947 = vmatprep.subr.bf16.mxu1 %v2220_v7  ;;  %v9252_v39 = vld [vmem:[%s12797_s0 + $0x7c] ss:$12 sps:$4 sm:$0xff]   ;;  %v9280_v48 = vld [vmem:[%s12797_s0 + $0x1cc] ss:$12 sps:$4 sm:$0xff]  }
 0x36a   :  { %v2188_v37 = vadd.f32 %v2187_v33, %v10519_v58  ;;  %v9251_v58 = vld [vmem:[%s12797_s0 + $0x60] ss:$12 sps:$4 sm:$0xff]   ;;  %v9276_v60 = vld [vmem:[%s12797_s0 + $0x19c] ss:$12 sps:$4 sm:$0xff]  }
 0x36b   :  { %v2222_v12 = vpack.c.bf16 %v2196_v14, %v2193_v38  ;;  %v9277_v38 = vld [vmem:[%s12797_s0 + $0x198] ss:$12 sps:$4 sm:$0xff]   ;;  %v9281_v33 = vld [vmem:[%s12797_s0 + $0x1c8] ss:$12 sps:$4 sm:$0xff]  }
 0x36c   :  { %7948 = vmatpush3.bf16.msra.mxu1 %v2220_v7  ;;  %v2221_v24 = vpack.c.bf16 %v2188_v37, %v2185_v20  ;;  %v9274_v7 = vld [vmem:[%s12797_s0 + $0x184] ss:$12 sps:$4 sm:$0xff]   ;;  %v9283_v37 = vld [vmem:[%s12797_s0 + $0x1e0] ss:$12 sps:$4 sm:$0xff]  }
 0x36d   :  { %2618 = vmatmul.mubr.bf16.gmra.mrb[204].mxu0 %v9249_v61  ;;  %v9279_v20 = vld [vmem:[%s12797_s0 + $0x1b0] ss:$12 sps:$4 sm:$0xff]   ;;  %v9286_v61 = vld [vmem:[%s12797_s0 + $0x214] ss:$12 sps:$4 sm:$0xff]  }
 0x36e   :  { %7933 = vmatprep.mubr.bf16.mxu1 %v2221_v24  ;;  %7949 = vmatprep.subr.bf16.mxu1 %v2221_v24  ;;  %v9282_v14 = vld [vmem:[%s12797_s0 + $0x1e4] ss:$12 sps:$4 sm:$0xff]  }
 0x36f   :  { %7934 = vmatmul.mubr.bf16.gmra.mrb[92].mxu1 %v2222_v12  ;;  %2625 = vmatprep.mubr.bf16.mxu0 %v9250_v4  ;;  %v9287_v4 = vld [vmem:[%s12797_s0 + $0x210] ss:$12 sps:$4 sm:$0xff]  }
 0x370   :  { %7950 = vmatpush3.bf16.msra.mxu1 %v2221_v24  ;;  %7953 = vmatprep.mubr.bf16.mxu1 %v10244_v21  ;;  %v9253_v21 = vld [vmem:[%s12797_s0 + $0x78] ss:$12 sps:$4 sm:$0xff]  }
 0x371   :  { %7951 = vmatprep.subr.bf16.mxu1 %v2222_v12  ;;  %v9285_v24 = vld [vmem:[%s12797_s0 + $0x1f8] ss:$12 sps:$4 sm:$0xff]  }
 0x374   :  { %7952 = vmatpush3.bf16.msra.mxu1 %v2222_v12  ;;  %v9284_v12 = vld [vmem:[%s12797_s0 + $0x1fc] ss:$12 sps:$4 sm:$0xff]  }
 0x375   :  { %2626 = vmatmul.mubr.bf16.gmra.mrb[208].mxu0 %v9251_v58  ;;  %8001 = vmatprep.subr.bf16.mxu1 %v8962_v46  ;;  %v9288_v58 = vld [vmem:[%s12797_s0 + $0x22c] ss:$12 sps:$4 sm:$0xff]  }
 0x376   :  { %2633 = vmatprep.mubr.bf16.mxu0 %v9252_v39  ;;  %v9289_v39 = vld [vmem:[%s12797_s0 + $0x228] ss:$12 sps:$4 sm:$0xff]  }
 0x377   :  { %7954 = vmatmul.mubr.bf16.vlgmr.msra.gmra.mrb[144].mxu1 %v10255_v35  ;;  %v9255_v35 = vld [vmem:[%s12797_s0 + $0x90] ss:$12 sps:$4 sm:$0xff]  }
 0x378   :  { %7957 = vmatprep.mubr.bf16.mxu1 %v10261_v50  ;;  %v9256_v50 = vld [vmem:[%s12797_s0 + $0xac] ss:$12 sps:$4 sm:$0xff]   ;;  %8002 = vmatpush3.bf16.msra.mxu1 %v8962_v46 }
 0x379   :  { %8003 = vmatprep.subr.bf16.mxu1 %v8963_v63 }
 0x37c   :  { %8004 = vmatpush3.bf16.msra.mxu1 %v8963_v63 }
 0x37d   :  { %2634 = vmatmul.mubr.bf16.gmra.mrb[212].mxu0 %v9253_v21  ;;  %8005 = vmatprep.subr.bf16.mxu1 %v8964_v56  ;;  %v13005_v21 = vld [vmem:[#allocation3_spill] sm:$0xff] }
 0x37e   :  { %2641 = vmatprep.mubr.bf16.mxu0 %v9254_v1 }
 0x37f   :  { %7958 = vmatmul.mubr.bf16.gmra.mrb[148].mxu1 %v10275_v11  ;;  %v9257_v11 = vld [vmem:[%s12797_s0 + $0xa8] ss:$12 sps:$4 sm:$0xff]  }
 0x380   :  { %7961 = vmatprep.mubr.bf16.mxu1 %v10281_v10  ;;  %v9258_v10 = vld [vmem:[%s12797_s0 + $0xc4] ss:$12 sps:$4 sm:$0xff]   ;;  %8006 = vmatpush3.bf16.msra.mxu1 %v8964_v56 }
 0x381   :  { %8007 = vmatprep.subr.bf16.mxu1 %v8965_v40 }
 0x384   :  { %8008 = vmatpush3.bf16.msra.mxu1 %v8965_v40 }
 0x385   :  { %2642 = vmatmul.mubr.bf16.gmra.mrb[216].mxu0 %v9255_v35  ;;  %8009 = vmatprep.subr.bf16.mxu1 %v8966_v25 }
 0x386   :  { %2649 = vmatprep.mubr.bf16.mxu0 %v9256_v50 }
 0x387   :  { %7962 = vmatmul.mubr.bf16.gmra.mrb[152].mxu1 %v10295_v57  ;;  %v9259_v57 = vld [vmem:[%s12797_s0 + $0xc0] ss:$12 sps:$4 sm:$0xff]  }
 0x388   :  { %7965 = vmatprep.mubr.bf16.mxu1 %v12987_v17  ;;  %8010 = vmatpush3.bf16.msra.mxu1 %v8966_v25 }
 0x389   :  { %8011 = vmatprep.subr.bf16.mxu1 %v8967_v9 }
 0x38c   :  { %8012 = vmatpush3.bf16.msra.mxu1 %v8967_v9 }
 0x38d   :  { %2650 = vmatmul.mubr.bf16.gmra.mrb[220].mxu0 %v9257_v11  ;;  %8013 = vmatprep.subr.bf16.mxu1 %v8968_v41 }
 0x38e   :  { %2657 = vmatprep.mubr.bf16.mxu0 %v9258_v10 }
 0x38f   :  { %7966 = vmatmul.mubr.bf16.gmra.mrb[156].mxu1 %v12988_v22 }
 0x390   :  { %7969 = vmatprep.mubr.bf16.mxu1 %v12989_v49  ;;  %8014 = vmatpush3.bf16.msra.mxu1 %v8968_v41 }
 0x391   :  { %8015 = vmatprep.subr.bf16.mxu1 %v8969_v15 }
 0x394   :  { %8016 = vmatpush3.bf16.msra.mxu1 %v8969_v15 }
 0x395   :  { %2658 = vmatmul.mubr.bf16.gmra.mrb[224].mxu0 %v9259_v57 }
 0x396   :  { %2665 = vmatprep.mubr.bf16.mxu0 %v9260_v34 }
 0x397   :  { %7970 = vmatmul.mubr.bf16.gmra.mrb[160].mxu1 %v12990_v2 }
 0x398   :  { %7973 = vmatprep.mubr.bf16.mxu1 %v12991_v28 }
 0x39d   :  { %2666 = vmatmul.mubr.bf16.gmra.mrb[228].mxu0 %v9261_v16 }
 0x39e   :  { %2673 = vmatprep.mubr.bf16.mxu0 %v9262_v32 }
 0x39f   :  { %7974 = vmatmul.mubr.bf16.gmra.mrb[164].mxu1 %v12992_v53 }
 0x3a0   :  { %7977 = vmatprep.mubr.bf16.mxu1 %v12993_v27 }
 0x3a5   :  { %2674 = vmatmul.mubr.bf16.gmra.mrb[232].mxu0 %v9263_v62 }
 0x3a6   :  { %2681 = vmatprep.mubr.bf16.mxu0 %v9264_v59 }
 0x3a7   :  { %7978 = vmatmul.mubr.bf16.gmra.mrb[168].mxu1 %v12994_v31 }
 0x3a8   :  { %7981 = vmatprep.mubr.bf16.mxu1 %v12995_v19 }
 0x3ad   :  { %2682 = vmatmul.mubr.bf16.gmra.mrb[236].mxu0 %v9265_v3 }
 0x3ae   :  { %2689 = vmatprep.mubr.bf16.mxu0 %v9266_v45 }
 0x3af   :  { %7982 = vmatmul.mubr.bf16.gmra.mrb[172].mxu1 %v12996_v30 }
 0x3b0   :  { %7985 = vmatprep.mubr.bf16.mxu1 %v12997_v42 }
 0x3b5   :  { %2690 = vmatmul.mubr.bf16.gmra.mrb[240].mxu0 %v9267_v13 }
 0x3b6   :  { %2697 = vmatprep.mubr.bf16.mxu0 %v9268_v23 }
 0x3b7   :  { %7986 = vmatmul.mubr.bf16.gmra.mrb[176].mxu1 %v12998_v44 }
 0x3b8   :  { %7989 = vmatprep.mubr.bf16.mxu1 %v12999_v43 }
 0x3bd   :  { %2698 = vmatmul.mubr.bf16.gmra.mrb[244].mxu0 %v9269_v29 }
 0x3be   :  { %2705 = vmatprep.mubr.bf16.mxu0 %v9270_v26 }
 0x3bf   :  { %7990 = vmatmul.mubr.bf16.gmra.mrb[180].mxu1 %v13000_v51 }
 0x3c0   :  { %7993 = vmatprep.mubr.bf16.mxu1 %v13001_v0 }
 0x3c5   :  { %2706 = vmatmul.mubr.bf16.gmra.mrb[248].mxu0 %v9271_v18 }
 0x3c6   :  { %2713 = vmatprep.mubr.bf16.mxu0 %v9272_v47 }
 0x3c7   :  { %7994 = vmatmul.mubr.bf16.gmra.mrb[184].mxu1 %v13002_v5 }
 0x3c8   :  { %7997 = vmatprep.mubr.bf16.mxu1 %v13003_v52 }
 0x3cd   :  { %2714 = vmatmul.mubr.bf16.gmra.mrb[252].mxu0 %v9273_v6 }
 0x3ce   :  { %2721 = vmatprep.mubr.bf16.mxu0 %v9274_v7 }
 0x3cf   :  { %7998 = vmatmul.mubr.bf16.gmra.mrb[188].mxu1 %v13004_v55 }
 0x3d5   :  { %2722 = vmatmul.mubr.bf16.gmra.mrb[0].mxu0 %v9275_v8 }
 0x3d6   :  { %2729 = vmatprep.mubr.bf16.mxu0 %v9276_v60 }
 0x3dd   :  { %2730 = vmatmul.mubr.bf16.gmra.mrb[4].mxu0 %v9277_v38 }
 0x3de   :  { %2737 = vmatprep.mubr.bf16.mxu0 %v9278_v54 }
 0x3e5   :  { %2738 = vmatmul.mubr.bf16.gmra.mrb[8].mxu0 %v9279_v20 }
 0x3e6   :  { %2745 = vmatprep.mubr.bf16.mxu0 %v9280_v48 }
 0x3ed   :  { %2746 = vmatmul.mubr.bf16.gmra.mrb[12].mxu0 %v9281_v33 }
 0x3ee   :  { %2753 = vmatprep.mubr.bf16.mxu0 %v9282_v14 }
 0x3f5   :  { %2754 = vmatmul.mubr.bf16.gmra.mrb[16].mxu0 %v9283_v37 }
 0x3f6   :  { %2761 = vmatprep.mubr.bf16.mxu0 %v9284_v12 }
 0x3fd   :  { %2762 = vmatmul.mubr.bf16.gmra.mrb[20].mxu0 %v9285_v24 }
 0x3fe   :  { %2769 = vmatprep.mubr.bf16.mxu0 %v9286_v61 }
 0x405   :  { %2770 = vmatmul.mubr.bf16.gmra.mrb[24].mxu0 %v9287_v4 }
 0x406   :  { %2777 = vmatprep.mubr.bf16.mxu0 %v9288_v58 }
 0x40d   :  { %2778 = vmatmul.mubr.bf16.gmra.mrb[28].mxu0 %v9289_v39 }
 0x40e   :  { %3644 = vmatprep.mubr.bf16.mxu0 %v13005_v21 }
 0x428   :  { %v2595_v1 = vpop.f32.mrb[192].mxu0 }
 0x429   :  { %v2597_v35 = vpop.f32.mrb[193].mxu0 }
 0x42a   :  { %v2598_v50 = vpop.f32.mrb[194].mxu0 }
 0x42b   :  { %v2600_v17 = vpop.f32.mrb[195].mxu0 }
 0x430   :  { %v2603_v11 = vpop.f32.mrb[196].mxu0 }
 0x431   :  { %v2605_v10 = vpop.f32.mrb[197].mxu0 }
 0x432   :  { %v2606_v22 = vpop.f32.mrb[198].mxu0 }
 0x433   :  { %v2608_v49 = vpop.f32.mrb[199].mxu0 }
 0x438   :  { %v2611_v57 = vpop.f32.mrb[200].mxu0 }
 0x439   :  { %v2613_v34 = vpop.f32.mrb[201].mxu0 }
 0x43a   :  { %v2614_v2 = vpop.f32.mrb[202].mxu0 }
 0x43b   :  { %v2616_v28 = vpop.f32.mrb[203].mxu0 }
 0x440   :  { %v2619_v16 = vpop.f32.mrb[204].mxu0 }
 0x441   :  { %v2621_v32 = vpop.f32.mrb[205].mxu0 }
 0x442   :  { %v2622_v53 = vpop.f32.mrb[206].mxu0 }
 0x443   :  { %v2624_v27 = vpop.f32.mrb[207].mxu0 }
 0x448   :  { %v2627_v62 = vpop.f32.mrb[208].mxu0 }
 0x449   :  { %v2629_v59 = vpop.f32.mrb[209].mxu0 }
 0x44a   :  { %v2630_v31 = vpop.f32.mrb[210].mxu0  ;;  %v7955_v19 = vpop.f32.mrb[144].mxu1 }
 0x44b   :  { %v2829_v3 = vadd.f32 %v7955_v19, %v2603_v11  ;;  %v2632_v45 = vpop.f32.mrb[211].mxu0  ;;  %v2820_v30 = vpop.f32.mrb[145].mxu1 }
 0x44c   :  { %v2821_v42 = vadd.f32 %v2820_v30, %v2595_v1  ;;  %v7956_v46 = vpop.f32.mrb[146].mxu1 }
 0x44d   :  { %v2832_v63 = vadd.f32 %v7956_v46, %v2606_v22  ;;  %v2823_v13 = vpop.f32.mrb[147].mxu1 }
 0x44e   :  { %v2824_v23 = vadd.f32 %v2823_v13, %v2598_v50 }
 0x44f   :  { %v3012_v44 = vpack.c.bf16 %v2832_v63, %v2829_v3 }
 0x450   :  { %v2635_v43 = vpop.f32.mrb[212].mxu0  ;;  %v3011_v56 = vpack.c.bf16 %v2824_v23, %v2821_v42 }
 0x451   :  { %v2637_v40 = vpop.f32.mrb[213].mxu0 }
 0x452   :  { %v2638_v29 = vpop.f32.mrb[214].mxu0  ;;  %v7959_v26 = vpop.f32.mrb[148].mxu1  ;;  %8017 = vmatprep.mubr.bf16.mxu1 %v3011_v56 }
 0x453   :  { %v2845_v51 = vadd.f32 %v7959_v26, %v2619_v16  ;;  %v2640_v0 = vpop.f32.mrb[215].mxu0  ;;  %v2836_v25 = vpop.f32.mrb[149].mxu1  ;;  %8018 = vmatmul.mubr.bf16.vlgmr.msra.gmra.mrb[48].mxu1 %v3012_v44 }
 0x454   :  { %v2837_v9 = vadd.f32 %v2836_v25, %v2611_v57  ;;  %v7960_v18 = vpop.f32.mrb[150].mxu1 }
 0x455   :  { %v2848_v47 = vadd.f32 %v7960_v18, %v2622_v53  ;;  %v2839_v5 = vpop.f32.mrb[151].mxu1 }
 0x456   :  { %v2840_v52 = vadd.f32 %v2839_v5, %v2614_v2 }
 0x457   :  { %v3014_v41 = vpack.c.bf16 %v2848_v47, %v2845_v51 }
 0x458   :  { %v2643_v6 = vpop.f32.mrb[216].mxu0  ;;  %v3013_v7 = vpack.c.bf16 %v2840_v52, %v2837_v9 }
 0x459   :  { %v2645_v15 = vpop.f32.mrb[217].mxu0 }
 0x45a   :  { %v2646_v55 = vpop.f32.mrb[218].mxu0  ;;  %v7963_v8 = vpop.f32.mrb[152].mxu1  ;;  %8021 = vmatprep.mubr.bf16.mxu1 %v3013_v7 }
 0x45b   :  { %v2861_v60 = vadd.f32 %v7963_v8, %v2635_v43  ;;  %v2648_v38 = vpop.f32.mrb[219].mxu0  ;;  %v2852_v54 = vpop.f32.mrb[153].mxu1  ;;  %8022 = vmatmul.mubr.bf16.gmra.mrb[52].mxu1 %v3014_v41 }
 0x45c   :  { %v2853_v20 = vadd.f32 %v2852_v54, %v2627_v62  ;;  %v7964_v48 = vpop.f32.mrb[154].mxu1 }
 0x45d   :  { %v2864_v33 = vadd.f32 %v7964_v48, %v2638_v29  ;;  %v2855_v14 = vpop.f32.mrb[155].mxu1 }
 0x45e   :  { %v2856_v37 = vadd.f32 %v2855_v14, %v2630_v31 }
 0x45f   :  { %v3016_v12 = vpack.c.bf16 %v2864_v33, %v2861_v60 }
 0x460   :  { %v2651_v24 = vpop.f32.mrb[220].mxu0  ;;  %v3015_v61 = vpack.c.bf16 %v2856_v37, %v2853_v20 }
 0x461   :  { %v2653_v4 = vpop.f32.mrb[221].mxu0 }
 0x462   :  { %v2654_v58 = vpop.f32.mrb[222].mxu0  ;;  %v7967_v39 = vpop.f32.mrb[156].mxu1  ;;  %8025 = vmatprep.mubr.bf16.mxu1 %v3015_v61 }
 0x463   :  { %v2877_v21 = vadd.f32 %v7967_v39, %v2651_v24  ;;  %v2656_v1 = vpop.f32.mrb[223].mxu0  ;;  %v2868_v35 = vpop.f32.mrb[157].mxu1  ;;  %8026 = vmatmul.mubr.bf16.gmra.mrb[56].mxu1 %v3016_v12 }
 0x464   :  { %v2869_v50 = vadd.f32 %v2868_v35, %v2643_v6  ;;  %v7968_v17 = vpop.f32.mrb[158].mxu1 }
 0x465   :  { %v2880_v11 = vadd.f32 %v7968_v17, %v2654_v58  ;;  %v2871_v10 = vpop.f32.mrb[159].mxu1 }
 0x466   :  { %v2872_v22 = vadd.f32 %v2871_v10, %v2646_v55 }
 0x467   :  { %v3018_v49 = vpack.c.bf16 %v2880_v11, %v2877_v21 }
 0x468   :  { %v2659_v57 = vpop.f32.mrb[224].mxu0  ;;  %v3017_v34 = vpack.c.bf16 %v2872_v22, %v2869_v50 }
 0x469   :  { %v2661_v2 = vpop.f32.mrb[225].mxu0 }
 0x46a   :  { %v2662_v28 = vpop.f32.mrb[226].mxu0  ;;  %v7971_v16 = vpop.f32.mrb[160].mxu1  ;;  %8029 = vmatprep.mubr.bf16.mxu1 %v3017_v34 }
 0x46b   :  { %v2664_v32 = vpop.f32.mrb[227].mxu0  ;;  %v2884_v53 = vpop.f32.mrb[161].mxu1  ;;  %8030 = vmatmul.mubr.bf16.gmra.mrb[60].mxu1 %v3018_v49 }
 0x46c   :  { %v2885_v27 = vadd.f32 %v2884_v53, %v2659_v57  ;;  %v7972_v62 = vpop.f32.mrb[162].mxu1 }
 0x46d   :  { %v2887_v59 = vpop.f32.mrb[163].mxu1 }
 0x46e   :  { %v2888_v31 = vadd.f32 %v2887_v59, %v2662_v28 }
 0x470   :  { %v2667_v19 = vpop.f32.mrb[228].mxu0  ;;  %v3019_v3 = vpack.c.bf16 %v2888_v31, %v2885_v27 }
 0x471   :  { %v2893_v45 = vadd.f32 %v7971_v16, %v2667_v19  ;;  %v2669_v30 = vpop.f32.mrb[229].mxu0 }
 0x472   :  { %v2670_v42 = vpop.f32.mrb[230].mxu0  ;;  %8033 = vmatprep.mubr.bf16.mxu1 %v3019_v3  ;;  %v7975_v46 = vpop.f32.mrb[164].mxu1 }
 0x473   :  { %v2896_v63 = vadd.f32 %v7972_v62, %v2670_v42  ;;  %v2672_v13 = vpop.f32.mrb[231].mxu0  ;;  %v2900_v23 = vpop.f32.mrb[165].mxu1 }
 0x474   :  { %v7976_v44 = vpop.f32.mrb[166].mxu1 }
 0x475   :  { %v3020_v43 = vpack.c.bf16 %v2896_v63, %v2893_v45  ;;  %v2903_v56 = vpop.f32.mrb[167].mxu1 }
 0x477   :  { %8034 = vmatmul.mubr.bf16.gmra.mrb[64].mxu1 %v3020_v43 }
 0x478   :  { %v2675_v40 = vpop.f32.mrb[232].mxu0 }
 0x479   :  { %v2901_v29 = vadd.f32 %v2900_v23, %v2675_v40  ;;  %v2677_v26 = vpop.f32.mrb[233].mxu0 }
 0x47a   :  { %v2678_v51 = vpop.f32.mrb[234].mxu0  ;;  %v7979_v0 = vpop.f32.mrb[168].mxu1 }
 0x47b   :  { %v2904_v25 = vadd.f32 %v2903_v56, %v2678_v51  ;;  %v2680_v9 = vpop.f32.mrb[235].mxu0  ;;  %v2916_v18 = vpop.f32.mrb[169].mxu1 }
 0x47c   :  { %v7980_v47 = vpop.f32.mrb[170].mxu1 }
 0x47d   :  { %v3021_v5 = vpack.c.bf16 %v2904_v25, %v2901_v29  ;;  %v2919_v52 = vpop.f32.mrb[171].mxu1 }
 0x47f   :  { %8037 = vmatprep.mubr.bf16.mxu1 %v3021_v5 }
 0x480   :  { %v2683_v41 = vpop.f32.mrb[236].mxu0 }
 0x481   :  { %v2909_v6 = vadd.f32 %v7975_v46, %v2683_v41  ;;  %v2685_v7 = vpop.f32.mrb[237].mxu0 }
 0x482   :  { %v2686_v15 = vpop.f32.mrb[238].mxu0  ;;  %v7983_v55 = vpop.f32.mrb[172].mxu1 }
 0x483   :  { %v2912_v8 = vadd.f32 %v7976_v44, %v2686_v15  ;;  %v2688_v60 = vpop.f32.mrb[239].mxu0  ;;  %v2932_v38 = vpop.f32.mrb[173].mxu1 }
 0x484   :  { %v7984_v54 = vpop.f32.mrb[174].mxu1 }
 0x485   :  { %v3022_v20 = vpack.c.bf16 %v2912_v8, %v2909_v6  ;;  %v2935_v48 = vpop.f32.mrb[175].mxu1 }
 0x487   :  { %8038 = vmatmul.mubr.bf16.gmra.mrb[68].mxu1 %v3022_v20 }
 0x488   :  { %v2691_v33 = vpop.f32.mrb[240].mxu0 }
 0x489   :  { %v2917_v14 = vadd.f32 %v2916_v18, %v2691_v33  ;;  %v2693_v37 = vpop.f32.mrb[241].mxu0 }
 0x48a   :  { %v2694_v12 = vpop.f32.mrb[242].mxu0  ;;  %v7987_v24 = vpop.f32.mrb[176].mxu1 }
 0x48b   :  { %v2920_v61 = vadd.f32 %v2919_v52, %v2694_v12  ;;  %v2696_v4 = vpop.f32.mrb[243].mxu0  ;;  %v2948_v58 = vpop.f32.mrb[177].mxu1 }
 0x48c   :  { %v7988_v39 = vpop.f32.mrb[178].mxu1 }
 0x48d   :  { %v3023_v21 = vpack.c.bf16 %v2920_v61, %v2917_v14  ;;  %v2951_v1 = vpop.f32.mrb[179].mxu1 }
 0x48f   :  { %8041 = vmatprep.mubr.bf16.mxu1 %v3023_v21 }
 0x490   :  { %v2699_v35 = vpop.f32.mrb[244].mxu0 }
 0x491   :  { %v2925_v50 = vadd.f32 %v7979_v0, %v2699_v35  ;;  %v2701_v17 = vpop.f32.mrb[245].mxu0 }
 0x492   :  { %v2702_v11 = vpop.f32.mrb[246].mxu0  ;;  %v7991_v10 = vpop.f32.mrb[180].mxu1 }
 0x493   :  { %v2928_v22 = vadd.f32 %v7980_v47, %v2702_v11  ;;  %v2704_v49 = vpop.f32.mrb[247].mxu0  ;;  %v2964_v57 = vpop.f32.mrb[181].mxu1 }
 0x494   :  { %v7992_v34 = vpop.f32.mrb[182].mxu1 }
 0x495   :  { %v3024_v2 = vpack.c.bf16 %v2928_v22, %v2925_v50  ;;  %v2967_v28 = vpop.f32.mrb[183].mxu1 }
 0x497   :  { %8042 = vmatmul.mubr.bf16.gmra.mrb[72].mxu1 %v3024_v2 }
 0x498   :  { %v2707_v16 = vpop.f32.mrb[248].mxu0 }
 0x499   :  { %v2933_v32 = vadd.f32 %v2932_v38, %v2707_v16  ;;  %v2709_v53 = vpop.f32.mrb[249].mxu0 }
 0x49a   :  { %v2710_v27 = vpop.f32.mrb[250].mxu0  ;;  %v7995_v62 = vpop.f32.mrb[184].mxu1 }
 0x49b   :  { %v2936_v59 = vadd.f32 %v2935_v48, %v2710_v27  ;;  %v2712_v31 = vpop.f32.mrb[251].mxu0  ;;  %v2980_v19 = vpop.f32.mrb[185].mxu1 }
 0x49c   :  { %v7996_v3 = vpop.f32.mrb[186].mxu1 }
 0x49d   :  { %v3025_v45 = vpack.c.bf16 %v2936_v59, %v2933_v32  ;;  %v2983_v30 = vpop.f32.mrb[187].mxu1 }
 0x49f   :  { %8045 = vmatprep.mubr.bf16.mxu1 %v3025_v45 }
 0x4a0   :  { %v2715_v42 = vpop.f32.mrb[252].mxu0 }
 0x4a1   :  { %v2941_v46 = vadd.f32 %v7983_v55, %v2715_v42  ;;  %v2717_v63 = vpop.f32.mrb[253].mxu0 }
 0x4a2   :  { %v2718_v13 = vpop.f32.mrb[254].mxu0  ;;  %v10769_v23 = vpop.f32.mrb[188].mxu1 }
 0x4a3   :  { %v2944_v44 = vadd.f32 %v7984_v54, %v2718_v13  ;;  %v2720_v43 = vpop.f32.mrb[255].mxu0  ;;  %v2996_v56 = vpop.f32.mrb[189].mxu1 }
 0x4a4   :  { %v10771_v40 = vpop.f32.mrb[190].mxu1  ;;  %v10781_v43 = vld [vmem:[%s12799_s3] ss:$0 sm:$0xff] }
 0x4a5   :  { %v3026_v29 = vpack.c.bf16 %v2944_v44, %v2941_v46  ;;  %v2999_v26 = vpop.f32.mrb[191].mxu1  ;;  %v9290_v44 = vld [vmem:[%s12797_s0 + $0x8] ss:$12 sps:$4 sm:$0xff]  }
 0x4a7   :  { %8046 = vmatmul.mubr.bf16.gmra.mrb[76].mxu1 %v3026_v29 }
 0x4a8   :  { %v2723_v51 = vpop.f32.mrb[0].mxu0 }
 0x4a9   :  { %v2725_v0 = vpop.f32.mrb[1].mxu0  ;;  %v2949_v25 = vadd.f32 %v2948_v58, %v2723_v51 }
 0x4aa   :  { %v2726_v9 = vpop.f32.mrb[2].mxu0 }
 0x4ab   :  { %v2728_v18 = vpop.f32.mrb[3].mxu0  ;;  %v2952_v47 = vadd.f32 %v2951_v1, %v2726_v9 }
 0x4ad   :  { %v3027_v5 = vpack.c.bf16 %v2952_v47, %v2949_v25 }
 0x4af   :  { %8049 = vmatprep.mubr.bf16.mxu1 %v3027_v5 }
 0x4b0   :  { %v2731_v52 = vpop.f32.mrb[4].mxu0 }
 0x4b1   :  { %v2957_v41 = vadd.f32 %v7987_v24, %v2731_v52  ;;  %v2733_v6 = vpop.f32.mrb[5].mxu0 }
 0x4b2   :  { %v2734_v7 = vpop.f32.mrb[6].mxu0 }
 0x4b3   :  { %v2960_v15 = vadd.f32 %v7988_v39, %v2734_v7  ;;  %v2736_v55 = vpop.f32.mrb[7].mxu0 }
 0x4b5   :  { %v3028_v8 = vpack.c.bf16 %v2960_v15, %v2957_v41 }
 0x4b7   :  { %8050 = vmatmul.mubr.bf16.gmra.mrb[80].mxu1 %v3028_v8 }
 0x4b8   :  { %v2739_v60 = vpop.f32.mrb[8].mxu0 }
 0x4b9   :  { %v2741_v38 = vpop.f32.mrb[9].mxu0  ;;  %v2965_v54 = vadd.f32 %v2964_v57, %v2739_v60 }
 0x4ba   :  { %v2742_v20 = vpop.f32.mrb[10].mxu0 }
 0x4bb   :  { %v2744_v48 = vpop.f32.mrb[11].mxu0  ;;  %v2968_v33 = vadd.f32 %v2967_v28, %v2742_v20 }
 0x4bd   :  { %v3029_v14 = vpack.c.bf16 %v2968_v33, %v2965_v54 }
 0x4bf   :  { %8053 = vmatprep.mubr.bf16.mxu1 %v3029_v14 }
 0x4c0   :  { %v2747_v37 = vpop.f32.mrb[12].mxu0 }
 0x4c1   :  { %v2973_v12 = vadd.f32 %v7991_v10, %v2747_v37  ;;  %v2749_v61 = vpop.f32.mrb[13].mxu0 }
 0x4c2   :  { %v2750_v4 = vpop.f32.mrb[14].mxu0 }
 0x4c3   :  { %v2976_v58 = vadd.f32 %v7992_v34, %v2750_v4  ;;  %v2752_v24 = vpop.f32.mrb[15].mxu0 }
 0x4c5   :  { %v3030_v21 = vpack.c.bf16 %v2976_v58, %v2973_v12 }
 0x4c7   :  { %8054 = vmatmul.mubr.bf16.gmra.mrb[84].mxu1 %v3030_v21 }
 0x4c8   :  { %v2755_v39 = vpop.f32.mrb[16].mxu0 }
 0x4c9   :  { %v2757_v1 = vpop.f32.mrb[17].mxu0  ;;  %v2981_v35 = vadd.f32 %v2980_v19, %v2755_v39 }
 0x4ca   :  { %v2758_v50 = vpop.f32.mrb[18].mxu0 }
 0x4cb   :  { %v2760_v17 = vpop.f32.mrb[19].mxu0  ;;  %v2984_v11 = vadd.f32 %v2983_v30, %v2758_v50 }
 0x4cd   :  { %v3031_v22 = vpack.c.bf16 %v2984_v11, %v2981_v35 }
 0x4cf   :  { %8057 = vmatprep.mubr.bf16.mxu1 %v3031_v22 }
 0x4d0   :  { %v2763_v49 = vpop.f32.mrb[20].mxu0 }
 0x4d1   :  { %v2989_v57 = vadd.f32 %v7995_v62, %v2763_v49  ;;  %v2765_v2 = vpop.f32.mrb[21].mxu0 }
 0x4d2   :  { %v2766_v28 = vpop.f32.mrb[22].mxu0 }
 0x4d3   :  { %v2992_v16 = vadd.f32 %v7996_v3, %v2766_v28  ;;  %v2768_v10 = vpop.f32.mrb[23].mxu0 }
 0x4d5   :  { %v3032_v32 = vpack.c.bf16 %v2992_v16, %v2989_v57 }
 0x4d7   :  { %8058 = vmatmul.mubr.bf16.gmra.mrb[88].mxu1 %v3032_v32 }
 0x4d8   :  { %v2771_v34 = vpop.f32.mrb[24].mxu0 }
 0x4d9   :  { %v2773_v53 = vpop.f32.mrb[25].mxu0  ;;  %v2997_v27 = vadd.f32 %v2996_v56, %v2771_v34 }
 0x4da   :  { %v2774_v59 = vpop.f32.mrb[26].mxu0 }
 0x4db   :  { %v2776_v31 = vpop.f32.mrb[27].mxu0  ;;  %v3000_v45 = vadd.f32 %v2999_v26, %v2774_v59 }
 0x4dd   :  { %v3033_v19 = vpack.c.bf16 %v3000_v45, %v2997_v27 }
 0x4df   :  { %8061 = vmatprep.mubr.bf16.mxu1 %v3033_v19 }
 0x4e0   :  { %v2779_v42 = vpop.f32.mrb[28].mxu0 }
 0x4e1   :  { %v3005_v30 = vadd.f32 %v10769_v23, %v2779_v42  ;;  %v2781_v46 = vpop.f32.mrb[29].mxu0 }
 0x4e2   :  { %v2782_v63 = vpop.f32.mrb[30].mxu0 }
 0x4e3   :  { %v3008_v62 = vadd.f32 %v10771_v40, %v2782_v63  ;;  %v2784_v13 = vpop.f32.mrb[31].mxu0 }
 0x4e5   :  { %v3034_v3 = vpack.c.bf16 %v3008_v62, %v3005_v30 }
 0x4e7   :  { %8062 = vmatmul.mubr.bf16.gmra.mrb[92].mxu1 %v3034_v3 }
 0x4e8   :  { %8081 = vmatprep.mubr.bf16.mxu1 %v9290_v44 }
 0x526   :  { %v8019_v56 = vpop.f32.mrb[48].mxu1 }
 0x527   :  { %v3382_v23 = vadd.f32 %v8019_v56, %v10781_v43  ;;  %v3134_v29 = vpop.f32.mrb[49].mxu1 }
 0x528   :  { %v3380_v26 = vadd.f32 %v10781_v43, %v3134_v29  ;;  %v8020_v40 = vpop.f32.mrb[50].mxu1 }
 0x529   :  { %v3478_v51 = vmul.f32 0.02, %v3382_v23  ;;  %v3383_v0 = vadd.f32 %v8020_v40, %v10781_v43  ;;  %v3137_v25 = vpop.f32.mrb[51].mxu1  ;;  %vm3430_vm0 = vcmp.ge.f32.partialorder %v3382_v23, 0.0 }
 0x52a   :  { %v3476_v9 = vmul.f32 0.02, %v3380_v26  ;;  %v3381_v18 = vadd.f32 %v10781_v43, %v3137_v25  ;;  %vm3428_vm1 = vcmp.ge.f32.partialorder %v3380_v26, 0.0 }
 0x52b   :  { %vm3431_vm2 = vcmp.ge.f32.partialorder %v3383_v0, 0.0  ;;  %v3479_v47 = vmul.f32 0.02, %v3383_v0  ;;  %v3526_v52 = vsel %vm3430_vm0, %v3382_v23, %v3478_v51 }
 0x52c   :  { %vm3429_vm3 = vcmp.ge.f32.partialorder %v3381_v18, 0.0  ;;  %v3477_v5 = vmul.f32 0.02, %v3381_v18  ;;  %v3524_v6 = vsel %vm3428_vm1, %v3380_v26, %v3476_v9 }
 0x52d   :  { %v3527_v41 = vsel %vm3431_vm2, %v3383_v0, %v3479_v47 }
 0x52e   :  { %v10787_v7 = vpack.c.bf16 %v3527_v41, %v3526_v52  ;;  %v3525_v15 = vsel %vm3429_vm3, %v3381_v18, %v3477_v5  ;;  %v8023_v55 = vpop.f32.mrb[52].mxu1 }
 0x52f   :  { %v10789_v8 = vpack.c.bf16 %v3525_v15, %v3524_v6  ;;  %v3386_v60 = vadd.f32 %v8023_v55, %v10781_v43  ;;  %v3150_v38 = vpop.f32.mrb[53].mxu1 }
 0x530   :  { %v3384_v54 = vadd.f32 %v10781_v43, %v3150_v38  ;;  %v8024_v20 = vpop.f32.mrb[54].mxu1 }
 0x531   :  { %v3482_v48 = vmul.f32 0.02, %v3386_v60  ;;  %v3387_v33 = vadd.f32 %v8024_v20, %v10781_v43  ;;  %v3153_v14 = vpop.f32.mrb[55].mxu1  ;;  %3613 = vmatpush1.bf16.msra.mxu0 %v10789_v8  ;;  %vm3434_vm4 = vcmp.ge.f32.partialorder %v3386_v60, 0.0 }
 0x532   :  { %v3480_v37 = vmul.f32 0.02, %v3384_v54  ;;  %v3385_v12 = vadd.f32 %v10781_v43, %v3153_v14  ;;  %3614 = vmatprep.subr.bf16.mxu0 %v12939_v36  ;;  %vm3432_vm5 = vcmp.ge.f32.partialorder %v3384_v54, 0.0 }
 0x533   :  { %vm3435_vm6 = vcmp.ge.f32.partialorder %v3387_v33, 0.0  ;;  %v3483_v61 = vmul.f32 0.02, %v3387_v33  ;;  %v3530_v58 = vsel %vm3434_vm4, %v3386_v60, %v3482_v48 }
 0x534   :  { %vm3433_vm7 = vcmp.ge.f32.partialorder %v3385_v12, 0.0  ;;  %v3481_v4 = vmul.f32 0.02, %v3385_v12  ;;  %v3528_v21 = vsel %vm3432_vm5, %v3384_v54, %v3480_v37 }
 0x535   :  { %v3531_v24 = vsel %vm3435_vm6, %v3387_v33, %v3483_v61  ;;  %3615 = vmatpush1.bf16.msra.mxu0 %v10787_v7 }
 0x536   :  { %v10798_v39 = vpack.c.bf16 %v3531_v24, %v3530_v58  ;;  %v3529_v1 = vsel %vm3433_vm7, %v3385_v12, %v3481_v4  ;;  %v8027_v35 = vpop.f32.mrb[56].mxu1  ;;  %3616 = vmatprep.subr.bf16.mxu0 %v12939_v36 }
 0x537   :  { %v10801_v50 = vpack.c.bf16 %v3529_v1, %v3528_v21  ;;  %v3390_v17 = vadd.f32 %v8027_v35, %v10781_v43  ;;  %v3166_v11 = vpop.f32.mrb[57].mxu1 }
 0x538   :  { %v3388_v22 = vadd.f32 %v10781_v43, %v3166_v11  ;;  %v8028_v49 = vpop.f32.mrb[58].mxu1 }
 0x539   :  { %v3486_v57 = vmul.f32 0.02, %v3390_v17  ;;  %v3391_v2 = vadd.f32 %v8028_v49, %v10781_v43  ;;  %v3169_v28 = vpop.f32.mrb[59].mxu1  ;;  %3617 = vmatpush1.bf16.msra.mxu0 %v10801_v50  ;;  %vm3438_vm8 = vcmp.ge.f32.partialorder %v3390_v17, 0.0 }
 0x53a   :  { %v3484_v16 = vmul.f32 0.02, %v3388_v22  ;;  %v3389_v10 = vadd.f32 %v10781_v43, %v3169_v28  ;;  %3618 = vmatprep.subr.bf16.mxu0 %v12939_v36  ;;  %vm3436_vm9 = vcmp.ge.f32.partialorder %v3388_v22, 0.0 }
 0x53b   :  { %vm3439_vm10 = vcmp.ge.f32.partialorder %v3391_v2, 0.0  ;;  %v3487_v32 = vmul.f32 0.02, %v3391_v2  ;;  %v3534_v53 = vsel %vm3438_vm8, %v3390_v17, %v3486_v57 }
 0x53c   :  { %vm3437_vm11 = vcmp.ge.f32.partialorder %v3389_v10, 0.0  ;;  %v3485_v34 = vmul.f32 0.02, %v3389_v10  ;;  %v3532_v59 = vsel %vm3436_vm9, %v3388_v22, %v3484_v16 }
 0x53d   :  { %v3535_v27 = vsel %vm3439_vm10, %v3391_v2, %v3487_v32  ;;  %3619 = vmatpush1.bf16.msra.mxu0 %v10798_v39 }
 0x53e   :  { %v10810_v31 = vpack.c.bf16 %v3535_v27, %v3534_v53  ;;  %v3533_v45 = vsel %vm3437_vm11, %v3389_v10, %v3485_v34  ;;  %v8031_v19 = vpop.f32.mrb[60].mxu1  ;;  %3620 = vmatprep.subr.bf16.mxu0 %v12939_v36 }
 0x53f   :  { %v10813_v42 = vpack.c.bf16 %v3533_v45, %v3532_v59  ;;  %v3394_v30 = vadd.f32 %v8031_v19, %v10781_v43  ;;  %v3182_v46 = vpop.f32.mrb[61].mxu1 }
 0x540   :  { %v3392_v63 = vadd.f32 %v10781_v43, %v3182_v46  ;;  %v8032_v62 = vpop.f32.mrb[62].mxu1 }
 0x541   :  { %v3490_v13 = vmul.f32 0.02, %v3394_v30  ;;  %v3395_v3 = vadd.f32 %v8032_v62, %v10781_v43  ;;  %v3185_v44 = vpop.f32.mrb[63].mxu1  ;;  %3621 = vmatpush1.bf16.msra.mxu0 %v10813_v42  ;;  %vm3442_vm12 = vcmp.ge.f32.partialorder %v3394_v30, 0.0 }
 0x542   :  { %v3488_v56 = vmul.f32 0.02, %v3392_v63  ;;  %v3393_v23 = vadd.f32 %v10781_v43, %v3185_v44  ;;  %3622 = vmatprep.subr.bf16.mxu0 %v12939_v36  ;;  %vm3440_vm13 = vcmp.ge.f32.partialorder %v3392_v63, 0.0 }
 0x543   :  { %vm3443_vm14 = vcmp.ge.f32.partialorder %v3395_v3, 0.0  ;;  %v3491_v29 = vmul.f32 0.02, %v3395_v3  ;;  %v3538_v40 = vsel %vm3442_vm12, %v3394_v30, %v3490_v13 }
 0x544   :  { %vm3441_vm15 = vcmp.ge.f32.partialorder %v3393_v23, 0.0  ;;  %v3489_v26 = vmul.f32 0.02, %v3393_v23  ;;  %v3536_v0 = vsel %vm3440_vm13, %v3392_v63, %v3488_v56 }
 0x545   :  { %v3539_v51 = vsel %vm3443_vm14, %v3395_v3, %v3491_v29  ;;  %3623 = vmatpush1.bf16.msra.mxu0 %v10810_v31 }
 0x546   :  { %v10822_v25 = vpack.c.bf16 %v3539_v51, %v3538_v40  ;;  %v3537_v9 = vsel %vm3441_vm15, %v3393_v23, %v3489_v26  ;;  %3624 = vmatprep.subr.bf16.mxu0 %v12939_v36 }
 0x547   :  { %v10825_v18 = vpack.c.bf16 %v3537_v9, %v3536_v0 }
 0x548   :  { %13006 = vst [vmem:[#allocation21_spill] sm:$0xff] %v10822_v25 }
 0x549   :  { %3625 = vmatpush1.bf16.msra.mxu0 %v10825_v18 }
 0x54a   :  { %v8035_v47 = vpop.f32.mrb[64].mxu1  ;;  %3626 = vmatprep.subr.bf16.mxu0 %v12939_v36 }
 0x54b   :  { %v3398_v5 = vadd.f32 %v8035_v47, %v10781_v43  ;;  %v3198_v52 = vpop.f32.mrb[65].mxu1 }
 0x54c   :  { %v3396_v41 = vadd.f32 %v10781_v43, %v3198_v52  ;;  %v8036_v6 = vpop.f32.mrb[66].mxu1 }
 0x54d   :  { %v3494_v15 = vmul.f32 0.02, %v3398_v5  ;;  %v3399_v55 = vadd.f32 %v8036_v6, %v10781_v43  ;;  %v3201_v60 = vpop.f32.mrb[67].mxu1  ;;  %3627 = vmatpush1.bf16.msra.mxu0 %v10822_v25  ;;  %vm3446_vm0 = vcmp.ge.f32.partialorder %v3398_v5, 0.0 }
 0x54e   :  { %v3492_v38 = vmul.f32 0.02, %v3396_v41  ;;  %v3397_v54 = vadd.f32 %v10781_v43, %v3201_v60  ;;  %3628 = vmatprep.subr.bf16.mxu0 %v12939_v36  ;;  %vm3444_vm1 = vcmp.ge.f32.partialorder %v3396_v41, 0.0 }
 0x54f   :  { %vm3447_vm2 = vcmp.ge.f32.partialorder %v3399_v55, 0.0  ;;  %v3495_v20 = vmul.f32 0.02, %v3399_v55  ;;  %v3542_v33 = vsel %vm3446_vm0, %v3398_v5, %v3494_v15 }
 0x550   :  { %vm3445_vm3 = vcmp.ge.f32.partialorder %v3397_v54, 0.0  ;;  %v3493_v48 = vmul.f32 0.02, %v3397_v54  ;;  %v3540_v37 = vsel %vm3444_vm1, %v3396_v41, %v3492_v38 }
 0x551   :  { %v3543_v14 = vsel %vm3447_vm2, %v3399_v55, %v3495_v20 }
 0x552   :  { %v10835_v12 = vpack.c.bf16 %v3543_v14, %v3542_v33  ;;  %v3541_v61 = vsel %vm3445_vm3, %v3397_v54, %v3493_v48 }
 0x553   :  { %v10837_v4 = vpack.c.bf16 %v3541_v61, %v3540_v37 }
 0x554   :  { %13007 = vst [vmem:[#allocation22_spill] sm:$0xff] %v10835_v12 }
 0x555   :  { %13008 = vst [vmem:[#allocation23_spill] sm:$0xff] %v10837_v4  ;;  %3629 = vmatpush1.bf16.msra.mxu0 %v10837_v4 }
 0x556   :  { %3630 = vmatprep.subr.bf16.mxu0 %v12939_v36 }
 0x559   :  { %3631 = vmatpush1.bf16.msra.mxu0 %v10835_v12 }
 0x55a   :  { %v8039_v58 = vpop.f32.mrb[68].mxu1  ;;  %3632 = vmatprep.subr.bf16.mxu0 %v12939_v36 }
 0x55b   :  { %v3402_v24 = vadd.f32 %v8039_v58, %v10781_v43  ;;  %v3214_v21 = vpop.f32.mrb[69].mxu1 }
 0x55c   :  { %v3400_v1 = vadd.f32 %v10781_v43, %v3214_v21  ;;  %v8040_v35 = vpop.f32.mrb[70].mxu1 }
 0x55d   :  { %v3498_v17 = vmul.f32 0.02, %v3402_v24  ;;  %v3403_v11 = vadd.f32 %v8040_v35, %v10781_v43  ;;  %v3217_v22 = vpop.f32.mrb[71].mxu1  ;;  %vm3450_vm4 = vcmp.ge.f32.partialorder %v3402_v24, 0.0 }
 0x55e   :  { %v3496_v49 = vmul.f32 0.02, %v3400_v1  ;;  %v3401_v57 = vadd.f32 %v10781_v43, %v3217_v22  ;;  %vm3448_vm5 = vcmp.ge.f32.partialorder %v3400_v1, 0.0  ;;  %v10884_v22 = vld [vmem:[%s12797_s0] ss:$12 sps:$4 sm:$0xff]  }
 0x55f   :  { %vm3451_vm6 = vcmp.ge.f32.partialorder %v3403_v11, 0.0  ;;  %v3499_v2 = vmul.f32 0.02, %v3403_v11  ;;  %v3546_v16 = vsel %vm3450_vm4, %v3402_v24, %v3498_v17 }
 0x560   :  { %vm3449_vm7 = vcmp.ge.f32.partialorder %v3401_v57, 0.0  ;;  %v3497_v28 = vmul.f32 0.02, %v3401_v57  ;;  %v3544_v32 = vsel %vm3448_vm5, %v3400_v1, %v3496_v49 }
 0x561   :  { %v3547_v10 = vsel %vm3451_vm6, %v3403_v11, %v3499_v2 }
 0x562   :  { %v10847_v34 = vpack.c.bf16 %v3547_v10, %v3546_v16  ;;  %v3545_v53 = vsel %vm3449_vm7, %v3401_v57, %v3497_v28  ;;  %v10891_v28 = vld [vmem:[%s12797_s0 + $0x1c] ss:$12 sps:$4 sm:$0xff]  }
 0x563   :  { %v10849_v27 = vpack.c.bf16 %v3545_v53, %v3544_v32 }
 0x564   :  { %13009 = vst [vmem:[#allocation24_spill] sm:$0xff] %v10847_v34 }
 0x565   :  { %13010 = vst [vmem:[#allocation25_spill] sm:$0xff] %v10849_v27  ;;  %3633 = vmatpush1.bf16.msra.mxu0 %v10849_v27 }
 0x566   :  { %3634 = vmatprep.subr.bf16.mxu0 %v12939_v36 }
 0x569   :  { %3635 = vmatpush1.bf16.msra.mxu0 %v10847_v34 }
 0x56a   :  { %v8043_v59 = vpop.f32.mrb[72].mxu1  ;;  %3636 = vmatprep.subr.bf16.mxu0 %v12939_v36 }
 0x56b   :  { %v3406_v45 = vadd.f32 %v8043_v59, %v10781_v43  ;;  %v3230_v19 = vpop.f32.mrb[73].mxu1 }
 0x56c   :  { %v3404_v30 = vadd.f32 %v10781_v43, %v3230_v19  ;;  %v8044_v46 = vpop.f32.mrb[74].mxu1 }
 0x56d   :  { %v3502_v63 = vmul.f32 0.02, %v3406_v45  ;;  %v3407_v62 = vadd.f32 %v8044_v46, %v10781_v43  ;;  %v3233_v13 = vpop.f32.mrb[75].mxu1  ;;  %vm3454_vm8 = vcmp.ge.f32.partialorder %v3406_v45, 0.0 }
 0x56e   :  { %v3500_v3 = vmul.f32 0.02, %v3404_v30  ;;  %v3405_v44 = vadd.f32 %v10781_v43, %v3233_v13  ;;  %vm3452_vm9 = vcmp.ge.f32.partialorder %v3404_v30, 0.0  ;;  %v10909_v13 = vld [vmem:[%s12797_s0 + $0x34] ss:$12 sps:$4 sm:$0xff]  }
 0x56f   :  { %vm3455_vm10 = vcmp.ge.f32.partialorder %v3407_v62, 0.0  ;;  %v3503_v56 = vmul.f32 0.02, %v3407_v62  ;;  %v3550_v29 = vsel %vm3454_vm8, %v3406_v45, %v3502_v63 }
 0x570   :  { %vm3453_vm11 = vcmp.ge.f32.partialorder %v3405_v44, 0.0  ;;  %v3501_v23 = vmul.f32 0.02, %v3405_v44  ;;  %v3548_v40 = vsel %vm3452_vm9, %v3404_v30, %v3500_v3 }
 0x571   :  { %v3551_v26 = vsel %vm3455_vm10, %v3407_v62, %v3503_v56  ;;  %v10902_v62 = vld [vmem:[%s12797_s0 + $0x18] ss:$12 sps:$4 sm:$0xff]  }
 0x572   :  { %v10859_v51 = vpack.c.bf16 %v3551_v26, %v3550_v29  ;;  %v3549_v0 = vsel %vm3453_vm11, %v3405_v44, %v3501_v23  ;;  %v10920_v26 = vld [vmem:[%s12797_s0 + $0x30] ss:$12 sps:$4 sm:$0xff]  }
 0x573   :  { %v10861_v9 = vpack.c.bf16 %v3549_v0, %v3548_v40 }
 0x574   :  { %13011 = vst [vmem:[#allocation26_spill] sm:$0xff] %v10859_v51 }
 0x575   :  { %13012 = vst [vmem:[#allocation27_spill] sm:$0xff] %v10861_v9  ;;  %3637 = vmatpush1.bf16.msra.mxu0 %v10861_v9 }
 0x576   :  { %3638 = vmatprep.subr.bf16.mxu0 %v12939_v36 }
 0x579   :  { %3639 = vmatpush1.bf16.msra.mxu0 %v10859_v51 }
 0x57a   :  { %v8047_v47 = vpop.f32.mrb[76].mxu1  ;;  %3640 = vmatprep.subr.bf16.mxu0 %v12939_v36 }
 0x57b   :  { %v3410_v5 = vadd.f32 %v8047_v47, %v10781_v43  ;;  %v3246_v52 = vpop.f32.mrb[77].mxu1 }
 0x57c   :  { %v3408_v41 = vadd.f32 %v10781_v43, %v3246_v52  ;;  %v8048_v6 = vpop.f32.mrb[78].mxu1 }
 0x57d   :  { %v3506_v15 = vmul.f32 0.02, %v3410_v5  ;;  %v3411_v55 = vadd.f32 %v8048_v6, %v10781_v43  ;;  %v3249_v60 = vpop.f32.mrb[79].mxu1  ;;  %vm3458_vm12 = vcmp.ge.f32.partialorder %v3410_v5, 0.0 }
 0x57e   :  { %v3504_v38 = vmul.f32 0.02, %v3408_v41  ;;  %v3409_v54 = vadd.f32 %v10781_v43, %v3249_v60  ;;  %vm3456_vm13 = vcmp.ge.f32.partialorder %v3408_v41, 0.0 }
 0x57f   :  { %vm3459_vm14 = vcmp.ge.f32.partialorder %v3411_v55, 0.0  ;;  %v3507_v20 = vmul.f32 0.02, %v3411_v55  ;;  %v3554_v33 = vsel %vm3458_vm12, %v3410_v5, %v3506_v15  ;;  %v10927_v5 = vld [vmem:[%s12797_s0 + $0x4c] ss:$12 sps:$4 sm:$0xff]  }
 0x580   :  { %vm3457_vm15 = vcmp.ge.f32.partialorder %v3409_v54, 0.0  ;;  %v3505_v48 = vmul.f32 0.02, %v3409_v54  ;;  %v3552_v37 = vsel %vm3456_vm13, %v3408_v41, %v3504_v38 }
 0x581   :  { %v3555_v14 = vsel %vm3459_vm14, %v3411_v55, %v3507_v20 }
 0x582   :  { %v10871_v61 = vpack.c.bf16 %v3555_v14, %v3554_v33  ;;  %v3553_v58 = vsel %vm3457_vm15, %v3409_v54, %v3505_v48  ;;  %v10938_v33 = vld [vmem:[%s12797_s0 + $0x48] ss:$12 sps:$4 sm:$0xff]   ;;  %v10945_v14 = vld [vmem:[%s12797_s0 + $0x64] ss:$12 sps:$4 sm:$0xff]  }
 0x583   :  { %v10873_v24 = vpack.c.bf16 %v3553_v58, %v3552_v37 }
 0x584   :  { %13013 = vst [vmem:[#allocation28_spill] sm:$0xff] %v10871_v61 }
 0x585   :  { %13014 = vst [vmem:[#allocation29_spill] sm:$0xff] %v10873_v24  ;;  %3641 = vmatpush1.bf16.msra.mxu0 %v10873_v24 }
 0x586   :  { %3642 = vmatprep.subr.bf16.mxu0 %v12939_v36 }
 0x589   :  { %3643 = vmatpush1.bf16.msra.mxu0 %v10871_v61 }
 0x58a   :  { %v8051_v21 = vpop.f32.mrb[80].mxu1  ;;  %4649 = vmatprep.subr.bf16.mxu0 %v12939_v36 }
 0x58b   :  { %v3414_v1 = vadd.f32 %v8051_v21, %v10781_v43  ;;  %v3262_v35 = vpop.f32.mrb[81].mxu1 }
 0x58c   :  { %v3412_v17 = vadd.f32 %v10781_v43, %v3262_v35  ;;  %v8052_v11 = vpop.f32.mrb[82].mxu1  ;;  %3645 = vmatmul.mubr.bf16.vlgmr.msra.gmra.mrb[32].mxu0 %v10884_v22 }
 0x58d   :  { %v3510_v49 = vmul.f32 0.02, %v3414_v1  ;;  %v3415_v57 = vadd.f32 %v8052_v11, %v10781_v43  ;;  %v3265_v2 = vpop.f32.mrb[83].mxu1  ;;  %3652 = vmatprep.mubr.bf16.mxu0 %v10891_v28  ;;  %vm3462_vm0 = vcmp.ge.f32.partialorder %v3414_v1, 0.0 }
 0x58e   :  { %v3508_v16 = vmul.f32 0.02, %v3412_v17  ;;  %v3413_v10 = vadd.f32 %v10781_v43, %v3265_v2  ;;  %vm3460_vm1 = vcmp.ge.f32.partialorder %v3412_v17, 0.0  ;;  %v10963_v2 = vld [vmem:[%s12797_s0 + $0x7c] ss:$12 sps:$4 sm:$0xff]  }
 0x58f   :  { %vm3463_vm2 = vcmp.ge.f32.partialorder %v3415_v57, 0.0  ;;  %v3511_v32 = vmul.f32 0.02, %v3415_v57  ;;  %v3558_v59 = vsel %vm3462_vm0, %v3414_v1, %v3510_v49 }
 0x590   :  { %vm3461_vm3 = vcmp.ge.f32.partialorder %v3413_v10, 0.0  ;;  %v3509_v53 = vmul.f32 0.02, %v3413_v10  ;;  %v3556_v19 = vsel %vm3460_vm1, %v3412_v17, %v3508_v16  ;;  %v10956_v17 = vld [vmem:[%s12797_s0 + $0x60] ss:$12 sps:$4 sm:$0xff]  }
 0x591   :  { %v3559_v45 = vsel %vm3463_vm2, %v3415_v57, %v3511_v32 }
 0x592   :  { %v3557_v30 = vsel %vm3461_vm3, %v3413_v10, %v3509_v53  ;;  %v10895_v46 = vpack.c.bf16 %v3559_v45, %v3558_v59 }
 0x593   :  { %v10897_v63 = vpack.c.bf16 %v3557_v30, %v3556_v19 }
 0x594   :  { %13015 = vst [vmem:[#allocation2_spill] sm:$0xff] %v10895_v46  ;;  %3653 = vmatmul.mubr.bf16.gmra.mrb[36].mxu0 %v10902_v62 }
 0x595   :  { %13016 = vst [vmem:[#allocation4_spill] sm:$0xff] %v10897_v63  ;;  %8065 = vmatprep.subr.bf16.mxu1 %v10897_v63  ;;  %3660 = vmatprep.mubr.bf16.mxu0 %v10909_v13 }
 0x596   :  { %8066 = vmatpush3.bf16.msra.mxu1 %v10897_v63 }
 0x597   :  { %8067 = vmatprep.subr.bf16.mxu1 %v10895_v46 }
 0x59a   :  { %v8055_v3 = vpop.f32.mrb[84].mxu1  ;;  %8068 = vmatpush3.bf16.msra.mxu1 %v10895_v46 }
 0x59b   :  { %v3418_v44 = vadd.f32 %v8055_v3, %v10781_v43  ;;  %v3278_v56 = vpop.f32.mrb[85].mxu1 }
 0x59c   :  { %v3416_v23 = vadd.f32 %v10781_v43, %v3278_v56  ;;  %v8056_v29 = vpop.f32.mrb[86].mxu1  ;;  %3661 = vmatmul.mubr.bf16.gmra.mrb[40].mxu0 %v10920_v26  ;;  %v10974_v56 = vld [vmem:[%s12797_s0 + $0x78] ss:$12 sps:$4 sm:$0xff]  }
 0x59d   :  { %v3514_v40 = vmul.f32 0.02, %v3418_v44  ;;  %v3419_v0 = vadd.f32 %v8056_v29, %v10781_v43  ;;  %v3281_v47 = vpop.f32.mrb[87].mxu1  ;;  %3668 = vmatprep.mubr.bf16.mxu0 %v10927_v5  ;;  %vm3466_vm4 = vcmp.ge.f32.partialorder %v3418_v44, 0.0 }
 0x59e   :  { %v3512_v52 = vmul.f32 0.02, %v3416_v23  ;;  %v3417_v41 = vadd.f32 %v10781_v43, %v3281_v47  ;;  %vm3464_vm5 = vcmp.ge.f32.partialorder %v3416_v23, 0.0 }
 0x59f   :  { %vm3467_vm6 = vcmp.ge.f32.partialorder %v3419_v0, 0.0  ;;  %v3515_v6 = vmul.f32 0.02, %v3419_v0  ;;  %v3562_v55 = vsel %vm3466_vm4, %v3418_v44, %v3514_v40 }
 0x5a0   :  { %vm3465_vm7 = vcmp.ge.f32.partialorder %v3417_v41, 0.0  ;;  %v3513_v15 = vmul.f32 0.02, %v3417_v41  ;;  %v3560_v38 = vsel %vm3464_vm5, %v3416_v23, %v3512_v52  ;;  %v10981_v23 = vld [vmem:[%s12797_s0 + $0x94] ss:$12 sps:$4 sm:$0xff]  }
 0x5a1   :  { %v3563_v60 = vsel %vm3467_vm6, %v3419_v0, %v3515_v6 }
 0x5a2   :  { %v3561_v54 = vsel %vm3465_vm7, %v3417_v41, %v3513_v15  ;;  %v10931_v20 = vpack.c.bf16 %v3563_v60, %v3562_v55  ;;  %v10992_v41 = vld [vmem:[%s12797_s0 + $0x90] ss:$12 sps:$4 sm:$0xff]   ;;  %v10999_v60 = vld [vmem:[%s12797_s0 + $0xac] ss:$12 sps:$4 sm:$0xff]  }
 0x5a3   :  { %v10933_v48 = vpack.c.bf16 %v3561_v54, %v3560_v38 }
 0x5a4   :  { %13017 = vst [vmem:[#allocation5_spill] sm:$0xff] %v10931_v20  ;;  %3669 = vmatmul.mubr.bf16.gmra.mrb[44].mxu0 %v10938_v33 }
 0x5a5   :  { %13018 = vst [vmem:[#allocation6_spill] sm:$0xff] %v10933_v48  ;;  %8069 = vmatprep.subr.bf16.mxu1 %v10933_v48  ;;  %3676 = vmatprep.mubr.bf16.mxu0 %v10945_v14 }
 0x5a6   :  { %8070 = vmatpush3.bf16.msra.mxu1 %v10933_v48 }
 0x5a7   :  { %8071 = vmatprep.subr.bf16.mxu1 %v10931_v20 }
 0x5aa   :  { %v8059_v37 = vpop.f32.mrb[88].mxu1  ;;  %8072 = vmatpush3.bf16.msra.mxu1 %v10931_v20 }
 0x5ab   :  { %v3422_v58 = vadd.f32 %v8059_v37, %v10781_v43  ;;  %v3294_v21 = vpop.f32.mrb[89].mxu1 }
 0x5ac   :  { %v3420_v1 = vadd.f32 %v10781_v43, %v3294_v21  ;;  %v8060_v35 = vpop.f32.mrb[90].mxu1  ;;  %3677 = vmatmul.mubr.bf16.gmra.mrb[48].mxu0 %v10956_v17 }
 0x5ad   :  { %v3518_v11 = vmul.f32 0.02, %v3422_v58  ;;  %v3423_v49 = vadd.f32 %v8060_v35, %v10781_v43  ;;  %v3297_v57 = vpop.f32.mrb[91].mxu1  ;;  %3684 = vmatprep.mubr.bf16.mxu0 %v10963_v2  ;;  %vm3470_vm8 = vcmp.ge.f32.partialorder %v3422_v58, 0.0 }
 0x5ae   :  { %v3516_v16 = vmul.f32 0.02, %v3420_v1  ;;  %v3421_v10 = vadd.f32 %v10781_v43, %v3297_v57  ;;  %vm3468_vm9 = vcmp.ge.f32.partialorder %v3420_v1, 0.0 }
 0x5af   :  { %vm3471_vm10 = vcmp.ge.f32.partialorder %v3423_v49, 0.0  ;;  %v3519_v32 = vmul.f32 0.02, %v3423_v49  ;;  %v3566_v59 = vsel %vm3470_vm8, %v3422_v58, %v3518_v11 }
 0x5b0   :  { %vm3469_vm11 = vcmp.ge.f32.partialorder %v3421_v10, 0.0  ;;  %v3517_v53 = vmul.f32 0.02, %v3421_v10  ;;  %v3564_v19 = vsel %vm3468_vm9, %v3420_v1, %v3516_v16  ;;  %v11010_v16 = vld [vmem:[%s12797_s0 + $0xa8] ss:$12 sps:$4 sm:$0xff]  }
 0x5b1   :  { %v3567_v45 = vsel %vm3471_vm10, %v3423_v49, %v3519_v32  ;;  %v9308_v32 = vld [vmem:[%s12797_s0 + $0x20] ss:$12 sps:$4 sm:$0xff]  }
 0x5b2   :  { %v3565_v30 = vsel %vm3469_vm11, %v3421_v10, %v3517_v53  ;;  %v10967_v3 = vpack.c.bf16 %v3567_v45, %v3566_v59  ;;  %v11026_v10 = vld [vmem:[%s12797_s0 + $0xc0] ss:$12 sps:$4 sm:$0xff]   ;;  %v11035_v53 = vld [vmem:[%s12797_s0 + $0xdc] ss:$12 sps:$4 sm:$0xff]   ;;  %v9310_v59 = vld [vmem:[%s12797_s0 + $0x38] ss:$12 sps:$4 sm:$0xff]  }
 0x5b3   :  { %v10969_v44 = vpack.c.bf16 %v3565_v30, %v3564_v19  ;;  %v11044_v45 = vld [vmem:[%s12797_s0 + $0xd8] ss:$12 sps:$4 sm:$0xff]   ;;  %v9312_v19 = vld [vmem:[%s12797_s0 + $0x50] ss:$12 sps:$4 sm:$0xff]   ;;  %v11053_v30 = vld [vmem:[%s12797_s0 + $0xf4] ss:$12 sps:$4 sm:$0xff]  }
 0x5b4   :  { %13019 = vst [vmem:[#allocation7_spill] sm:$0xff] %v10967_v3  ;;  %3685 = vmatmul.mubr.bf16.gmra.mrb[52].mxu0 %v10974_v56 }
 0x5b5   :  { %13020 = vst [vmem:[#allocation8_spill] sm:$0xff] %v10969_v44  ;;  %8073 = vmatprep.subr.bf16.mxu1 %v10969_v44  ;;  %3692 = vmatprep.mubr.bf16.mxu0 %v10981_v23 }
 0x5b6   :  { %8074 = vmatpush3.bf16.msra.mxu1 %v10969_v44 }
 0x5b7   :  { %8075 = vmatprep.subr.bf16.mxu1 %v10967_v3 }
 0x5ba   :  { %v8063_v29 = vpop.f32.mrb[92].mxu1  ;;  %8076 = vmatpush3.bf16.msra.mxu1 %v10967_v3 }
 0x5bb   :  { %v3426_v40 = vadd.f32 %v8063_v29, %v10781_v43  ;;  %v3310_v0 = vpop.f32.mrb[93].mxu1  ;;  %v9314_v29 = vld [vmem:[%s12797_s0 + $0x68] ss:$12 sps:$4 sm:$0xff]  }
 0x5bc   :  { %v3424_v47 = vadd.f32 %v10781_v43, %v3310_v0  ;;  %v8064_v52 = vpop.f32.mrb[94].mxu1  ;;  %3693 = vmatmul.mubr.bf16.gmra.mrb[56].mxu0 %v10992_v41  ;;  %v9316_v0 = vld [vmem:[%s12797_s0 + $0x80] ss:$12 sps:$4 sm:$0xff]  }
 0x5bd   :  { %v3522_v6 = vmul.f32 0.02, %v3426_v40  ;;  %v3427_v15 = vadd.f32 %v8064_v52, %v10781_v43  ;;  %v3313_v55 = vpop.f32.mrb[95].mxu1  ;;  %3700 = vmatprep.mubr.bf16.mxu0 %v10999_v60  ;;  %vm3474_vm12 = vcmp.ge.f32.partialorder %v3426_v40, 0.0  ;;  %v9318_v52 = vld [vmem:[%s12797_s0 + $0x98] ss:$12 sps:$4 sm:$0xff]  }
 0x5be   :  { %v3520_v38 = vmul.f32 0.02, %v3424_v47  ;;  %v3425_v54 = vadd.f32 %v10781_v43, %v3313_v55  ;;  %vm3472_vm13 = vcmp.ge.f32.partialorder %v3424_v47, 0.0  ;;  %v11017_v43 = vld [vmem:[%s12797_s0 + $0xc4] ss:$12 sps:$4 sm:$0xff]  }
 0x5bf   :  { %vm3475_vm14 = vcmp.ge.f32.partialorder %v3427_v15, 0.0  ;;  %v3523_v37 = vmul.f32 0.02, %v3427_v15  ;;  %v3570_v21 = vsel %vm3474_vm12, %v3426_v40, %v3522_v6  ;;  %v11062_v40 = vld [vmem:[%s12797_s0 + $0xf0] ss:$12 sps:$4 sm:$0xff]  }
 0x5c0   :  { %vm3473_vm15 = vcmp.ge.f32.partialorder %v3425_v54, 0.0  ;;  %v3521_v58 = vmul.f32 0.02, %v3425_v54  ;;  %v3568_v35 = vsel %vm3472_vm13, %v3424_v47, %v3520_v38  ;;  %v11071_v47 = vld [vmem:[%s12797_s0 + $0x10c] ss:$12 sps:$4 sm:$0xff]  }
 0x5c1   :  { %v3571_v1 = vsel %vm3475_vm14, %v3427_v15, %v3523_v37  ;;  %v11080_v6 = vld [vmem:[%s12797_s0 + $0x108] ss:$12 sps:$4 sm:$0xff]   ;;  %v9320_v15 = vld [vmem:[%s12797_s0 + $0xb0] ss:$12 sps:$4 sm:$0xff]   ;;  %v9324_v37 = vld [vmem:[%s12797_s0 + $0xe0] ss:$12 sps:$4 sm:$0xff]  }
 0x5c2   :  { %v3569_v11 = vsel %vm3473_vm15, %v3425_v54, %v3521_v58  ;;  %v11003_v49 = vpack.c.bf16 %v3571_v1, %v3570_v21  ;;  %13023 = vst [vmem:[#allocation11_spill] sm:$0xff] %v11080_v6  ;;  %v11089_v55 = vld [vmem:[%s12797_s0 + $0x124] ss:$12 sps:$4 sm:$0xff]   ;;  %v9322_v38 = vld [vmem:[%s12797_s0 + $0xc8] ss:$12 sps:$4 sm:$0xff]  }
 0x5c3   :  { %v11005_v57 = vpack.c.bf16 %v3569_v11, %v3568_v35  ;;  %13024 = vst [vmem:[#allocation12_spill] sm:$0xff] %v11089_v55  ;;  %v11098_v54 = vld [vmem:[%s12797_s0 + $0x120] ss:$12 sps:$4 sm:$0xff]   ;;  %v11107_v58 = vld [vmem:[%s12797_s0 + $0x13c] ss:$12 sps:$4 sm:$0xff]  }
 0x5c4   :  { %13021 = vst [vmem:[#allocation9_spill] sm:$0xff] %v11003_v49  ;;  %3701 = vmatmul.mubr.bf16.gmra.mrb[60].mxu0 %v11010_v16  ;;  %13025 = vst [vmem:[#allocation13_spill] sm:$0xff] %v11098_v54  ;;  %v9326_v21 = vld [vmem:[%s12797_s0 + $0xf8] ss:$12 sps:$4 sm:$0xff]   ;;  %v9328_v35 = vld [vmem:[%s12797_s0 + $0x110] ss:$12 sps:$4 sm:$0xff]  }
 0x5c5   :  { %13022 = vst [vmem:[#allocation10_spill] sm:$0xff] %v11005_v57  ;;  %8077 = vmatprep.subr.bf16.mxu1 %v11005_v57  ;;  %3708 = vmatprep.mubr.bf16.mxu0 %v11017_v43  ;;  %13026 = vst [vmem:[#allocation14_spill] sm:$0xff] %v11107_v58  ;;  %v11116_v1 = vld [vmem:[%s12797_s0 + $0x138] ss:$12 sps:$4 sm:$0xff]   ;;  %v11125_v11 = vld [vmem:[%s12797_s0 + $0x154] ss:$12 sps:$4 sm:$0xff]  }
 0x5c6   :  { %8078 = vmatpush3.bf16.msra.mxu1 %v11005_v57  ;;  %13027 = vst [vmem:[#allocation15_spill] sm:$0xff] %v11116_v1  ;;  %13028 = vst [vmem:[#allocation16_spill] sm:$0xff] %v11125_v11  ;;  %v8975_v57 = vld [vmem:[%s12800_s4 + $0x68] sm:$0xff]  }
 0x5c7   :  { %8079 = vmatprep.subr.bf16.mxu1 %v11003_v49 }
 0x5ca   :  { %8080 = vmatpush3.bf16.msra.mxu1 %v11003_v49  ;;  %v8974_v49 = vld [vmem:[%s12800_s4 + $0x60] sm:$0xff]  }
 0x5cc   :  { %3709 = vmatmul.mubr.bf16.gmra.mrb[64].mxu0 %v11026_v10 }
 0x5cd   :  { %8082 = vmatmul.mubr.bf16.vlgmr.msra.gmra.mrb[192].mxu1 %v9308_v32  ;;  %3716 = vmatprep.mubr.bf16.mxu0 %v11035_v53  ;;  %v9330_v32 = vld [vmem:[%s12797_s0 + $0x128] ss:$12 sps:$4 sm:$0xff]  }
 0x5ce   :  { %8085 = vmatprep.mubr.bf16.mxu1 %v9310_v59  ;;  %v11134_v59 = vld [vmem:[%s12797_s0 + $0x150] ss:$12 sps:$4 sm:$0xff]  }
 0x5cf   :  { %13029 = vst [vmem:[#allocation17_spill] sm:$0xff] %v11134_v59 }
 0x5d4   :  { %3717 = vmatmul.mubr.bf16.gmra.mrb[68].mxu0 %v11044_v45 }
 0x5d5   :  { %8086 = vmatmul.mubr.bf16.gmra.mrb[196].mxu1 %v9312_v19  ;;  %3724 = vmatprep.mubr.bf16.mxu0 %v11053_v30  ;;  %v9332_v19 = vld [vmem:[%s12797_s0 + $0x140] ss:$12 sps:$4 sm:$0xff]  }
 0x5d6   :  { %8089 = vmatprep.mubr.bf16.mxu1 %v9314_v29  ;;  %v11143_v29 = vld [vmem:[%s12797_s0 + $0x16c] ss:$12 sps:$4 sm:$0xff]  }
 0x5d7   :  { %13030 = vst [vmem:[#allocation18_spill] sm:$0xff] %v11143_v29 }
 0x5dc   :  { %3725 = vmatmul.mubr.bf16.gmra.mrb[72].mxu0 %v11062_v40 }
 0x5dd   :  { %8090 = vmatmul.mubr.bf16.gmra.mrb[200].mxu1 %v9316_v0  ;;  %3732 = vmatprep.mubr.bf16.mxu0 %v11071_v47  ;;  %v9334_v0 = vld [vmem:[%s12797_s0 + $0x158] ss:$12 sps:$4 sm:$0xff]  }
 0x5de   :  { %8093 = vmatprep.mubr.bf16.mxu1 %v9318_v52  ;;  %v11152_v52 = vld [vmem:[%s12797_s0 + $0x168] ss:$12 sps:$4 sm:$0xff]  }
 0x5df   :  { %13031 = vst [vmem:[#allocation19_spill] sm:$0xff] %v11152_v52 }
 0x5e4   :  { %3733 = vmatmul.mubr.bf16.gmra.mrb[76].mxu0 %v11080_v6 }
 0x5e5   :  { %8094 = vmatmul.mubr.bf16.gmra.mrb[204].mxu1 %v9320_v15  ;;  %3740 = vmatprep.mubr.bf16.mxu0 %v11089_v55  ;;  %v9336_v15 = vld [vmem:[%s12797_s0 + $0x170] ss:$12 sps:$4 sm:$0xff]  }
 0x5e6   :  { %8097 = vmatprep.mubr.bf16.mxu1 %v9322_v38  ;;  %v11161_v38 = vld [vmem:[%s12797_s0 + $0x184] ss:$12 sps:$4 sm:$0xff]  }
 0x5e7   :  { %13032 = vst [vmem:[#allocation20_spill] sm:$0xff] %v11161_v38 }
 0x5ec   :  { %3741 = vmatmul.mubr.bf16.gmra.mrb[80].mxu0 %v11098_v54 }
 0x5ed   :  { %8098 = vmatmul.mubr.bf16.gmra.mrb[208].mxu1 %v9324_v37  ;;  %3748 = vmatprep.mubr.bf16.mxu0 %v11107_v58  ;;  %v9338_v37 = vld [vmem:[%s12797_s0 + $0x188] ss:$12 sps:$4 sm:$0xff]  }
 0x5ee   :  { %8101 = vmatprep.mubr.bf16.mxu1 %v9326_v21  ;;  %v8970_v21 = vld [vmem:[%s12800_s4 + $0x40] sm:$0xff]  }
 0x5ef   :  { %8129 = vmatprep.subr.bf16.mxu1 %v8970_v21 }
 0x5f0   :  { %8130 = vmatpush3.bf16.msra.mxu1 %v8970_v21  ;;  %v8973_v21 = vld [vmem:[%s12800_s4 + $0x58] sm:$0xff]  }
 0x5f4   :  { %3749 = vmatmul.mubr.bf16.gmra.mrb[84].mxu0 %v11116_v1 }
 0x5f5   :  { %8102 = vmatmul.mubr.bf16.gmra.mrb[212].mxu1 %v9328_v35  ;;  %3756 = vmatprep.mubr.bf16.mxu0 %v11125_v11  ;;  %v8971_v35 = vld [vmem:[%s12800_s4 + $0x48] sm:$0xff]  }
 0x5f6   :  { %8105 = vmatprep.mubr.bf16.mxu1 %v9330_v32  ;;  %v11176_v32 = vld [vmem:[%s12797_s0 + $0x180] ss:$12 sps:$4 sm:$0xff]   ;;  %8131 = vmatprep.subr.bf16.mxu1 %v8971_v35 }
 0x5f7   :  { %13033 = vst [vmem:[#allocation3_spill] sm:$0xff] %v11176_v32  ;;  %8132 = vmatpush3.bf16.msra.mxu1 %v8971_v35  ;;  %v11206_v35 = vld [vmem:[%s12797_s0 + $0x1b4] ss:$12 sps:$4 sm:$0xff]  }
 0x5f8   :  { %13036 = vst [vmem:[#allocation32_spill] sm:$0xff] %v11206_v35 }
 0x5fc   :  { %3757 = vmatmul.mubr.bf16.gmra.mrb[88].mxu0 %v11134_v59 }
 0x5fd   :  { %8106 = vmatmul.mubr.bf16.gmra.mrb[216].mxu1 %v9332_v19  ;;  %3764 = vmatprep.mubr.bf16.mxu0 %v11143_v29  ;;  %v9340_v19 = vld [vmem:[%s12797_s0 + $0x1a0] ss:$12 sps:$4 sm:$0xff]  }
 0x5fe   :  { %8109 = vmatprep.mubr.bf16.mxu1 %v9334_v0  ;;  %v11185_v0 = vld [vmem:[%s12797_s0 + $0x19c] ss:$12 sps:$4 sm:$0xff]  }
 0x5ff   :  { %13034 = vst [vmem:[#allocation30_spill] sm:$0xff] %v11185_v0 }
 0x604   :  { %3765 = vmatmul.mubr.bf16.gmra.mrb[92].mxu0 %v11152_v52 }
 0x605   :  { %8110 = vmatmul.mubr.bf16.gmra.mrb[220].mxu1 %v9336_v15  ;;  %3772 = vmatprep.mubr.bf16.mxu0 %v11161_v38  ;;  %v9342_v15 = vld [vmem:[%s12797_s0 + $0x1b8] ss:$12 sps:$4 sm:$0xff]  }
 0x606   :  { %8113 = vmatprep.mubr.bf16.mxu1 %v9338_v37  ;;  %v8972_v37 = vld [vmem:[%s12800_s4 + $0x50] sm:$0xff]  }
 0x607   :  { %8133 = vmatprep.subr.bf16.mxu1 %v8972_v37 }
 0x608   :  { %8134 = vmatpush3.bf16.msra.mxu1 %v8972_v37  ;;  %v11218_v37 = vld [vmem:[%s12797_s0 + $0x1e8] ss:$12 sps:$4 sm:$0xff]  }
 0x609   :  { %8135 = vmatprep.subr.bf16.mxu1 %v8973_v21  ;;  %13038 = vst [vmem:[#allocation34_spill] sm:$0xff] %v11218_v37 }
 0x60c   :  { %3773 = vmatmul.mubr.bf16.gmra.mrb[96].mxu0 %v11176_v32  ;;  %8136 = vmatpush3.bf16.msra.mxu1 %v8973_v21  ;;  %v11236_v21 = vld [vmem:[%s12797_s0 + $0x1cc] ss:$12 sps:$4 sm:$0xff]  }
 0x60d   :  { %8114 = vmatmul.mubr.bf16.gmra.mrb[224].mxu1 %v9340_v19  ;;  %3780 = vmatprep.mubr.bf16.mxu0 %v11185_v0  ;;  %v11200_v19 = vld [vmem:[%s12797_s0 + $0x198] ss:$12 sps:$4 sm:$0xff]   ;;  %13040 = vst [vmem:[#allocation36_spill] sm:$0xff] %v11236_v21 }
 0x60e   :  { %8117 = vmatprep.mubr.bf16.mxu1 %v9342_v15  ;;  %13035 = vst [vmem:[#allocation31_spill] sm:$0xff] %v11200_v19  ;;  %v11212_v15 = vld [vmem:[%s12797_s0 + $0x1d0] ss:$12 sps:$4 sm:$0xff]   ;;  %8137 = vmatprep.subr.bf16.mxu1 %v8974_v49 }
 0x60f   :  { %13037 = vst [vmem:[#allocation33_spill] sm:$0xff] %v11212_v15 }
 0x610   :  { %8138 = vmatpush3.bf16.msra.mxu1 %v8974_v49  ;;  %v11248_v49 = vld [vmem:[%s12797_s0 + $0x218] ss:$12 sps:$4 sm:$0xff]  }
 0x611   :  { %8139 = vmatprep.subr.bf16.mxu1 %v8975_v57  ;;  %13042 = vst [vmem:[#allocation38_spill] sm:$0xff] %v11248_v49 }
 0x614   :  { %3781 = vmatmul.mubr.bf16.gmra.mrb[100].mxu0 %v11200_v19  ;;  %8140 = vmatpush3.bf16.msra.mxu1 %v8975_v57  ;;  %v11266_v57 = vld [vmem:[%s12797_s0 + $0x1e4] ss:$12 sps:$4 sm:$0xff]  }
 0x615   :  { %3788 = vmatprep.mubr.bf16.mxu0 %v11206_v35  ;;  %8118 = vmatmul.mubr.bf16.gmra.mrb[228].mxu1 %v11212_v15  ;;  %v11230_v15 = vld [vmem:[%s12797_s0 + $0x1b0] ss:$12 sps:$4 sm:$0xff]   ;;  %13044 = vst [vmem:[#allocation40_spill] sm:$0xff] %v11266_v57 }
 0x616   :  { %8121 = vmatprep.mubr.bf16.mxu1 %v11218_v37  ;;  %13039 = vst [vmem:[#allocation35_spill] sm:$0xff] %v11230_v15  ;;  %v11242_v37 = vld [vmem:[%s12797_s0 + $0x200] ss:$12 sps:$4 sm:$0xff]  }
 0x617   :  { %13041 = vst [vmem:[#allocation37_spill] sm:$0xff] %v11242_v37 }
 0x61c   :  { %3789 = vmatmul.mubr.bf16.gmra.mrb[104].mxu0 %v11230_v15  ;;  %v8976_v15 = vld [vmem:[%s12800_s4 + $0x70] sm:$0xff]  }
 0x61d   :  { %3796 = vmatprep.mubr.bf16.mxu0 %v11236_v21  ;;  %8122 = vmatmul.mubr.bf16.gmra.mrb[232].mxu1 %v11242_v37  ;;  %v11257_v21 = vld [vmem:[%s12797_s0 + $0x1c8] ss:$12 sps:$4 sm:$0xff]   ;;  %v8977_v37 = vld [vmem:[%s12800_s4 + $0x78] sm:$0xff]  }
 0x61e   :  { %8125 = vmatprep.mubr.bf16.mxu1 %v11248_v49  ;;  %8141 = vmatprep.subr.bf16.mxu1 %v8976_v15  ;;  %13043 = vst [vmem:[#allocation39_spill] sm:$0xff] %v11257_v21  ;;  %v11278_v49 = vld [vmem:[%s12797_s0 + $0x1e0] ss:$12 sps:$4 sm:$0xff]  }
 0x61f   :  { %8142 = vmatpush3.bf16.msra.mxu1 %v8976_v15  ;;  %v11272_v15 = vld [vmem:[%s12797_s0 + $0x230] ss:$12 sps:$4 sm:$0xff]   ;;  %13046 = vst [vmem:[#allocation42_spill] sm:$0xff] %v11278_v49 }
 0x620   :  { %13045 = vst [vmem:[#allocation41_spill] sm:$0xff] %v11272_v15  ;;  %8143 = vmatprep.subr.bf16.mxu1 %v8977_v37 }
 0x623   :  { %8144 = vmatpush3.bf16.msra.mxu1 %v8977_v37  ;;  %v11296_v37 = vld [vmem:[%s12797_s0 + $0x214] ss:$12 sps:$4 sm:$0xff]  }
 0x624   :  { %3797 = vmatmul.mubr.bf16.gmra.mrb[108].mxu0 %v11257_v21  ;;  %13049 = vst [vmem:[#allocation45_spill] sm:$0xff] %v11296_v37 }
 0x625   :  { %3804 = vmatprep.mubr.bf16.mxu0 %v11266_v57  ;;  %8126 = vmatmul.mubr.bf16.gmra.mrb[236].mxu1 %v11272_v15  ;;  %v11284_v57 = vld [vmem:[%s12797_s0 + $0x1fc] ss:$12 sps:$4 sm:$0xff]   ;;  %v11290_v15 = vld [vmem:[%s12797_s0 + $0x1f8] ss:$12 sps:$4 sm:$0xff]  }
 0x626   :  { %13047 = vst [vmem:[#allocation43_spill] sm:$0xff] %v11284_v57  ;;  %13048 = vst [vmem:[#allocation44_spill] sm:$0xff] %v11290_v15 }
 0x62c   :  { %3805 = vmatmul.mubr.bf16.gmra.mrb[112].mxu0 %v11278_v49  ;;  %v11302_v49 = vld [vmem:[%s12797_s0 + $0x210] ss:$12 sps:$4 sm:$0xff]  }
 0x62d   :  { %3812 = vmatprep.mubr.bf16.mxu0 %v11284_v57  ;;  %13050 = vst [vmem:[#allocation46_spill] sm:$0xff] %v11302_v49  ;;  %v11308_v57 = vld [vmem:[%s12797_s0 + $0x22c] ss:$12 sps:$4 sm:$0xff]  }
 0x62e   :  { %13051 = vst [vmem:[#allocation47_spill] sm:$0xff] %v11308_v57 }
 0x634   :  { %3813 = vmatmul.mubr.bf16.gmra.mrb[116].mxu0 %v11290_v15  ;;  %v11314_v15 = vld [vmem:[%s12797_s0 + $0x228] ss:$12 sps:$4 sm:$0xff]  }
 0x635   :  { %3820 = vmatprep.mubr.bf16.mxu0 %v11296_v37  ;;  %13052 = vst [vmem:[#allocation48_spill] sm:$0xff] %v11314_v15  ;;  %v11320_v37 = vld [vmem:[%s12797_s0 + $0x4] ss:$12 sps:$4 sm:$0xff]  }
 0x636   :  { %13053 = vst [vmem:[#allocation49_spill] sm:$0xff] %v11320_v37 }
 0x63c   :  { %3821 = vmatmul.mubr.bf16.gmra.mrb[120].mxu0 %v11302_v49  ;;  %v8978_v49 = vld [vmem:[%s12800_s4] sm:$0xff]  }
 0x63d   :  { %3828 = vmatprep.mubr.bf16.mxu0 %v11308_v57  ;;  %8193 = vmatprep.subr.bf16.mxu1 %v8978_v49 }
 0x644   :  { %3829 = vmatmul.mubr.bf16.gmra.mrb[124].mxu0 %v11314_v15 }
 0x645   :  { %4681 = vmatprep.mubr.bf16.mxu0 %v11320_v37 }
 0x65f   :  { %v3646_v57 = vpop.f32.mrb[32].mxu0 }
 0x660   :  { %v3648_v21 = vpop.f32.mrb[33].mxu0 }
 0x661   :  { %v3649_v3 = vpop.f32.mrb[34].mxu0 }
 0x662   :  { %v3651_v35 = vpop.f32.mrb[35].mxu0 }
 0x667   :  { %v3654_v19 = vpop.f32.mrb[36].mxu0 }
 0x668   :  { %v3656_v44 = vpop.f32.mrb[37].mxu0 }
 0x669   :  { %v3657_v20 = vpop.f32.mrb[38].mxu0 }
 0x66a   :  { %v3659_v15 = vpop.f32.mrb[39].mxu0 }
 0x66f   :  { %v3662_v0 = vpop.f32.mrb[40].mxu0 }
 0x670   :  { %v3664_v32 = vpop.f32.mrb[41].mxu0 }
 0x671   :  { %v3665_v48 = vpop.f32.mrb[42].mxu0 }
 0x672   :  { %v3667_v46 = vpop.f32.mrb[43].mxu0 }
 0x677   :  { %v3670_v38 = vpop.f32.mrb[44].mxu0 }
 0x678   :  { %v3672_v52 = vpop.f32.mrb[45].mxu0 }
 0x679   :  { %v3673_v37 = vpop.f32.mrb[46].mxu0 }
 0x67a   :  { %v3675_v63 = vpop.f32.mrb[47].mxu0 }
 0x67f   :  { %v11326_v61 = vpop.f32.mrb[48].mxu0 }
 0x680   :  { %v3680_v29 = vpop.f32.mrb[49].mxu0 }
 0x681   :  { %v11328_v59 = vpop.f32.mrb[50].mxu0 }
 0x682   :  { %v3683_v21 = vpop.f32.mrb[51].mxu0 }
 0x687   :  { %v3686_v24 = vpop.f32.mrb[52].mxu0 }
 0x688   :  { %v3688_v35 = vpop.f32.mrb[53].mxu0 }
 0x689   :  { %v11330_v51 = vpop.f32.mrb[54].mxu0 }
 0x68a   :  { %v3691_v44 = vpop.f32.mrb[55].mxu0 }
 0x68f   :  { %v11332_v15 = vpop.f32.mrb[56].mxu0 }
 0x690   :  { %v3696_v32 = vpop.f32.mrb[57].mxu0 }
 0x691   :  { %v11334_v11 = vpop.f32.mrb[58].mxu0 }
 0x692   :  { %v3699_v46 = vpop.f32.mrb[59].mxu0 }
 0x697   :  { %v11336_v52 = vpop.f32.mrb[60].mxu0 }
 0x698   :  { %v3704_v63 = vpop.f32.mrb[61].mxu0 }
 0x699   :  { %v11338_v1 = vpop.f32.mrb[62].mxu0 }
 0x69a   :  { %v3707_v29 = vpop.f32.mrb[63].mxu0 }
 0x69b   :  { %v8979_v29 = vld [vmem:[%s12800_s4 + $0x8] sm:$0xff]  }
 0x69f   :  { %v11340_v9 = vpop.f32.mrb[64].mxu0 }
 0x6a0   :  { %v3712_v21 = vpop.f32.mrb[65].mxu0  ;;  %v8083_v34 = vpop.f32.mrb[192].mxu1 }
 0x6a1   :  { %v3880_v35 = vadd.f32 %v8083_v34, %v3654_v19  ;;  %v11342_v58 = vpop.f32.mrb[66].mxu0  ;;  %v3871_v44 = vpop.f32.mrb[193].mxu1 }
 0x6a2   :  { %v3872_v54 = vadd.f32 %v3871_v44, %v3646_v57  ;;  %v3715_v27 = vpop.f32.mrb[67].mxu0  ;;  %v8084_v32 = vpop.f32.mrb[194].mxu1  ;;  %v8980_v57 = vld [vmem:[%s12800_s4 + $0x10] sm:$0xff]  }
 0x6a3   :  { %v3883_v12 = vadd.f32 %v8084_v32, %v3657_v20  ;;  %v3874_v55 = vpop.f32.mrb[195].mxu1 }
 0x6a4   :  { %v3875_v46 = vadd.f32 %v3874_v55, %v3649_v3 }
 0x6a5   :  { %v4063_v6 = vpack.c.bf16 %v3883_v12, %v3880_v35 }
 0x6a6   :  { %v4062_v4 = vpack.c.bf16 %v3875_v46, %v3872_v54 }
 0x6a7   :  { %v11344_v63 = vpop.f32.mrb[68].mxu0 }
 0x6a8   :  { %v3720_v21 = vpop.f32.mrb[69].mxu0  ;;  %v8087_v25 = vpop.f32.mrb[196].mxu1  ;;  %8145 = vmatprep.mubr.bf16.mxu1 %v4062_v4  ;;  %4650 = vmatpush1.bf16.msra.mxu0 %v4062_v4 }
 0x6a9   :  { %v3896_v34 = vadd.f32 %v8087_v25, %v3670_v38  ;;  %v11349_v19 = vpop.f32.mrb[70].mxu0  ;;  %v3887_v27 = vpop.f32.mrb[197].mxu1  ;;  %8146 = vmatmul.mubr.bf16.vlgmr.msra.gmra.mrb[240].mxu1 %v4063_v6  ;;  %4651 = vmatprep.subr.bf16.mxu0 %v12939_v36 }
 0x6aa   :  { %v3888_v20 = vadd.f32 %v3887_v27, %v3662_v0  ;;  %v3723_v12 = vpop.f32.mrb[71].mxu0  ;;  %v8088_v3 = vpop.f32.mrb[198].mxu1  ;;  %8194 = vmatpush3.bf16.msra.mxu1 %v8978_v49  ;;  %v8981_v0 = vld [vmem:[%s12800_s4 + $0x18] sm:$0xff]   ;;  %v8982_v27 = vld [vmem:[%s12800_s4 + $0x20] sm:$0xff]  }
 0x6ab   :  { %v3899_v55 = vadd.f32 %v8088_v3, %v3673_v37  ;;  %v3890_v54 = vpop.f32.mrb[199].mxu1  ;;  %8195 = vmatprep.subr.bf16.mxu1 %v8979_v29 }
 0x6ac   :  { %v3891_v35 = vadd.f32 %v3890_v54, %v3665_v48  ;;  %4652 = vmatpush1.bf16.msra.mxu0 %v4063_v6 }
 0x6ad   :  { %v4065_v25 = vpack.c.bf16 %v3899_v55, %v3896_v34  ;;  %4653 = vmatprep.subr.bf16.mxu0 %v12939_v36 }
 0x6ae   :  { %v4064_v4 = vpack.c.bf16 %v3891_v35, %v3888_v20  ;;  %8196 = vmatpush3.bf16.msra.mxu1 %v8979_v29 }
 0x6af   :  { %v11356_v38 = vpop.f32.mrb[72].mxu0  ;;  %8197 = vmatprep.subr.bf16.mxu1 %v8980_v57 }
 0x6b0   :  { %v3728_v49 = vpop.f32.mrb[73].mxu0  ;;  %v8091_v37 = vpop.f32.mrb[200].mxu1  ;;  %8149 = vmatprep.mubr.bf16.mxu1 %v4064_v4  ;;  %4654 = vmatpush1.bf16.msra.mxu0 %v4064_v4 }
 0x6b1   :  { %v3912_v44 = vadd.f32 %v8091_v37, %v3686_v24  ;;  %v11361_v32 = vpop.f32.mrb[74].mxu0  ;;  %v3903_v48 = vpop.f32.mrb[201].mxu1  ;;  %8150 = vmatmul.mubr.bf16.gmra.mrb[244].mxu1 %v4065_v25  ;;  %4655 = vmatprep.subr.bf16.mxu0 %v12939_v36  ;;  %v8984_v37 = vld [vmem:[%s12800_s4 + $0x30] sm:$0xff]  }
 0x6b2   :  { %v3904_v6 = vadd.f32 %v3903_v48, %v11326_v61  ;;  %v3731_v46 = vpop.f32.mrb[75].mxu0  ;;  %v8092_v29 = vpop.f32.mrb[202].mxu1  ;;  %8198 = vmatpush3.bf16.msra.mxu1 %v8980_v57 }
 0x6b3   :  { %v3915_v21 = vadd.f32 %v8092_v29, %v11330_v51  ;;  %v3906_v34 = vpop.f32.mrb[203].mxu1  ;;  %8199 = vmatprep.subr.bf16.mxu1 %v8981_v0  ;;  %v8983_v51 = vld [vmem:[%s12800_s4 + $0x28] sm:$0xff]  }
 0x6b4   :  { %v3907_v24 = vadd.f32 %v3906_v34, %v11328_v59  ;;  %4656 = vmatpush1.bf16.msra.mxu0 %v4065_v25 }
 0x6b5   :  { %v4067_v20 = vpack.c.bf16 %v3915_v21, %v3912_v44  ;;  %4657 = vmatprep.subr.bf16.mxu0 %v12939_v36 }
 0x6b6   :  { %v4066_v12 = vpack.c.bf16 %v3907_v24, %v3904_v6  ;;  %8200 = vmatpush3.bf16.msra.mxu1 %v8981_v0 }
 0x6b7   :  { %v3734_v61 = vpop.f32.mrb[76].mxu0  ;;  %8201 = vmatprep.subr.bf16.mxu1 %v8982_v27 }
 0x6b8   :  { %v3736_v3 = vpop.f32.mrb[77].mxu0  ;;  %v8095_v55 = vpop.f32.mrb[204].mxu1  ;;  %8153 = vmatprep.mubr.bf16.mxu1 %v4066_v12  ;;  %4658 = vmatpush1.bf16.msra.mxu0 %v4066_v12 }
 0x6b9   :  { %v3928_v54 = vadd.f32 %v8095_v55, %v11336_v52  ;;  %v3737_v57 = vpop.f32.mrb[78].mxu0  ;;  %v3919_v59 = vpop.f32.mrb[205].mxu1  ;;  %8154 = vmatmul.mubr.bf16.gmra.mrb[248].mxu1 %v4067_v20  ;;  %4659 = vmatprep.subr.bf16.mxu0 %v12939_v36 }
 0x6ba   :  { %v3920_v35 = vadd.f32 %v3919_v59, %v11332_v15  ;;  %v3739_v25 = vpop.f32.mrb[79].mxu0  ;;  %v8096_v4 = vpop.f32.mrb[206].mxu1  ;;  %8202 = vmatpush3.bf16.msra.mxu1 %v8982_v27 }
 0x6bb   :  { %v3931_v0 = vadd.f32 %v8096_v4, %v11338_v1  ;;  %v3922_v49 = vpop.f32.mrb[207].mxu1  ;;  %8203 = vmatprep.subr.bf16.mxu1 %v8983_v51  ;;  %v8985_v1 = vld [vmem:[%s12800_s4 + $0x38] sm:$0xff]  }
 0x6bc   :  { %v3923_v52 = vadd.f32 %v3922_v49, %v11334_v11  ;;  %4660 = vmatpush1.bf16.msra.mxu0 %v4067_v20 }
 0x6bd   :  { %v4069_v44 = vpack.c.bf16 %v3931_v0, %v3928_v54  ;;  %4661 = vmatprep.subr.bf16.mxu0 %v12939_v36 }
 0x6be   :  { %v4068_v48 = vpack.c.bf16 %v3923_v52, %v3920_v35  ;;  %8204 = vmatpush3.bf16.msra.mxu1 %v8983_v51 }
 0x6bf   :  { %v3742_v15 = vpop.f32.mrb[80].mxu0  ;;  %8205 = vmatprep.subr.bf16.mxu1 %v8984_v37 }
 0x6c0   :  { %v3744_v6 = vpop.f32.mrb[81].mxu0  ;;  %v8099_v46 = vpop.f32.mrb[208].mxu1  ;;  %8157 = vmatprep.mubr.bf16.mxu1 %v4068_v48  ;;  %4662 = vmatpush1.bf16.msra.mxu0 %v4068_v48 }
 0x6c1   :  { %v3944_v29 = vadd.f32 %v8099_v46, %v11344_v63  ;;  %v3745_v21 = vpop.f32.mrb[82].mxu0  ;;  %v3935_v11 = vpop.f32.mrb[209].mxu1  ;;  %8158 = vmatmul.mubr.bf16.gmra.mrb[252].mxu1 %v4069_v44  ;;  %4663 = vmatprep.subr.bf16.mxu0 %v12939_v36 }
 0x6c2   :  { %v3936_v34 = vadd.f32 %v3935_v11, %v11340_v9  ;;  %v3747_v27 = vpop.f32.mrb[83].mxu0  ;;  %v8100_v24 = vpop.f32.mrb[210].mxu1  ;;  %8206 = vmatpush3.bf16.msra.mxu1 %v8984_v37 }
 0x6c3   :  { %v3947_v20 = vadd.f32 %v8100_v24, %v11349_v19  ;;  %v3938_v12 = vpop.f32.mrb[211].mxu1  ;;  %8207 = vmatprep.subr.bf16.mxu1 %v8985_v1 }
 0x6c4   :  { %v3939_v51 = vadd.f32 %v3938_v12, %v11342_v58  ;;  %4664 = vmatpush1.bf16.msra.mxu0 %v4069_v44 }
 0x6c5   :  { %v4071_v3 = vpack.c.bf16 %v3947_v20, %v3944_v29  ;;  %4665 = vmatprep.subr.bf16.mxu0 %v12939_v36 }
 0x6c6   :  { %v4070_v63 = vpack.c.bf16 %v3939_v51, %v3936_v34  ;;  %8208 = vmatpush3.bf16.msra.mxu1 %v8985_v1 }
 0x6c7   :  { %v3750_v55 = vpop.f32.mrb[84].mxu0 }
 0x6c8   :  { %v3752_v54 = vpop.f32.mrb[85].mxu0  ;;  %v8103_v59 = vpop.f32.mrb[212].mxu1  ;;  %8161 = vmatprep.mubr.bf16.mxu1 %v4070_v63  ;;  %4666 = vmatpush1.bf16.msra.mxu0 %v4070_v63 }
 0x6c9   :  { %v3960_v9 = vadd.f32 %v8103_v59, %v3734_v61  ;;  %v3753_v35 = vpop.f32.mrb[86].mxu0  ;;  %v3951_v25 = vpop.f32.mrb[213].mxu1  ;;  %8162 = vmatmul.mubr.bf16.gmra.mrb[0].mxu1 %v4071_v3  ;;  %4667 = vmatprep.subr.bf16.mxu0 %v12939_v36 }
 0x6ca   :  { %v3952_v19 = vadd.f32 %v3951_v25, %v11356_v38  ;;  %v3755_v58 = vpop.f32.mrb[87].mxu0  ;;  %v8104_v4 = vpop.f32.mrb[214].mxu1 }
 0x6cb   :  { %v3963_v0 = vadd.f32 %v8104_v4, %v3737_v57  ;;  %v3954_v49 = vpop.f32.mrb[215].mxu1 }
 0x6cc   :  { %v3955_v37 = vadd.f32 %v3954_v49, %v11361_v32  ;;  %4668 = vmatpush1.bf16.msra.mxu0 %v4071_v3 }
 0x6cd   :  { %v4073_v52 = vpack.c.bf16 %v3963_v0, %v3960_v9  ;;  %4669 = vmatprep.subr.bf16.mxu0 %v12939_v36 }
 0x6ce   :  { %v4072_v44 = vpack.c.bf16 %v3955_v37, %v3952_v19 }
 0x6cf   :  { %v3758_v48 = vpop.f32.mrb[88].mxu0 }
 0x6d0   :  { %v3760_v61 = vpop.f32.mrb[89].mxu0  ;;  %v8107_v1 = vpop.f32.mrb[216].mxu1  ;;  %8165 = vmatprep.mubr.bf16.mxu1 %v4072_v44  ;;  %4670 = vmatpush1.bf16.msra.mxu0 %v4072_v44 }
 0x6d1   :  { %v3976_v6 = vadd.f32 %v8107_v1, %v3750_v55  ;;  %v3761_v46 = vpop.f32.mrb[90].mxu0  ;;  %v3967_v29 = vpop.f32.mrb[217].mxu1  ;;  %8166 = vmatmul.mubr.bf16.gmra.mrb[4].mxu1 %v4073_v52  ;;  %4671 = vmatprep.subr.bf16.mxu0 %v12939_v36 }
 0x6d2   :  { %v3968_v38 = vadd.f32 %v3967_v29, %v3742_v15  ;;  %v3763_v57 = vpop.f32.mrb[91].mxu0  ;;  %v8108_v11 = vpop.f32.mrb[218].mxu1 }
 0x6d3   :  { %v3979_v32 = vadd.f32 %v8108_v11, %v3753_v35  ;;  %v3970_v34 = vpop.f32.mrb[219].mxu1 }
 0x6d4   :  { %v3971_v27 = vadd.f32 %v3970_v34, %v3745_v21  ;;  %4672 = vmatpush1.bf16.msra.mxu0 %v4073_v52 }
 0x6d5   :  { %v4075_v24 = vpack.c.bf16 %v3979_v32, %v3976_v6  ;;  %4673 = vmatprep.subr.bf16.mxu0 %v12939_v36 }
 0x6d6   :  { %v4074_v20 = vpack.c.bf16 %v3971_v27, %v3968_v38 }
 0x6d7   :  { %v3766_v12 = vpop.f32.mrb[92].mxu0 }
 0x6d8   :  { %v3768_v51 = vpop.f32.mrb[93].mxu0  ;;  %v8111_v3 = vpop.f32.mrb[220].mxu1  ;;  %8169 = vmatprep.mubr.bf16.mxu1 %v4074_v20  ;;  %4674 = vmatpush1.bf16.msra.mxu0 %v4074_v20 }
 0x6d9   :  { %v3992_v63 = vadd.f32 %v8111_v3, %v3766_v12  ;;  %v3769_v55 = vpop.f32.mrb[94].mxu0  ;;  %v3983_v54 = vpop.f32.mrb[221].mxu1  ;;  %8170 = vmatmul.mubr.bf16.gmra.mrb[8].mxu1 %v4075_v24  ;;  %4675 = vmatprep.subr.bf16.mxu0 %v12939_v36 }
 0x6da   :  { %v3984_v15 = vadd.f32 %v3983_v54, %v3758_v48  ;;  %v3771_v59 = vpop.f32.mrb[95].mxu0  ;;  %v8112_v9 = vpop.f32.mrb[222].mxu1 }
 0x6db   :  { %v3995_v21 = vadd.f32 %v8112_v9, %v3769_v55  ;;  %v3986_v35 = vpop.f32.mrb[223].mxu1 }
 0x6dc   :  { %v3987_v25 = vadd.f32 %v3986_v35, %v3761_v46  ;;  %4676 = vmatpush1.bf16.msra.mxu0 %v4075_v24 }
 0x6dd   :  { %v4077_v19 = vpack.c.bf16 %v3995_v21, %v3992_v63  ;;  %4677 = vmatprep.subr.bf16.mxu0 %v12939_v36 }
 0x6de   :  { %v4076_v58 = vpack.c.bf16 %v3987_v25, %v3984_v15 }
 0x6df   :  { %v3774_v4 = vpop.f32.mrb[96].mxu0 }
 0x6e0   :  { %v3776_v0 = vpop.f32.mrb[97].mxu0  ;;  %v8115_v49 = vpop.f32.mrb[224].mxu1  ;;  %8173 = vmatprep.mubr.bf16.mxu1 %v4076_v58  ;;  %4678 = vmatpush1.bf16.msra.mxu0 %v4076_v58 }
 0x6e1   :  { %v3777_v37 = vpop.f32.mrb[98].mxu0  ;;  %v3999_v52 = vpop.f32.mrb[225].mxu1  ;;  %8174 = vmatmul.mubr.bf16.gmra.mrb[12].mxu1 %v4077_v19  ;;  %4679 = vmatprep.subr.bf16.mxu0 %v12939_v36 }
 0x6e2   :  { %v4000_v44 = vadd.f32 %v3999_v52, %v3774_v4  ;;  %v3779_v48 = vpop.f32.mrb[99].mxu0  ;;  %v8116_v61 = vpop.f32.mrb[226].mxu1 }
 0x6e3   :  { %v4002_v1 = vpop.f32.mrb[227].mxu1 }
 0x6e4   :  { %v4003_v6 = vadd.f32 %v4002_v1, %v3777_v37  ;;  %4680 = vmatpush1.bf16.msra.mxu0 %v4077_v19 }
 0x6e5   :  { %5461 = vmatprep.subr.bf16.mxu0 %v12939_v36 }
 0x6e6   :  { %v11402_v46 = vpack.c.bf16 %v4003_v6, %v4000_v44 }
 0x6e7   :  { %v3782_v29 = vpop.f32.mrb[100].mxu0  ;;  %4682 = vmatmul.mubr.bf16.vlgmr.msra.gmra.mrb[128].mxu0 %v10884_v22 }
 0x6e8   :  { %v4008_v38 = vadd.f32 %v8115_v49, %v3782_v29  ;;  %v3784_v57 = vpop.f32.mrb[101].mxu0  ;;  %8177 = vmatprep.mubr.bf16.mxu1 %v11402_v46  ;;  %8257 = vmatprep.subr.bf16.mxu1 %v11402_v46  ;;  %v8119_v11 = vpop.f32.mrb[228].mxu1 }
 0x6e9   :  { %v3785_v32 = vpop.f32.mrb[102].mxu0  ;;  %v4015_v34 = vpop.f32.mrb[229].mxu1  ;;  %4689 = vmatprep.mubr.bf16.mxu0 %v10891_v28 }
 0x6ea   :  { %v4011_v27 = vadd.f32 %v8116_v61, %v3785_v32  ;;  %v3787_v24 = vpop.f32.mrb[103].mxu0  ;;  %v8120_v20 = vpop.f32.mrb[230].mxu1 }
 0x6eb   :  { %v4018_v12 = vpop.f32.mrb[231].mxu1 }
 0x6ec   :  { %v11408_v51 = vpack.c.bf16 %v4011_v27, %v4008_v38 }
 0x6ee   :  { %8178 = vmatmul.mubr.bf16.gmra.mrb[16].mxu1 %v11408_v51 }
 0x6ef   :  { %v3790_v22 = vpop.f32.mrb[104].mxu0  ;;  %4690 = vmatmul.mubr.bf16.gmra.mrb[132].mxu0 %v10902_v62 }
 0x6f0   :  { %v4016_v3 = vadd.f32 %v4015_v34, %v3790_v22  ;;  %v3792_v63 = vpop.f32.mrb[105].mxu0  ;;  %v8123_v55 = vpop.f32.mrb[232].mxu1  ;;  %4697 = vmatprep.mubr.bf16.mxu0 %v10909_v13 }
 0x6f1   :  { %v3793_v54 = vpop.f32.mrb[106].mxu0  ;;  %v4031_v15 = vpop.f32.mrb[233].mxu1 }
 0x6f2   :  { %v4019_v59 = vadd.f32 %v4018_v12, %v3793_v54  ;;  %v3795_v28 = vpop.f32.mrb[107].mxu0  ;;  %v8124_v9 = vpop.f32.mrb[234].mxu1 }
 0x6f3   :  { %v4034_v21 = vpop.f32.mrb[235].mxu1  ;;  %v13073_v28 = vld [vmem:[#allocation20_spill] sm:$0xff] }
 0x6f4   :  { %v11413_v35 = vpack.c.bf16 %v4019_v59, %v4016_v3 }
 0x6f6   :  { %8181 = vmatprep.mubr.bf16.mxu1 %v11413_v35 }
 0x6f7   :  { %v3798_v25 = vpop.f32.mrb[108].mxu0  ;;  %4698 = vmatmul.mubr.bf16.gmra.mrb[136].mxu0 %v10920_v26 }
 0x6f8   :  { %v4024_v19 = vadd.f32 %v8119_v11, %v3798_v25  ;;  %v3800_v62 = vpop.f32.mrb[109].mxu0  ;;  %v8127_v58 = vpop.f32.mrb[236].mxu1  ;;  %4705 = vmatprep.mubr.bf16.mxu0 %v10927_v5  ;;  %v13077_v25 = vld [vmem:[#allocation30_spill] sm:$0xff] }
 0x6f9   :  { %v3801_v4 = vpop.f32.mrb[110].mxu0  ;;  %v4047_v13 = vpop.f32.mrb[237].mxu1  ;;  %v13079_v62 = vld [vmem:[#allocation8_spill] sm:$0xff] }
 0x6fa   :  { %v4027_v0 = vadd.f32 %v8120_v20, %v3801_v4  ;;  %v3803_v49 = vpop.f32.mrb[111].mxu0  ;;  %v8128_v37 = vpop.f32.mrb[238].mxu1  ;;  %v13081_v4 = vld [vmem:[#allocation32_spill] sm:$0xff] }
 0x6fb   :  { %v4050_v52 = vpop.f32.mrb[239].mxu1  ;;  %v13084_v49 = vld [vmem:[#allocation35_spill] sm:$0xff] }
 0x6fc   :  { %v4081_v44 = vpack.c.bf16 %v4027_v0, %v4024_v19  ;;  %v13078_v19 = vld [vmem:[#allocation5_spill] sm:$0xff]  ;;  %v13083_v0 = vld [vmem:[#allocation10_spill] sm:$0xff] }
 0x6fe   :  { %8182 = vmatmul.mubr.bf16.gmra.mrb[20].mxu1 %v4081_v44 }
 0x6ff   :  { %v3806_v48 = vpop.f32.mrb[112].mxu0  ;;  %4706 = vmatmul.mubr.bf16.gmra.mrb[140].mxu0 %v10938_v33 }
 0x700   :  { %v4032_v61 = vadd.f32 %v4031_v15, %v3806_v48  ;;  %v3808_v1 = vpop.f32.mrb[113].mxu0  ;;  %4713 = vmatprep.mubr.bf16.mxu0 %v10945_v14  ;;  %v13087_v48 = vld [vmem:[#allocation39_spill] sm:$0xff] }
 0x701   :  { %v3809_v26 = vpop.f32.mrb[114].mxu0  ;;  %v8987_v1 = vld [vmem:[%s12800_s4 + $0x88] sm:$0xff]  }
 0x702   :  { %v4035_v6 = vadd.f32 %v4034_v21, %v3809_v26  ;;  %v3811_v29 = vpop.f32.mrb[115].mxu0  ;;  %v13075_v21 = vld [vmem:[#allocation6_spill] sm:$0xff] }
 0x703   :  { %v11496_v26 = vld [vmem:[%s12797_s0 + $0x20] ss:$12 sps:$4 sm:$0xff]  }
 0x704   :  { %v4082_v38 = vpack.c.bf16 %v4035_v6, %v4032_v61  ;;  %v13088_v61 = vld [vmem:[#allocation40_spill] sm:$0xff]  ;;  %v11502_v6 = vld [vmem:[%s12797_s0 + $0x38] ss:$12 sps:$4 sm:$0xff]  }
 0x705   :  { %v13089_v29 = vld [vmem:[#allocation42_spill] sm:$0xff] }
 0x706   :  { %8185 = vmatprep.mubr.bf16.mxu1 %v4082_v38 }
 0x707   :  { %v3814_v5 = vpop.f32.mrb[116].mxu0  ;;  %4714 = vmatmul.mubr.bf16.gmra.mrb[144].mxu0 %v10956_v17 }
 0x708   :  { %v4040_v57 = vadd.f32 %v8123_v55, %v3814_v5  ;;  %v3816_v11 = vpop.f32.mrb[117].mxu0  ;;  %4721 = vmatprep.mubr.bf16.mxu0 %v10963_v2  ;;  %v13090_v5 = vld [vmem:[#allocation43_spill] sm:$0xff] }
 0x709   :  { %v3817_v32 = vpop.f32.mrb[118].mxu0  ;;  %v11516_v11 = vld [vmem:[%s12797_s0 + $0x50] ss:$12 sps:$4 sm:$0xff]  }
 0x70a   :  { %v4043_v34 = vadd.f32 %v8124_v9, %v3817_v32  ;;  %v3819_v27 = vpop.f32.mrb[119].mxu0  ;;  %v13074_v9 = vld [vmem:[#allocation2_spill] sm:$0xff]  ;;  %v11522_v32 = vld [vmem:[%s12797_s0 + $0x68] ss:$12 sps:$4 sm:$0xff]  }
 0x70b   :  { %v8990_v27 = vld [vmem:[%s12800_s4 + $0xa0] sm:$0xff]  }
 0x70c   :  { %v4083_v33 = vpack.c.bf16 %v4043_v34, %v4040_v57  ;;  %v8989_v57 = vld [vmem:[%s12800_s4 + $0x98] sm:$0xff]   ;;  %v13091_v34 = vld [vmem:[#allocation44_spill] sm:$0xff] }
 0x70e   :  { %8186 = vmatmul.mubr.bf16.gmra.mrb[24].mxu1 %v4083_v33 }
 0x70f   :  { %v3822_v24 = vpop.f32.mrb[120].mxu0  ;;  %4722 = vmatmul.mubr.bf16.gmra.mrb[148].mxu0 %v10974_v56 }
 0x710   :  { %v4048_v14 = vadd.f32 %v4047_v13, %v3822_v24  ;;  %v3824_v20 = vpop.f32.mrb[121].mxu0  ;;  %4729 = vmatprep.mubr.bf16.mxu0 %v10981_v23  ;;  %v13061_v23 = vld [vmem:[#allocation14_spill] sm:$0xff]  ;;  %v13082_v13 = vld [vmem:[#allocation7_spill] sm:$0xff] }
 0x711   :  { %v3825_v12 = vpop.f32.mrb[122].mxu0  ;;  %v8991_v24 = vld [vmem:[%s12800_s4 + $0xa8] sm:$0xff]   ;;  %v11542_v20 = vld [vmem:[%s12797_s0 + $0x98] ss:$12 sps:$4 sm:$0xff]  }
 0x712   :  { %v4051_v22 = vadd.f32 %v4050_v52, %v3825_v12  ;;  %v3827_v3 = vpop.f32.mrb[123].mxu0  ;;  %v13086_v52 = vld [vmem:[#allocation9_spill] sm:$0xff]  ;;  %v13093_v12 = vld [vmem:[#allocation46_spill] sm:$0xff] }
 0x713   :  { %v11550_v3 = vld [vmem:[%s12797_s0 + $0xb0] ss:$12 sps:$4 sm:$0xff]  }
 0x714   :  { %v4084_v17 = vpack.c.bf16 %v4051_v22, %v4048_v14  ;;  %v11536_v14 = vld [vmem:[%s12797_s0 + $0x80] ss:$12 sps:$4 sm:$0xff]  }
 0x715   :  { %v13094_v22 = vld [vmem:[#allocation47_spill] sm:$0xff] }
 0x716   :  { %8189 = vmatprep.mubr.bf16.mxu1 %v4084_v17 }
 0x717   :  { %v3830_v63 = vpop.f32.mrb[124].mxu0  ;;  %4730 = vmatmul.mubr.bf16.gmra.mrb[152].mxu0 %v10992_v41  ;;  %v13062_v41 = vld [vmem:[#allocation24_spill] sm:$0xff] }
 0x718   :  { %v4056_v2 = vadd.f32 %v8127_v58, %v3830_v63  ;;  %v3832_v55 = vpop.f32.mrb[125].mxu0  ;;  %4737 = vmatprep.mubr.bf16.mxu0 %v10999_v60  ;;  %v13063_v60 = vld [vmem:[#allocation27_spill] sm:$0xff]  ;;  %v13096_v63 = vld [vmem:[#allocation48_spill] sm:$0xff] }
 0x719   :  { %v3833_v54 = vpop.f32.mrb[126].mxu0  ;;  %v13080_v58 = vld [vmem:[#allocation31_spill] sm:$0xff] }
 0x71a   :  { %v4059_v15 = vadd.f32 %v8128_v37, %v3833_v54  ;;  %v3835_v59 = vpop.f32.mrb[127].mxu0  ;;  %v13085_v37 = vld [vmem:[#allocation36_spill] sm:$0xff]  ;;  %v11564_v55 = vld [vmem:[%s12797_s0 + $0xe0] ss:$12 sps:$4 sm:$0xff]   ;;  %v11570_v54 = vld [vmem:[%s12797_s0 + $0xf8] ss:$12 sps:$4 sm:$0xff]  }
 0x71b   :  { %v11582_v59 = vld [vmem:[%s12797_s0 + $0x128] ss:$12 sps:$4 sm:$0xff]  }
 0x71c   :  { %v4085_v56 = vpack.c.bf16 %v4059_v15, %v4056_v2  ;;  %v13097_v2 = vld [vmem:[#allocation49_spill] sm:$0xff] }
 0x71d   :  { %v11576_v15 = vld [vmem:[%s12797_s0 + $0x110] ss:$12 sps:$4 sm:$0xff]  }
 0x71e   :  { %8190 = vmatmul.mubr.bf16.gmra.mrb[28].mxu1 %v4085_v56 }
 0x71f   :  { %8209 = vmatprep.mubr.bf16.mxu1 %v10789_v8  ;;  %4738 = vmatmul.mubr.bf16.gmra.mrb[156].mxu0 %v11010_v16  ;;  %v13055_v8 = vld [vmem:[#allocation23_spill] sm:$0xff] }
 0x720   :  { %4745 = vmatprep.mubr.bf16.mxu0 %v11017_v43  ;;  %v13064_v16 = vld [vmem:[#allocation15_spill] sm:$0xff]  ;;  %v13065_v43 = vld [vmem:[#allocation16_spill] sm:$0xff]  ;;  %13098 = vst [vmem:[#allocation23_spill] sm:$0xff] %v11564_v55 }
 0x726   :  { %8210 = vmatmul.mubr.bf16.vlgmr.msra.gmra.mrb[240].mxu1 %v10787_v7  ;;  %v13054_v7 = vld [vmem:[#allocation21_spill] sm:$0xff] }
 0x727   :  { %8258 = vmatpush3.bf16.msra.mxu1 %v11402_v46  ;;  %8213 = vmatprep.mubr.bf16.mxu1 %v10801_v50  ;;  %v13057_v50 = vld [vmem:[#allocation12_spill] sm:$0xff] }
 0x728   :  { %8259 = vmatprep.subr.bf16.mxu1 %v11408_v51  ;;  %4746 = vmatmul.mubr.bf16.gmra.mrb[160].mxu0 %v11026_v10  ;;  %v13066_v10 = vld [vmem:[#allocation26_spill] sm:$0xff]  ;;  %v13071_v46 = vld [vmem:[#allocation4_spill] sm:$0xff]  ;;  %13100 = vst [vmem:[#allocation12_spill] sm:$0xff] %v11576_v15 }
 0x729   :  { %4753 = vmatprep.mubr.bf16.mxu0 %v11035_v53  ;;  %v13067_v53 = vld [vmem:[#allocation29_spill] sm:$0xff] }
 0x72b   :  { %8260 = vmatpush3.bf16.msra.mxu1 %v11408_v51  ;;  %v13072_v51 = vld [vmem:[#allocation19_spill] sm:$0xff] }
 0x72c   :  { %8261 = vmatprep.subr.bf16.mxu1 %v11413_v35 }
 0x72e   :  { %8214 = vmatmul.mubr.bf16.gmra.mrb[244].mxu1 %v10798_v39  ;;  %v13056_v39 = vld [vmem:[#allocation11_spill] sm:$0xff] }
 0x72f   :  { %8262 = vmatpush3.bf16.msra.mxu1 %v11413_v35  ;;  %8217 = vmatprep.mubr.bf16.mxu1 %v10813_v42  ;;  %v13059_v42 = vld [vmem:[#allocation25_spill] sm:$0xff]  ;;  %v13076_v35 = vld [vmem:[#allocation3_spill] sm:$0xff]  ;;  %13099 = vst [vmem:[#allocation11_spill] sm:$0xff] %v11570_v54 }
 0x730   :  { %8263 = vmatprep.subr.bf16.mxu1 %v4081_v44  ;;  %4754 = vmatmul.mubr.bf16.gmra.mrb[164].mxu0 %v11044_v45  ;;  %v13068_v45 = vld [vmem:[#allocation17_spill] sm:$0xff] }
 0x731   :  { %4761 = vmatprep.mubr.bf16.mxu0 %v11053_v30  ;;  %v13069_v30 = vld [vmem:[#allocation18_spill] sm:$0xff] }
 0x733   :  { %8264 = vmatpush3.bf16.msra.mxu1 %v4081_v44  ;;  %v11485_v44 = vld [vmem:[%s12797_s0 + $0x8] ss:$12 sps:$4 sm:$0xff]  }
 0x734   :  { %8265 = vmatprep.subr.bf16.mxu1 %v4082_v38 }
 0x736   :  { %8218 = vmatmul.mubr.bf16.gmra.mrb[248].mxu1 %v10810_v31  ;;  %v13058_v31 = vld [vmem:[#allocation22_spill] sm:$0xff] }
 0x737   :  { %8266 = vmatpush3.bf16.msra.mxu1 %v4082_v38  ;;  %8221 = vmatprep.mubr.bf16.mxu1 %v10825_v18  ;;  %v13060_v18 = vld [vmem:[#allocation13_spill] sm:$0xff]  ;;  %v8988_v38 = vld [vmem:[%s12800_s4 + $0x90] sm:$0xff]   ;;  %13101 = vst [vmem:[#allocation22_spill] sm:$0xff] %v11582_v59 }
 0x738   :  { %8267 = vmatprep.subr.bf16.mxu1 %v4083_v33  ;;  %4762 = vmatmul.mubr.bf16.gmra.mrb[168].mxu0 %v11062_v40  ;;  %v13070_v40 = vld [vmem:[#allocation28_spill] sm:$0xff] }
 0x739   :  { %4769 = vmatprep.mubr.bf16.mxu0 %v11071_v47  ;;  %v8986_v47 = vld [vmem:[%s12800_s4 + $0x80] sm:$0xff]  }
 0x73b   :  { %8268 = vmatpush3.bf16.msra.mxu1 %v4083_v33  ;;  %v13092_v33 = vld [vmem:[#allocation45_spill] sm:$0xff] }
 0x73c   :  { %8269 = vmatprep.subr.bf16.mxu1 %v4084_v17 }
 0x73e   :  { %8222 = vmatmul.mubr.bf16.gmra.mrb[252].mxu1 %v13054_v7  ;;  %v11594_v7 = vld [vmem:[%s12797_s0 + $0x158] ss:$12 sps:$4 sm:$0xff]  }
 0x73f   :  { %8270 = vmatpush3.bf16.msra.mxu1 %v4084_v17  ;;  %8225 = vmatprep.mubr.bf16.mxu1 %v13055_v8  ;;  %v11556_v17 = vld [vmem:[%s12797_s0 + $0xc8] ss:$12 sps:$4 sm:$0xff]   ;;  %13103 = vst [vmem:[#allocation13_spill] sm:$0xff] %v11594_v7 }
 0x740   :  { %8271 = vmatprep.subr.bf16.mxu1 %v4085_v56  ;;  %4770 = vmatmul.mubr.bf16.gmra.mrb[172].mxu0 %v13056_v39  ;;  %13095 = vst [vmem:[#allocation21_spill] sm:$0xff] %v11556_v17 }
 0x741   :  { %4777 = vmatprep.mubr.bf16.mxu0 %v13057_v50 }
 0x743   :  { %8272 = vmatpush3.bf16.msra.mxu1 %v4085_v56  ;;  %v11588_v56 = vld [vmem:[%s12797_s0 + $0x140] ss:$12 sps:$4 sm:$0xff]  }
 0x744   :  { %8321 = vmatprep.subr.bf16.mxu1 %v8986_v47  ;;  %13102 = vst [vmem:[#allocation25_spill] sm:$0xff] %v11588_v56 }
 0x746   :  { %8226 = vmatmul.mubr.bf16.gmra.mrb[0].mxu1 %v13058_v31 }
 0x747   :  { %8229 = vmatprep.mubr.bf16.mxu1 %v13059_v42  ;;  %v11604_v42 = vld [vmem:[%s12797_s0 + $0x170] ss:$12 sps:$4 sm:$0xff]  }
 0x748   :  { %4778 = vmatmul.mubr.bf16.gmra.mrb[176].mxu0 %v13060_v18  ;;  %13104 = vst [vmem:[#allocation14_spill] sm:$0xff] %v11604_v42  ;;  %v11610_v18 = vld [vmem:[%s12797_s0 + $0x188] ss:$12 sps:$4 sm:$0xff]  }
 0x749   :  { %4785 = vmatprep.mubr.bf16.mxu0 %v13061_v23  ;;  %13105 = vst [vmem:[#allocation24_spill] sm:$0xff] %v11610_v18 }
 0x74e   :  { %8230 = vmatmul.mubr.bf16.gmra.mrb[4].mxu1 %v13062_v41 }
 0x74f   :  { %8233 = vmatprep.mubr.bf16.mxu1 %v13063_v60 }
 0x750   :  { %4786 = vmatmul.mubr.bf16.gmra.mrb[180].mxu0 %v13064_v16 }
 0x751   :  { %4793 = vmatprep.mubr.bf16.mxu0 %v13065_v43  ;;  %v11620_v43 = vld [vmem:[%s12797_s0 + $0x1a0] ss:$12 sps:$4 sm:$0xff]  }
 0x752   :  { %13106 = vst [vmem:[#allocation27_spill] sm:$0xff] %v11620_v43 }
 0x756   :  { %8234 = vmatmul.mubr.bf16.gmra.mrb[8].mxu1 %v13066_v10  ;;  %v11626_v10 = vld [vmem:[%s12797_s0 + $0x1b8] ss:$12 sps:$4 sm:$0xff]  }
 0x757   :  { %8237 = vmatprep.mubr.bf16.mxu1 %v13067_v53  ;;  %13107 = vst [vmem:[#allocation15_spill] sm:$0xff] %v11626_v10 }
 0x758   :  { %4794 = vmatmul.mubr.bf16.gmra.mrb[184].mxu0 %v13068_v45 }
 0x759   :  { %4801 = vmatprep.mubr.bf16.mxu0 %v13069_v30 }
 0x75e   :  { %8238 = vmatmul.mubr.bf16.gmra.mrb[12].mxu1 %v13070_v40 }
 0x75f   :  { %8241 = vmatprep.mubr.bf16.mxu1 %v13071_v46  ;;  %v13109_v46 = vld [vmem:[#allocation34_spill] sm:$0xff] }
 0x760   :  { %4802 = vmatmul.mubr.bf16.gmra.mrb[188].mxu0 %v13072_v51 }
 0x761   :  { %4809 = vmatprep.mubr.bf16.mxu0 %v13073_v28 }
 0x766   :  { %8242 = vmatmul.mubr.bf16.gmra.mrb[16].mxu1 %v13074_v9 }
 0x767   :  { %8245 = vmatprep.mubr.bf16.mxu1 %v13075_v21 }
 0x768   :  { %4810 = vmatmul.mubr.bf16.gmra.mrb[192].mxu0 %v13076_v35  ;;  %v13110_v35 = vld [vmem:[#allocation37_spill] sm:$0xff] }
 0x769   :  { %4817 = vmatprep.mubr.bf16.mxu0 %v13077_v25  ;;  %v13111_v25 = vld [vmem:[#allocation38_spill] sm:$0xff] }
 0x76e   :  { %8246 = vmatmul.mubr.bf16.gmra.mrb[20].mxu1 %v13078_v19  ;;  %v8992_v19 = vld [vmem:[%s12800_s4 + $0xb0] sm:$0xff]  }
 0x76f   :  { %8249 = vmatprep.mubr.bf16.mxu1 %v13079_v62 }
 0x770   :  { %4818 = vmatmul.mubr.bf16.gmra.mrb[196].mxu0 %v13080_v58 }
 0x771   :  { %4825 = vmatprep.mubr.bf16.mxu0 %v13081_v4 }
 0x776   :  { %8250 = vmatmul.mubr.bf16.gmra.mrb[24].mxu1 %v13082_v13  ;;  %v8993_v13 = vld [vmem:[%s12800_s4 + $0xb8] sm:$0xff]  }
 0x777   :  { %8253 = vmatprep.mubr.bf16.mxu1 %v13083_v0 }
 0x778   :  { %4826 = vmatmul.mubr.bf16.gmra.mrb[200].mxu0 %v13084_v49  ;;  %v13112_v49 = vld [vmem:[#allocation41_spill] sm:$0xff] }
 0x779   :  { %4833 = vmatprep.mubr.bf16.mxu0 %v13085_v37 }
 0x77e   :  { %8254 = vmatmul.mubr.bf16.gmra.mrb[28].mxu1 %v13086_v52 }
 0x77f   :  { %8273 = vmatprep.mubr.bf16.mxu1 %v11485_v44 }
 0x780   :  { %4834 = vmatmul.mubr.bf16.gmra.mrb[204].mxu0 %v13087_v48 }
 0x781   :  { %4841 = vmatprep.mubr.bf16.mxu0 %v13088_v61 }
 0x786   :  { %8274 = vmatmul.mubr.bf16.vlgmr.msra.gmra.mrb[32].mxu1 %v11496_v26 }
 0x787   :  { %8277 = vmatprep.mubr.bf16.mxu1 %v11502_v6  ;;  %8322 = vmatpush3.bf16.msra.mxu1 %v8986_v47  ;;  %v13108_v47 = vld [vmem:[#allocation33_spill] sm:$0xff] }
 0x788   :  { %4842 = vmatmul.mubr.bf16.gmra.mrb[208].mxu0 %v13089_v29  ;;  %8323 = vmatprep.subr.bf16.mxu1 %v8987_v1 }
 0x789   :  { %4849 = vmatprep.mubr.bf16.mxu0 %v13090_v5 }
 0x78b   :  { %8324 = vmatpush3.bf16.msra.mxu1 %v8987_v1 }
 0x78c   :  { %8325 = vmatprep.subr.bf16.mxu1 %v8988_v38 }
 0x78e   :  { %8278 = vmatmul.mubr.bf16.gmra.mrb[36].mxu1 %v11516_v11 }
 0x78f   :  { %8281 = vmatprep.mubr.bf16.mxu1 %v11522_v32  ;;  %8326 = vmatpush3.bf16.msra.mxu1 %v8988_v38 }
 0x790   :  { %4850 = vmatmul.mubr.bf16.gmra.mrb[212].mxu0 %v13091_v34  ;;  %8327 = vmatprep.subr.bf16.mxu1 %v8989_v57 }
 0x791   :  { %4857 = vmatprep.mubr.bf16.mxu0 %v13092_v33 }
 0x793   :  { %8328 = vmatpush3.bf16.msra.mxu1 %v8989_v57 }
 0x794   :  { %8329 = vmatprep.subr.bf16.mxu1 %v8990_v27 }
 0x796   :  { %8282 = vmatmul.mubr.bf16.gmra.mrb[40].mxu1 %v11536_v14 }
 0x797   :  { %8285 = vmatprep.mubr.bf16.mxu1 %v11542_v20  ;;  %8330 = vmatpush3.bf16.msra.mxu1 %v8990_v27 }
 0x798   :  { %4858 = vmatmul.mubr.bf16.gmra.mrb[216].mxu0 %v13093_v12  ;;  %8331 = vmatprep.subr.bf16.mxu1 %v8991_v24 }
 0x799   :  { %4865 = vmatprep.mubr.bf16.mxu0 %v13094_v22 }
 0x79b   :  { %8332 = vmatpush3.bf16.msra.mxu1 %v8991_v24 }
 0x79c   :  { %8333 = vmatprep.subr.bf16.mxu1 %v8992_v19 }
 0x79e   :  { %8286 = vmatmul.mubr.bf16.gmra.mrb[44].mxu1 %v11550_v3 }
 0x79f   :  { %8289 = vmatprep.mubr.bf16.mxu1 %v11556_v17  ;;  %8334 = vmatpush3.bf16.msra.mxu1 %v8992_v19 }
 0x7a0   :  { %4866 = vmatmul.mubr.bf16.gmra.mrb[220].mxu0 %v13096_v63  ;;  %8335 = vmatprep.subr.bf16.mxu1 %v8993_v13 }
 0x7a1   :  { %5493 = vmatprep.mubr.bf16.mxu0 %v13097_v2 }
 0x7a3   :  { %8336 = vmatpush3.bf16.msra.mxu1 %v8993_v13 }
 0x7a6   :  { %8290 = vmatmul.mubr.bf16.gmra.mrb[96].mxu1 %v11564_v55 }
 0x7a7   :  { %8293 = vmatprep.mubr.bf16.mxu1 %v11570_v54 }
 0x7ae   :  { %8294 = vmatmul.mubr.bf16.gmra.mrb[100].mxu1 %v11576_v15 }
 0x7af   :  { %8297 = vmatprep.mubr.bf16.mxu1 %v11582_v59 }
 0x7b6   :  { %8298 = vmatmul.mubr.bf16.gmra.mrb[104].mxu1 %v11588_v56 }
 0x7b7   :  { %8301 = vmatprep.mubr.bf16.mxu1 %v11594_v7 }
 0x7ba   :  { %v11597_v8 = vpop.f32.mrb[128].mxu0 }
 0x7bb   :  { %v4685_v39 = vpop.f32.mrb[129].mxu0 }
 0x7bc   :  { %v11599_v50 = vpop.f32.mrb[130].mxu0 }
 0x7bd   :  { %v4688_v31 = vpop.f32.mrb[131].mxu0 }
 0x7be   :  { %8302 = vmatmul.mubr.bf16.gmra.mrb[108].mxu1 %v11604_v42 }
 0x7bf   :  { %8305 = vmatprep.mubr.bf16.mxu1 %v11610_v18 }
 0x7c2   :  { %v11613_v23 = vpop.f32.mrb[132].mxu0 }
 0x7c3   :  { %v4693_v41 = vpop.f32.mrb[133].mxu0 }
 0x7c4   :  { %v11615_v60 = vpop.f32.mrb[134].mxu0 }
 0x7c5   :  { %v4696_v16 = vpop.f32.mrb[135].mxu0 }
 0x7c6   :  { %8306 = vmatmul.mubr.bf16.gmra.mrb[112].mxu1 %v11620_v43 }
 0x7c7   :  { %8309 = vmatprep.mubr.bf16.mxu1 %v11626_v10 }
 0x7ca   :  { %v11629_v53 = vpop.f32.mrb[136].mxu0 }
 0x7cb   :  { %v4701_v45 = vpop.f32.mrb[137].mxu0 }
 0x7cc   :  { %v11631_v30 = vpop.f32.mrb[138].mxu0 }
 0x7cd   :  { %v4704_v40 = vpop.f32.mrb[139].mxu0 }
 0x7ce   :  { %8310 = vmatmul.mubr.bf16.gmra.mrb[116].mxu1 %v13108_v47 }
 0x7cf   :  { %8313 = vmatprep.mubr.bf16.mxu1 %v13109_v46 }
 0x7d2   :  { %v11635_v51 = vpop.f32.mrb[140].mxu0 }
 0x7d3   :  { %v4709_v28 = vpop.f32.mrb[141].mxu0 }
 0x7d4   :  { %v11637_v9 = vpop.f32.mrb[142].mxu0 }
 0x7d5   :  { %v4712_v21 = vpop.f32.mrb[143].mxu0 }
 0x7d6   :  { %8314 = vmatmul.mubr.bf16.gmra.mrb[120].mxu1 %v13110_v35 }
 0x7d7   :  { %8317 = vmatprep.mubr.bf16.mxu1 %v13111_v25 }
 0x7da   :  { %v11644_v62 = vpop.f32.mrb[144].mxu0 }
 0x7db   :  { %v4717_v58 = vpop.f32.mrb[145].mxu0 }
 0x7dc   :  { %v11646_v4 = vpop.f32.mrb[146].mxu0 }
 0x7dd   :  { %v4720_v0 = vpop.f32.mrb[147].mxu0 }
 0x7de   :  { %8318 = vmatmul.mubr.bf16.gmra.mrb[124].mxu1 %v13112_v49 }
 0x7e2   :  { %v11652_v37 = vpop.f32.mrb[148].mxu0 }
 0x7e3   :  { %v4725_v52 = vpop.f32.mrb[149].mxu0 }
 0x7e4   :  { %v11654_v48 = vpop.f32.mrb[150].mxu0 }
 0x7e5   :  { %v4728_v61 = vpop.f32.mrb[151].mxu0 }
 0x7ea   :  { %v11656_v1 = vpop.f32.mrb[152].mxu0 }
 0x7eb   :  { %v4733_v29 = vpop.f32.mrb[153].mxu0 }
 0x7ec   :  { %v11658_v38 = vpop.f32.mrb[154].mxu0 }
 0x7ed   :  { %v4736_v5 = vpop.f32.mrb[155].mxu0 }
 0x7f2   :  { %v11660_v57 = vpop.f32.mrb[156].mxu0 }
 0x7f3   :  { %v4741_v34 = vpop.f32.mrb[157].mxu0 }
 0x7f4   :  { %v11662_v27 = vpop.f32.mrb[158].mxu0 }
 0x7f5   :  { %v4744_v33 = vpop.f32.mrb[159].mxu0 }
 0x7fb   :  { %v11664_v24 = vpop.f32.mrb[160].mxu0 }
 0x7fc   :  { %v4749_v12 = vpop.f32.mrb[161].mxu0 }
 0x7fd   :  { %v11666_v22 = vpop.f32.mrb[162].mxu0 }
 0x7fe   :  { %v4752_v63 = vpop.f32.mrb[163].mxu0 }
 0x803   :  { %v11668_v2 = vpop.f32.mrb[164].mxu0 }
 0x804   :  { %v4757_v39 = vpop.f32.mrb[165].mxu0 }
 0x805   :  { %v11670_v31 = vpop.f32.mrb[166].mxu0 }
 0x806   :  { %v4760_v41 = vpop.f32.mrb[167].mxu0 }
 0x80b   :  { %v11672_v16 = vpop.f32.mrb[168].mxu0 }
 0x80c   :  { %v4765_v45 = vpop.f32.mrb[169].mxu0 }
 0x80d   :  { %v11674_v40 = vpop.f32.mrb[170].mxu0 }
 0x80e   :  { %v4768_v47 = vpop.f32.mrb[171].mxu0 }
 0x813   :  { %v11676_v46 = vpop.f32.mrb[172].mxu0 }
 0x814   :  { %v4773_v28 = vpop.f32.mrb[173].mxu0 }
 0x815   :  { %v11678_v21 = vpop.f32.mrb[174].mxu0 }
 0x816   :  { %v4776_v35 = vpop.f32.mrb[175].mxu0 }
 0x81b   :  { %v11680_v25 = vpop.f32.mrb[176].mxu0 }
 0x81c   :  { %v4781_v19 = vpop.f32.mrb[177].mxu0 }
 0x81d   :  { %v11682_v58 = vpop.f32.mrb[178].mxu0 }
 0x81e   :  { %v4784_v13 = vpop.f32.mrb[179].mxu0 }
 0x823   :  { %v11684_v0 = vpop.f32.mrb[180].mxu0 }
 0x824   :  { %v4789_v49 = vpop.f32.mrb[181].mxu0 }
 0x825   :  { %v11686_v52 = vpop.f32.mrb[182].mxu0 }
 0x826   :  { %v4792_v61 = vpop.f32.mrb[183].mxu0 }
 0x82b   :  { %v11688_v29 = vpop.f32.mrb[184].mxu0 }
 0x82c   :  { %v4797_v5 = vpop.f32.mrb[185].mxu0 }
 0x82d   :  { %v11690_v34 = vpop.f32.mrb[186].mxu0 }
 0x82e   :  { %v4800_v33 = vpop.f32.mrb[187].mxu0 }
 0x833   :  { %v11692_v12 = vpop.f32.mrb[188].mxu0 }
 0x834   :  { %v4805_v63 = vpop.f32.mrb[189].mxu0 }
 0x835   :  { %v11694_v39 = vpop.f32.mrb[190].mxu0 }
 0x836   :  { %v4808_v41 = vpop.f32.mrb[191].mxu0 }
 0x83b   :  { %v11696_v45 = vpop.f32.mrb[192].mxu0 }
 0x83c   :  { %v4813_v47 = vpop.f32.mrb[193].mxu0 }
 0x83d   :  { %v11698_v28 = vpop.f32.mrb[194].mxu0 }
 0x83e   :  { %v4816_v35 = vpop.f32.mrb[195].mxu0 }
 0x843   :  { %v11700_v19 = vpop.f32.mrb[196].mxu0 }
 0x844   :  { %v4821_v13 = vpop.f32.mrb[197].mxu0 }
 0x845   :  { %v11702_v49 = vpop.f32.mrb[198].mxu0 }
 0x846   :  { %v4824_v61 = vpop.f32.mrb[199].mxu0 }
 0x84b   :  { %v11704_v5 = vpop.f32.mrb[200].mxu0 }
 0x84c   :  { %v4829_v33 = vpop.f32.mrb[201].mxu0 }
 0x84d   :  { %v11706_v10 = vpop.f32.mrb[202].mxu0 }
 0x84e   :  { %v4832_v63 = vpop.f32.mrb[203].mxu0 }
 0x853   :  { %v11708_v43 = vpop.f32.mrb[204].mxu0 }
 0x854   :  { %v4837_v41 = vpop.f32.mrb[205].mxu0 }
 0x855   :  { %v11710_v18 = vpop.f32.mrb[206].mxu0 }
 0x856   :  { %v4840_v47 = vpop.f32.mrb[207].mxu0 }
 0x859   :  { %v8275_v42 = vpop.f32.mrb[32].mxu1 }
 0x85a   :  { %v4917_v35 = vadd.f32 %v8275_v42, %v11613_v23  ;;  %v4908_v7 = vpop.f32.mrb[33].mxu1 }
 0x85b   :  { %v4909_v13 = vadd.f32 %v4908_v7, %v11597_v8  ;;  %v8276_v56 = vpop.f32.mrb[34].mxu1  ;;  %v11714_v61 = vpop.f32.mrb[208].mxu0 }
 0x85c   :  { %v4920_v33 = vadd.f32 %v8276_v56, %v11615_v60  ;;  %v4911_v59 = vpop.f32.mrb[35].mxu1  ;;  %v4845_v15 = vpop.f32.mrb[209].mxu0 }
 0x85d   :  { %v4912_v63 = vadd.f32 %v4911_v59, %v11599_v50  ;;  %v11718_v54 = vpop.f32.mrb[210].mxu0 }
 0x85e   :  { %v5100_v41 = vpack.c.bf16 %v4920_v33, %v4917_v35  ;;  %v4848_v55 = vpop.f32.mrb[211].mxu0 }
 0x85f   :  { %v5099_v47 = vpack.c.bf16 %v4912_v63, %v4909_v13 }
 0x861   :  { %v8279_v17 = vpop.f32.mrb[36].mxu1  ;;  %8337 = vmatprep.mubr.bf16.mxu1 %v5099_v47  ;;  %5462 = vmatpush1.bf16.msra.mxu0 %v5099_v47 }
 0x862   :  { %v4924_v42 = vpop.f32.mrb[37].mxu1  ;;  %8338 = vmatmul.mubr.bf16.vlgmr.msra.gmra.mrb[240].mxu1 %v5100_v41  ;;  %v4933_v7 = vadd.f32 %v8279_v17, %v11635_v51  ;;  %5463 = vmatprep.subr.bf16.mxu0 %v12939_v36 }
 0x863   :  { %v4925_v56 = vadd.f32 %v4924_v42, %v11629_v53  ;;  %v8280_v8 = vpop.f32.mrb[38].mxu1  ;;  %v11723_v15 = vpop.f32.mrb[212].mxu0 }
 0x864   :  { %v4927_v59 = vpop.f32.mrb[39].mxu1  ;;  %v4936_v50 = vadd.f32 %v8280_v8, %v11637_v9  ;;  %v4853_v23 = vpop.f32.mrb[213].mxu0 }
 0x865   :  { %v4928_v55 = vadd.f32 %v4927_v59, %v11631_v30  ;;  %5464 = vmatpush1.bf16.msra.mxu0 %v5100_v41  ;;  %v11727_v60 = vpop.f32.mrb[214].mxu0 }
 0x866   :  { %v5102_v35 = vpack.c.bf16 %v4936_v50, %v4933_v7  ;;  %5465 = vmatprep.subr.bf16.mxu0 %v12939_v36  ;;  %v4856_v17 = vpop.f32.mrb[215].mxu0 }
 0x867   :  { %v5101_v51 = vpack.c.bf16 %v4928_v55, %v4925_v56 }
 0x869   :  { %v8283_v13 = vpop.f32.mrb[40].mxu1  ;;  %8341 = vmatprep.mubr.bf16.mxu1 %v5101_v51  ;;  %5466 = vmatpush1.bf16.msra.mxu0 %v5101_v51 }
 0x86a   :  { %v4940_v53 = vpop.f32.mrb[41].mxu1  ;;  %8342 = vmatmul.mubr.bf16.gmra.mrb[244].mxu1 %v5102_v35  ;;  %v4949_v33 = vadd.f32 %v8283_v13, %v11652_v37  ;;  %5467 = vmatprep.subr.bf16.mxu0 %v12939_v36 }
 0x86b   :  { %v4941_v9 = vadd.f32 %v4940_v53, %v11644_v62  ;;  %v8284_v30 = vpop.f32.mrb[42].mxu1  ;;  %v11733_v63 = vpop.f32.mrb[216].mxu0 }
 0x86c   :  { %v4943_v41 = vpop.f32.mrb[43].mxu1  ;;  %v4952_v47 = vadd.f32 %v8284_v30, %v11654_v48  ;;  %v4861_v42 = vpop.f32.mrb[217].mxu0 }
 0x86d   :  { %v4944_v7 = vadd.f32 %v4943_v41, %v11646_v4  ;;  %5468 = vmatpush1.bf16.msra.mxu0 %v5102_v35  ;;  %v11737_v56 = vpop.f32.mrb[218].mxu0 }
 0x86e   :  { %v5104_v8 = vpack.c.bf16 %v4952_v47, %v4949_v33  ;;  %5469 = vmatprep.subr.bf16.mxu0 %v12939_v36  ;;  %v4864_v37 = vpop.f32.mrb[219].mxu0 }
 0x86f   :  { %v5103_v59 = vpack.c.bf16 %v4944_v7, %v4941_v9 }
 0x871   :  { %v8287_v50 = vpop.f32.mrb[44].mxu1  ;;  %8345 = vmatprep.mubr.bf16.mxu1 %v5103_v59  ;;  %5470 = vmatpush1.bf16.msra.mxu0 %v5103_v59 }
 0x872   :  { %v4956_v62 = vpop.f32.mrb[45].mxu1  ;;  %8346 = vmatmul.mubr.bf16.gmra.mrb[248].mxu1 %v5104_v8  ;;  %v4965_v23 = vadd.f32 %v8287_v50, %v11660_v57  ;;  %5471 = vmatprep.subr.bf16.mxu0 %v12939_v36 }
 0x873   :  { %v4957_v48 = vadd.f32 %v4956_v62, %v11656_v1  ;;  %v8288_v4 = vpop.f32.mrb[46].mxu1  ;;  %v11743_v55 = vpop.f32.mrb[220].mxu0 }
 0x874   :  { %v4959_v35 = vpop.f32.mrb[47].mxu1  ;;  %v4968_v17 = vadd.f32 %v8288_v4, %v11662_v27  ;;  %v4869_v51 = vpop.f32.mrb[221].mxu0 }
 0x875   :  { %v4960_v13 = vadd.f32 %v4959_v35, %v11658_v38  ;;  %5472 = vmatpush1.bf16.msra.mxu0 %v5104_v8  ;;  %v11747_v53 = vpop.f32.mrb[222].mxu0 }
 0x876   :  { %v5106_v33 = vpack.c.bf16 %v4968_v17, %v4965_v23  ;;  %5473 = vmatprep.subr.bf16.mxu0 %v12939_v36  ;;  %v4872_v57 = vpop.f32.mrb[223].mxu0 }
 0x877   :  { %v5105_v9 = vpack.c.bf16 %v4960_v13, %v4957_v48 }
 0x879   :  { %v8291_v30 = vpop.f32.mrb[96].mxu1  ;;  %8349 = vmatprep.mubr.bf16.mxu1 %v5105_v9  ;;  %5474 = vmatpush1.bf16.msra.mxu0 %v5105_v9 }
 0x87a   :  { %v4972_v1 = vpop.f32.mrb[97].mxu1  ;;  %8350 = vmatmul.mubr.bf16.gmra.mrb[252].mxu1 %v5106_v33  ;;  %v4981_v41 = vadd.f32 %v8291_v30, %v11668_v2  ;;  %5475 = vmatprep.subr.bf16.mxu0 %v12939_v36 }
 0x87b   :  { %v4973_v27 = vadd.f32 %v4972_v1, %v11664_v24  ;;  %v8292_v38 = vpop.f32.mrb[98].mxu1 }
 0x87c   :  { %v4975_v47 = vpop.f32.mrb[99].mxu1  ;;  %v4984_v42 = vadd.f32 %v8292_v38, %v11670_v31 }
 0x87d   :  { %v4976_v7 = vadd.f32 %v4975_v47, %v11666_v22  ;;  %5476 = vmatpush1.bf16.msra.mxu0 %v5106_v33 }
 0x87e   :  { %v5108_v8 = vpack.c.bf16 %v4984_v42, %v4981_v41  ;;  %5477 = vmatprep.subr.bf16.mxu0 %v12939_v36 }
 0x87f   :  { %v5107_v37 = vpack.c.bf16 %v4976_v7, %v4973_v27 }
 0x881   :  { %v8295_v59 = vpop.f32.mrb[100].mxu1  ;;  %8353 = vmatprep.mubr.bf16.mxu1 %v5107_v37  ;;  %5478 = vmatpush1.bf16.msra.mxu0 %v5107_v37 }
 0x882   :  { %v4988_v50 = vpop.f32.mrb[101].mxu1  ;;  %8354 = vmatmul.mubr.bf16.gmra.mrb[0].mxu1 %v5108_v8  ;;  %v4997_v2 = vadd.f32 %v8295_v59, %v11676_v46  ;;  %5479 = vmatprep.subr.bf16.mxu0 %v12939_v36 }
 0x883   :  { %v4989_v24 = vadd.f32 %v4988_v50, %v11672_v16  ;;  %v8296_v62 = vpop.f32.mrb[102].mxu1  ;;  %v9381_v50 = vld [vmem:[%s12797_s0] ss:$12 sps:$4 sm:$0xff]  }
 0x884   :  { %v4991_v31 = vpop.f32.mrb[103].mxu1  ;;  %v5000_v22 = vadd.f32 %v8296_v62, %v11678_v21 }
 0x885   :  { %v4992_v23 = vadd.f32 %v4991_v31, %v11674_v40  ;;  %5480 = vmatpush1.bf16.msra.mxu0 %v5108_v8 }
 0x886   :  { %v5110_v48 = vpack.c.bf16 %v5000_v22, %v4997_v2  ;;  %5481 = vmatprep.subr.bf16.mxu0 %v12939_v36 }
 0x887   :  { %v5109_v4 = vpack.c.bf16 %v4992_v23, %v4989_v24 }
 0x889   :  { %v8299_v35 = vpop.f32.mrb[104].mxu1  ;;  %8357 = vmatprep.mubr.bf16.mxu1 %v5109_v4  ;;  %5482 = vmatpush1.bf16.msra.mxu0 %v5109_v4 }
 0x88a   :  { %v5004_v17 = vpop.f32.mrb[105].mxu1  ;;  %8358 = vmatmul.mubr.bf16.gmra.mrb[4].mxu1 %v5110_v48  ;;  %v5013_v46 = vadd.f32 %v8299_v35, %v11684_v0  ;;  %5483 = vmatprep.subr.bf16.mxu0 %v12939_v36 }
 0x88b   :  { %v5005_v16 = vadd.f32 %v5004_v17, %v11680_v25  ;;  %v8300_v51 = vpop.f32.mrb[106].mxu1 }
 0x88c   :  { %v5007_v21 = vpop.f32.mrb[107].mxu1  ;;  %v5016_v40 = vadd.f32 %v8300_v51, %v11686_v52 }
 0x88d   :  { %v5008_v13 = vadd.f32 %v5007_v21, %v11682_v58  ;;  %5484 = vmatpush1.bf16.msra.mxu0 %v5110_v48 }
 0x88e   :  { %v5112_v33 = vpack.c.bf16 %v5016_v40, %v5013_v46  ;;  %5485 = vmatprep.subr.bf16.mxu0 %v12939_v36 }
 0x88f   :  { %v5111_v57 = vpack.c.bf16 %v5008_v13, %v5005_v16 }
 0x891   :  { %v8303_v9 = vpop.f32.mrb[108].mxu1  ;;  %8361 = vmatprep.mubr.bf16.mxu1 %v5111_v57  ;;  %5486 = vmatpush1.bf16.msra.mxu0 %v5111_v57 }
 0x892   :  { %v5020_v30 = vpop.f32.mrb[109].mxu1  ;;  %8362 = vmatmul.mubr.bf16.gmra.mrb[8].mxu1 %v5112_v33  ;;  %v5029_v0 = vadd.f32 %v8303_v9, %v11692_v12  ;;  %5487 = vmatprep.subr.bf16.mxu0 %v12939_v36 }
 0x893   :  { %v5021_v25 = vadd.f32 %v5020_v30, %v11688_v29  ;;  %v8304_v1 = vpop.f32.mrb[110].mxu1 }
 0x894   :  { %v5023_v52 = vpop.f32.mrb[111].mxu1  ;;  %v5032_v58 = vadd.f32 %v8304_v1, %v11694_v39  ;;  %v9392_v1 = vld [vmem:[%s12797_s0 + $0x94] ss:$12 sps:$4 sm:$0xff]  }
 0x895   :  { %v5024_v41 = vadd.f32 %v5023_v52, %v11690_v34  ;;  %5488 = vmatpush1.bf16.msra.mxu0 %v5112_v33  ;;  %v13113_v52 = vld [vmem:[#allocation21_spill] sm:$0xff] }
 0x896   :  { %v5114_v27 = vpack.c.bf16 %v5032_v58, %v5029_v0  ;;  %5489 = vmatprep.subr.bf16.mxu0 %v12939_v36  ;;  %v13114_v58 = vld [vmem:[#allocation23_spill] sm:$0xff] }
 0x897   :  { %v5113_v38 = vpack.c.bf16 %v5024_v41, %v5021_v25  ;;  %v13115_v41 = vld [vmem:[#allocation11_spill] sm:$0xff] }
 0x899   :  { %v8307_v47 = vpop.f32.mrb[112].mxu1  ;;  %8365 = vmatprep.mubr.bf16.mxu1 %v5113_v38  ;;  %5490 = vmatpush1.bf16.msra.mxu0 %v5113_v38  ;;  %v13116_v38 = vld [vmem:[#allocation12_spill] sm:$0xff] }
 0x89a   :  { %v5036_v42 = vpop.f32.mrb[113].mxu1  ;;  %8366 = vmatmul.mubr.bf16.gmra.mrb[12].mxu1 %v5114_v27  ;;  %v5045_v12 = vadd.f32 %v8307_v47, %v11700_v19  ;;  %5491 = vmatprep.subr.bf16.mxu0 %v12939_v36  ;;  %v9382_v19 = vld [vmem:[%s12797_s0 + $0x1c] ss:$12 sps:$4 sm:$0xff]   ;;  %v13117_v47 = vld [vmem:[#allocation22_spill] sm:$0xff] }
 0x89b   :  { %v5037_v29 = vadd.f32 %v5036_v42, %v11696_v45  ;;  %v8308_v7 = vpop.f32.mrb[114].mxu1  ;;  %v9401_v42 = vld [vmem:[%s12797_s0 + $0xf0] ss:$12 sps:$4 sm:$0xff]  }
 0x89c   :  { %v5039_v39 = vpop.f32.mrb[115].mxu1  ;;  %v5048_v34 = vadd.f32 %v8308_v7, %v11702_v49  ;;  %v13119_v7 = vld [vmem:[#allocation13_spill] sm:$0xff] }
 0x89d   :  { %v5040_v8 = vadd.f32 %v5039_v39, %v11698_v28  ;;  %5492 = vmatpush1.bf16.msra.mxu0 %v5114_v27  ;;  %v9400_v27 = vld [vmem:[%s12797_s0 + $0xf4] ss:$12 sps:$4 sm:$0xff]  }
 0x89e   :  { %v5116_v37 = vpack.c.bf16 %v5048_v34, %v5045_v12  ;;  %v9402_v12 = vld [vmem:[%s12797_s0 + $0x10c] ss:$12 sps:$4 sm:$0xff]   ;;  %v9403_v39 = vld [vmem:[%s12797_s0 + $0x108] ss:$12 sps:$4 sm:$0xff]   ;;  %v9404_v34 = vld [vmem:[%s12797_s0 + $0x124] ss:$12 sps:$4 sm:$0xff]  }
 0x89f   :  { %v5115_v59 = vpack.c.bf16 %v5040_v8, %v5037_v29  ;;  %v13118_v29 = vld [vmem:[#allocation25_spill] sm:$0xff]  ;;  %v13120_v8 = vld [vmem:[#allocation14_spill] sm:$0xff] }
 0x8a0   :  { %5494 = vmatmul.mubr.bf16.vlgmr.msra.gmra.mrb[224].mxu0 %v9381_v50  ;;  %v9405_v50 = vld [vmem:[%s12797_s0 + $0x120] ss:$12 sps:$4 sm:$0xff]  }
 0x8a1   :  { %v8311_v2 = vpop.f32.mrb[116].mxu1  ;;  %8369 = vmatprep.mubr.bf16.mxu1 %v5115_v59  ;;  %8385 = vmatprep.subr.bf16.mxu1 %v5115_v59 }
 0x8a2   :  { %v5052_v36 = vpop.f32.mrb[117].mxu1  ;;  %8370 = vmatmul.mubr.bf16.gmra.mrb[16].mxu1 %v5116_v37  ;;  %v5061_v45 = vadd.f32 %v8311_v2, %v11708_v43  ;;  %5501 = vmatprep.mubr.bf16.mxu0 %v9382_v19  ;;  %v9383_v43 = vld [vmem:[%s12797_s0 + $0x18] ss:$12 sps:$4 sm:$0xff]   ;;  %v8995_v2 = vld [vmem:[%s12800_s4 + $0xc8] sm:$0xff]   ;;  %v8996_v19 = vld [vmem:[%s12800_s4 + $0xd0] sm:$0xff]  }
 0x8a3   :  { %v5053_v28 = vadd.f32 %v5052_v36, %v11704_v5  ;;  %v8312_v49 = vpop.f32.mrb[118].mxu1  ;;  %8386 = vmatpush3.bf16.msra.mxu1 %v5115_v59  ;;  %v8994_v59 = vld [vmem:[%s12800_s4 + $0xc0] sm:$0xff]   ;;  %v9406_v36 = vld [vmem:[%s12797_s0 + $0x13c] ss:$12 sps:$4 sm:$0xff]  }
 0x8a4   :  { %v5055_v24 = vpop.f32.mrb[119].mxu1  ;;  %v5064_v62 = vadd.f32 %v8312_v49, %v11710_v18  ;;  %8387 = vmatprep.subr.bf16.mxu1 %v5116_v37  ;;  %v9384_v18 = vld [vmem:[%s12797_s0 + $0x34] ss:$12 sps:$4 sm:$0xff]   ;;  %8449 = vmatprep.subr.bf16.mxu0 %v8994_v59  ;;  %v8997_v49 = vld [vmem:[%s12800_s4 + $0xd8] sm:$0xff]  }
 0x8a5   :  { %v5056_v31 = vadd.f32 %v5055_v24, %v11706_v10  ;;  %8450 = vmatpush3.bf16.msra.mxu0 %v8994_v59  ;;  %v9407_v24 = vld [vmem:[%s12797_s0 + $0x138] ss:$12 sps:$4 sm:$0xff]  }
 0x8a6   :  { %v5118_v22 = vpack.c.bf16 %v5064_v62, %v5061_v45  ;;  %v13122_v45 = vld [vmem:[#allocation27_spill] sm:$0xff]  ;;  %8451 = vmatprep.subr.bf16.mxu0 %v8995_v2  ;;  %v9408_v62 = vld [vmem:[%s12797_s0 + $0x154] ss:$12 sps:$4 sm:$0xff]  }
 0x8a7   :  { %v5117_v23 = vpack.c.bf16 %v5056_v31, %v5053_v28  ;;  %8388 = vmatpush3.bf16.msra.mxu1 %v5116_v37  ;;  %v13121_v37 = vld [vmem:[#allocation24_spill] sm:$0xff]  ;;  %v13123_v28 = vld [vmem:[#allocation15_spill] sm:$0xff] }
 0x8a8   :  { %5502 = vmatmul.mubr.bf16.gmra.mrb[228].mxu0 %v9383_v43  ;;  %v9409_v31 = vld [vmem:[%s12797_s0 + $0x1d0] ss:$12 sps:$4 sm:$0xff]   ;;  %v8999_v43 = vld [vmem:[%s12800_s4 + $0xe8] sm:$0xff]  }
 0x8a9   :  { %v8315_v48 = vpop.f32.mrb[120].mxu1  ;;  %8373 = vmatprep.mubr.bf16.mxu1 %v5117_v23  ;;  %8389 = vmatprep.subr.bf16.mxu1 %v5117_v23 }
 0x8aa   :  { %v5068_v5 = vpop.f32.mrb[121].mxu1  ;;  %8374 = vmatmul.mubr.bf16.gmra.mrb[20].mxu1 %v5118_v22  ;;  %v5077_v4 = vadd.f32 %v8315_v48, %v11723_v15  ;;  %5509 = vmatprep.mubr.bf16.mxu0 %v9384_v18  ;;  %v9385_v15 = vld [vmem:[%s12797_s0 + $0x30] ss:$12 sps:$4 sm:$0xff]   ;;  %v9414_v18 = vld [vmem:[%s12797_s0 + $0x218] ss:$12 sps:$4 sm:$0xff]  }
 0x8ab   :  { %v5069_v10 = vadd.f32 %v5068_v5, %v11714_v61  ;;  %v8316_v35 = vpop.f32.mrb[122].mxu1  ;;  %8390 = vmatpush3.bf16.msra.mxu1 %v5117_v23  ;;  %8452 = vmatpush3.bf16.msra.mxu0 %v8995_v2  ;;  %v9410_v23 = vld [vmem:[%s12797_s0 + $0x1e8] ss:$12 sps:$4 sm:$0xff]   ;;  %v9411_v48 = vld [vmem:[%s12797_s0 + $0x150] ss:$12 sps:$4 sm:$0xff]  }
 0x8ac   :  { %v5071_v17 = vpop.f32.mrb[123].mxu1  ;;  %v5080_v46 = vadd.f32 %v8316_v35, %v11727_v60  ;;  %8391 = vmatprep.subr.bf16.mxu1 %v5118_v22  ;;  %v9386_v60 = vld [vmem:[%s12797_s0 + $0x4c] ss:$12 sps:$4 sm:$0xff]   ;;  %8453 = vmatprep.subr.bf16.mxu0 %v8996_v19  ;;  %v9415_v35 = vld [vmem:[%s12797_s0 + $0x168] ss:$12 sps:$4 sm:$0xff]  }
 0x8ad   :  { %v5072_v16 = vadd.f32 %v5071_v17, %v11718_v54  ;;  %v9412_v5 = vld [vmem:[%s12797_s0 + $0x16c] ss:$12 sps:$4 sm:$0xff]   ;;  %v9416_v17 = vld [vmem:[%s12797_s0 + $0x184] ss:$12 sps:$4 sm:$0xff]  }
 0x8ae   :  { %v5120_v51 = vpack.c.bf16 %v5080_v46, %v5077_v4  ;;  %v9413_v4 = vld [vmem:[%s12797_s0 + $0x200] ss:$12 sps:$4 sm:$0xff]   ;;  %v9001_v46 = vld [vmem:[%s12800_s4 + $0xf8] sm:$0xff]  }
 0x8af   :  { %v5119_v21 = vpack.c.bf16 %v5072_v16, %v5069_v10  ;;  %8392 = vmatpush3.bf16.msra.mxu1 %v5118_v22  ;;  %8454 = vmatpush3.bf16.msra.mxu0 %v8996_v19  ;;  %v8998_v22 = vld [vmem:[%s12800_s4 + $0xe0] sm:$0xff]   ;;  %v9000_v10 = vld [vmem:[%s12800_s4 + $0xf0] sm:$0xff]  }
 0x8b0   :  { %5510 = vmatmul.mubr.bf16.gmra.mrb[232].mxu0 %v9385_v15  ;;  %8455 = vmatprep.subr.bf16.mxu0 %v8997_v49  ;;  %v9417_v16 = vld [vmem:[%s12797_s0 + $0x230] ss:$12 sps:$4 sm:$0xff]   ;;  %v9420_v15 = vld [vmem:[%s12797_s0 + $0x198] ss:$12 sps:$4 sm:$0xff]  }
 0x8b1   :  { %v8319_v40 = vpop.f32.mrb[124].mxu1  ;;  %8377 = vmatprep.mubr.bf16.mxu1 %v5119_v21  ;;  %8393 = vmatprep.subr.bf16.mxu1 %v5119_v21 }
 0x8b2   :  { %v5084_v61 = vpop.f32.mrb[125].mxu1  ;;  %8378 = vmatmul.mubr.bf16.gmra.mrb[24].mxu1 %v5120_v51  ;;  %v5093_v13 = vadd.f32 %v8319_v40, %v11743_v55  ;;  %5517 = vmatprep.mubr.bf16.mxu0 %v9386_v60  ;;  %v9387_v55 = vld [vmem:[%s12797_s0 + $0x48] ss:$12 sps:$4 sm:$0xff]  }
 0x8b3   :  { %v5085_v54 = vadd.f32 %v5084_v61, %v11733_v63  ;;  %v8320_v33 = vpop.f32.mrb[126].mxu1  ;;  %8394 = vmatpush3.bf16.msra.mxu1 %v5119_v21  ;;  %v9388_v63 = vld [vmem:[%s12797_s0 + $0x64] ss:$12 sps:$4 sm:$0xff]   ;;  %8456 = vmatpush3.bf16.msra.mxu0 %v8997_v49  ;;  %v9419_v21 = vld [vmem:[%s12797_s0 + $0x19c] ss:$12 sps:$4 sm:$0xff]  }
 0x8b4   :  { %v5087_v57 = vpop.f32.mrb[127].mxu1  ;;  %v5096_v9 = vadd.f32 %v8320_v33, %v11747_v53  ;;  %8395 = vmatprep.subr.bf16.mxu1 %v5120_v51  ;;  %v9390_v53 = vld [vmem:[%s12797_s0 + $0x7c] ss:$12 sps:$4 sm:$0xff]   ;;  %8457 = vmatprep.subr.bf16.mxu0 %v8998_v22  ;;  %v9421_v40 = vld [vmem:[%s12797_s0 + $0x1b4] ss:$12 sps:$4 sm:$0xff]  }
 0x8b5   :  { %v5088_v30 = vadd.f32 %v5087_v57, %v11737_v56  ;;  %v9389_v56 = vld [vmem:[%s12797_s0 + $0x60] ss:$12 sps:$4 sm:$0xff]   ;;  %v9422_v61 = vld [vmem:[%s12797_s0 + $0x1b0] ss:$12 sps:$4 sm:$0xff]  }
 0x8b6   :  { %v5122_v0 = vpack.c.bf16 %v5096_v9, %v5093_v13  ;;  %v9423_v13 = vld [vmem:[%s12797_s0 + $0x1cc] ss:$12 sps:$4 sm:$0xff]   ;;  %v9424_v9 = vld [vmem:[%s12797_s0 + $0x1c8] ss:$12 sps:$4 sm:$0xff]  }
 0x8b7   :  { %v5121_v25 = vpack.c.bf16 %v5088_v30, %v5085_v54  ;;  %8396 = vmatpush3.bf16.msra.mxu1 %v5120_v51  ;;  %8458 = vmatpush3.bf16.msra.mxu0 %v8998_v22  ;;  %v9418_v51 = vld [vmem:[%s12797_s0 + $0x180] ss:$12 sps:$4 sm:$0xff]   ;;  %v9425_v30 = vld [vmem:[%s12797_s0 + $0x1e4] ss:$12 sps:$4 sm:$0xff]  }
 0x8b8   :  { %5518 = vmatmul.mubr.bf16.gmra.mrb[236].mxu0 %v9387_v55  ;;  %8459 = vmatprep.subr.bf16.mxu0 %v8999_v43 }
 0x8b9   :  { %8381 = vmatprep.mubr.bf16.mxu1 %v5121_v25  ;;  %8397 = vmatprep.subr.bf16.mxu1 %v5121_v25 }
 0x8ba   :  { %8382 = vmatmul.mubr.bf16.gmra.mrb[28].mxu1 %v5122_v0  ;;  %5525 = vmatprep.mubr.bf16.mxu0 %v9388_v63 }
 0x8bb   :  { %8398 = vmatpush3.bf16.msra.mxu1 %v5121_v25  ;;  %8401 = vmatprep.mubr.bf16.mxu1 %v11485_v44  ;;  %v9391_v44 = vld [vmem:[%s12797_s0 + $0x78] ss:$12 sps:$4 sm:$0xff]  }
 0x8bc   :  { %8399 = vmatprep.subr.bf16.mxu1 %v5122_v0  ;;  %8460 = vmatpush3.bf16.msra.mxu0 %v8999_v43 }
 0x8bd   :  { %8461 = vmatprep.subr.bf16.mxu0 %v9000_v10 }
 0x8bf   :  { %8400 = vmatpush3.bf16.msra.mxu1 %v5122_v0 }
 0x8c0   :  { %5526 = vmatmul.mubr.bf16.gmra.mrb[240].mxu0 %v9389_v56  ;;  %8513 = vmatprep.subr.bf16.mxu1 %v8994_v59  ;;  %v9426_v56 = vld [vmem:[%s12797_s0 + $0x1e0] ss:$12 sps:$4 sm:$0xff]  }
 0x8c1   :  { %5533 = vmatprep.mubr.bf16.mxu0 %v9390_v53  ;;  %8462 = vmatpush3.bf16.msra.mxu0 %v9000_v10  ;;  %v9427_v53 = vld [vmem:[%s12797_s0 + $0x1fc] ss:$12 sps:$4 sm:$0xff]  }
 0x8c2   :  { %8402 = vmatmul.mubr.bf16.vlgmr.msra.gmra.mrb[128].mxu1 %v11496_v26  ;;  %v9393_v26 = vld [vmem:[%s12797_s0 + $0x90] ss:$12 sps:$4 sm:$0xff]   ;;  %8463 = vmatprep.subr.bf16.mxu0 %v9001_v46 }
 0x8c3   :  { %8405 = vmatprep.mubr.bf16.mxu1 %v11502_v6  ;;  %v9394_v6 = vld [vmem:[%s12797_s0 + $0xac] ss:$12 sps:$4 sm:$0xff]   ;;  %8521 = vmatpush3.bf16.msra.mxu1 %v8994_v59 }
 0x8c4   :  { %8514 = vmatprep.subr.bf16.mxu1 %v8995_v2 }
 0x8c5   :  { %8464 = vmatpush3.bf16.msra.mxu0 %v9001_v46 }
 0x8c7   :  { %8522 = vmatpush3.bf16.msra.mxu1 %v8995_v2 }
 0x8c8   :  { %5534 = vmatmul.mubr.bf16.gmra.mrb[244].mxu0 %v9391_v44  ;;  %8515 = vmatprep.subr.bf16.mxu1 %v8996_v19 }
 0x8c9   :  { %5541 = vmatprep.mubr.bf16.mxu0 %v9392_v1 }
 0x8ca   :  { %8406 = vmatmul.mubr.bf16.gmra.mrb[132].mxu1 %v11516_v11  ;;  %v9395_v11 = vld [vmem:[%s12797_s0 + $0xa8] ss:$12 sps:$4 sm:$0xff]  }
 0x8cb   :  { %8409 = vmatprep.mubr.bf16.mxu1 %v11522_v32  ;;  %v9396_v32 = vld [vmem:[%s12797_s0 + $0xc4] ss:$12 sps:$4 sm:$0xff]   ;;  %8523 = vmatpush3.bf16.msra.mxu1 %v8996_v19 }
 0x8cc   :  { %8516 = vmatprep.subr.bf16.mxu1 %v8997_v49 }
 0x8cf   :  { %8524 = vmatpush3.bf16.msra.mxu1 %v8997_v49 }
 0x8d0   :  { %5542 = vmatmul.mubr.bf16.gmra.mrb[248].mxu0 %v9393_v26  ;;  %8517 = vmatprep.subr.bf16.mxu1 %v8998_v22 }
 0x8d1   :  { %5549 = vmatprep.mubr.bf16.mxu0 %v9394_v6 }
 0x8d2   :  { %8410 = vmatmul.mubr.bf16.gmra.mrb[136].mxu1 %v11536_v14  ;;  %v9397_v14 = vld [vmem:[%s12797_s0 + $0xc0] ss:$12 sps:$4 sm:$0xff]  }
 0x8d3   :  { %8413 = vmatprep.mubr.bf16.mxu1 %v11542_v20  ;;  %v9398_v20 = vld [vmem:[%s12797_s0 + $0xdc] ss:$12 sps:$4 sm:$0xff]   ;;  %8525 = vmatpush3.bf16.msra.mxu1 %v8998_v22 }
 0x8d4   :  { %8518 = vmatprep.subr.bf16.mxu1 %v8999_v43 }
 0x8d7   :  { %8526 = vmatpush3.bf16.msra.mxu1 %v8999_v43 }
 0x8d8   :  { %5550 = vmatmul.mubr.bf16.gmra.mrb[252].mxu0 %v9395_v11  ;;  %8519 = vmatprep.subr.bf16.mxu1 %v9000_v10  ;;  %v9428_v11 = vld [vmem:[%s12797_s0 + $0x1f8] ss:$12 sps:$4 sm:$0xff]  }
 0x8d9   :  { %5557 = vmatprep.mubr.bf16.mxu0 %v9396_v32  ;;  %v9429_v32 = vld [vmem:[%s12797_s0 + $0x214] ss:$12 sps:$4 sm:$0xff]  }
 0x8da   :  { %8414 = vmatmul.mubr.bf16.gmra.mrb[140].mxu1 %v11550_v3  ;;  %v9399_v3 = vld [vmem:[%s12797_s0 + $0xd8] ss:$12 sps:$4 sm:$0xff]  }
 0x8db   :  { %8417 = vmatprep.mubr.bf16.mxu1 %v13113_v52  ;;  %8527 = vmatpush3.bf16.msra.mxu1 %v9000_v10 }
 0x8dc   :  { %8520 = vmatprep.subr.bf16.mxu1 %v9001_v46 }
 0x8df   :  { %8528 = vmatpush3.bf16.msra.mxu1 %v9001_v46 }
 0x8e0   :  { %5558 = vmatmul.mubr.bf16.gmra.mrb[0].mxu0 %v9397_v14 }
 0x8e1   :  { %5565 = vmatprep.mubr.bf16.mxu0 %v9398_v20 }
 0x8e2   :  { %8418 = vmatmul.mubr.bf16.gmra.mrb[144].mxu1 %v13114_v58 }
 0x8e3   :  { %8421 = vmatprep.mubr.bf16.mxu1 %v13115_v41  ;;  %v9430_v41 = vld [vmem:[%s12797_s0 + $0x210] ss:$12 sps:$4 sm:$0xff]  }
 0x8e8   :  { %5566 = vmatmul.mubr.bf16.gmra.mrb[4].mxu0 %v9399_v3  ;;  %v9431_v3 = vld [vmem:[%s12797_s0 + $0x22c] ss:$12 sps:$4 sm:$0xff]  }
 0x8e9   :  { %5573 = vmatprep.mubr.bf16.mxu0 %v9400_v27 }
 0x8ea   :  { %8422 = vmatmul.mubr.bf16.gmra.mrb[148].mxu1 %v13116_v38 }
 0x8eb   :  { %8425 = vmatprep.mubr.bf16.mxu1 %v13117_v47 }
 0x8f0   :  { %5574 = vmatmul.mubr.bf16.gmra.mrb[8].mxu0 %v9401_v42 }
 0x8f1   :  { %5581 = vmatprep.mubr.bf16.mxu0 %v9402_v12  ;;  %v9432_v12 = vld [vmem:[%s12797_s0 + $0x228] ss:$12 sps:$4 sm:$0xff]  }
 0x8f2   :  { %8426 = vmatmul.mubr.bf16.gmra.mrb[152].mxu1 %v13118_v29 }
 0x8f3   :  { %8429 = vmatprep.mubr.bf16.mxu1 %v13119_v7 }
 0x8f8   :  { %5582 = vmatmul.mubr.bf16.gmra.mrb[12].mxu0 %v9403_v39 }
 0x8f9   :  { %5589 = vmatprep.mubr.bf16.mxu0 %v9404_v34 }
 0x8fa   :  { %8430 = vmatmul.mubr.bf16.gmra.mrb[156].mxu1 %v13120_v8 }
 0x8fb   :  { %8433 = vmatprep.mubr.bf16.mxu1 %v13121_v37 }
 0x900   :  { %5590 = vmatmul.mubr.bf16.gmra.mrb[16].mxu0 %v9405_v50 }
 0x901   :  { %5597 = vmatprep.mubr.bf16.mxu0 %v9406_v36 }
 0x902   :  { %8434 = vmatmul.mubr.bf16.gmra.mrb[160].mxu1 %v13122_v45 }
 0x903   :  { %8437 = vmatprep.mubr.bf16.mxu1 %v13123_v28 }
 0x908   :  { %5598 = vmatmul.mubr.bf16.gmra.mrb[20].mxu0 %v9407_v24 }
 0x909   :  { %5605 = vmatprep.mubr.bf16.mxu0 %v9408_v62 }
 0x90a   :  { %8438 = vmatmul.mubr.bf16.gmra.mrb[164].mxu1 %v9409_v31 }
 0x90b   :  { %8441 = vmatprep.mubr.bf16.mxu1 %v9410_v23 }
 0x910   :  { %5606 = vmatmul.mubr.bf16.gmra.mrb[24].mxu0 %v9411_v48 }
 0x911   :  { %5613 = vmatprep.mubr.bf16.mxu0 %v9412_v5 }
 0x912   :  { %8442 = vmatmul.mubr.bf16.gmra.mrb[168].mxu1 %v9413_v4 }
 0x913   :  { %8445 = vmatprep.mubr.bf16.mxu1 %v9414_v18 }
 0x918   :  { %5614 = vmatmul.mubr.bf16.gmra.mrb[28].mxu0 %v9415_v35 }
 0x919   :  { %5621 = vmatprep.mubr.bf16.mxu0 %v9416_v17 }
 0x91a   :  { %8446 = vmatmul.mubr.bf16.gmra.mrb[172].mxu1 %v9417_v16 }
 0x920   :  { %5622 = vmatmul.mubr.bf16.gmra.mrb[32].mxu0 %v9418_v51 }
 0x921   :  { %5629 = vmatprep.mubr.bf16.mxu0 %v9419_v21 }
 0x928   :  { %5630 = vmatmul.mubr.bf16.gmra.mrb[36].mxu0 %v9420_v15 }
 0x929   :  { %5637 = vmatprep.mubr.bf16.mxu0 %v9421_v40 }
 0x930   :  { %5638 = vmatmul.mubr.bf16.gmra.mrb[40].mxu0 %v9422_v61 }
 0x931   :  { %5645 = vmatprep.mubr.bf16.mxu0 %v9423_v13 }
 0x935   :  { %v11963_v60 = vpop.f32.mrb[240].mxu1 }
 0x936   :  { %v11965_v54 = vpop.f32.mrb[241].mxu1 }
 0x937   :  { %v11967_v33 = vpop.f32.mrb[242].mxu1 }
 0x938   :  { %v11969_v57 = vpop.f32.mrb[243].mxu1  ;;  %5646 = vmatmul.mubr.bf16.gmra.mrb[44].mxu0 %v9424_v9 }
 0x939   :  { %5653 = vmatprep.mubr.bf16.mxu0 %v9425_v30 }
 0x93d   :  { %v11977_v0 = vpop.f32.mrb[244].mxu1 }
 0x93e   :  { %v11979_v25 = vpop.f32.mrb[245].mxu1 }
 0x93f   :  { %v11981_v55 = vpop.f32.mrb[246].mxu1 }
 0x940   :  { %v11983_v63 = vpop.f32.mrb[247].mxu1  ;;  %5654 = vmatmul.mubr.bf16.gmra.mrb[48].mxu0 %v9426_v56 }
 0x941   :  { %5661 = vmatprep.mubr.bf16.mxu0 %v9427_v53 }
 0x945   :  { %v11991_v44 = vpop.f32.mrb[248].mxu1 }
 0x946   :  { %v11993_v1 = vpop.f32.mrb[249].mxu1 }
 0x947   :  { %v11995_v26 = vpop.f32.mrb[250].mxu1 }
 0x948   :  { %v11997_v6 = vpop.f32.mrb[251].mxu1  ;;  %5662 = vmatmul.mubr.bf16.gmra.mrb[52].mxu0 %v9428_v11 }
 0x949   :  { %5669 = vmatprep.mubr.bf16.mxu0 %v9429_v32 }
 0x94d   :  { %v12005_v52 = vpop.f32.mrb[252].mxu1 }
 0x94e   :  { %v12007_v14 = vpop.f32.mrb[253].mxu1 }
 0x94f   :  { %v12009_v20 = vpop.f32.mrb[254].mxu1 }
 0x950   :  { %v12011_v58 = vpop.f32.mrb[255].mxu1  ;;  %5670 = vmatmul.mubr.bf16.gmra.mrb[56].mxu0 %v9430_v41 }
 0x951   :  { %5677 = vmatprep.mubr.bf16.mxu0 %v9431_v3 }
 0x955   :  { %v12019_v27 = vpop.f32.mrb[0].mxu1 }
 0x956   :  { %v12021_v38 = vpop.f32.mrb[1].mxu1 }
 0x957   :  { %v12023_v47 = vpop.f32.mrb[2].mxu1 }
 0x958   :  { %v12025_v42 = vpop.f32.mrb[3].mxu1  ;;  %5678 = vmatmul.mubr.bf16.gmra.mrb[60].mxu0 %v9432_v12 }
 0x95d   :  { %v12030_v29 = vpop.f32.mrb[4].mxu1 }
 0x95e   :  { %v12032_v7 = vpop.f32.mrb[5].mxu1 }
 0x95f   :  { %v12034_v39 = vpop.f32.mrb[6].mxu1 }
 0x960   :  { %v12036_v34 = vpop.f32.mrb[7].mxu1 }
 0x965   :  { %v12038_v8 = vpop.f32.mrb[8].mxu1 }
 0x966   :  { %v12040_v37 = vpop.f32.mrb[9].mxu1 }
 0x967   :  { %v12042_v59 = vpop.f32.mrb[10].mxu1 }
 0x968   :  { %v12044_v50 = vpop.f32.mrb[11].mxu1 }
 0x96d   :  { %v12046_v2 = vpop.f32.mrb[12].mxu1 }
 0x96e   :  { %v12048_v36 = vpop.f32.mrb[13].mxu1 }
 0x96f   :  { %13124 = vst [vmem:[#allocation16_spill] sm:$0xff] %v12048_v36  ;;  %v12050_v45 = vpop.f32.mrb[14].mxu1 }
 0x970   :  { %13125 = vst [vmem:[#allocation26_spill] sm:$0xff] %v12050_v45  ;;  %v12052_v19 = vpop.f32.mrb[15].mxu1 }
 0x971   :  { %13126 = vst [vmem:[#allocation29_spill] sm:$0xff] %v12052_v19 }
 0x973   :  { %v5495_v28 = vpop.f32.mrb[224].mxu0 }
 0x974   :  { %v5497_v49 = vpop.f32.mrb[225].mxu0 }
 0x975   :  { %v12054_v24 = vpop.f32.mrb[16].mxu1  ;;  %v5498_v62 = vpop.f32.mrb[226].mxu0 }
 0x976   :  { %13127 = vst [vmem:[#allocation17_spill] sm:$0xff] %v12054_v24  ;;  %v12056_v31 = vpop.f32.mrb[17].mxu1  ;;  %v5500_v22 = vpop.f32.mrb[227].mxu0 }
 0x977   :  { %13128 = vst [vmem:[#allocation18_spill] sm:$0xff] %v12056_v31  ;;  %v12058_v23 = vpop.f32.mrb[18].mxu1 }
 0x978   :  { %13129 = vst [vmem:[#allocation28_spill] sm:$0xff] %v12058_v23  ;;  %v12060_v43 = vpop.f32.mrb[19].mxu1 }
 0x979   :  { %13130 = vst [vmem:[#allocation4_spill] sm:$0xff] %v12060_v43 }
 0x97b   :  { %v5503_v48 = vpop.f32.mrb[228].mxu0 }
 0x97c   :  { %v5505_v5 = vpop.f32.mrb[229].mxu0 }
 0x97d   :  { %v12062_v4 = vpop.f32.mrb[20].mxu1  ;;  %v5506_v18 = vpop.f32.mrb[230].mxu0 }
 0x97e   :  { %13131 = vst [vmem:[#allocation19_spill] sm:$0xff] %v12062_v4  ;;  %v12064_v10 = vpop.f32.mrb[21].mxu1  ;;  %v5508_v35 = vpop.f32.mrb[231].mxu0 }
 0x97f   :  { %13132 = vst [vmem:[#allocation20_spill] sm:$0xff] %v12064_v10  ;;  %v12066_v17 = vpop.f32.mrb[22].mxu1 }
 0x980   :  { %13133 = vst [vmem:[#allocation2_spill] sm:$0xff] %v12066_v17  ;;  %v12068_v46 = vpop.f32.mrb[23].mxu1 }
 0x981   :  { %13134 = vst [vmem:[#allocation6_spill] sm:$0xff] %v12068_v46 }
 0x983   :  { %v5511_v16 = vpop.f32.mrb[232].mxu0 }
 0x984   :  { %v5513_v51 = vpop.f32.mrb[233].mxu0 }
 0x985   :  { %v5514_v21 = vpop.f32.mrb[234].mxu0 }
 0x986   :  { %v5516_v15 = vpop.f32.mrb[235].mxu0 }
 0x98b   :  { %v5519_v40 = vpop.f32.mrb[236].mxu0 }
 0x98c   :  { %v5521_v61 = vpop.f32.mrb[237].mxu0 }
 0x98d   :  { %v5522_v13 = vpop.f32.mrb[238].mxu0 }
 0x98e   :  { %v5524_v9 = vpop.f32.mrb[239].mxu0 }
 0x993   :  { %v5527_v30 = vpop.f32.mrb[240].mxu0 }
 0x994   :  { %v5529_v56 = vpop.f32.mrb[241].mxu0 }
 0x995   :  { %v8403_v53 = vpop.f32.mrb[128].mxu1  ;;  %v5530_v11 = vpop.f32.mrb[242].mxu0 }
 0x996   :  { %v5720_v32 = vpop.f32.mrb[129].mxu1  ;;  %v5729_v41 = vadd.f32 %v8403_v53, %v5503_v48  ;;  %v5532_v3 = vpop.f32.mrb[243].mxu0 }
 0x997   :  { %v5721_v12 = vadd.f32 %v5720_v32, %v5495_v28  ;;  %v8404_v49 = vpop.f32.mrb[130].mxu1 }
 0x998   :  { %v5723_v22 = vpop.f32.mrb[131].mxu1  ;;  %v5732_v5 = vadd.f32 %v8404_v49, %v5506_v18 }
 0x999   :  { %v5724_v35 = vadd.f32 %v5723_v22, %v5498_v62 }
 0x99a   :  { %v5912_v46 = vpack.c.bf16 %v5732_v5, %v5729_v41 }
 0x99b   :  { %v5911_v51 = vpack.c.bf16 %v5724_v35, %v5721_v12  ;;  %v5535_v17 = vpop.f32.mrb[244].mxu0 }
 0x99c   :  { %v5537_v15 = vpop.f32.mrb[245].mxu0 }
 0x99d   :  { %v8407_v10 = vpop.f32.mrb[132].mxu1  ;;  %8465 = vmatprep.mubr.bf16.mxu0 %v5911_v51  ;;  %v5538_v61 = vpop.f32.mrb[246].mxu0 }
 0x99e   :  { %v5736_v9 = vpop.f32.mrb[133].mxu1  ;;  %8466 = vmatmul.mubr.bf16.vlgmr.msra.gmra.mrb[64].mxu0 %v5912_v46  ;;  %v5745_v56 = vadd.f32 %v8407_v10, %v5519_v40  ;;  %v5540_v4 = vpop.f32.mrb[247].mxu0 }
 0x99f   :  { %v5737_v43 = vadd.f32 %v5736_v9, %v5511_v16  ;;  %v8408_v23 = vpop.f32.mrb[134].mxu1 }
 0x9a0   :  { %v5739_v48 = vpop.f32.mrb[135].mxu1  ;;  %v5748_v53 = vadd.f32 %v8408_v23, %v5522_v13 }
 0x9a1   :  { %v5740_v28 = vadd.f32 %v5739_v48, %v5514_v21 }
 0x9a2   :  { %v5914_v32 = vpack.c.bf16 %v5748_v53, %v5745_v56 }
 0x9a3   :  { %v5913_v3 = vpack.c.bf16 %v5740_v28, %v5737_v43  ;;  %v5543_v18 = vpop.f32.mrb[248].mxu0 }
 0x9a4   :  { %v5545_v62 = vpop.f32.mrb[249].mxu0 }
 0x9a5   :  { %v8411_v41 = vpop.f32.mrb[136].mxu1  ;;  %8469 = vmatprep.mubr.bf16.mxu0 %v5913_v3  ;;  %v5546_v12 = vpop.f32.mrb[250].mxu0 }
 0x9a6   :  { %v5752_v49 = vpop.f32.mrb[137].mxu1  ;;  %8470 = vmatmul.mubr.bf16.gmra.mrb[68].mxu0 %v5914_v32  ;;  %v5761_v22 = vadd.f32 %v8411_v41, %v5535_v17  ;;  %v5548_v5 = vpop.f32.mrb[251].mxu0 }
 0x9a7   :  { %v5753_v35 = vadd.f32 %v5752_v49, %v5527_v30  ;;  %v8412_v46 = vpop.f32.mrb[138].mxu1 }
 0x9a8   :  { %v5755_v10 = vpop.f32.mrb[139].mxu1  ;;  %v5764_v4 = vadd.f32 %v8412_v46, %v5538_v61 }
 0x9a9   :  { %v5756_v16 = vadd.f32 %v5755_v10, %v5530_v11 }
 0x9aa   :  { %v5916_v40 = vpack.c.bf16 %v5764_v4, %v5761_v22 }
 0x9ab   :  { %v5915_v51 = vpack.c.bf16 %v5756_v16, %v5753_v35  ;;  %v5551_v23 = vpop.f32.mrb[252].mxu0 }
 0x9ac   :  { %v5553_v21 = vpop.f32.mrb[253].mxu0 }
 0x9ad   :  { %v8415_v13 = vpop.f32.mrb[140].mxu1  ;;  %8473 = vmatprep.mubr.bf16.mxu0 %v5915_v51  ;;  %v5554_v43 = vpop.f32.mrb[254].mxu0 }
 0x9ae   :  { %v5768_v15 = vpop.f32.mrb[141].mxu1  ;;  %8474 = vmatmul.mubr.bf16.gmra.mrb[72].mxu0 %v5916_v40  ;;  %v5777_v9 = vadd.f32 %v8415_v13, %v5551_v23  ;;  %v5556_v56 = vpop.f32.mrb[255].mxu0 }
 0x9af   :  { %v5769_v48 = vadd.f32 %v5768_v15, %v5543_v18  ;;  %v8416_v53 = vpop.f32.mrb[142].mxu1 }
 0x9b0   :  { %v5771_v17 = vpop.f32.mrb[143].mxu1  ;;  %v5780_v28 = vadd.f32 %v8416_v53, %v5554_v43 }
 0x9b1   :  { %v5772_v30 = vadd.f32 %v5771_v17, %v5546_v12 }
 0x9b2   :  { %v5918_v32 = vpack.c.bf16 %v5780_v28, %v5777_v9 }
 0x9b3   :  { %v5917_v3 = vpack.c.bf16 %v5772_v30, %v5769_v48  ;;  %v5559_v61 = vpop.f32.mrb[0].mxu0 }
 0x9b4   :  { %v5561_v11 = vpop.f32.mrb[1].mxu0 }
 0x9b5   :  { %8477 = vmatprep.mubr.bf16.mxu0 %v5917_v3  ;;  %v5562_v62 = vpop.f32.mrb[2].mxu0  ;;  %v8419_v41 = vpop.f32.mrb[144].mxu1 }
 0x9b6   :  { %8478 = vmatmul.mubr.bf16.gmra.mrb[76].mxu0 %v5918_v32  ;;  %v5564_v49 = vpop.f32.mrb[3].mxu0  ;;  %v5784_v22 = vpop.f32.mrb[145].mxu1 }
 0x9b7   :  { %v5785_v5 = vadd.f32 %v5784_v22, %v5559_v61  ;;  %v8420_v35 = vpop.f32.mrb[146].mxu1 }
 0x9b8   :  { %v5787_v46 = vpop.f32.mrb[147].mxu1 }
 0x9b9   :  { %v5788_v10 = vadd.f32 %v5787_v46, %v5562_v62 }
 0x9bb   :  { %v5567_v4 = vpop.f32.mrb[4].mxu0  ;;  %v5919_v18 = vpack.c.bf16 %v5788_v10, %v5785_v5 }
 0x9bc   :  { %v5793_v16 = vadd.f32 %v8419_v41, %v5567_v4  ;;  %v5569_v40 = vpop.f32.mrb[5].mxu0 }
 0x9bd   :  { %v5570_v51 = vpop.f32.mrb[6].mxu0  ;;  %8481 = vmatprep.mubr.bf16.mxu0 %v5919_v18  ;;  %v8423_v12 = vpop.f32.mrb[148].mxu1 }
 0x9be   :  { %v5796_v23 = vadd.f32 %v8420_v35, %v5570_v51  ;;  %v5572_v21 = vpop.f32.mrb[7].mxu0  ;;  %v5800_v13 = vpop.f32.mrb[149].mxu1 }
 0x9bf   :  { %v8424_v43 = vpop.f32.mrb[150].mxu1 }
 0x9c0   :  { %v5920_v15 = vpack.c.bf16 %v5796_v23, %v5793_v16  ;;  %v5803_v9 = vpop.f32.mrb[151].mxu1 }
 0x9c2   :  { %8482 = vmatmul.mubr.bf16.gmra.mrb[80].mxu0 %v5920_v15 }
 0x9c3   :  { %v5575_v56 = vpop.f32.mrb[8].mxu0 }
 0x9c4   :  { %v5577_v48 = vpop.f32.mrb[9].mxu0  ;;  %v5801_v53 = vadd.f32 %v5800_v13, %v5575_v56 }
 0x9c5   :  { %v5578_v17 = vpop.f32.mrb[10].mxu0  ;;  %v8427_v28 = vpop.f32.mrb[152].mxu1 }
 0x9c6   :  { %v5580_v30 = vpop.f32.mrb[11].mxu0  ;;  %v5804_v32 = vadd.f32 %v5803_v9, %v5578_v17  ;;  %v5816_v3 = vpop.f32.mrb[153].mxu1 }
 0x9c7   :  { %v8428_v61 = vpop.f32.mrb[154].mxu1 }
 0x9c8   :  { %v5921_v11 = vpack.c.bf16 %v5804_v32, %v5801_v53  ;;  %v5819_v62 = vpop.f32.mrb[155].mxu1 }
 0x9ca   :  { %8485 = vmatprep.mubr.bf16.mxu0 %v5921_v11 }
 0x9cb   :  { %v5583_v41 = vpop.f32.mrb[12].mxu0 }
 0x9cc   :  { %v5809_v49 = vadd.f32 %v8423_v12, %v5583_v41  ;;  %v5585_v22 = vpop.f32.mrb[13].mxu0 }
 0x9cd   :  { %v5586_v5 = vpop.f32.mrb[14].mxu0  ;;  %v8431_v35 = vpop.f32.mrb[156].mxu1 }
 0x9ce   :  { %v5812_v46 = vadd.f32 %v8424_v43, %v5586_v5  ;;  %v5588_v10 = vpop.f32.mrb[15].mxu0  ;;  %v5832_v4 = vpop.f32.mrb[157].mxu1 }
 0x9cf   :  { %v8432_v18 = vpop.f32.mrb[158].mxu1 }
 0x9d0   :  { %v5922_v16 = vpack.c.bf16 %v5812_v46, %v5809_v49  ;;  %v5835_v40 = vpop.f32.mrb[159].mxu1 }
 0x9d2   :  { %8486 = vmatmul.mubr.bf16.gmra.mrb[84].mxu0 %v5922_v16 }
 0x9d3   :  { %v5591_v51 = vpop.f32.mrb[16].mxu0 }
 0x9d4   :  { %v5593_v23 = vpop.f32.mrb[17].mxu0  ;;  %v5817_v21 = vadd.f32 %v5816_v3, %v5591_v51 }
 0x9d5   :  { %v5594_v13 = vpop.f32.mrb[18].mxu0  ;;  %v8435_v15 = vpop.f32.mrb[160].mxu1 }
 0x9d6   :  { %v5596_v9 = vpop.f32.mrb[19].mxu0  ;;  %v5820_v56 = vadd.f32 %v5819_v62, %v5594_v13  ;;  %v5848_v48 = vpop.f32.mrb[161].mxu1 }
 0x9d7   :  { %v8436_v53 = vpop.f32.mrb[162].mxu1 }
 0x9d8   :  { %v5923_v12 = vpack.c.bf16 %v5820_v56, %v5817_v21  ;;  %v5851_v17 = vpop.f32.mrb[163].mxu1 }
 0x9da   :  { %8489 = vmatprep.mubr.bf16.mxu0 %v5923_v12 }
 0x9db   :  { %v5599_v30 = vpop.f32.mrb[20].mxu0 }
 0x9dc   :  { %v5825_v43 = vadd.f32 %v8427_v28, %v5599_v30  ;;  %v5601_v32 = vpop.f32.mrb[21].mxu0 }
 0x9dd   :  { %v5602_v11 = vpop.f32.mrb[22].mxu0  ;;  %v8439_v41 = vpop.f32.mrb[164].mxu1 }
 0x9de   :  { %v5828_v49 = vadd.f32 %v8428_v61, %v5602_v11  ;;  %v5604_v22 = vpop.f32.mrb[23].mxu0  ;;  %v5864_v5 = vpop.f32.mrb[165].mxu1 }
 0x9df   :  { %v8440_v46 = vpop.f32.mrb[166].mxu1 }
 0x9e0   :  { %v5924_v10 = vpack.c.bf16 %v5828_v49, %v5825_v43  ;;  %v5867_v3 = vpop.f32.mrb[167].mxu1 }
 0x9e2   :  { %8490 = vmatmul.mubr.bf16.gmra.mrb[88].mxu0 %v5924_v10 }
 0x9e3   :  { %v5607_v16 = vpop.f32.mrb[24].mxu0 }
 0x9e4   :  { %v5609_v51 = vpop.f32.mrb[25].mxu0  ;;  %v5833_v62 = vadd.f32 %v5832_v4, %v5607_v16 }
 0x9e5   :  { %v5610_v23 = vpop.f32.mrb[26].mxu0  ;;  %v8443_v13 = vpop.f32.mrb[168].mxu1 }
 0x9e6   :  { %v5612_v21 = vpop.f32.mrb[27].mxu0  ;;  %v5836_v9 = vadd.f32 %v5835_v40, %v5610_v23  ;;  %v5880_v56 = vpop.f32.mrb[169].mxu1 }
 0x9e7   :  { %v8444_v12 = vpop.f32.mrb[170].mxu1 }
 0x9e8   :  { %v5925_v28 = vpack.c.bf16 %v5836_v9, %v5833_v62  ;;  %v5883_v30 = vpop.f32.mrb[171].mxu1 }
 0x9ea   :  { %8493 = vmatprep.mubr.bf16.mxu0 %v5925_v28 }
 0x9eb   :  { %v5615_v32 = vpop.f32.mrb[28].mxu0 }
 0x9ec   :  { %v5841_v61 = vadd.f32 %v8431_v35, %v5615_v32  ;;  %v5617_v11 = vpop.f32.mrb[29].mxu0 }
 0x9ed   :  { %v5618_v22 = vpop.f32.mrb[30].mxu0  ;;  %v12070_v31 = vpop.f32.mrb[172].mxu1 }
 0x9ee   :  { %v5844_v43 = vadd.f32 %v8432_v18, %v5618_v22  ;;  %v5620_v49 = vpop.f32.mrb[31].mxu0  ;;  %v5896_v10 = vpop.f32.mrb[173].mxu1 }
 0x9ef   :  { %v12072_v51 = vpop.f32.mrb[174].mxu1 }
 0x9f0   :  { %v5926_v4 = vpack.c.bf16 %v5844_v43, %v5841_v61  ;;  %v5899_v16 = vpop.f32.mrb[175].mxu1 }
 0x9f2   :  { %8494 = vmatmul.mubr.bf16.gmra.mrb[92].mxu0 %v5926_v4 }
 0x9f3   :  { %v5623_v40 = vpop.f32.mrb[32].mxu0 }
 0x9f4   :  { %v5625_v23 = vpop.f32.mrb[33].mxu0  ;;  %v5849_v21 = vadd.f32 %v5848_v48, %v5623_v40 }
 0x9f5   :  { %v5626_v62 = vpop.f32.mrb[34].mxu0 }
 0x9f6   :  { %v5628_v9 = vpop.f32.mrb[35].mxu0  ;;  %v5852_v28 = vadd.f32 %v5851_v17, %v5626_v62 }
 0x9f8   :  { %v5927_v24 = vpack.c.bf16 %v5852_v28, %v5849_v21 }
 0x9fa   :  { %8497 = vmatprep.mubr.bf16.mxu0 %v5927_v24 }
 0x9fb   :  { %v5631_v35 = vpop.f32.mrb[36].mxu0 }
 0x9fc   :  { %v5857_v32 = vadd.f32 %v8435_v15, %v5631_v35  ;;  %v5633_v11 = vpop.f32.mrb[37].mxu0 }
 0x9fd   :  { %v5634_v19 = vpop.f32.mrb[38].mxu0 }
 0x9fe   :  { %v5860_v18 = vadd.f32 %v8436_v53, %v5634_v19  ;;  %v5636_v22 = vpop.f32.mrb[39].mxu0 }
 0xa00   :  { %v5928_v49 = vpack.c.bf16 %v5860_v18, %v5857_v32 }
 0xa02   :  { %8498 = vmatmul.mubr.bf16.gmra.mrb[96].mxu0 %v5928_v49 }
 0xa03   :  { %v5639_v45 = vpop.f32.mrb[40].mxu0 }
 0xa04   :  { %v5641_v61 = vpop.f32.mrb[41].mxu0  ;;  %v5865_v43 = vadd.f32 %v5864_v5, %v5639_v45 }
 0xa05   :  { %v5642_v4 = vpop.f32.mrb[42].mxu0 }
 0xa06   :  { %v5644_v36 = vpop.f32.mrb[43].mxu0  ;;  %v5868_v23 = vadd.f32 %v5867_v3, %v5642_v4 }
 0xa08   :  { %v5929_v48 = vpack.c.bf16 %v5868_v23, %v5865_v43 }
 0xa0a   :  { %8501 = vmatprep.mubr.bf16.mxu0 %v5929_v48 }
 0xa0b   :  { %v5647_v40 = vpop.f32.mrb[44].mxu0 }
 0xa0c   :  { %v5873_v17 = vadd.f32 %v8439_v41, %v5647_v40  ;;  %v5649_v21 = vpop.f32.mrb[45].mxu0 }
 0xa0d   :  { %v5650_v24 = vpop.f32.mrb[46].mxu0 }
 0xa0e   :  { %v5876_v62 = vadd.f32 %v8440_v46, %v5650_v24  ;;  %v5652_v15 = vpop.f32.mrb[47].mxu0 }
 0xa10   :  { %v5930_v9 = vpack.c.bf16 %v5876_v62, %v5873_v17  ;;  %v6328_v62 = vlaneseq }
 0xa12   :  { %8502 = vmatmul.mubr.bf16.gmra.mrb[100].mxu0 %v5930_v9  ;;  %v12076_v15 = vand.u32 127, %v6328_v62 }
 0xa13   :  { %v5655_v19 = vpop.f32.mrb[48].mxu0 }
 0xa14   :  { %v5657_v53 = vpop.f32.mrb[49].mxu0  ;;  %v5881_v28 = vadd.f32 %v5880_v56, %v5655_v19  ;;  %vm6330_vm0 = vcmp.lt.s32.totalorder %v12076_v15, 16 }
 0xa15   :  { %v5658_v35 = vpop.f32.mrb[50].mxu0 }
 0xa16   :  { %v5660_v32 = vpop.f32.mrb[51].mxu0  ;;  %v5884_v11 = vadd.f32 %v5883_v30, %v5658_v35 }
 0xa18   :  { %v5931_v45 = vpack.c.bf16 %v5884_v11, %v5881_v28 }
 0xa1a   :  { %8505 = vmatprep.mubr.bf16.mxu1 %v5931_v45 }
 0xa1b   :  { %v5663_v36 = vpop.f32.mrb[52].mxu0 }
 0xa1c   :  { %v5889_v5 = vadd.f32 %v8443_v13, %v5663_v36  ;;  %v5665_v3 = vpop.f32.mrb[53].mxu0 }
 0xa1d   :  { %v5666_v18 = vpop.f32.mrb[54].mxu0 }
 0xa1e   :  { %v5892_v22 = vadd.f32 %v8444_v12, %v5666_v18  ;;  %v5668_v41 = vpop.f32.mrb[55].mxu0 }
 0xa20   :  { %v5932_v49 = vpack.c.bf16 %v5892_v22, %v5889_v5 }
 0xa22   :  { %8506 = vmatmul.mubr.bf16.vlgmr.msra.gmra.mrb[24].mxu1 %v5932_v49 }
 0xa23   :  { %v5671_v46 = vpop.f32.mrb[56].mxu0 }
 0xa24   :  { %v5673_v61 = vpop.f32.mrb[57].mxu0  ;;  %v5897_v43 = vadd.f32 %v5896_v10, %v5671_v46  ;;  %v12081_v10 = vld [vmem:[%s12801_s5] ss:$0 sm:$0xff] }
 0xa25   :  { %v5674_v4 = vpop.f32.mrb[58].mxu0 }
 0xa26   :  { %v5676_v23 = vpop.f32.mrb[59].mxu0  ;;  %v5900_v48 = vadd.f32 %v5899_v16, %v5674_v4 }
 0xa28   :  { %v5933_v56 = vpack.c.bf16 %v5900_v48, %v5897_v43 }
 0xa2a   :  { %8509 = vmatprep.mubr.bf16.mxu1 %v5933_v56 }
 0xa2b   :  { %v5679_v40 = vpop.f32.mrb[60].mxu0 }
 0xa2c   :  { %v5905_v30 = vadd.f32 %v12070_v31, %v5679_v40  ;;  %v5681_v17 = vpop.f32.mrb[61].mxu0 }
 0xa2d   :  { %v5682_v21 = vpop.f32.mrb[62].mxu0 }
 0xa2e   :  { %v5908_v13 = vadd.f32 %v12072_v51, %v5682_v21  ;;  %v5684_v24 = vpop.f32.mrb[63].mxu0 }
 0xa30   :  { %v5934_v12 = vpack.c.bf16 %v5908_v13, %v5905_v30 }
 0xa32   :  { %8510 = vmatmul.mubr.bf16.gmra.mrb[28].mxu1 %v5934_v12 }
 0xa71   :  { %v8467_v9 = vpop.f32.mrb[64].mxu0 }
 0xa72   :  { %v8529_v16 = vadd.f32 %v8467_v9, %v11963_v60  ;;  %v6034_v19 = vpop.f32.mrb[65].mxu0 }
 0xa73   :  { %v8530_v31 = vadd.f32 %v6034_v19, %v11965_v54  ;;  %v8468_v53 = vpop.f32.mrb[66].mxu0 }
 0xa74   :  { %v8531_v51 = vadd.f32 %v8468_v53, %v11967_v33  ;;  %v6037_v28 = vpop.f32.mrb[67].mxu0  ;;  %v6282_v35 = vadd.f32 %v8529_v16, %v12081_v10 }
 0xa75   :  { %v8532_v32 = vadd.f32 %v6037_v28, %v11969_v57  ;;  %v6280_v11 = vadd.f32 %v8530_v31, %v12081_v10 }
 0xa76   :  { %v12092_v45 = vsel %vm6330_vm0, %v6282_v35, -inf  ;;  %v6283_v60 = vadd.f32 %v8531_v51, %v12081_v10 }
 0xa77   :  { %6383 = vmax.xlane.f32.xlu1 %v12092_v45  ;;  %v12098_v54 = vsel %vm6330_vm0, %v6280_v11, -inf  ;;  %v6281_v33 = vadd.f32 %v8532_v32, %v12081_v10 }
 0xa78   :  { %6379 = vmax.xlane.f32.xlu0 %v12098_v54  ;;  %v12105_v3 = vsel %vm6330_vm0, %v6283_v60, -inf }
 0xa79   :  { %v8471_v36 = vpop.f32.mrb[68].mxu0  ;;  %v12111_v41 = vsel %vm6330_vm0, %v6281_v33, -inf }
 0xa7a   :  { %v8533_v57 = vadd.f32 %v8471_v36, %v11977_v0  ;;  %v6050_v5 = vpop.f32.mrb[69].mxu0 }
 0xa7b   :  { %v8534_v18 = vadd.f32 %v6050_v5, %v11979_v25  ;;  %6385 = vmax.xlane.f32.xlu1 %v12105_v3  ;;  %v8472_v22 = vpop.f32.mrb[70].mxu0 }
 0xa7c   :  { %v8535_v49 = vadd.f32 %v8472_v22, %v11981_v55  ;;  %6381 = vmax.xlane.f32.xlu0 %v12111_v41  ;;  %v6053_v46 = vpop.f32.mrb[71].mxu0  ;;  %v6286_v0 = vadd.f32 %v8533_v57, %v12081_v10 }
 0xa7d   :  { %v8536_v61 = vadd.f32 %v6053_v46, %v11983_v63  ;;  %v6284_v4 = vadd.f32 %v8534_v18, %v12081_v10 }
 0xa7e   :  { %v12119_v43 = vsel %vm6330_vm0, %v6286_v0, -inf  ;;  %v6287_v25 = vadd.f32 %v8535_v49, %v12081_v10 }
 0xa7f   :  { %v6285_v23 = vadd.f32 %v8536_v61, %v12081_v10  ;;  %v12134_v17 = vsel %vm6330_vm0, %v6284_v4, -inf }
 0xa80   :  { %6391 = vmax.xlane.f32.xlu0 %v12119_v43  ;;  %v12126_v55 = vsel %vm6330_vm0, %v6287_v25, -inf }
 0xa81   :  { %6393 = vmax.xlane.f32.xlu1 %v12126_v55  ;;  %v8475_v48 = vpop.f32.mrb[72].mxu0  ;;  %v12140_v24 = vsel %vm6330_vm0, %v6285_v23, -inf }
 0xa82   :  { %v8537_v63 = vadd.f32 %v8475_v48, %v11991_v44  ;;  %v6066_v56 = vpop.f32.mrb[73].mxu0 }
 0xa83   :  { %v8538_v40 = vadd.f32 %v6066_v56, %v11993_v1  ;;  %v8476_v30 = vpop.f32.mrb[74].mxu0 }
 0xa84   :  { %v8539_v21 = vadd.f32 %v8476_v30, %v11995_v26  ;;  %6387 = vmax.xlane.f32.xlu0 %v12134_v17  ;;  %v6069_v13 = vpop.f32.mrb[75].mxu0  ;;  %v6290_v12 = vadd.f32 %v8537_v63, %v12081_v10 }
 0xa85   :  { %v8540_v44 = vadd.f32 %v6069_v13, %v11997_v6  ;;  %6389 = vmax.xlane.f32.xlu1 %v12140_v24  ;;  %v6288_v26 = vadd.f32 %v8538_v40, %v12081_v10 }
 0xa86   :  { %v12147_v1 = vsel %vm6330_vm0, %v6290_v12, -inf  ;;  %v6291_v62 = vadd.f32 %v8539_v21, %v12081_v10 }
 0xa87   :  { %v6289_v16 = vadd.f32 %v8540_v44, %v12081_v10  ;;  %v12162_v28 = vsel %vm6330_vm0, %v6288_v26, -inf }
 0xa88   :  { %6399 = vmax.xlane.f32.xlu0 %v12147_v1  ;;  %v12154_v9 = vsel %vm6330_vm0, %v6291_v62, -inf }
 0xa89   :  { %6401 = vmax.xlane.f32.xlu1 %v12154_v9  ;;  %v8479_v6 = vpop.f32.mrb[76].mxu0  ;;  %v12168_v11 = vsel %vm6330_vm0, %v6289_v16, -inf }
 0xa8a   :  { %v8541_v19 = vadd.f32 %v8479_v6, %v12005_v52  ;;  %v6082_v31 = vpop.f32.mrb[77].mxu0 }
 0xa8b   :  { %v8542_v53 = vadd.f32 %v6082_v31, %v12007_v14  ;;  %v8480_v51 = vpop.f32.mrb[78].mxu0 }
 0xa8c   :  { %v8543_v35 = vadd.f32 %v8480_v51, %v12009_v20  ;;  %6395 = vmax.xlane.f32.xlu0 %v12162_v28  ;;  %v6085_v32 = vpop.f32.mrb[79].mxu0  ;;  %v6294_v60 = vadd.f32 %v8541_v19, %v12081_v10 }
 0xa8d   :  { %v8544_v52 = vadd.f32 %v6085_v32, %v12011_v58  ;;  %6397 = vmax.xlane.f32.xlu1 %v12168_v11  ;;  %v6292_v20 = vadd.f32 %v8542_v53, %v12081_v10 }
 0xa8e   :  { %v12175_v14 = vsel %vm6330_vm0, %v6294_v60, -inf  ;;  %v6295_v33 = vadd.f32 %v8543_v35, %v12081_v10 }
 0xa8f   :  { %v6293_v57 = vadd.f32 %v8544_v52, %v12081_v10  ;;  %v12188_v58 = vsel %vm6330_vm0, %v6292_v20, -inf }
 0xa90   :  { %6407 = vmax.xlane.f32.xlu0 %v12175_v14  ;;  %v12182_v36 = vsel %vm6330_vm0, %v6295_v33, -inf }
 0xa91   :  { %6409 = vmax.xlane.f32.xlu1 %v12182_v36  ;;  %v12193_v5 = vsel %vm6330_vm0, %v6293_v57, -inf }
 0xa94   :  { %6403 = vmax.xlane.f32.xlu0 %v12188_v58 }
 0xa95   :  { %6405 = vmax.xlane.f32.xlu1 %v12193_v5  ;;  %v8483_v18 = vpop.f32.mrb[80].mxu0 }
 0xa96   :  { %v8545_v22 = vadd.f32 %v8483_v18, %v12019_v27  ;;  %v6098_v49 = vpop.f32.mrb[81].mxu0 }
 0xa97   :  { %v8546_v46 = vadd.f32 %v6098_v49, %v12021_v38  ;;  %v8484_v0 = vpop.f32.mrb[82].mxu0 }
 0xa98   :  { %v8547_v61 = vadd.f32 %v8484_v0, %v12023_v47  ;;  %v6101_v25 = vpop.f32.mrb[83].mxu0  ;;  %v6298_v4 = vadd.f32 %v8545_v22, %v12081_v10 }
 0xa99   :  { %v8548_v23 = vadd.f32 %v6101_v25, %v12025_v42  ;;  %v6296_v56 = vadd.f32 %v8546_v46, %v12081_v10  ;;  %v13135_v25 = vld [vmem:[#allocation16_spill] sm:$0xff] }
 0xa9a   :  { %v12203_v48 = vsel %vm6330_vm0, %v6298_v4, -inf  ;;  %v6299_v63 = vadd.f32 %v8547_v61, %v12081_v10 }
 0xa9b   :  { %6415 = vmax.xlane.f32.xlu0 %v12203_v48  ;;  %v6297_v38 = vadd.f32 %v8548_v23, %v12081_v10  ;;  %v12216_v47 = vsel %vm6330_vm0, %v6296_v56, -inf }
 0xa9c   :  { %v12210_v27 = vsel %vm6330_vm0, %v6299_v63, -inf  ;;  %v13136_v63 = vld [vmem:[#allocation26_spill] sm:$0xff] }
 0xa9d   :  { %6417 = vmax.xlane.f32.xlu1 %v12210_v27  ;;  %v12221_v42 = vsel %vm6330_vm0, %v6297_v38, -inf }
 0xa9f   :  { %6411 = vmax.xlane.f32.xlu0 %v12216_v47 }
 0xaa1   :  { %6413 = vmax.xlane.f32.xlu1 %v12221_v42 }
 0xaa5   :  { %v8487_v40 = vpop.f32.mrb[84].mxu0 }
 0xaa6   :  { %v8549_v30 = vadd.f32 %v8487_v40, %v12030_v29  ;;  %v6114_v21 = vpop.f32.mrb[85].mxu0 }
 0xaa7   :  { %v8550_v13 = vadd.f32 %v6114_v21, %v12032_v7  ;;  %v8488_v12 = vpop.f32.mrb[86].mxu0 }
 0xaa8   :  { %v8551_v44 = vadd.f32 %v8488_v12, %v12034_v39  ;;  %v6117_v62 = vpop.f32.mrb[87].mxu0  ;;  %v6302_v26 = vadd.f32 %v8549_v30, %v12081_v10  ;;  %v13137_v30 = vld [vmem:[#allocation29_spill] sm:$0xff] }
 0xaa9   :  { %v8552_v16 = vadd.f32 %v6117_v62, %v12036_v34  ;;  %v6300_v31 = vadd.f32 %v8550_v13, %v12081_v10 }
 0xaaa   :  { %v12231_v6 = vsel %vm6330_vm0, %v6302_v26, -inf  ;;  %v6303_v19 = vadd.f32 %v8551_v44, %v12081_v10 }
 0xaab   :  { %6423 = vmax.xlane.f32.xlu0 %v12231_v6  ;;  %v6301_v7 = vadd.f32 %v8552_v16, %v12081_v10  ;;  %v12244_v39 = vsel %vm6330_vm0, %v6300_v31, -inf  ;;  %v13138_v31 = vld [vmem:[#allocation17_spill] sm:$0xff] }
 0xaac   :  { %v12238_v29 = vsel %vm6330_vm0, %v6303_v19, -inf }
 0xaad   :  { %6425 = vmax.xlane.f32.xlu1 %v12238_v29  ;;  %v12249_v34 = vsel %vm6330_vm0, %v6301_v7, -inf }
 0xaaf   :  { %6419 = vmax.xlane.f32.xlu0 %v12244_v39 }
 0xab1   :  { %6421 = vmax.xlane.f32.xlu1 %v12249_v34 }
 0xab5   :  { %v8491_v53 = vpop.f32.mrb[88].mxu0 }
 0xab6   :  { %v8553_v51 = vadd.f32 %v8491_v53, %v12038_v8  ;;  %v6130_v35 = vpop.f32.mrb[89].mxu0 }
 0xab7   :  { %v8554_v32 = vadd.f32 %v6130_v35, %v12040_v37  ;;  %v8492_v60 = vpop.f32.mrb[90].mxu0 }
 0xab8   :  { %v8555_v52 = vadd.f32 %v8492_v60, %v12042_v59  ;;  %v6133_v33 = vpop.f32.mrb[91].mxu0  ;;  %v6306_v20 = vadd.f32 %v8553_v51, %v12081_v10  ;;  %v13139_v51 = vld [vmem:[#allocation18_spill] sm:$0xff]  ;;  %v13140_v60 = vld [vmem:[#allocation28_spill] sm:$0xff] }
 0xab9   :  { %v8556_v57 = vadd.f32 %v6133_v33, %v12044_v50  ;;  %v6304_v49 = vadd.f32 %v8554_v32, %v12081_v10 }
 0xaba   :  { %v12259_v18 = vsel %vm6330_vm0, %v6306_v20, -inf  ;;  %v6307_v22 = vadd.f32 %v8555_v52, %v12081_v10 }
 0xabb   :  { %6431 = vmax.xlane.f32.xlu0 %v12259_v18  ;;  %v6305_v37 = vadd.f32 %v8556_v57, %v12081_v10  ;;  %v12272_v59 = vsel %vm6330_vm0, %v6304_v49, -inf  ;;  %v13141_v57 = vld [vmem:[#allocation4_spill] sm:$0xff] }
 0xabc   :  { %v12266_v8 = vsel %vm6330_vm0, %v6307_v22, -inf }
 0xabd   :  { %6433 = vmax.xlane.f32.xlu1 %v12266_v8  ;;  %v12277_v50 = vsel %vm6330_vm0, %v6305_v37, -inf }
 0xabf   :  { %6427 = vmax.xlane.f32.xlu0 %v12272_v59 }
 0xac1   :  { %6429 = vmax.xlane.f32.xlu1 %v12277_v50 }
 0xac5   :  { %v8495_v46 = vpop.f32.mrb[92].mxu0 }
 0xac6   :  { %v8557_v0 = vadd.f32 %v8495_v46, %v12046_v2  ;;  %v6146_v61 = vpop.f32.mrb[93].mxu0 }
 0xac7   :  { %v8558_v4 = vadd.f32 %v6146_v61, %v13135_v25  ;;  %v8496_v23 = vpop.f32.mrb[94].mxu0 }
 0xac8   :  { %v8559_v56 = vadd.f32 %v8496_v23, %v13136_v63  ;;  %v6149_v38 = vpop.f32.mrb[95].mxu0  ;;  %v6310_v40 = vadd.f32 %v8557_v0, %v12081_v10  ;;  %v13142_v63 = vld [vmem:[#allocation19_spill] sm:$0xff] }
 0xac9   :  { %v8560_v21 = vadd.f32 %v6149_v38, %v13137_v30  ;;  %v6308_v44 = vadd.f32 %v8558_v4, %v12081_v10 }
 0xaca   :  { %v12287_v13 = vsel %vm6330_vm0, %v6310_v40, -inf  ;;  %v6311_v12 = vadd.f32 %v8559_v56, %v12081_v10  ;;  %v13143_v40 = vld [vmem:[#allocation20_spill] sm:$0xff] }
 0xacb   :  { %6439 = vmax.xlane.f32.xlu0 %v12287_v13  ;;  %v6309_v62 = vadd.f32 %v8560_v21, %v12081_v10  ;;  %v12300_v26 = vsel %vm6330_vm0, %v6308_v44, -inf }
 0xacc   :  { %v12294_v2 = vsel %vm6330_vm0, %v6311_v12, -inf  ;;  %v13144_v12 = vld [vmem:[#allocation2_spill] sm:$0xff] }
 0xacd   :  { %6441 = vmax.xlane.f32.xlu1 %v12294_v2  ;;  %v12305_v16 = vsel %vm6330_vm0, %v6309_v62, -inf }
 0xacf   :  { %6435 = vmax.xlane.f32.xlu0 %v12300_v26 }
 0xad1   :  { %6437 = vmax.xlane.f32.xlu1 %v12305_v16 }
 0xad5   :  { %v8499_v19 = vpop.f32.mrb[96].mxu0 }
 0xad6   :  { %v8561_v7 = vadd.f32 %v8499_v19, %v13138_v31  ;;  %v6162_v53 = vpop.f32.mrb[97].mxu0  ;;  %v13145_v31 = vld [vmem:[#allocation6_spill] sm:$0xff] }
 0xad7   :  { %v8562_v35 = vadd.f32 %v6162_v53, %v13139_v51  ;;  %v8500_v32 = vpop.f32.mrb[98].mxu0 }
 0xad8   :  { %v8563_v52 = vadd.f32 %v8500_v32, %v13140_v60  ;;  %v6165_v33 = vpop.f32.mrb[99].mxu0  ;;  %v6314_v20 = vadd.f32 %v8561_v7, %v12081_v10 }
 0xad9   :  { %v8564_v22 = vadd.f32 %v6165_v33, %v13141_v57  ;;  %v6312_v46 = vadd.f32 %v8562_v35, %v12081_v10 }
 0xada   :  { %v12315_v49 = vsel %vm6330_vm0, %v6314_v20, -inf  ;;  %v6315_v37 = vadd.f32 %v8563_v52, %v12081_v10 }
 0xadb   :  { %6447 = vmax.xlane.f32.xlu0 %v12315_v49  ;;  %v6313_v61 = vadd.f32 %v8564_v22, %v12081_v10  ;;  %v12328_v25 = vsel %vm6330_vm0, %v6312_v46, -inf }
 0xadc   :  { %v12322_v0 = vsel %vm6330_vm0, %v6315_v37, -inf }
 0xadd   :  { %6449 = vmax.xlane.f32.xlu1 %v12322_v0  ;;  %v12333_v4 = vsel %vm6330_vm0, %v6313_v61, -inf }
 0xadf   :  { %6443 = vmax.xlane.f32.xlu0 %v12328_v25 }
 0xae1   :  { %6445 = vmax.xlane.f32.xlu1 %v12333_v4 }
 0xae5   :  { %v8503_v23 = vpop.f32.mrb[100].mxu0 }
 0xae6   :  { %v8565_v56 = vadd.f32 %v8503_v23, %v13142_v63  ;;  %v6178_v38 = vpop.f32.mrb[101].mxu0 }
 0xae7   :  { %v8566_v30 = vadd.f32 %v6178_v38, %v13143_v40  ;;  %v8504_v21 = vpop.f32.mrb[102].mxu0 }
 0xae8   :  { %v8567_v44 = vadd.f32 %v8504_v21, %v13144_v12  ;;  %v6181_v62 = vpop.f32.mrb[103].mxu0  ;;  %v6318_v19 = vadd.f32 %v8565_v56, %v12081_v10 }
 0xae9   :  { %v8568_v7 = vadd.f32 %v6181_v62, %v13145_v31  ;;  %v6316_v35 = vadd.f32 %v8566_v30, %v12081_v10 }
 0xaea   :  { %v12343_v53 = vsel %vm6330_vm0, %v6318_v19, -inf  ;;  %v6319_v51 = vadd.f32 %v8567_v44, %v12081_v10 }
 0xaeb   :  { %6455 = vmax.xlane.f32.xlu0 %v12343_v53  ;;  %v6317_v60 = vadd.f32 %v8568_v7, %v12081_v10  ;;  %v12356_v52 = vsel %vm6330_vm0, %v6316_v35, -inf }
 0xaec   :  { %v12350_v32 = vsel %vm6330_vm0, %v6319_v51, -inf }
 0xaed   :  { %6457 = vmax.xlane.f32.xlu1 %v12350_v32  ;;  %v12361_v33 = vsel %vm6330_vm0, %v6317_v60, -inf }
 0xaef   :  { %6451 = vmax.xlane.f32.xlu0 %v12356_v52 }
 0xaf1   :  { %6453 = vmax.xlane.f32.xlu1 %v12361_v33 }
 0xaf5   :  { %v8507_v20 = vpop.f32.mrb[24].mxu1 }
 0xaf6   :  { %v6322_v57 = vadd.f32 %v8507_v20, %v12081_v10  ;;  %v6194_v22 = vpop.f32.mrb[25].mxu1 }
 0xaf7   :  { %v8508_v37 = vpop.f32.mrb[26].mxu1  ;;  %v6320_v46 = vadd.f32 %v12081_v10, %v6194_v22 }
 0xaf8   :  { %v6323_v61 = vadd.f32 %v8508_v37, %v12081_v10  ;;  %v6197_v23 = vpop.f32.mrb[27].mxu1  ;;  %v12369_v63 = vsel %vm6330_vm0, %v6322_v57, -inf }
 0xaf9   :  { %6463 = vmax.xlane.f32.xlu0 %v12369_v63  ;;  %v6321_v56 = vadd.f32 %v12081_v10, %v6197_v23  ;;  %v12380_v40 = vsel %vm6330_vm0, %v6320_v46, -inf }
 0xafa   :  { %v12375_v38 = vsel %vm6330_vm0, %v6323_v61, -inf }
 0xafb   :  { %6465 = vmax.xlane.f32.xlu1 %v12375_v38  ;;  %v12385_v30 = vsel %vm6330_vm0, %v6321_v56, -inf }
 0xafd   :  { %6459 = vmax.xlane.f32.xlu0 %v12380_v40 }
 0xaff   :  { %6461 = vmax.xlane.f32.xlu1 %v12385_v30 }
 0xb04   :  { %v6384_v21 = vpop.xlane.xlu1 %6383 }
 0xb05   :  { %v12389_v12 = vsub.f32 %v12092_v45, %v6384_v21  ;;  %v8511_v44 = vpop.f32.mrb[28].mxu1  ;;  %v6380_v62 = vpop.xlane.xlu0 %6379 }
 0xb06   :  { %v6326_v19 = vadd.f32 %v8511_v44, %v12081_v10  ;;  %v12393_v31 = vsub.f32 %v12098_v54, %v6380_v62  ;;  %v6210_v7 = vpop.f32.mrb[29].mxu1 }
 0xb07   :  { %v6527_v51 = vmul.f32 1.442695, %v12389_v12  ;;  %v8512_v35 = vpop.f32.mrb[30].mxu1  ;;  %v6324_v20 = vadd.f32 %v12081_v10, %v6210_v7 }
 0xb08   :  { %v6523_v60 = vmul.f32 1.442695, %v12393_v31  ;;  %v6327_v57 = vadd.f32 %v8512_v35, %v12081_v10  ;;  %v6213_v22 = vpop.f32.mrb[31].mxu1  ;;  %v6386_v45 = vpop.xlane.xlu1 %6385  ;;  %v12401_v37 = vsel %vm6330_vm0, %v6326_v19, -inf }
 0xb09   :  { %9002 = vpow2.f32 %v6527_v51  ;;  %v12404_v54 = vsub.f32 %v12105_v3, %v6386_v45  ;;  %v6382_v46 = vpop.xlane.xlu0 %6381  ;;  %6471 = vmax.xlane.f32.xlu0 %v12401_v37  ;;  %v6325_v61 = vadd.f32 %v12081_v10, %v6213_v22  ;;  %v12419_v3 = vsel %vm6330_vm0, %v6324_v20, -inf }
 0xb0a   :  { %v12409_v23 = vsub.f32 %v12111_v41, %v6382_v46  ;;  %v12413_v56 = vsel %vm6330_vm0, %v6327_v57, -inf  ;;  %9004 = vpow2.f32 %v6523_v60 }
 0xb0b   :  { %v6529_v21 = vmul.f32 1.442695, %v12404_v54  ;;  %6473 = vmax.xlane.f32.xlu1 %v12413_v56  ;;  %v12428_v19 = vsel %vm6330_vm0, %v6325_v61, -inf }
 0xb0c   :  { %v6525_v44 = vmul.f32 1.442695, %v12409_v23 }
 0xb0d   :  { %9006 = vpow2.f32 %v6529_v21  ;;  %v6392_v10 = vpop.xlane.xlu0 %6391  ;;  %6467 = vmax.xlane.f32.xlu0 %v12419_v3 }
 0xb0e   :  { %v12424_v41 = vsub.f32 %v12119_v43, %v6392_v10  ;;  %v6394_v62 = vpop.xlane.xlu1 %6393  ;;  %9008 = vpow2.f32 %v6525_v44 }
 0xb0f   :  { %v12431_v7 = vsub.f32 %v12126_v55, %v6394_v62  ;;  %6469 = vmax.xlane.f32.xlu1 %v12428_v19 }
 0xb10   :  { %v6535_v51 = vmul.f32 1.442695, %v12424_v41 }
 0xb11   :  { %v6537_v35 = vmul.f32 1.442695, %v12431_v7  ;;  %v6388_v60 = vpop.xlane.xlu0 %6387 }
 0xb12   :  { %9010 = vpow2.f32 %v6535_v51  ;;  %v12437_v43 = vsub.f32 %v12134_v17, %v6388_v60  ;;  %v6390_v20 = vpop.xlane.xlu1 %6389 }
 0xb13   :  { %v9003_v57 = vpop.eup %9002  ;;  %v12440_v15 = vsub.f32 %v12140_v24, %v6390_v20  ;;  %9012 = vpow2.f32 %v6537_v35 }
 0xb14   :  { %v6531_v55 = vmul.f32 1.442695, %v12437_v43  ;;  %6623 = vadd.xlane.f32.xlu0 %v9003_v57  ;;  %v9005_v46 = vpop.eup %9004 }
 0xb15   :  { %v6533_v22 = vmul.f32 1.442695, %v12440_v15  ;;  %v6400_v45 = vpop.xlane.xlu0 %6399 }
 0xb16   :  { %9014 = vpow2.f32 %v6531_v55  ;;  %v12445_v61 = vsub.f32 %v12147_v1, %v6400_v45  ;;  %v6402_v21 = vpop.xlane.xlu1 %6401 }
 0xb17   :  { %v9007_v17 = vpop.eup %9006  ;;  %v12448_v44 = vsub.f32 %v12154_v9, %v6402_v21  ;;  %9016 = vpow2.f32 %v6533_v22 }
 0xb18   :  { %v6543_v24 = vmul.f32 1.442695, %v12445_v61  ;;  %6619 = vadd.xlane.f32.xlu0 %v9005_v46  ;;  %6625 = vadd.xlane.f32.xlu1 %v9007_v17  ;;  %v9009_v1 = vpop.eup %9008 }
 0xb19   :  { %v6545_v10 = vmul.f32 1.442695, %v12448_v44  ;;  %v6396_v62 = vpop.xlane.xlu0 %6395 }
 0xb1a   :  { %9018 = vpow2.f32 %v6543_v24  ;;  %v12453_v51 = vsub.f32 %v12162_v28, %v6396_v62  ;;  %v6398_v35 = vpop.xlane.xlu1 %6397 }
 0xb1b   :  { %v12456_v60 = vsub.f32 %v12168_v11, %v6398_v35  ;;  %9020 = vpow2.f32 %v6545_v10 }
 0xb1c   :  { %v9011_v20 = vpop.eup %9010  ;;  %v6539_v9 = vmul.f32 1.442695, %v12453_v51  ;;  %6621 = vadd.xlane.f32.xlu1 %v9009_v1 }
 0xb1d   :  { %v6541_v57 = vmul.f32 1.442695, %v12456_v60  ;;  %v6408_v55 = vpop.xlane.xlu0 %6407  ;;  %6631 = vadd.xlane.f32.xlu0 %v9011_v20  ;;  %v9013_v45 = vpop.eup %9012 }
 0xb1e   :  { %9022 = vpow2.f32 %v6539_v9  ;;  %v12461_v22 = vsub.f32 %v12175_v14, %v6408_v55  ;;  %v6410_v28 = vpop.xlane.xlu1 %6409 }
 0xb1f   :  { %v12464_v46 = vsub.f32 %v12182_v36, %v6410_v28  ;;  %9024 = vpow2.f32 %v6541_v57 }
 0xb20   :  { %v9015_v11 = vpop.eup %9014  ;;  %v6551_v21 = vmul.f32 1.442695, %v12461_v22  ;;  %6633 = vadd.xlane.f32.xlu1 %v9013_v45 }
 0xb21   :  { %v6553_v17 = vmul.f32 1.442695, %v12464_v46  ;;  %v6404_v24 = vpop.xlane.xlu0 %6403  ;;  %6627 = vadd.xlane.f32.xlu0 %v9015_v11  ;;  %v9017_v62 = vpop.eup %9016 }
 0xb22   :  { %9026 = vpow2.f32 %v6551_v21  ;;  %v12469_v10 = vsub.f32 %v12188_v58, %v6404_v24  ;;  %v6406_v14 = vpop.xlane.xlu1 %6405 }
 0xb23   :  { %v12472_v35 = vsub.f32 %v12193_v5, %v6406_v14  ;;  %9028 = vpow2.f32 %v6553_v17 }
 0xb24   :  { %v9019_v36 = vpop.eup %9018  ;;  %v6547_v1 = vmul.f32 1.442695, %v12469_v10  ;;  %6629 = vadd.xlane.f32.xlu1 %v9017_v62 }
 0xb25   :  { %v6549_v20 = vmul.f32 1.442695, %v12472_v35  ;;  %6639 = vadd.xlane.f32.xlu0 %v9019_v36  ;;  %v9021_v9 = vpop.eup %9020 }
 0xb26   :  { %9030 = vpow2.f32 %v6547_v1 }
 0xb27   :  { %9032 = vpow2.f32 %v6549_v20 }
 0xb28   :  { %v9023_v57 = vpop.eup %9022  ;;  %v6416_v55 = vpop.xlane.xlu0 %6415  ;;  %6641 = vadd.xlane.f32.xlu1 %v9021_v9 }
 0xb29   :  { %v12477_v58 = vsub.f32 %v12203_v48, %v6416_v55  ;;  %6635 = vadd.xlane.f32.xlu0 %v9023_v57  ;;  %v9025_v28 = vpop.eup %9024 }
 0xb2a   :  { %v6418_v5 = vpop.xlane.xlu1 %6417 }
 0xb2b   :  { %v6559_v45 = vmul.f32 1.442695, %v12477_v58  ;;  %v12481_v11 = vsub.f32 %v12210_v27, %v6418_v5 }
 0xb2c   :  { %v9027_v21 = vpop.eup %9026  ;;  %v6412_v17 = vpop.xlane.xlu0 %6411  ;;  %6637 = vadd.xlane.f32.xlu1 %v9025_v28 }
 0xb2d   :  { %9034 = vpow2.f32 %v6559_v45  ;;  %v6561_v24 = vmul.f32 1.442695, %v12481_v11  ;;  %v12485_v14 = vsub.f32 %v12216_v47, %v6412_v17  ;;  %6647 = vadd.xlane.f32.xlu0 %v9027_v21  ;;  %v9029_v62 = vpop.eup %9028 }
 0xb2e   :  { %v6414_v48 = vpop.xlane.xlu1 %6413 }
 0xb2f   :  { %9036 = vpow2.f32 %v6561_v24  ;;  %v6555_v36 = vmul.f32 1.442695, %v12485_v14  ;;  %v12489_v1 = vsub.f32 %v12221_v42, %v6414_v48 }
 0xb30   :  { %v9031_v27 = vpop.eup %9030  ;;  %6649 = vadd.xlane.f32.xlu1 %v9029_v62 }
 0xb31   :  { %9038 = vpow2.f32 %v6555_v36  ;;  %v6557_v20 = vmul.f32 1.442695, %v12489_v1  ;;  %6643 = vadd.xlane.f32.xlu0 %v9031_v27  ;;  %v9033_v9 = vpop.eup %9032 }
 0xb33   :  { %9040 = vpow2.f32 %v6557_v20 }
 0xb34   :  { %6645 = vadd.xlane.f32.xlu1 %v9033_v9 }
 0xb37   :  { %v9035_v47 = vpop.eup %9034 }
 0xb38   :  { %v6424_v57 = vpop.xlane.xlu0 %6423  ;;  %6655 = vadd.xlane.f32.xlu0 %v9035_v47 }
 0xb39   :  { %v9037_v55 = vpop.eup %9036  ;;  %v12493_v5 = vsub.f32 %v12231_v6, %v6424_v57 }
 0xb3a   :  { %v6426_v28 = vpop.xlane.xlu1 %6425  ;;  %6657 = vadd.xlane.f32.xlu1 %v9037_v55 }
 0xb3b   :  { %v9039_v42 = vpop.eup %9038  ;;  %v6567_v45 = vmul.f32 1.442695, %v12493_v5  ;;  %v12497_v21 = vsub.f32 %v12238_v29, %v6426_v28 }
 0xb3c   :  { %v6420_v17 = vpop.xlane.xlu0 %6419  ;;  %6651 = vadd.xlane.f32.xlu0 %v9039_v42 }
 0xb3d   :  { %v9041_v24 = vpop.eup %9040  ;;  %9042 = vpow2.f32 %v6567_v45  ;;  %v6569_v48 = vmul.f32 1.442695, %v12497_v21  ;;  %v12501_v62 = vsub.f32 %v12244_v39, %v6420_v17 }
 0xb3e   :  { %v6422_v36 = vpop.xlane.xlu1 %6421  ;;  %6653 = vadd.xlane.f32.xlu1 %v9041_v24 }
 0xb3f   :  { %9044 = vpow2.f32 %v6569_v48  ;;  %v6563_v6 = vmul.f32 1.442695, %v12501_v62  ;;  %v12505_v27 = vsub.f32 %v12249_v34, %v6422_v36 }
 0xb41   :  { %9046 = vpow2.f32 %v6563_v6  ;;  %v6565_v29 = vmul.f32 1.442695, %v12505_v27 }
 0xb43   :  { %9048 = vpow2.f32 %v6565_v29 }
 0xb47   :  { %v9043_v20 = vpop.eup %9042 }
 0xb48   :  { %v6432_v9 = vpop.xlane.xlu0 %6431  ;;  %6663 = vadd.xlane.f32.xlu0 %v9043_v20 }
 0xb49   :  { %v9045_v47 = vpop.eup %9044  ;;  %v12509_v57 = vsub.f32 %v12259_v18, %v6432_v9 }
 0xb4a   :  { %v6434_v39 = vpop.xlane.xlu1 %6433  ;;  %6665 = vadd.xlane.f32.xlu1 %v9045_v47 }
 0xb4b   :  { %v9047_v55 = vpop.eup %9046  ;;  %v6575_v28 = vmul.f32 1.442695, %v12509_v57  ;;  %v12513_v42 = vsub.f32 %v12266_v8, %v6434_v39 }
 0xb4c   :  { %v6428_v34 = vpop.xlane.xlu0 %6427  ;;  %6659 = vadd.xlane.f32.xlu0 %v9047_v55 }
 0xb4d   :  { %v9049_v45 = vpop.eup %9048  ;;  %9050 = vpow2.f32 %v6575_v28  ;;  %v6577_v17 = vmul.f32 1.442695, %v12513_v42  ;;  %v12517_v24 = vsub.f32 %v12272_v59, %v6428_v34 }
 0xb4e   :  { %v6430_v48 = vpop.xlane.xlu1 %6429  ;;  %6661 = vadd.xlane.f32.xlu1 %v9049_v45 }
 0xb4f   :  { %9052 = vpow2.f32 %v6577_v17  ;;  %v6571_v18 = vmul.f32 1.442695, %v12517_v24  ;;  %v12521_v36 = vsub.f32 %v12277_v50, %v6430_v48 }
 0xb51   :  { %9054 = vpow2.f32 %v6571_v18  ;;  %v6573_v8 = vmul.f32 1.442695, %v12521_v36 }
 0xb53   :  { %9056 = vpow2.f32 %v6573_v8 }
 0xb57   :  { %v9051_v6 = vpop.eup %9050 }
 0xb58   :  { %v6440_v29 = vpop.xlane.xlu0 %6439  ;;  %6671 = vadd.xlane.f32.xlu0 %v9051_v6 }
 0xb59   :  { %v9053_v20 = vpop.eup %9052  ;;  %v12525_v9 = vsub.f32 %v12287_v13, %v6440_v29 }
 0xb5a   :  { %v6442_v59 = vpop.xlane.xlu1 %6441  ;;  %6673 = vadd.xlane.f32.xlu1 %v9053_v20 }
 0xb5b   :  { %v9055_v47 = vpop.eup %9054  ;;  %v6583_v39 = vmul.f32 1.442695, %v12525_v9  ;;  %v12529_v55 = vsub.f32 %v12294_v2, %v6442_v59 }
 0xb5c   :  { %v6436_v50 = vpop.xlane.xlu0 %6435  ;;  %6667 = vadd.xlane.f32.xlu0 %v9055_v47 }
 0xb5d   :  { %v9057_v28 = vpop.eup %9056  ;;  %9058 = vpow2.f32 %v6583_v39  ;;  %v6585_v34 = vmul.f32 1.442695, %v12529_v55  ;;  %v12533_v45 = vsub.f32 %v12300_v26, %v6436_v50 }
 0xb5e   :  { %v6438_v17 = vpop.xlane.xlu1 %6437  ;;  %6669 = vadd.xlane.f32.xlu1 %v9057_v28 }
 0xb5f   :  { %9060 = vpow2.f32 %v6585_v34  ;;  %v6579_v13 = vmul.f32 1.442695, %v12533_v45  ;;  %v12537_v48 = vsub.f32 %v12305_v16, %v6438_v17 }
 0xb61   :  { %9062 = vpow2.f32 %v6579_v13  ;;  %v6581_v2 = vmul.f32 1.442695, %v12537_v48 }
 0xb63   :  { %9064 = vpow2.f32 %v6581_v2 }
 0xb67   :  { %v9059_v18 = vpop.eup %9058 }
 0xb68   :  { %v6448_v8 = vpop.xlane.xlu0 %6447  ;;  %6679 = vadd.xlane.f32.xlu0 %v9059_v18 }
 0xb69   :  { %v9061_v6 = vpop.eup %9060  ;;  %v12541_v29 = vsub.f32 %v12315_v49, %v6448_v8 }
 0xb6a   :  { %v6450_v26 = vpop.xlane.xlu1 %6449  ;;  %6681 = vadd.xlane.f32.xlu1 %v9061_v6 }
 0xb6b   :  { %v9063_v20 = vpop.eup %9062  ;;  %v6591_v59 = vmul.f32 1.442695, %v12541_v29  ;;  %v12545_v47 = vsub.f32 %v12322_v0, %v6450_v26 }
 0xb6c   :  { %v6444_v16 = vpop.xlane.xlu0 %6443  ;;  %6675 = vadd.xlane.f32.xlu0 %v9063_v20 }
 0xb6d   :  { %v9065_v39 = vpop.eup %9064  ;;  %9066 = vpow2.f32 %v6591_v59  ;;  %v6593_v50 = vmul.f32 1.442695, %v12545_v47  ;;  %v12549_v28 = vsub.f32 %v12328_v25, %v6444_v16 }
 0xb6e   :  { %v6446_v34 = vpop.xlane.xlu1 %6445  ;;  %6677 = vadd.xlane.f32.xlu1 %v9065_v39 }
 0xb6f   :  { %9068 = vpow2.f32 %v6593_v50  ;;  %v6587_v49 = vmul.f32 1.442695, %v12549_v28  ;;  %v12553_v17 = vsub.f32 %v12333_v4, %v6446_v34 }
 0xb71   :  { %9070 = vpow2.f32 %v6587_v49  ;;  %v6589_v0 = vmul.f32 1.442695, %v12553_v17 }
 0xb73   :  { %9072 = vpow2.f32 %v6589_v0 }
 0xb77   :  { %v9067_v13 = vpop.eup %9066 }
 0xb78   :  { %v6456_v2 = vpop.xlane.xlu0 %6455  ;;  %6687 = vadd.xlane.f32.xlu0 %v9067_v13 }
 0xb79   :  { %v9069_v18 = vpop.eup %9068  ;;  %v12557_v8 = vsub.f32 %v12343_v53, %v6456_v2 }
 0xb7a   :  { %v6458_v25 = vpop.xlane.xlu1 %6457  ;;  %6689 = vadd.xlane.f32.xlu1 %v9069_v18 }
 0xb7b   :  { %v9071_v6 = vpop.eup %9070  ;;  %v6599_v26 = vmul.f32 1.442695, %v12557_v8  ;;  %v12561_v20 = vsub.f32 %v12350_v32, %v6458_v25 }
 0xb7c   :  { %6683 = vadd.xlane.f32.xlu0 %v9071_v6  ;;  %v6452_v4 = vpop.xlane.xlu0 %6451 }
 0xb7d   :  { %v9073_v59 = vpop.eup %9072  ;;  %9074 = vpow2.f32 %v6599_v26  ;;  %v6601_v16 = vmul.f32 1.442695, %v12561_v20  ;;  %v12565_v39 = vsub.f32 %v12356_v52, %v6452_v4 }
 0xb7e   :  { %6685 = vadd.xlane.f32.xlu1 %v9073_v59  ;;  %v6454_v53 = vpop.xlane.xlu1 %6453 }
 0xb7f   :  { %9076 = vpow2.f32 %v6601_v16  ;;  %v6595_v50 = vmul.f32 1.442695, %v12565_v39  ;;  %v12569_v34 = vsub.f32 %v12361_v33, %v6454_v53 }
 0xb81   :  { %9078 = vpow2.f32 %v6595_v50  ;;  %v6597_v32 = vmul.f32 1.442695, %v12569_v34 }
 0xb83   :  { %9080 = vpow2.f32 %v6597_v32 }
 0xb86   :  { %v6464_v49 = vpop.xlane.xlu0 %6463 }
 0xb87   :  { %v9075_v0 = vpop.eup %9074  ;;  %v12573_v13 = vsub.f32 %v12369_v63, %v6464_v49 }
 0xb88   :  { %6695 = vadd.xlane.f32.xlu0 %v9075_v0  ;;  %v6466_v52 = vpop.xlane.xlu1 %6465 }
 0xb89   :  { %v9077_v2 = vpop.eup %9076  ;;  %v6607_v18 = vmul.f32 1.442695, %v12573_v13  ;;  %v12577_v25 = vsub.f32 %v12375_v38, %v6466_v52 }
 0xb8a   :  { %v6460_v6 = vpop.xlane.xlu0 %6459  ;;  %6697 = vadd.xlane.f32.xlu1 %v9077_v2 }
 0xb8b   :  { %v9079_v33 = vpop.eup %9078  ;;  %9082 = vpow2.f32 %v6607_v18  ;;  %v6609_v26 = vmul.f32 1.442695, %v12577_v25  ;;  %v12581_v4 = vsub.f32 %v12380_v40, %v6460_v6 }
 0xb8c   :  { %6691 = vadd.xlane.f32.xlu0 %v9079_v33  ;;  %v6462_v63 = vpop.xlane.xlu1 %6461 }
 0xb8d   :  { %v9081_v59 = vpop.eup %9080  ;;  %9084 = vpow2.f32 %v6609_v26  ;;  %v6603_v16 = vmul.f32 1.442695, %v12581_v4  ;;  %v12585_v53 = vsub.f32 %v12385_v30, %v6462_v63 }
 0xb8e   :  { %6693 = vadd.xlane.f32.xlu1 %v9081_v59 }
 0xb8f   :  { %9086 = vpow2.f32 %v6603_v16  ;;  %v6605_v38 = vmul.f32 1.442695, %v12585_v53 }
 0xb91   :  { %9088 = vpow2.f32 %v6605_v38 }
 0xb95   :  { %v9083_v50 = vpop.eup %9082 }
 0xb96   :  { %6703 = vadd.xlane.f32.xlu0 %v9083_v50  ;;  %v6472_v32 = vpop.xlane.xlu0 %6471 }
 0xb97   :  { %v9085_v49 = vpop.eup %9084  ;;  %v12589_v18 = vsub.f32 %v12401_v37, %v6472_v32 }
 0xb98   :  { %6705 = vadd.xlane.f32.xlu1 %v9085_v49  ;;  %v6474_v40 = vpop.xlane.xlu1 %6473 }
 0xb99   :  { %v9087_v0 = vpop.eup %9086  ;;  %v12595_v33 = vsub.f32 %v12413_v56, %v6474_v40  ;;  %v6615_v59 = vmul.f32 1.442695, %v12589_v18 }
 0xb9a   :  { %6699 = vadd.xlane.f32.xlu0 %v9087_v0  ;;  %v6468_v52 = vpop.xlane.xlu0 %6467 }
 0xb9b   :  { %v9089_v2 = vpop.eup %9088  ;;  %v12592_v30 = vsub.f32 %v12419_v3, %v6468_v52  ;;  %v6617_v37 = vmul.f32 1.442695, %v12595_v33 }
 0xb9c   :  { %6701 = vadd.xlane.f32.xlu1 %v9089_v2  ;;  %v6470_v6 = vpop.xlane.xlu1 %6469 }
 0xb9d   :  { %v6611_v26 = vmul.f32 1.442695, %v12592_v30  ;;  %v12599_v63 = vsub.f32 %v12428_v19, %v6470_v6 }
 0xb9f   :  { %9090 = vpow2.f32 %v6611_v26  ;;  %v6613_v16 = vmul.f32 1.442695, %v12599_v63 }
 0xba1   :  { %9092 = vpow2.f32 %v6613_v16  ;;  %v6624_v3 = vpop.xlane.xlu0 %6623 }
 0xba2   :  { %9094 = vlog2.f32 %v6624_v3 }
 0xba3   :  { %9096 = vpow2.f32 %v6615_v59 }
 0xba4   :  { %9098 = vpow2.f32 %v6617_v37 }
 0xba5   :  { %v6620_v38 = vpop.xlane.xlu0 %6619  ;;  %v6626_v56 = vpop.xlane.xlu1 %6625 }
 0xba6   :  { %9100 = vlog2.f32 %v6620_v38 }
 0xba7   :  { %9102 = vlog2.f32 %v6626_v56 }
 0xba9   :  { %v9091_v50 = vpop.eup %9090  ;;  %v6622_v32 = vpop.xlane.xlu1 %6621 }
 0xbaa   :  { %9104 = vlog2.f32 %v6622_v32  ;;  %6707 = vadd.xlane.f32.xlu0 %v9091_v50  ;;  %v6632_v19 = vpop.xlane.xlu0 %6631 }
 0xbab   :  { %v9093_v49 = vpop.eup %9092  ;;  %9106 = vlog2.f32 %v6632_v19 }
 0xbac   :  { %v9095_v40 = vpop.eup %9094  ;;  %6709 = vadd.xlane.f32.xlu1 %v9093_v49 }
 0xbad   :  { %v9097_v0 = vpop.eup %9096  ;;  %v6720_v52 = vmul.f32 0.6931472, %v9095_v40  ;;  %v6634_v2 = vpop.xlane.xlu1 %6633 }
 0xbae   :  { %9108 = vlog2.f32 %v6634_v2  ;;  %6711 = vadd.xlane.f32.xlu0 %v9097_v0  ;;  %v6628_v6 = vpop.xlane.xlu0 %6627  ;;  %v9099_v26 = vpop.eup %9098 }
 0xbaf   :  { %v6813_v59 = vsub.f32 %v12389_v12, %v6720_v52  ;;  %9110 = vlog2.f32 %v6628_v6 }
 0xbb0   :  { %v9101_v16 = vpop.eup %9100  ;;  %6713 = vadd.xlane.f32.xlu1 %v9099_v26 }
 0xbb1   :  { %v9103_v37 = vpop.eup %9102  ;;  %6861 = vst [vmem:[%s12802_s6 + $0x10] sm:$0xff] %v6813_v59  ;;  %v6716_v3 = vmul.f32 0.6931472, %v9101_v16  ;;  %v6630_v38 = vpop.xlane.xlu1 %6629 }
 0xbb2   :  { %v6722_v56 = vmul.f32 0.6931472, %v9103_v37  ;;  %9112 = vlog2.f32 %v6630_v38  ;;  %v6640_v50 = vpop.xlane.xlu0 %6639 }
 0xbb3   :  { %v6811_v32 = vsub.f32 %v12393_v31, %v6716_v3  ;;  %9114 = vlog2.f32 %v6640_v50 }
 0xbb4   :  { %v9105_v19 = vpop.eup %9104  ;;  %v6814_v49 = vsub.f32 %v12404_v54, %v6722_v56 }
 0xbb5   :  { %v9107_v12 = vpop.eup %9106  ;;  %6859 = vst [vmem:[%s12802_s6] sm:$0xff] %v6811_v32  ;;  %v6718_v40 = vmul.f32 0.6931472, %v9105_v19  ;;  %v6642_v0 = vpop.xlane.xlu1 %6641 }
 0xbb6   :  { %6862 = vst [vmem:[%s12802_s6 + $0x18] sm:$0xff] %v6814_v49  ;;  %v6728_v52 = vmul.f32 0.6931472, %v9107_v12  ;;  %9116 = vlog2.f32 %v6642_v0  ;;  %v6636_v2 = vpop.xlane.xlu0 %6635 }
 0xbb7   :  { %v6812_v31 = vsub.f32 %v12409_v23, %v6718_v40  ;;  %9118 = vlog2.f32 %v6636_v2 }
 0xbb8   :  { %v9109_v6 = vpop.eup %9108  ;;  %v6817_v54 = vsub.f32 %v12424_v41, %v6728_v52 }
 0xbb9   :  { %v9111_v26 = vpop.eup %9110  ;;  %6860 = vst [vmem:[%s12802_s6 + $0x8] sm:$0xff] %v6812_v31  ;;  %v6730_v59 = vmul.f32 0.6931472, %v9109_v6  ;;  %v6638_v16 = vpop.xlane.xlu1 %6637 }
 0xbba   :  { %6865 = vst [vmem:[%s12802_s6 + $0x30] sm:$0xff] %v6817_v54  ;;  %v6724_v37 = vmul.f32 0.6931472, %v9111_v26  ;;  %9120 = vlog2.f32 %v6638_v16  ;;  %v6648_v3 = vpop.xlane.xlu0 %6647 }
 0xbbb   :  { %v6818_v23 = vsub.f32 %v12431_v7, %v6730_v59  ;;  %9122 = vlog2.f32 %v6648_v3 }
 0xbbc   :  { %v9113_v38 = vpop.eup %9112  ;;  %v6815_v41 = vsub.f32 %v12437_v43, %v6724_v37 }
 0xbbd   :  { %v9115_v56 = vpop.eup %9114  ;;  %6866 = vst [vmem:[%s12802_s6 + $0x38] sm:$0xff] %v6818_v23  ;;  %v6726_v50 = vmul.f32 0.6931472, %v9113_v38  ;;  %v6650_v32 = vpop.xlane.xlu1 %6649 }
 0xbbe   :  { %6863 = vst [vmem:[%s12802_s6 + $0x20] sm:$0xff] %v6815_v41  ;;  %v6736_v19 = vmul.f32 0.6931472, %v9115_v56  ;;  %9124 = vlog2.f32 %v6650_v32  ;;  %v6644_v49 = vpop.xlane.xlu0 %6643 }
 0xbbf   :  { %v6816_v7 = vsub.f32 %v12440_v15, %v6726_v50  ;;  %9126 = vlog2.f32 %v6644_v49 }
 0xbc0   :  { %v9117_v12 = vpop.eup %9116  ;;  %v6821_v43 = vsub.f32 %v12445_v61, %v6736_v19 }
 0xbc1   :  { %v9119_v40 = vpop.eup %9118  ;;  %6864 = vst [vmem:[%s12802_s6 + $0x28] sm:$0xff] %v6816_v7  ;;  %v6738_v0 = vmul.f32 0.6931472, %v9117_v12  ;;  %v6646_v52 = vpop.xlane.xlu1 %6645 }
 0xbc2   :  { %6869 = vst [vmem:[%s12802_s6 + $0x50] sm:$0xff] %v6821_v43  ;;  %v6732_v2 = vmul.f32 0.6931472, %v9119_v40  ;;  %9128 = vlog2.f32 %v6646_v52 }
 0xbc3   :  { %v6822_v31 = vsub.f32 %v12448_v44, %v6738_v0 }
 0xbc4   :  { %v9121_v15 = vpop.eup %9120  ;;  %v6819_v6 = vsub.f32 %v12453_v51, %v6732_v2 }
 0xbc5   :  { %v9123_v54 = vpop.eup %9122  ;;  %6870 = vst [vmem:[%s12802_s6 + $0x58] sm:$0xff] %v6822_v31  ;;  %v6734_v61 = vmul.f32 0.6931472, %v9121_v15  ;;  %v6656_v26 = vpop.xlane.xlu0 %6655 }
 0xbc6   :  { %6867 = vst [vmem:[%s12802_s6 + $0x40] sm:$0xff] %v6819_v6  ;;  %v6744_v59 = vmul.f32 0.6931472, %v9123_v54  ;;  %9130 = vlog2.f32 %v6656_v26 }
 0xbc7   :  { %v6820_v16 = vsub.f32 %v12456_v60, %v6734_v61  ;;  %v6658_v37 = vpop.xlane.xlu1 %6657 }
 0xbc8   :  { %v9125_v44 = vpop.eup %9124  ;;  %v6825_v3 = vsub.f32 %v12461_v22, %v6744_v59  ;;  %9132 = vlog2.f32 %v6658_v37 }
 0xbc9   :  { %v9127_v51 = vpop.eup %9126  ;;  %6868 = vst [vmem:[%s12802_s6 + $0x48] sm:$0xff] %v6820_v16  ;;  %v6746_v23 = vmul.f32 0.6931472, %v9125_v44  ;;  %v6652_v38 = vpop.xlane.xlu0 %6651 }
 0xbca   :  { %6873 = vst [vmem:[%s12802_s6 + $0x70] sm:$0xff] %v6825_v3  ;;  %v6740_v41 = vmul.f32 0.6931472, %v9127_v51  ;;  %9134 = vlog2.f32 %v6652_v38 }
 0xbcb   :  { %v6826_v60 = vsub.f32 %v12464_v46, %v6746_v23  ;;  %v6654_v56 = vpop.xlane.xlu1 %6653 }
 0xbcc   :  { %v9129_v50 = vpop.eup %9128  ;;  %v6823_v22 = vsub.f32 %v12469_v10, %v6740_v41  ;;  %9136 = vlog2.f32 %v6654_v56 }
 0xbcd   :  { %6874 = vst [vmem:[%s12802_s6 + $0x78] sm:$0xff] %v6826_v60  ;;  %v6742_v32 = vmul.f32 0.6931472, %v9129_v50 }
 0xbce   :  { %6871 = vst [vmem:[%s12802_s6 + $0x60] sm:$0xff] %v6823_v22 }
 0xbcf   :  { %v6824_v19 = vsub.f32 %v12472_v35, %v6742_v32 }
 0xbd0   :  { %v9131_v49 = vpop.eup %9130 }
 0xbd1   :  { %6872 = vst [vmem:[%s12802_s6 + $0x68] sm:$0xff] %v6824_v19  ;;  %v6752_v46 = vmul.f32 0.6931472, %v9131_v49 }
 0xbd2   :  { %v9133_v7 = vpop.eup %9132 }
 0xbd3   :  { %v6829_v10 = vsub.f32 %v12477_v58, %v6752_v46  ;;  %v6754_v12 = vmul.f32 0.6931472, %v9133_v7 }
 0xbd4   :  { %v9135_v43 = vpop.eup %9134 }
 0xbd5   :  { %6877 = vst [vmem:[%s12802_s6 + $0x90] sm:$0xff] %v6829_v10  ;;  %v6830_v40 = vsub.f32 %v12481_v11, %v6754_v12  ;;  %v6748_v0 = vmul.f32 0.6931472, %v9135_v43  ;;  %v6664_v52 = vpop.xlane.xlu0 %6663 }
 0xbd6   :  { %v9137_v35 = vpop.eup %9136  ;;  %9138 = vlog2.f32 %v6664_v52 }
 0xbd7   :  { %6878 = vst [vmem:[%s12802_s6 + $0x98] sm:$0xff] %v6830_v40  ;;  %v6827_v2 = vsub.f32 %v12485_v14, %v6748_v0  ;;  %v6750_v31 = vmul.f32 0.6931472, %v9137_v35  ;;  %v6666_v58 = vpop.xlane.xlu1 %6665 }
 0xbd8   :  { %9140 = vlog2.f32 %v6666_v58 }
 0xbd9   :  { %6875 = vst [vmem:[%s12802_s6 + $0x80] sm:$0xff] %v6827_v2  ;;  %v6828_v15 = vsub.f32 %v12489_v1, %v6750_v31  ;;  %v6660_v11 = vpop.xlane.xlu0 %6659 }
 0xbda   :  { %9142 = vlog2.f32 %v6660_v11 }
 0xbdb   :  { %6876 = vst [vmem:[%s12802_s6 + $0x88] sm:$0xff] %v6828_v15  ;;  %v6662_v6 = vpop.xlane.xlu1 %6661 }
 0xbdc   :  { %9144 = vlog2.f32 %v6662_v6 }
 0xbe0   :  { %v9139_v54 = vpop.eup %9138 }
 0xbe1   :  { %v6760_v61 = vmul.f32 0.6931472, %v9139_v54 }
 0xbe2   :  { %v9141_v14 = vpop.eup %9140 }
 0xbe3   :  { %v6833_v26 = vsub.f32 %v12493_v5, %v6760_v61  ;;  %v6762_v59 = vmul.f32 0.6931472, %v9141_v14 }
 0xbe4   :  { %v9143_v16 = vpop.eup %9142 }
 0xbe5   :  { %6881 = vst [vmem:[%s12802_s6 + $0xb0] sm:$0xff] %v6833_v26  ;;  %v6834_v1 = vsub.f32 %v12497_v21, %v6762_v59  ;;  %v6756_v37 = vmul.f32 0.6931472, %v9143_v16  ;;  %v6672_v44 = vpop.xlane.xlu0 %6671 }
 0xbe6   :  { %v9145_v3 = vpop.eup %9144  ;;  %9146 = vlog2.f32 %v6672_v44 }
 0xbe7   :  { %6882 = vst [vmem:[%s12802_s6 + $0xb8] sm:$0xff] %v6834_v1  ;;  %v6831_v51 = vsub.f32 %v12501_v62, %v6756_v37  ;;  %v6758_v23 = vmul.f32 0.6931472, %v9145_v3  ;;  %v6674_v5 = vpop.xlane.xlu1 %6673 }
 0xbe8   :  { %9148 = vlog2.f32 %v6674_v5 }
 0xbe9   :  { %6879 = vst [vmem:[%s12802_s6 + $0xa0] sm:$0xff] %v6831_v51  ;;  %v6832_v38 = vsub.f32 %v12505_v27, %v6758_v23  ;;  %v6668_v21 = vpop.xlane.xlu0 %6667 }
 0xbea   :  { %9150 = vlog2.f32 %v6668_v21 }
 0xbeb   :  { %6880 = vst [vmem:[%s12802_s6 + $0xa8] sm:$0xff] %v6832_v38  ;;  %v6670_v41 = vpop.xlane.xlu1 %6669 }
 0xbec   :  { %9152 = vlog2.f32 %v6670_v41 }
 0xbf0   :  { %v9147_v60 = vpop.eup %9146 }
 0xbf1   :  { %v6768_v56 = vmul.f32 0.6931472, %v9147_v60 }
 0xbf2   :  { %v9149_v62 = vpop.eup %9148 }
 0xbf3   :  { %v6837_v50 = vsub.f32 %v12509_v57, %v6768_v56  ;;  %v6770_v22 = vmul.f32 0.6931472, %v9149_v62 }
 0xbf4   :  { %v9151_v32 = vpop.eup %9150 }
 0xbf5   :  { %6885 = vst [vmem:[%s12802_s6 + $0xd0] sm:$0xff] %v6837_v50  ;;  %v6838_v27 = vsub.f32 %v12513_v42, %v6770_v22  ;;  %v6764_v19 = vmul.f32 0.6931472, %v9151_v32  ;;  %v6680_v49 = vpop.xlane.xlu0 %6679 }
 0xbf6   :  { %v9153_v46 = vpop.eup %9152  ;;  %9154 = vlog2.f32 %v6680_v49 }
 0xbf7   :  { %6886 = vst [vmem:[%s12802_s6 + $0xd8] sm:$0xff] %v6838_v27  ;;  %v6835_v7 = vsub.f32 %v12517_v24, %v6764_v19  ;;  %v6766_v10 = vmul.f32 0.6931472, %v9153_v46  ;;  %v6682_v57 = vpop.xlane.xlu1 %6681 }
 0xbf8   :  { %9156 = vlog2.f32 %v6682_v57 }
 0xbf9   :  { %6883 = vst [vmem:[%s12802_s6 + $0xc0] sm:$0xff] %v6835_v7  ;;  %v6836_v12 = vsub.f32 %v12521_v36, %v6766_v10  ;;  %v6676_v42 = vpop.xlane.xlu0 %6675 }
 0xbfa   :  { %9158 = vlog2.f32 %v6676_v42 }
 0xbfb   :  { %6884 = vst [vmem:[%s12802_s6 + $0xc8] sm:$0xff] %v6836_v12  ;;  %v6678_v43 = vpop.xlane.xlu1 %6677 }
 0xbfc   :  { %9160 = vlog2.f32 %v6678_v43 }
 0xc00   :  { %v9155_v40 = vpop.eup %9154 }
 0xc01   :  { %v6776_v0 = vmul.f32 0.6931472, %v9155_v40 }
 0xc02   :  { %v9157_v24 = vpop.eup %9156 }
 0xc03   :  { %v6841_v52 = vsub.f32 %v12525_v9, %v6776_v0  ;;  %v6778_v35 = vmul.f32 0.6931472, %v9157_v24 }
 0xc04   :  { %v9159_v2 = vpop.eup %9158 }
 0xc05   :  { %6889 = vst [vmem:[%s12802_s6 + $0xf0] sm:$0xff] %v6841_v52  ;;  %v6842_v36 = vsub.f32 %v12529_v55, %v6778_v35  ;;  %v6772_v31 = vmul.f32 0.6931472, %v9159_v2  ;;  %v6688_v58 = vpop.xlane.xlu0 %6687 }
 0xc06   :  { %v9161_v15 = vpop.eup %9160  ;;  %9162 = vlog2.f32 %v6688_v58 }
 0xc07   :  { %6890 = vst [vmem:[%s12802_s6 + $0xf8] sm:$0xff] %v6842_v36  ;;  %v6839_v11 = vsub.f32 %v12533_v45, %v6772_v31  ;;  %v6774_v6 = vmul.f32 0.6931472, %v9161_v15  ;;  %v6690_v9 = vpop.xlane.xlu1 %6689 }
 0xc08   :  { %9164 = vlog2.f32 %v6690_v9 }
 0xc09   :  { %6887 = vst [vmem:[%s12802_s6 + $0xe0] sm:$0xff] %v6839_v11  ;;  %v6840_v54 = vsub.f32 %v12537_v48, %v6774_v6  ;;  %v6684_v55 = vpop.xlane.xlu0 %6683 }
 0xc0a   :  { %9166 = vlog2.f32 %v6684_v55 }
 0xc0b   :  { %6888 = vst [vmem:[%s12802_s6 + $0xe8] sm:$0xff] %v6840_v54  ;;  %v6686_v61 = vpop.xlane.xlu1 %6685 }
 0xc0c   :  { %9168 = vlog2.f32 %v6686_v61 }
 0xc10   :  { %v9163_v14 = vpop.eup %9162 }
 0xc11   :  { %v6784_v26 = vmul.f32 0.6931472, %v9163_v14 }
 0xc12   :  { %v9165_v45 = vpop.eup %9164 }
 0xc13   :  { %v6845_v59 = vsub.f32 %v12541_v29, %v6784_v26  ;;  %v6786_v16 = vmul.f32 0.6931472, %v9165_v45 }
 0xc14   :  { %v9167_v1 = vpop.eup %9166 }
 0xc15   :  { %6893 = vst [vmem:[%s12802_s6 + $0x110] sm:$0xff] %v6845_v59  ;;  %v6846_v48 = vsub.f32 %v12545_v47, %v6786_v16  ;;  %v6780_v37 = vmul.f32 0.6931472, %v9167_v1  ;;  %v6696_v44 = vpop.xlane.xlu0 %6695 }
 0xc16   :  { %v9169_v3 = vpop.eup %9168  ;;  %9170 = vlog2.f32 %v6696_v44 }
 0xc17   :  { %6894 = vst [vmem:[%s12802_s6 + $0x118] sm:$0xff] %v6846_v48  ;;  %v6843_v51 = vsub.f32 %v12549_v28, %v6780_v37  ;;  %v6782_v23 = vmul.f32 0.6931472, %v9169_v3  ;;  %v6698_v29 = vpop.xlane.xlu1 %6697 }
 0xc18   :  { %9172 = vlog2.f32 %v6698_v29 }
 0xc19   :  { %6891 = vst [vmem:[%s12802_s6 + $0x100] sm:$0xff] %v6843_v51  ;;  %v6844_v5 = vsub.f32 %v12553_v17, %v6782_v23  ;;  %v6692_v47 = vpop.xlane.xlu0 %6691 }
 0xc1a   :  { %9174 = vlog2.f32 %v6692_v47 }
 0xc1b   :  { %6892 = vst [vmem:[%s12802_s6 + $0x108] sm:$0xff] %v6844_v5  ;;  %v6694_v38 = vpop.xlane.xlu1 %6693 }
 0xc1c   :  { %9176 = vlog2.f32 %v6694_v38 }
 0xc20   :  { %v9171_v21 = vpop.eup %9170 }
 0xc21   :  { %v6792_v41 = vmul.f32 0.6931472, %v9171_v21 }
 0xc22   :  { %v9173_v28 = vpop.eup %9172 }
 0xc23   :  { %v6849_v60 = vsub.f32 %v12557_v8, %v6792_v41  ;;  %v6794_v56 = vmul.f32 0.6931472, %v9173_v28  ;;  %v6704_v62 = vpop.xlane.xlu0 %6703 }
 0xc24   :  { %v9175_v50 = vpop.eup %9174  ;;  %9178 = vlog2.f32 %v6704_v62 }
 0xc25   :  { %6897 = vst [vmem:[%s12802_s6 + $0x130] sm:$0xff] %v6849_v60  ;;  %v6850_v17 = vsub.f32 %v12561_v20, %v6794_v56  ;;  %v6788_v22 = vmul.f32 0.6931472, %v9175_v50  ;;  %v6706_v32 = vpop.xlane.xlu1 %6705 }
 0xc26   :  { %v9177_v27 = vpop.eup %9176  ;;  %9180 = vlog2.f32 %v6706_v32 }
 0xc27   :  { %6898 = vst [vmem:[%s12802_s6 + $0x138] sm:$0xff] %v6850_v17  ;;  %v6847_v8 = vsub.f32 %v12565_v39, %v6788_v22  ;;  %v6790_v19 = vmul.f32 0.6931472, %v9177_v27  ;;  %v6700_v49 = vpop.xlane.xlu0 %6699 }
 0xc28   :  { %9182 = vlog2.f32 %v6700_v49 }
 0xc29   :  { %6895 = vst [vmem:[%s12802_s6 + $0x120] sm:$0xff] %v6847_v8  ;;  %v6848_v46 = vsub.f32 %v12569_v34, %v6790_v19  ;;  %v6702_v20 = vpop.xlane.xlu1 %6701 }
 0xc2a   :  { %9184 = vlog2.f32 %v6702_v20 }
 0xc2b   :  { %6896 = vst [vmem:[%s12802_s6 + $0x128] sm:$0xff] %v6848_v46 }
 0xc2e   :  { %v9179_v7 = vpop.eup %9178 }
 0xc2f   :  { %v6800_v10 = vmul.f32 0.6931472, %v9179_v7 }
 0xc30   :  { %v9181_v57 = vpop.eup %9180 }
 0xc31   :  { %v6853_v39 = vsub.f32 %v12573_v13, %v6800_v10  ;;  %v6802_v12 = vmul.f32 0.6931472, %v9181_v57 }
 0xc32   :  { %v9183_v42 = vpop.eup %9182 }
 0xc33   :  { %6901 = vst [vmem:[%s12802_s6 + $0x150] sm:$0xff] %v6853_v39  ;;  %v6854_v43 = vsub.f32 %v12577_v25, %v6802_v12  ;;  %v6796_v34 = vmul.f32 0.6931472, %v9183_v42 }
 0xc34   :  { %v9185_v40 = vpop.eup %9184 }
 0xc35   :  { %6902 = vst [vmem:[%s12802_s6 + $0x158] sm:$0xff] %v6854_v43  ;;  %v6851_v0 = vsub.f32 %v12581_v4, %v6796_v34  ;;  %v6798_v24 = vmul.f32 0.6931472, %v9185_v40 }
 0xc37   :  { %6899 = vst [vmem:[%s12802_s6 + $0x140] sm:$0xff] %v6851_v0  ;;  %v6852_v13 = vsub.f32 %v12585_v53, %v6798_v24  ;;  %v6708_v52 = vpop.xlane.xlu0 %6707 }
 0xc38   :  { %9186 = vlog2.f32 %v6708_v52 }
 0xc39   :  { %6900 = vst [vmem:[%s12802_s6 + $0x148] sm:$0xff] %v6852_v13  ;;  %v6710_v25 = vpop.xlane.xlu1 %6709 }
 0xc3a   :  { %9188 = vlog2.f32 %v6710_v25 }
 0xc3b   :  { %v6712_v35 = vpop.xlane.xlu0 %6711 }
 0xc3c   :  { %9190 = vlog2.f32 %v6712_v35 }
 0xc3d   :  { %v6714_v2 = vpop.xlane.xlu1 %6713 }
 0xc3e   :  { %9192 = vlog2.f32 %v6714_v2 }
 0xc42   :  { %v9187_v4 = vpop.eup %9186 }
 0xc43   :  { %v6804_v36 = vmul.f32 0.6931472, %v9187_v4 }
 0xc44   :  { %v9189_v31 = vpop.eup %9188 }
 0xc45   :  { %v6855_v58 = vsub.f32 %v12592_v30, %v6804_v36  ;;  %v6806_v15 = vmul.f32 0.6931472, %v9189_v31 }
 0xc46   :  { %v9191_v11 = vpop.eup %9190 }
 0xc47   :  { %6903 = vst [vmem:[%s12802_s6 + $0x160] sm:$0xff] %v6855_v58  ;;  %v6856_v53 = vsub.f32 %v12599_v63, %v6806_v15  ;;  %v6808_v6 = vmul.f32 0.6931472, %v9191_v11 }
 0xc48   :  { %v9193_v9 = vpop.eup %9192 }
 0xc49   :  { %6904 = vst [vmem:[%s12802_s6 + $0x168] sm:$0xff] %v6856_v53  ;;  %v6857_v54 = vsub.f32 %v12589_v18, %v6808_v6  ;;  %v6810_v55 = vmul.f32 0.6931472, %v9193_v9 }
 0xc4b   :  { %6905 = vst [vmem:[%s12802_s6 + $0x170] sm:$0xff] %v6857_v54  ;;  %v6858_v30 = vsub.f32 %v12595_v33, %v6810_v55 }
 0xc4d   :  { %6906 = vst [vmem:[%s12802_s6 + $0x178] sm:$0xff] %v6858_v30 }

</bundles_post_ra>
